<compile_context>
chip_gen: v5e
topology: v5e:2x2
jax: 0.10.0
libtpu: 0.0.40
codegen_flags: <defaults>
</compile_context>

<pallas_src>
import numpy as np
import jax
import jax.numpy as jnp
from jax.experimental import pallas as pl
from jax.experimental.pallas import tpu as pltpu


# ----------------------------------------------------------------------------
# Host-side helpers: attention mask (reference-faithful) and relative bias
# ----------------------------------------------------------------------------
def window_partition_np(x, ws):
    B, H, W, C = x.shape
    x = x.reshape(B, H // ws, ws, W // ws, ws, C)
    return x.transpose(0, 1, 3, 2, 4, 5).reshape(-1, ws, ws, C)


def calculate_attention_mask(H, W, window_size, shift_size):
    # Literal port of the reference.  NOTE: the reference returns the *raw*
    # region-label differences (its masked_fill result is assigned to a local
    # and discarded), so we reproduce exactly that.
    Hp = int(np.ceil(H / window_size)) * window_size
    Wp = int(np.ceil(W / window_size)) * window_size
    img_mask = np.zeros((1, Hp, Wp, 1), dtype=np.float32)
    h_slices = (slice(0, -window_size), slice(-window_size, -shift_size),
                slice(-shift_size, None))
    w_slices = (slice(0, -window_size), slice(-window_size, -shift_size),
                slice(-shift_size, None))
    cnt = 0
    for h in h_slices:
        for w in w_slices:
            img_mask[:, h, w, :] = cnt
            cnt += 1
    mask_windows = window_partition_np(img_mask, window_size)
    mask_windows = mask_windows.reshape(-1, window_size * window_size)
    attention_mask = mask_windows[:, None, :] - mask_windows[:, :, None]   # (nW, N, N)
    return attention_mask.astype(np.float32)


def relative_position_bias(table, ws, num_heads):
    coords = np.stack(np.meshgrid(np.arange(ws), np.arange(ws), indexing="ij"))
    cf = coords.reshape(2, -1)
    rel = (cf[:, :, None] - cf[:, None, :]).transpose(1, 2, 0)
    rel[:, :, 0] += ws - 1
    rel[:, :, 1] += ws - 1
    rel[:, :, 0] *= 2 * ws - 1
    idx = rel.sum(-1)                                           # (N, N)
    bias = table[idx.reshape(-1)].reshape(ws * ws, ws * ws, num_heads)
    return jnp.asarray(np.transpose(bias, (2, 0, 1)))           # (nH, N, N)


# ----------------------------------------------------------------------------
# Generation-aware tiling configuration
# ----------------------------------------------------------------------------
def _chip_config():
    kind = ""
    try:
        kind = jax.devices()[0].device_kind.lower()
    except Exception:
        pass
    if "v5 lite" in kind or "v5e" in kind or "v5lite" in kind:
        # 128 MiB VMEM, 1 TC, 4x(128x128) MXU
        return dict(vmem=100 * 2 ** 20, tok_target=2048, multicore=False, m_align=128)
    if "v6" in kind or "trillium" in kind:
        # 128 MiB VMEM, 1 TC, 2x(256x256) MXU
        return dict(vmem=100 * 2 ** 20, tok_target=2048, multicore=False, m_align=256)
    if "v7" in kind:
        # 64 MiB VMEM per TC, 2 TCs -> enforce grid >= 2, 256-aligned M
        return dict(vmem=48 * 2 ** 20, tok_target=1024, multicore=True, m_align=256)
    return dict(vmem=64 * 2 ** 20, tok_target=1024, multicore=False, m_align=128)


def _score_tile(toks, grid_total, cfg, bytes_per_tok):
    fits = (toks <= cfg["tok_target"]
            and toks * bytes_per_tok * 4 < cfg["vmem"] // 2)
    multi_ok = (not cfg["multicore"]) or grid_total >= 2
    aligned = (toks % cfg["m_align"]) == 0
    size_key = toks if fits else -toks
    return (int(fits), int(multi_ok), int(aligned), size_key)


def _pick_rows_per_block(BH, H, ws, ncol, C, cfg):
    """Rows per attention strip: multiple of ws dividing H, or multiple of H."""
    cands = set()
    for r in range(ws, H + 1, ws):
        if H % r == 0:
            cands.add(r)
    k = 1
    while k * H <= BH:
        if BH % (k * H) == 0:
            cands.add(k * H)
        k += 1
    return max(cands, key=lambda r: _score_tile(r * ws, (BH // r) * ncol, cfg,
                                                bytes_per_tok=16 * C))


def _pick_row_tile(M, C, hidden, cfg):
    cands = [d for d in range(8, M + 1, 8) if M % d == 0] or [M]
    return max(cands, key=lambda d: _score_tile(d, M // d, cfg,
                                                bytes_per_tok=8 * (C + hidden)))


# ----------------------------------------------------------------------------
# Pallas kernels
# ----------------------------------------------------------------------------
def make_attn_kernel(C, num_heads, rb, ws, use_mask, out_dtype):
    """Fused LN1 + W-MSA + output projection for one window-column strip."""
    hd = C // num_heads
    N = ws * ws
    M = rb * N

    def kernel(*refs):
        if use_mask:
            (x_ref, mask_ref, g1_ref, b1_ref, qkvw_ref, qkvb_ref,
             bias_ref, projw_ref, projb_ref, o_ref) = refs
        else:
            (x_ref, g1_ref, b1_ref, qkvw_ref, qkvb_ref,
             bias_ref, projw_ref, projb_ref, o_ref) = refs
            mask_ref = None

        # x_ref is (rb*ws, ws, C): window r occupies rows [r*ws, (r+1)*ws).
        # Collapsing leading dims yields tokens already in per-window raster
        # order -> window partition costs no transpose and no HBM pass.
        xw = x_ref[...].reshape(M, C)

        # ---- LayerNorm1 (f32, per token) ----
        mu = jnp.mean(xw, axis=-1, keepdims=True)
        var = jnp.mean((xw - mu) ** 2, axis=-1, keepdims=True)
        xn = (xw - mu) * jax.lax.rsqrt(var + 1e-5) * g1_ref[0] + b1_ref[0]

        # ---- QKV projection (bf16 MXU operands, f32 accumulation);
        #      q-scale is pre-folded into qkv_w / qkv_b at init ----
        qkv = jnp.dot(xn.astype(jnp.bfloat16), qkvw_ref[...],
                      preferred_element_type=jnp.float32) + qkvb_ref[0]   # (M, 3C)
        qkv3 = qkv.reshape(rb, N, 3 * C)

        m = mask_ref[0] if use_mask else None                   # (rb, N, N)

        # ---- per-head attention over the rb windows of this strip ----
        # TODO(synk): for large num_heads switch to lax.fori_loop + VMEM scratch
        # accumulator to bound register live ranges (static unroll ok for nh<=8).
        heads = []
        for h in range(num_heads):
            q = qkv3[:, :, h * hd:(h + 1) * hd].astype(jnp.bfloat16)
            k = qkv3[:, :, C + h * hd:C + (h + 1) * hd].astype(jnp.bfloat16)
            v = qkv3[:, :, 2 * C + h * hd:2 * C + (h + 1) * hd].astype(jnp.bfloat16)

            s = jnp.einsum('wnd,wmd->wnm', q, k,
                           preferred_element_type=jnp.float32)             # (rb,N,N)
            s = s + bias_ref[h][None]
            if use_mask:
                s = s + m
            s = s - jnp.max(s, axis=-1, keepdims=True)
            e = jnp.exp(s)
            p = e * pl.reciprocal(jnp.sum(e, axis=-1, keepdims=True), approx=True)

            o = jnp.einsum('wnm,wmd->wnd', p.astype(jnp.bfloat16), v,
                           preferred_element_type=jnp.float32)             # (rb,N,hd)
            heads.append(o.reshape(M, hd))

        # merge heads and run ONE full-depth (M, C) @ (C, C) output projection
        # (K = C keeps MXU depth instead of num_heads shallow K = hd matmuls)
        ctx = heads[0] if num_heads == 1 else jnp.concatenate(heads, axis=-1)
        out = jnp.dot(ctx.astype(jnp.bfloat16), projw_ref[...],
                      preferred_element_type=jnp.float32) + projb_ref[0]
        # un-window is again just a leading-dim reshape
        o_ref[...] = out.reshape(rb * ws, ws, C).astype(out_dtype)

    return kernel


def mlp_kernel(short_ref, attn_ref, g2_ref, b2_ref, w1_ref, fb1_ref,
               w2_ref, fb2_ref, o_ref):
    """Fused residual-1 + LayerNorm2 + MLP(GELU) + residual-2 for one row tile."""
    x = short_ref[...] + attn_ref[...].astype(jnp.float32)      # residual 1
    mu = jnp.mean(x, axis=-1, keepdims=True)
    var = jnp.mean((x - mu) ** 2, axis=-1, keepdims=True)
    xn = (x - mu) * jax.lax.rsqrt(var + 1e-5) * g2_ref[0] + b2_ref[0]
    h = jnp.dot(xn.astype(jnp.bfloat16), w1_ref[...],
                preferred_element_type=jnp.float32) + fb1_ref[0]
    # tanh-approximation GELU (EUP tanh + VPU ops, f32 math)
    h = 0.5 * h * (1.0 + jnp.tanh(0.7978845608028654 * (h + 0.044715 * h * h * h)))
    y = jnp.dot(h.astype(jnp.bfloat16), w2_ref[...],
                preferred_element_type=jnp.float32) + fb2_ref[0]
    o_ref[...] = x + y                                          # residual 2


# ----------------------------------------------------------------------------
# pallas_call wrappers
# ----------------------------------------------------------------------------
def window_attention_call(x_rows, mask_img, p, num_heads, ws, H, cfg, use_mask):
    """x_rows: (B*H, W, C) f32.  Returns attention output in the same layout."""
    BH, W, C = x_rows.shape
    ncol = W // ws
    N = ws * ws
    rows_pb = _pick_rows_per_block(BH, H, ws, ncol, C, cfg)
    rb = rows_pb // ws
    grid = (BH // rows_pb, ncol)

    # bf16 intermediate only when the out block obeys bf16 (16,128) tiling.
    out_dtype = jnp.bfloat16 if (ws % 16 == 0 or ws == W) else jnp.float32
    kernel = make_attn_kernel(C, num_heads, rb, ws, use_mask, out_dtype)

    c2 = lambda i, j: (0, 0)
    c3 = lambda i, j: (0, 0, 0)

    # TODO(synk): for C < 128 the C-minor stores are masked (vst.msk); a
    # lane-dense (rows, ws*C) presentation needs a minor-dim-changing reshape
    # in-kernel -- skipped for lowering safety (real Swin dims are >= 96).
    in_specs = [pl.BlockSpec((rows_pb, ws, C), lambda i, j: (i, j, 0))]
    args = [x_rows]

    if use_mask:
        nrow_img = H // ws
        spi = (H // rows_pb) if rows_pb <= H else 1             # strips per image
        m_img = np.asarray(mask_img).reshape(nrow_img, ncol, N, N)
        mask_np = np.empty((spi * ncol, rb, N, N), np.float32)
        for s in range(spi):
            for j in range(ncol):
                for r in range(rb):
                    mask_np[s * ncol + j, r] = m_img[(s * rb + r) % nrow_img, j]
        in_specs.append(pl.BlockSpec(
            (1, rb, N, N), lambda i, j: ((i % spi) * ncol + j, 0, 0, 0)))
        args.append(jnp.asarray(mask_np))

    # TODO(synk): weight inputs could be single-buffered (pipeline_mode=
    # pl.Buffered(1)) to save VMEM on v7x; left at default for lowering safety.
    in_specs += [
        pl.BlockSpec((1, C), c2),
        pl.BlockSpec((1, C), c2),
        pl.BlockSpec((C, 3 * C), c2),
        pl.BlockSpec((1, 3 * C), c2),
        pl.BlockSpec((num_heads, N, N), c3),
        pl.BlockSpec((C, C), c2),
        pl.BlockSpec((1, C), c2),
    ]
    args += [p["g1"], p["b1"], p["qkv_w"], p["qkv_b"], p["rel_bias"],
             p["proj_w"], p["proj_b"]]

    return pl.pallas_call(
        kernel,
        grid=grid,
        in_specs=in_specs,
        out_specs=pl.BlockSpec((rows_pb, ws, C), lambda i, j: (i, j, 0)),
        out_shape=jax.ShapeDtypeStruct((BH, W, C), out_dtype),
        compiler_params=pltpu.CompilerParams(
            dimension_semantics=("parallel", "parallel"),
            vmem_limit_bytes=cfg["vmem"]),
    )(*args)


def mlp_call(shortcut, attn_out, p, cfg):
    M, C = shortcut.shape
    hidden = p["fc1_w"].shape[1]
    TM = _pick_row_tile(M, C, hidden, cfg)
    grid = (M // TM,)
    c2 = lambda i: (0, 0)
    return pl.pallas_call(
        mlp_kernel,
        grid=grid,
        in_specs=[
            pl.BlockSpec((TM, C), lambda i: (i, 0)),
            pl.BlockSpec((TM, C), lambda i: (i, 0)),
            pl.BlockSpec((1, C), c2),
            pl.BlockSpec((1, C), c2),
            pl.BlockSpec((C, hidden), c2),
            pl.BlockSpec((1, hidden), c2),
            pl.BlockSpec((hidden, C), c2),
            pl.BlockSpec((1, C), c2),
        ],
        out_specs=pl.BlockSpec((TM, C), lambda i: (i, 0)),
        out_shape=jax.ShapeDtypeStruct((M, C), jnp.float32),
        compiler_params=pltpu.CompilerParams(
            dimension_semantics=("parallel",),
            vmem_limit_bytes=cfg["vmem"]),
    )(shortcut, attn_out, p["g2"], p["b2"], p["fc1_w"], p["fc1_b"],
      p["fc2_w"], p["fc2_b"])


# ----------------------------------------------------------------------------
# EncoderBlock forward (Swin block stack)
# ----------------------------------------------------------------------------
def swin_block_forward(x, H, W, attention_mask, p, window_size, shift_size,
                       num_heads, cfg):
    B, L, C = x.shape
    assert L == H * W
    assert H % window_size == 0 and W % window_size == 0   # TODO(synk): no pad path
    shortcut = x.reshape(B * L, C)

    xs = x.reshape(B, H, W, C)
    if shift_size > 0:
        # TODO(synk): the cyclic shift wraps around and cannot be expressed as a
        # rectangular BlockSpec window, so it stays one XLA roll pass each way.
        xs = jnp.roll(xs, shift=(-shift_size, -shift_size), axis=(1, 2))
    x_rows = xs.reshape(B * H, W, C)        # free reshape; window partition is
                                            # done by the attention BlockSpec
    attn_rows = window_attention_call(x_rows, attention_mask, p, num_heads,
                                      window_size, H, cfg,
                                      use_mask=shift_size > 0)
    ys = attn_rows.reshape(B, H, W, C)
    if shift_size > 0:
        ys = jnp.roll(ys, shift=(shift_size, shift_size), axis=(1, 2))
    attn_out = ys.reshape(B * L, C)

    # residual-1 + LN2 + MLP + residual-2 fused in one tiled Pallas kernel
    out = mlp_call(shortcut, attn_out, p, cfg)
    return out.reshape(B, L, C)


def encoder_block_forward(x, H, W, blocks_params, window_size, num_heads):
    cfg = _chip_config()
    shift = window_size // 2
    attention_mask = calculate_attention_mask(H, W, window_size, shift)
    for i, p in enumerate(blocks_params):
        ss = 0 if i % 2 == 0 else shift
        x = swin_block_forward(x, H, W, attention_mask, p, window_size, ss,
                               num_heads, cfg)
    # TODO(synk): downsample=None in this config; PatchMerging not instantiated.
    return x, H, W


# ----------------------------------------------------------------------------
# Deterministic parameter init (matmul weights stored bf16, q-scale pre-folded)
# ----------------------------------------------------------------------------
def init_block_params(key, C, num_heads, window_size, mlp_ratio=4.0):
    ks = jax.random.split(key, 5)
    hidden = int(C * mlp_ratio)
    hd = C // num_heads
    scale = hd ** -0.5

    table = 0.02 * jax.random.normal(ks[0], ((2 * window_size - 1) ** 2, num_heads),
                                     jnp.float32)

    qkv_w = 0.02 * jax.random.normal(ks[1], (C, 3 * C), jnp.float32)
    qkv_b = jnp.zeros((1, 3 * C), jnp.float32)
    qkv_w = qkv_w.at[:, :C].multiply(scale)            # fold q-scale into weights
    qkv_b = qkv_b.at[:, :C].multiply(scale)            # ...and bias (zero here)

    proj_w = 0.02 * jax.random.normal(ks[2], (C, C), jnp.float32)

    return dict(
        g1=jnp.ones((1, C), jnp.float32), b1=jnp.zeros((1, C), jnp.float32),
        qkv_w=qkv_w.astype(jnp.bfloat16),
        qkv_b=qkv_b,
        rel_bias=relative_position_bias(np.asarray(table), window_size, num_heads),
        proj_w=proj_w.astype(jnp.bfloat16),
        proj_b=jnp.zeros((1, C), jnp.float32),
        g2=jnp.ones((1, C), jnp.float32), b2=jnp.zeros((1, C), jnp.float32),
        fc1_w=(0.02 * jax.random.normal(ks[3], (C, hidden), jnp.float32)).astype(jnp.bfloat16),
        fc1_b=jnp.zeros((1, hidden), jnp.float32),
        fc2_w=(0.02 * jax.random.normal(ks[4], (hidden, C), jnp.float32)).astype(jnp.bfloat16),
        fc2_b=jnp.zeros((1, C), jnp.float32),
    )


# ----------------------------------------------------------------------------
if __name__ == "__main__":
    # Small config: dim=32, depth=2, num_heads=4, window_size=8, H=W=16, B=2.
    B, H, W = 2, 16, 16
    dim, depth, num_heads, window_size = 32, 2, 4, 8

    key = jax.random.PRNGKey(0)
    kx, kp = jax.random.split(key)
    x = jax.random.normal(kx, (B, H * W, dim), jnp.float32)   # (B, H*W, C)

    block_keys = jax.random.split(kp, depth)
    blocks_params = [init_block_params(block_keys[i], dim, num_heads, window_size)
                     for i in range(depth)]

    out, oH, oW = encoder_block_forward(x, H, W, blocks_params, window_size, num_heads)
    out = jax.block_until_ready(out)
    assert out.shape == (B, H * W, dim)
    assert oH == H and oW == W
    assert bool(jnp.all(jnp.isfinite(out)))
    print("KERNEL_OK")
</pallas_src>

<mosaic_0001>
module attributes {stable_mosaic.version = 11 : i64} {
  func.func @kernel(%arg0: i32, %arg1: i32, %arg2: memref<32x8x32xf32, #tpu.memory_space<vmem>>, %arg3: memref<1x32xf32, #tpu.memory_space<vmem>>, %arg4: memref<1x32xf32, #tpu.memory_space<vmem>>, %arg5: memref<32x96xbf16, #tpu.memory_space<vmem>>, %arg6: memref<1x96xf32, #tpu.memory_space<vmem>>, %arg7: memref<4x64x64xf32, #tpu.memory_space<vmem>>, %arg8: memref<32x32xbf16, #tpu.memory_space<vmem>>, %arg9: memref<1x32xf32, #tpu.memory_space<vmem>>, %arg10: memref<32x8x32xf32, #tpu.memory_space<vmem>>) attributes {dimension_semantics = [#tpu.dimension_semantics<parallel>, #tpu.dimension_semantics<parallel>], iteration_bounds = array<i64: 1, 2>, scalar_prefetch = 0 : i64, scratch_operands = 0 : i64, tpu.core_type = #tpu.core_type<tc>, window_params = [{transform_indices = @transform_0, window_bounds = array<i64: 32, 8, 32>}, {pipeline_mode = #tpu.pipeline_mode<synchronous>, transform_indices = @transform_1, window_bounds = array<i64: 1, 32>}, {pipeline_mode = #tpu.pipeline_mode<synchronous>, transform_indices = @transform_2, window_bounds = array<i64: 1, 32>}, {pipeline_mode = #tpu.pipeline_mode<synchronous>, transform_indices = @transform_3, window_bounds = array<i64: 32, 96>}, {pipeline_mode = #tpu.pipeline_mode<synchronous>, transform_indices = @transform_4, window_bounds = array<i64: 1, 96>}, {pipeline_mode = #tpu.pipeline_mode<synchronous>, transform_indices = @transform_5, window_bounds = array<i64: 4, 64, 64>}, {pipeline_mode = #tpu.pipeline_mode<synchronous>, transform_indices = @transform_6, window_bounds = array<i64: 32, 32>}, {pipeline_mode = #tpu.pipeline_mode<synchronous>, transform_indices = @transform_7, window_bounds = array<i64: 1, 32>}, {transform_indices = @transform_8, window_bounds = array<i64: 32, 8, 32>}]} {
    %c0 = arith.constant 0 : index
    %c0_0 = arith.constant 0 : index
    %c0_1 = arith.constant 0 : index
    %0 = vector.load %arg2[%c0, %c0_0, %c0_1] : memref<32x8x32xf32, #tpu.memory_space<vmem>>, vector<32x8x32xf32>
    %1 = vector.shape_cast %0 : vector<32x8x32xf32> to vector<256x32xf32>
    %cst = arith.constant dense<0.000000e+00> : vector<256xf32>
    %2 = vector.multi_reduction <add>, %1, %cst [1] : vector<256x32xf32> to vector<256xf32>
    %3 = vector.shape_cast %2 : vector<256xf32> to vector<256x1xf32>
    %cst_2 = arith.constant 3.200000e+01 : f32
    %4 = vector.broadcast %cst_2 : f32 to vector<256x1xf32>
    %5 = arith.divf %3, %4 : vector<256x1xf32>
    %6 = vector.broadcast %5 : vector<256x1xf32> to vector<256x32xf32>
    %7 = arith.subf %1, %6 : vector<256x32xf32>
    %8 = arith.mulf %7, %7 : vector<256x32xf32>
    %cst_3 = arith.constant dense<0.000000e+00> : vector<256xf32>
    %9 = vector.multi_reduction <add>, %8, %cst_3 [1] : vector<256x32xf32> to vector<256xf32>
    %10 = vector.shape_cast %9 : vector<256xf32> to vector<256x1xf32>
    %cst_4 = arith.constant 3.200000e+01 : f32
    %11 = vector.broadcast %cst_4 : f32 to vector<256x1xf32>
    %12 = arith.divf %10, %11 : vector<256x1xf32>
    %13 = vector.broadcast %5 : vector<256x1xf32> to vector<256x32xf32>
    %14 = arith.subf %1, %13 : vector<256x32xf32>
    %cst_5 = arith.constant 9.99999974E-6 : f32
    %15 = vector.broadcast %cst_5 : f32 to vector<256x1xf32>
    %16 = arith.addf %12, %15 : vector<256x1xf32>
    %17 = math.rsqrt %16 : vector<256x1xf32>
    %18 = vector.broadcast %17 : vector<256x1xf32> to vector<256x32xf32>
    %19 = arith.mulf %14, %18 : vector<256x32xf32>
    %c0_6 = arith.constant 0 : index
    %c0_7 = arith.constant 0 : index
    %20 = vector.load %arg3[%c0_6, %c0_7] : memref<1x32xf32, #tpu.memory_space<vmem>>, vector<1x32xf32>
    %21 = vector.shape_cast %20 : vector<1x32xf32> to vector<32xf32>
    %22 = vector.shape_cast %21 : vector<32xf32> to vector<1x32xf32>
    %23 = vector.broadcast %22 : vector<1x32xf32> to vector<256x32xf32>
    %24 = arith.mulf %19, %23 : vector<256x32xf32>
    %c0_8 = arith.constant 0 : index
    %c0_9 = arith.constant 0 : index
    %25 = vector.load %arg4[%c0_8, %c0_9] : memref<1x32xf32, #tpu.memory_space<vmem>>, vector<1x32xf32>
    %26 = vector.shape_cast %25 : vector<1x32xf32> to vector<32xf32>
    %27 = vector.shape_cast %26 : vector<32xf32> to vector<1x32xf32>
    %28 = vector.broadcast %27 : vector<1x32xf32> to vector<256x32xf32>
    %29 = arith.addf %24, %28 : vector<256x32xf32>
    %30 = arith.truncf %29 : vector<256x32xf32> to vector<256x32xbf16>
    %c0_10 = arith.constant 0 : index
    %c0_11 = arith.constant 0 : index
    %31 = vector.load %arg5[%c0_10, %c0_11] : memref<32x96xbf16, #tpu.memory_space<vmem>>, vector<32x96xbf16>
    %cst_12 = arith.constant dense<0.000000e+00> : vector<256x96xf32>
    %32 = tpu.matmul %30, %31, %cst_12 {dimension_numbers = #tpu.dot_dimension_numbers<[1], [0], [0], [1], [0, 0, 1, 1], [], []>} : vector<256x32xbf16>, vector<32x96xbf16>, vector<256x96xf32> -> vector<256x96xf32>
    %c0_13 = arith.constant 0 : index
    %c0_14 = arith.constant 0 : index
    %33 = vector.load %arg6[%c0_13, %c0_14] : memref<1x96xf32, #tpu.memory_space<vmem>>, vector<1x96xf32>
    %34 = vector.shape_cast %33 : vector<1x96xf32> to vector<96xf32>
    %35 = vector.shape_cast %34 : vector<96xf32> to vector<1x96xf32>
    %36 = vector.broadcast %35 : vector<1x96xf32> to vector<256x96xf32>
    %37 = arith.addf %32, %36 : vector<256x96xf32>
    %38 = vector.shape_cast %37 : vector<256x96xf32> to vector<4x64x96xf32>
    %39 = vector.extract_strided_slice %38 {offsets = [0, 0, 0], sizes = [4, 64, 8], strides = [1, 1, 1]} : vector<4x64x96xf32> to vector<4x64x8xf32>
    %40 = arith.truncf %39 : vector<4x64x8xf32> to vector<4x64x8xbf16>
    %41 = vector.extract_strided_slice %38 {offsets = [0, 0, 32], sizes = [4, 64, 8], strides = [1, 1, 1]} : vector<4x64x96xf32> to vector<4x64x8xf32>
    %42 = arith.truncf %41 : vector<4x64x8xf32> to vector<4x64x8xbf16>
    %43 = vector.extract_strided_slice %38 {offsets = [0, 0, 64], sizes = [4, 64, 8], strides = [1, 1, 1]} : vector<4x64x96xf32> to vector<4x64x8xf32>
    %44 = arith.truncf %43 : vector<4x64x8xf32> to vector<4x64x8xbf16>
    "tpu.trace_start"() <{level = 10 : i32, message = "wnd,wmd->wnm"}> : () -> ()
    %cst_15 = arith.constant dense<0.000000e+00> : vector<4x64x64xf32>
    %45 = tpu.matmul %40, %42, %cst_15 {dimension_numbers = #tpu.dot_dimension_numbers<[2], [2], [1], [1], [0, 0, 0, 1, 1, 1], [0], [0]>} : vector<4x64x8xbf16>, vector<4x64x8xbf16>, vector<4x64x64xf32> -> vector<4x64x64xf32>
    "tpu.trace_stop"() : () -> ()
    %c0_16 = arith.constant 0 : index
    %c0_17 = arith.constant 0 : index
    %c0_18 = arith.constant 0 : index
    %46 = vector.load %arg7[%c0_16, %c0_17, %c0_18] : memref<4x64x64xf32, #tpu.memory_space<vmem>>, vector<1x64x64xf32>
    %47 = vector.shape_cast %46 : vector<1x64x64xf32> to vector<64x64xf32>
    %48 = vector.shape_cast %47 : vector<64x64xf32> to vector<1x64x64xf32>
    %49 = vector.broadcast %48 : vector<1x64x64xf32> to vector<4x64x64xf32>
    %50 = arith.addf %45, %49 : vector<4x64x64xf32>
    %cst_19 = arith.constant dense<0xFF800000> : vector<4x64xf32>
    %51 = vector.multi_reduction <maximumf>, %50, %cst_19 [2] : vector<4x64x64xf32> to vector<4x64xf32>
    %52 = vector.shape_cast %51 : vector<4x64xf32> to vector<4x64x1xf32>
    %53 = vector.broadcast %52 : vector<4x64x1xf32> to vector<4x64x64xf32>
    %54 = arith.subf %50, %53 : vector<4x64x64xf32>
    %55 = math.exp %54 : vector<4x64x64xf32>
    %cst_20 = arith.constant dense<0.000000e+00> : vector<4x64xf32>
    %56 = vector.multi_reduction <add>, %55, %cst_20 [2] : vector<4x64x64xf32> to vector<4x64xf32>
    %57 = vector.shape_cast %56 : vector<4x64xf32> to vector<4x64x1xf32>
    %58 = tpu.reciprocal %57 {approx = true} : vector<4x64x1xf32> -> vector<4x64x1xf32>
    %59 = vector.broadcast %58 : vector<4x64x1xf32> to vector<4x64x64xf32>
    %60 = arith.mulf %55, %59 : vector<4x64x64xf32>
    %61 = arith.truncf %60 : vector<4x64x64xf32> to vector<4x64x64xbf16>
    "tpu.trace_start"() <{level = 10 : i32, message = "wnm,wmd->wnd"}> : () -> ()
    %cst_21 = arith.constant dense<0.000000e+00> : vector<4x64x8xf32>
    %62 = tpu.matmul %61, %44, %cst_21 {dimension_numbers = #tpu.dot_dimension_numbers<[2], [1], [1], [2], [0, 0, 0, 1, 1, 2], [0], [0]>} : vector<4x64x64xbf16>, vector<4x64x8xbf16>, vector<4x64x8xf32> -> vector<4x64x8xf32>
    "tpu.trace_stop"() : () -> ()
    %63 = vector.shape_cast %62 : vector<4x64x8xf32> to vector<256x8xf32>
    %64 = vector.extract_strided_slice %38 {offsets = [0, 0, 8], sizes = [4, 64, 8], strides = [1, 1, 1]} : vector<4x64x96xf32> to vector<4x64x8xf32>
    %65 = arith.truncf %64 : vector<4x64x8xf32> to vector<4x64x8xbf16>
    %66 = vector.extract_strided_slice %38 {offsets = [0, 0, 40], sizes = [4, 64, 8], strides = [1, 1, 1]} : vector<4x64x96xf32> to vector<4x64x8xf32>
    %67 = arith.truncf %66 : vector<4x64x8xf32> to vector<4x64x8xbf16>
    %68 = vector.extract_strided_slice %38 {offsets = [0, 0, 72], sizes = [4, 64, 8], strides = [1, 1, 1]} : vector<4x64x96xf32> to vector<4x64x8xf32>
    %69 = arith.truncf %68 : vector<4x64x8xf32> to vector<4x64x8xbf16>
    "tpu.trace_start"() <{level = 10 : i32, message = "wnd,wmd->wnm"}> : () -> ()
    %cst_22 = arith.constant dense<0.000000e+00> : vector<4x64x64xf32>
    %70 = tpu.matmul %65, %67, %cst_22 {dimension_numbers = #tpu.dot_dimension_numbers<[2], [2], [1], [1], [0, 0, 0, 1, 1, 1], [0], [0]>} : vector<4x64x8xbf16>, vector<4x64x8xbf16>, vector<4x64x64xf32> -> vector<4x64x64xf32>
    "tpu.trace_stop"() : () -> ()
    %c1 = arith.constant 1 : index
    %c0_23 = arith.constant 0 : index
    %c0_24 = arith.constant 0 : index
    %71 = vector.load %arg7[%c1, %c0_23, %c0_24] : memref<4x64x64xf32, #tpu.memory_space<vmem>>, vector<1x64x64xf32>
    %72 = vector.shape_cast %71 : vector<1x64x64xf32> to vector<64x64xf32>
    %73 = vector.shape_cast %72 : vector<64x64xf32> to vector<1x64x64xf32>
    %74 = vector.broadcast %73 : vector<1x64x64xf32> to vector<4x64x64xf32>
    %75 = arith.addf %70, %74 : vector<4x64x64xf32>
    %cst_25 = arith.constant dense<0xFF800000> : vector<4x64xf32>
    %76 = vector.multi_reduction <maximumf>, %75, %cst_25 [2] : vector<4x64x64xf32> to vector<4x64xf32>
    %77 = vector.shape_cast %76 : vector<4x64xf32> to vector<4x64x1xf32>
    %78 = vector.broadcast %77 : vector<4x64x1xf32> to vector<4x64x64xf32>
    %79 = arith.subf %75, %78 : vector<4x64x64xf32>
    %80 = math.exp %79 : vector<4x64x64xf32>
    %cst_26 = arith.constant dense<0.000000e+00> : vector<4x64xf32>
    %81 = vector.multi_reduction <add>, %80, %cst_26 [2] : vector<4x64x64xf32> to vector<4x64xf32>
    %82 = vector.shape_cast %81 : vector<4x64xf32> to vector<4x64x1xf32>
    %83 = tpu.reciprocal %82 {approx = true} : vector<4x64x1xf32> -> vector<4x64x1xf32>
    %84 = vector.broadcast %83 : vector<4x64x1xf32> to vector<4x64x64xf32>
    %85 = arith.mulf %80, %84 : vector<4x64x64xf32>
    %86 = arith.truncf %85 : vector<4x64x64xf32> to vector<4x64x64xbf16>
    "tpu.trace_start"() <{level = 10 : i32, message = "wnm,wmd->wnd"}> : () -> ()
    %cst_27 = arith.constant dense<0.000000e+00> : vector<4x64x8xf32>
    %87 = tpu.matmul %86, %69, %cst_27 {dimension_numbers = #tpu.dot_dimension_numbers<[2], [1], [1], [2], [0, 0, 0, 1, 1, 2], [0], [0]>} : vector<4x64x64xbf16>, vector<4x64x8xbf16>, vector<4x64x8xf32> -> vector<4x64x8xf32>
    "tpu.trace_stop"() : () -> ()
    %88 = vector.shape_cast %87 : vector<4x64x8xf32> to vector<256x8xf32>
    %89 = vector.extract_strided_slice %38 {offsets = [0, 0, 16], sizes = [4, 64, 8], strides = [1, 1, 1]} : vector<4x64x96xf32> to vector<4x64x8xf32>
    %90 = arith.truncf %89 : vector<4x64x8xf32> to vector<4x64x8xbf16>
    %91 = vector.extract_strided_slice %38 {offsets = [0, 0, 48], sizes = [4, 64, 8], strides = [1, 1, 1]} : vector<4x64x96xf32> to vector<4x64x8xf32>
    %92 = arith.truncf %91 : vector<4x64x8xf32> to vector<4x64x8xbf16>
    %93 = vector.extract_strided_slice %38 {offsets = [0, 0, 80], sizes = [4, 64, 8], strides = [1, 1, 1]} : vector<4x64x96xf32> to vector<4x64x8xf32>
    %94 = arith.truncf %93 : vector<4x64x8xf32> to vector<4x64x8xbf16>
    "tpu.trace_start"() <{level = 10 : i32, message = "wnd,wmd->wnm"}> : () -> ()
    %cst_28 = arith.constant dense<0.000000e+00> : vector<4x64x64xf32>
    %95 = tpu.matmul %90, %92, %cst_28 {dimension_numbers = #tpu.dot_dimension_numbers<[2], [2], [1], [1], [0, 0, 0, 1, 1, 1], [0], [0]>} : vector<4x64x8xbf16>, vector<4x64x8xbf16>, vector<4x64x64xf32> -> vector<4x64x64xf32>
    "tpu.trace_stop"() : () -> ()
    %c2 = arith.constant 2 : index
    %c0_29 = arith.constant 0 : index
    %c0_30 = arith.constant 0 : index
    %96 = vector.load %arg7[%c2, %c0_29, %c0_30] : memref<4x64x64xf32, #tpu.memory_space<vmem>>, vector<1x64x64xf32>
    %97 = vector.shape_cast %96 : vector<1x64x64xf32> to vector<64x64xf32>
    %98 = vector.shape_cast %97 : vector<64x64xf32> to vector<1x64x64xf32>
    %99 = vector.broadcast %98 : vector<1x64x64xf32> to vector<4x64x64xf32>
    %100 = arith.addf %95, %99 : vector<4x64x64xf32>
    %cst_31 = arith.constant dense<0xFF800000> : vector<4x64xf32>
    %101 = vector.multi_reduction <maximumf>, %100, %cst_31 [2] : vector<4x64x64xf32> to vector<4x64xf32>
    %102 = vector.shape_cast %101 : vector<4x64xf32> to vector<4x64x1xf32>
    %103 = vector.broadcast %102 : vector<4x64x1xf32> to vector<4x64x64xf32>
    %104 = arith.subf %100, %103 : vector<4x64x64xf32>
    %105 = math.exp %104 : vector<4x64x64xf32>
    %cst_32 = arith.constant dense<0.000000e+00> : vector<4x64xf32>
    %106 = vector.multi_reduction <add>, %105, %cst_32 [2] : vector<4x64x64xf32> to vector<4x64xf32>
    %107 = vector.shape_cast %106 : vector<4x64xf32> to vector<4x64x1xf32>
    %108 = tpu.reciprocal %107 {approx = true} : vector<4x64x1xf32> -> vector<4x64x1xf32>
    %109 = vector.broadcast %108 : vector<4x64x1xf32> to vector<4x64x64xf32>
    %110 = arith.mulf %105, %109 : vector<4x64x64xf32>
    %111 = arith.truncf %110 : vector<4x64x64xf32> to vector<4x64x64xbf16>
    "tpu.trace_start"() <{level = 10 : i32, message = "wnm,wmd->wnd"}> : () -> ()
    %cst_33 = arith.constant dense<0.000000e+00> : vector<4x64x8xf32>
    %112 = tpu.matmul %111, %94, %cst_33 {dimension_numbers = #tpu.dot_dimension_numbers<[2], [1], [1], [2], [0, 0, 0, 1, 1, 2], [0], [0]>} : vector<4x64x64xbf16>, vector<4x64x8xbf16>, vector<4x64x8xf32> -> vector<4x64x8xf32>
    "tpu.trace_stop"() : () -> ()
    %113 = vector.shape_cast %112 : vector<4x64x8xf32> to vector<256x8xf32>
    %114 = vector.extract_strided_slice %38 {offsets = [0, 0, 24], sizes = [4, 64, 8], strides = [1, 1, 1]} : vector<4x64x96xf32> to vector<4x64x8xf32>
    %115 = arith.truncf %114 : vector<4x64x8xf32> to vector<4x64x8xbf16>
    %116 = vector.extract_strided_slice %38 {offsets = [0, 0, 56], sizes = [4, 64, 8], strides = [1, 1, 1]} : vector<4x64x96xf32> to vector<4x64x8xf32>
    %117 = arith.truncf %116 : vector<4x64x8xf32> to vector<4x64x8xbf16>
    %118 = vector.extract_strided_slice %38 {offsets = [0, 0, 88], sizes = [4, 64, 8], strides = [1, 1, 1]} : vector<4x64x96xf32> to vector<4x64x8xf32>
    %119 = arith.truncf %118 : vector<4x64x8xf32> to vector<4x64x8xbf16>
    "tpu.trace_start"() <{level = 10 : i32, message = "wnd,wmd->wnm"}> : () -> ()
    %cst_34 = arith.constant dense<0.000000e+00> : vector<4x64x64xf32>
    %120 = tpu.matmul %115, %117, %cst_34 {dimension_numbers = #tpu.dot_dimension_numbers<[2], [2], [1], [1], [0, 0, 0, 1, 1, 1], [0], [0]>} : vector<4x64x8xbf16>, vector<4x64x8xbf16>, vector<4x64x64xf32> -> vector<4x64x64xf32>
    "tpu.trace_stop"() : () -> ()
    %c3 = arith.constant 3 : index
    %c0_35 = arith.constant 0 : index
    %c0_36 = arith.constant 0 : index
    %121 = vector.load %arg7[%c3, %c0_35, %c0_36] : memref<4x64x64xf32, #tpu.memory_space<vmem>>, vector<1x64x64xf32>
    %122 = vector.shape_cast %121 : vector<1x64x64xf32> to vector<64x64xf32>
    %123 = vector.shape_cast %122 : vector<64x64xf32> to vector<1x64x64xf32>
    %124 = vector.broadcast %123 : vector<1x64x64xf32> to vector<4x64x64xf32>
    %125 = arith.addf %120, %124 : vector<4x64x64xf32>
    %cst_37 = arith.constant dense<0xFF800000> : vector<4x64xf32>
    %126 = vector.multi_reduction <maximumf>, %125, %cst_37 [2] : vector<4x64x64xf32> to vector<4x64xf32>
    %127 = vector.shape_cast %126 : vector<4x64xf32> to vector<4x64x1xf32>
    %128 = vector.broadcast %127 : vector<4x64x1xf32> to vector<4x64x64xf32>
    %129 = arith.subf %125, %128 : vector<4x64x64xf32>
    %130 = math.exp %129 : vector<4x64x64xf32>
    %cst_38 = arith.constant dense<0.000000e+00> : vector<4x64xf32>
    %131 = vector.multi_reduction <add>, %130, %cst_38 [2] : vector<4x64x64xf32> to vector<4x64xf32>
    %132 = vector.shape_cast %131 : vector<4x64xf32> to vector<4x64x1xf32>
    %133 = tpu.reciprocal %132 {approx = true} : vector<4x64x1xf32> -> vector<4x64x1xf32>
    %134 = vector.broadcast %133 : vector<4x64x1xf32> to vector<4x64x64xf32>
    %135 = arith.mulf %130, %134 : vector<4x64x64xf32>
    %136 = arith.truncf %135 : vector<4x64x64xf32> to vector<4x64x64xbf16>
    "tpu.trace_start"() <{level = 10 : i32, message = "wnm,wmd->wnd"}> : () -> ()
    %cst_39 = arith.constant dense<0.000000e+00> : vector<4x64x8xf32>
    %137 = tpu.matmul %136, %119, %cst_39 {dimension_numbers = #tpu.dot_dimension_numbers<[2], [1], [1], [2], [0, 0, 0, 1, 1, 2], [0], [0]>} : vector<4x64x64xbf16>, vector<4x64x8xbf16>, vector<4x64x8xf32> -> vector<4x64x8xf32>
    "tpu.trace_stop"() : () -> ()
    %138 = vector.shape_cast %137 : vector<4x64x8xf32> to vector<256x8xf32>
    %139 = tpu.concatenate %63, %88, %113, %138 in 1 : vector<256x8xf32>, vector<256x8xf32>, vector<256x8xf32>, vector<256x8xf32> -> vector<256x32xf32>
    %140 = arith.truncf %139 : vector<256x32xf32> to vector<256x32xbf16>
    %c0_40 = arith.constant 0 : index
    %c0_41 = arith.constant 0 : index
    %141 = vector.load %arg8[%c0_40, %c0_41] : memref<32x32xbf16, #tpu.memory_space<vmem>>, vector<32x32xbf16>
    %cst_42 = arith.constant dense<0.000000e+00> : vector<256x32xf32>
    %142 = tpu.matmul %140, %141, %cst_42 {dimension_numbers = #tpu.dot_dimension_numbers<[1], [0], [0], [1], [0, 0, 1, 1], [], []>} : vector<256x32xbf16>, vector<32x32xbf16>, vector<256x32xf32> -> vector<256x32xf32>
    %c0_43 = arith.constant 0 : index
    %c0_44 = arith.constant 0 : index
    %143 = vector.load %arg9[%c0_43, %c0_44] : memref<1x32xf32, #tpu.memory_space<vmem>>, vector<1x32xf32>
    %144 = vector.shape_cast %143 : vector<1x32xf32> to vector<32xf32>
    %145 = vector.shape_cast %144 : vector<32xf32> to vector<1x32xf32>
    %146 = vector.broadcast %145 : vector<1x32xf32> to vector<256x32xf32>
    %147 = arith.addf %142, %146 : vector<256x32xf32>
    %148 = vector.shape_cast %147 : vector<256x32xf32> to vector<32x8x32xf32>
    %c0_45 = arith.constant 0 : index
    %c0_46 = arith.constant 0 : index
    %c0_47 = arith.constant 0 : index
    %149 = vector.load %arg10[%c0_45, %c0_46, %c0_47] : memref<32x8x32xf32, #tpu.memory_space<vmem>>, vector<32x8x32xf32>
    tpu.vector_store %arg10[%c0_45, %c0_46, %c0_47], %148 {strides = array<i32>} : memref<32x8x32xf32, #tpu.memory_space<vmem>>, vector<32x8x32xf32>,
    return
  }
  func.func @transform_0(%arg0: i32, %arg1: i32) -> (i32, i32, i32) {
    %c0_i32 = arith.constant 0 : i32
    %c0_i32_0 = arith.constant 0 : i32
    return %arg0, %arg1, %c0_i32 : i32, i32, i32
  }
  func.func @transform_1(%arg0: i32, %arg1: i32) -> (i32, i32) {
    %c0_i32 = arith.constant 0 : i32
    %c0_i32_0 = arith.constant 0 : i32
    %c0_i32_1 = arith.constant 0 : i32
    return %c0_i32, %c0_i32_0 : i32, i32
  }
  func.func @transform_2(%arg0: i32, %arg1: i32) -> (i32, i32) {
    %c0_i32 = arith.constant 0 : i32
    %c0_i32_0 = arith.constant 0 : i32
    %c0_i32_1 = arith.constant 0 : i32
    return %c0_i32, %c0_i32_0 : i32, i32
  }
  func.func @transform_3(%arg0: i32, %arg1: i32) -> (i32, i32) {
    %c0_i32 = arith.constant 0 : i32
    %c0_i32_0 = arith.constant 0 : i32
    %c0_i32_1 = arith.constant 0 : i32
    return %c0_i32, %c0_i32_0 : i32, i32
  }
  func.func @transform_4(%arg0: i32, %arg1: i32) -> (i32, i32) {
    %c0_i32 = arith.constant 0 : i32
    %c0_i32_0 = arith.constant 0 : i32
    %c0_i32_1 = arith.constant 0 : i32
    return %c0_i32, %c0_i32_0 : i32, i32
  }
  func.func @transform_5(%arg0: i32, %arg1: i32) -> (i32, i32, i32) {
    %c0_i32 = arith.constant 0 : i32
    %c0_i32_0 = arith.constant 0 : i32
    %c0_i32_1 = arith.constant 0 : i32
    %c0_i32_2 = arith.constant 0 : i32
    return %c0_i32, %c0_i32_0, %c0_i32_1 : i32, i32, i32
  }
  func.func @transform_6(%arg0: i32, %arg1: i32) -> (i32, i32) {
    %c0_i32 = arith.constant 0 : i32
    %c0_i32_0 = arith.constant 0 : i32
    %c0_i32_1 = arith.constant 0 : i32
    return %c0_i32, %c0_i32_0 : i32, i32
  }
  func.func @transform_7(%arg0: i32, %arg1: i32) -> (i32, i32) {
    %c0_i32 = arith.constant 0 : i32
    %c0_i32_0 = arith.constant 0 : i32
    %c0_i32_1 = arith.constant 0 : i32
    return %c0_i32, %c0_i32_0 : i32, i32
  }
  func.func @transform_8(%arg0: i32, %arg1: i32) -> (i32, i32, i32) {
    %c0_i32 = arith.constant 0 : i32
    %c0_i32_0 = arith.constant 0 : i32
    return %arg0, %arg1, %c0_i32 : i32, i32, i32
  }
}

</mosaic_0001>

<bundles_post_ra>
// kernel: tpu_custom_call.1
= control target key start
LH: loop header
LB: loop body
LE: loop exit
PB: predicated region body
PF: predicated region fallthrough
CT: control target
= control target key end

     0   :  { %s12082_s0 = inlined_call_operand.hbm [shape: f32[32,16,32], index: 0, kind: input, shape index: {}]   ;;  %s12083_s1 = inlined_call_operand.hbm [shape: f32[1,32], index: 1, kind: input, shape index: {}]   ;;  %s12084_s2 = inlined_call_operand.vmem [shape: f32[1,32], index: 2, kind: input, shape index: {}]   ;;  %s12085_s3 = inlined_call_operand.hbm [shape: bf16[32,96], index: 3, kind: input, shape index: {}]   ;;  %s12086_s4 = inlined_call_operand.vmem [shape: f32[1,96], index: 4, kind: input, shape index: {}]   ;;  %s12087_s5 = inlined_call_operand.hbm [shape: f32[4,64,64], index: 5, kind: input, shape index: {}]   ;;  %s12088_s6 = inlined_call_operand.hbm [shape: bf16[32,32], index: 6, kind: input, shape index: {}]   ;;  %s12089_s7 = inlined_call_operand.vmem [shape: f32[1,32], index: 7, kind: input, shape index: {}]   ;;  %s12090_s8 = inlined_call_operand.hbm [shape: f32[32,16,32], index: 8, kind: output, shape index: {}]  }
   0x1   :  { %12158 = sst [smem:[#allocation104_spill]] %s12083_s1 }
   0x2   :  { %12159 = sst [smem:[#allocation105_spill]] %s12085_s3 }
   0x3   :  { %12160 = sst [smem:[#allocation106_spill]] %s12087_s5 }
   0x4   :  { %12161 = sst [smem:[#allocation107_spill]] %s12088_s6 }
   0x5   :  { %13 = vsyncpa [#allocation3], 0 }
   0x6   :  { %15 = vsyncpa [#allocation3 + $0x1], 0 }
   0x7   :  { %16 = vsyncpa [#allocation6], 0 }
   0x8   :  { %17 = vsyncpa [#allocation9], 0 }
   0x9   :  { %18 = vsyncpa [#allocation4], 0 }
   0xa   :  { %20 = vsyncpa [#allocation4 + $0x1], 0  ;;  %s7629_s27 = smov 0   ;;  %s7631_s28 = smov 0  }
   0xb   :  { %s7633_s29 = smov 0   ;;  %s7635_s30 = smov 0  }
   0xc   :  { %s7637_s9 = smov 0   ;;  %s7639_s10 = smov 0  }
   0xd LB: > { %s6153_s11 = sadd.s32 4294967295, %s7556_s10   ;;  %s6154_s12 = sadd.s32 4294967294, %s7556_s10   ;;  %s7556_s10 = sphi %s7639_s10, %s26_s10   ;;  %s7552_s9 = sphi %s7637_s9, %s12546_s9   ;;  %s7548_s30 = sphi %s7635_s30, %s12545_s30   ;;  %s7544_s29 = sphi %s7633_s29, %s12544_s29   ;;  %s7540_s28 = sphi %s7631_s28, %s12543_s28   ;;  %s7536_s27 = sphi %s7629_s27, %s12542_s27  }
   0xe   : > { %p60_p0 = scmp.ne.s32.totalorder %s7540_s28, %s7536_s27  ;;  %p7663_p1 = scmp.eq.s32.totalorder %s6153_s11, 0 }
   0xf   : > { %p7667_p2 = scmp.eq.s32.totalorder %s6153_s11, 1  ;;  %p239_p3 = scmp.eq.s32.totalorder %s6154_s12, 1 }
  0x10   : > { %p7673_p4 = por %p7663_p1, %p60_p0  ;;  %p6155_p5 = scmp.ge.s32.totalorder %s7556_s10, 1 }
  0x11   : > { %p7678_p6 = por %p239_p3, %p60_p0  ;;  %p246_p7 = scmp.lt.s32.totalorder %s7556_s10, 3 }
  0x12   : > { %s12167_s1 = sld [smem:[#allocation104_spill]]  ;;  %p6160_p9 = scmp.ge.s32.totalorder %s7556_s10, 2 }
  0x13   : > { %s12165_s16 = scalar_select %p7678_p6, 1, 0 }
  0x14   : > { %p7686_p8 = pnand %p6155_p5, %p246_p7  ;;  %s7558_s21 = smov [#allocation5]  }
  0x15   : > { %12166 = sst [smem:[#allocation16_spill]] %s12165_s16  ;;  %s260_s22 = sshll.u32 %s7558_s21, 4  ;;  %s261_s22 = int_to_ptr.vmem [resolvable:$true] %s260_s22 }
  0x16   : > { %p6384_p10 = pneg %p7686_p8  ;;  %s12169_s5 = sld [smem:[#allocation106_spill]] }
  0x17   : > { %s7559_s11 = smov [#allocation8]   ;;  %s12092_s17 = smov 128  }
  0x18   : > { %s258_s19 = sshll.u32 %s12167_s1, 4  ;;  %p7698_p11 = pnand %p6384_p10, %p7663_p1  ;;  %s259_s19 = int_to_ptr.hbm [resolvable:$true] %s258_s19 }
  0x19   : > { %s291_s12 = sshll.u32 %s7559_s11, 4  ;;  %s12093_s18 = smov 8   ;;  %s292_s12 = int_to_ptr.vmem [resolvable:$true] %s291_s12 }
  0x1a   : > { %6387 = dma.hbm_to_vmem [thread:$0]  (!%p7698_p11), %s259_s19, 16, %s261_s22, [#allocation6]  }
  0x1b   : > { %s12171_s3 = sld [smem:[#allocation105_spill]]  ;;  %s7562_s11 = smov [#allocation7]  }
  0x1c   : > { %s289_s25 = sshll.u32 %s12169_s5, 4  ;;  %s274_s19 = sshll.u32 %s7562_s11, 4  ;;  %s290_s25 = int_to_ptr.hbm [resolvable:$true] %s289_s25  ;;  %s275_s19 = int_to_ptr.vmem [resolvable:$true] %s274_s19 }
  0x1d   : > { %6393 = dma.hbm_to_vmem [thread:$0]  (!%p7698_p11), %s290_s25, 4096, %s292_s12, [#allocation9], %s12092_s17, %s12092_s17, %s12093_s18  }
  0x1e   : > { %s12172_s6 = sld [smem:[#allocation107_spill]]  ;;  %s7563_s16 = smov 64  }
  0x1f   : > { %s7564_s25 = smov 4   ;;  %s7565_s12 = smov [#allocation10]  }
  0x20   : > { %s305_s21 = sshll.u32 %s7565_s12, 4  ;;  %s35_s23 = sadd.s32 1, %s7552_s9  ;;  %s306_s21 = int_to_ptr.vmem [resolvable:$true] %s305_s21 }
  0x21   : > { %s272_s24 = sshll.u32 %s12171_s3, 4  ;;  %s47_s11 = sadd.s32 1, %s7544_s29  ;;  %s273_s24 = int_to_ptr.hbm [resolvable:$true] %s272_s24 }
  0x22   : > { %6390 = dma.hbm_to_vmem [thread:$0]  (!%p7698_p11), %s273_s24, 256, %s275_s19, [#allocation6], %s7563_s16, %s7563_s16, %s7564_s25  }
  0x23   : > { %p36_p12 = scmp.ge.s32.totalorder %s35_s23, 2  ;;  %p54_p13 = scmp.ne.s32.totalorder %s7544_s29, %s7540_s28 }
  0x24   : > { %s303_s5 = sshll.u32 %s12172_s6, 4  ;;  %p55_p0 = scmp.eq.s32.totalorder %s7556_s10, 0  ;;  %s304_s5 = int_to_ptr.hbm [resolvable:$true] %s303_s5 }
  0x25   : > { %6396 = dma.hbm_to_vmem [thread:$0]  (!%p7698_p11), %s304_s5, 256, %s306_s21, [#allocation9], %s7563_s16, %s7563_s16, %s7564_s25  }
  0x26   : > { %p6409_p3 = scmp.lt.s32.totalorder %s7556_s10, 2  ;;  %s12548_s23 = smov (%p36_p12, %s35_s23), 0 }
  0x27   : > { %12173 = sst [smem:[#allocation17_spill]] %s12548_s23  ;;  %p7727_p5 = por %p55_p0, %p54_p13 }
  0x28   : > { %p7733_p7 = por %p7667_p2, %p54_p13  ;;  %s43_s5 = ssub.s32 %s7552_s9, %s12548_s23 }
  0x29   : > { %s322_s16 = sand.u32 1, %s7544_s29   ;;  %p45_p10 = scmp.eq.s32.totalorder %s43_s5, 0 }
  0x2a   : > { %s6161_s24 = sshll.u32 %s322_s16, 8  ;;  %s6162_s19 = sshll.u32 %s7552_s9, 3 }
  0x2b   : > { %s7742_s22 = scalar_select %p45_p10, %s7544_s29, %s47_s11  }
  0x2c   : > { %s333_s21 = scalar_lea.hbm %s12082_s0, %s6162_s19  ;;  %s326_s18 = scalar_lea.vmem [#allocation2], %s6161_s24 }
  0x2d   : > { %s334_s17 = sshll.u32 %s333_s21, 4  ;;  %s336_s3 = sshll.u32 %s326_s18, 4  ;;  %s335_s17 = int_to_ptr.hbm [resolvable:$true] %s334_s17  ;;  %s337_s3 = int_to_ptr.vmem [resolvable:$true] %s336_s3 }
  0x2e   : > { %p6398_p2 = pnand %p6409_p3, %p7727_p5  ;;  %s323_s14 = scalar_lea.sflag [#allocation3], %s322_s16 }
  0x2f   : > { %s7566_s6 = smov 256   ;;  %s12176_s23 = smov 8  }
  0x30   : > { %s12177_s5 = smov 128   ;;  %348 = sbr.rel (%p7686_p8) target bundleno = 3867 (0xf1b), region = 52 }
  0x31   : > { %6400 = dma.hbm_to_vmem [thread:$0]  (!%p6398_p2), %s335_s17, 4096, %s337_s3, %s323_s14, %s7566_s6, %s12177_s5, %s12176_s23  }
  0x35   : > { %s7756_s11 = sand.u32 1, %s7540_s28  }
  0x36   : > { %s6164_s18 = sshll.u32 %s7756_s11, 8  ;;  %s351_s24 = scalar_lea.sflag [#allocation3], %s7756_s11 }
  0x37   : > { %s7762_s1 = scalar_lea.vmem [#allocation2], %s6164_s18 }
  0x38   : > { %7519 = dma.done.wait (%p7673_p4), %s351_s24, 4096  }
  0x39   : > { %7521 = vsyncadd (%p7673_p4), %s351_s24, 4294963200 }
  0x3a   : > { %7523 = dma.done.wait (%p7663_p1), [#allocation6], 272  }
  0x3b   : > { %7525 = vsyncadd (%p7663_p1), [#allocation6], 4294967024 }
  0x3c   : > { %7527 = dma.done.wait (%p7663_p1), [#allocation9], 4352  }
  0x3d   : > { %7529 = vsyncadd (%p7663_p1), [#allocation9], 4294962944  ;;  %vm443_vm0 = vcmask 261120   ;;  %v7777_v0 = vld [vmem:[%s7762_s1 + $0x20] sm:$0xff]  ;;  %v7787_v4 = vld [vmem:[%s7762_s1 + $0x10] sm:$0xff]  ;;  %v7567_v62 = vmov 32.0  }
  0x3e   : > { %v7780_v1 = vld [vmem:[%s7762_s1] sm:$0xff]  ;;  %v456_v2 = vsel %vm443_vm0, %v7777_v0, 0.0  ;;  %v450_v5 = vsel %vm443_vm0, %v7787_v4, 0.0  ;;  %v7792_v6 = vld [vmem:[%s7762_s1 + $0x28] sm:$0xff]  ;;  %v7798_v8 = vld [vmem:[%s7762_s1 + $0x18] sm:$0xff]  ;;  %6733 = vrcp.f32 %v7567_v62  ;;  %s7568_s20 = smov 96  }
  0x3f   : > { %v444_v3 = vsel %vm443_vm0, %v7780_v1, 0.0  ;;  %457 = vadd.xlane.f32.xlu2 %v456_v2  ;;  %451 = vadd.xlane.f32.xlu1 %v450_v5  ;;  %v7795_v7 = vld [vmem:[%s7762_s1 + $0x8] sm:$0xff]  ;;  %v459_v9 = vsel %vm443_vm0, %v7792_v6, 0.0  ;;  %v453_v11 = vsel %vm443_vm0, %v7798_v8, 0.0  ;;  %v7807_v12 = vld [vmem:[%s7762_s1 + $0x30] sm:$0xff]  ;;  %v7810_v13 = vld [vmem:[%s7762_s1 + $0x38] sm:$0xff] }
  0x40   : > { %445 = vadd.xlane.f32.xlu0 %v444_v3  ;;  %v447_v10 = vsel %vm443_vm0, %v7795_v7, 0.0  ;;  %v7813_v14 = vld [vmem:[%s7762_s1 + $0x60] sm:$0xff]  ;;  %v462_v15 = vsel %vm443_vm0, %v7807_v12, 0.0  ;;  %v465_v16 = vsel %vm443_vm0, %v7810_v13, 0.0  ;;  %v7822_v18 = vld [vmem:[%s7762_s1 + $0x68] sm:$0xff]  ;;  %v7828_v20 = vld [vmem:[%s7762_s1 + $0x70] sm:$0xff] }
  0x41   : > { %v480_v17 = vsel %vm443_vm0, %v7813_v14, 0.0  ;;  %v7825_v19 = vld [vmem:[%s7762_s1 + $0x48] sm:$0xff]  ;;  %v483_v21 = vsel %vm443_vm0, %v7822_v18, 0.0  ;;  %v486_v23 = vsel %vm443_vm0, %v7828_v20, 0.0  ;;  %v7837_v24 = vld [vmem:[%s7762_s1 + $0x40] sm:$0xff]  ;;  %v7840_v25 = vld [vmem:[%s7762_s1 + $0x58] sm:$0xff] }
  0x42   : > { %v471_v22 = vsel %vm443_vm0, %v7825_v19, 0.0  ;;  %v7843_v26 = vld [vmem:[%s7762_s1 + $0xa0] sm:$0xff]  ;;  %v468_v27 = vsel %vm443_vm0, %v7837_v24, 0.0  ;;  %v477_v28 = vsel %vm443_vm0, %v7840_v25, 0.0  ;;  %v7852_v30 = vld [vmem:[%s7762_s1 + $0x78] sm:$0xff]  ;;  %v7858_v32 = vld [vmem:[%s7762_s1 + $0xc8] sm:$0xff] }
  0x43   : > { %v504_v29 = vsel %vm443_vm0, %v7843_v26, 0.0  ;;  %v7855_v31 = vld [vmem:[%s7762_s1 + $0xc0] sm:$0xff]  ;;  %v489_v33 = vsel %vm443_vm0, %v7852_v30, 0.0  ;;  %v519_v35 = vsel %vm443_vm0, %v7858_v32, 0.0  ;;  %v7867_v36 = vld [vmem:[%s7762_s1 + $0x50] sm:$0xff]  ;;  %v7873_v38 = vld [vmem:[%s7762_s1 + $0xb8] sm:$0xff] }
  0x44   : > { %v516_v34 = vsel %vm443_vm0, %v7855_v31, 0.0  ;;  %v7870_v37 = vld [vmem:[%s7762_s1 + $0xb0] sm:$0xff]  ;;  %v474_v39 = vsel %vm443_vm0, %v7867_v36, 0.0  ;;  %v513_v41 = vsel %vm443_vm0, %v7873_v38, 0.0  ;;  %v7882_v42 = vld [vmem:[%s7762_s1 + $0xa8] sm:$0xff]  ;;  %v7897_v48 = vld [vmem:[%s7762_s1 + $0x80] sm:$0xff]  ;;  %v6734_v63 = vpop.eup %6733 }
  0x45   : > { %v510_v40 = vsel %vm443_vm0, %v7870_v37, 0.0  ;;  %v7885_v43 = vld [vmem:[%s7762_s1 + $0x88] sm:$0xff]  ;;  %v7888_v44 = vld [vmem:[%s7762_s1 + $0xd0] sm:$0xff]  ;;  %v507_v45 = vsel %vm443_vm0, %v7882_v42, 0.0  ;;  %v7900_v49 = vld [vmem:[%s7762_s1 + $0xe0] sm:$0xff]  ;;  %v492_v51 = vsel %vm443_vm0, %v7897_v48, 0.0  ;;  %vm545_vm1 = vweird.f32 %v6734_v63 }
  0x46   : > { %v495_v46 = vsel %vm443_vm0, %v7885_v43, 0.0  ;;  %v522_v47 = vsel %vm443_vm0, %v7888_v44, 0.0  ;;  %v7903_v50 = vld [vmem:[%s7762_s1 + $0x90] sm:$0xff]  ;;  %v528_v52 = vsel %vm443_vm0, %v7900_v49, 0.0  ;;  %v7912_v54 = vld [vmem:[%s7762_s1 + $0xd8] sm:$0xff]  ;;  %v7915_v55 = vld [vmem:[%s7762_s1 + $0xe8] sm:$0xff] }
  0x47   : > { %460 = vadd.xlane.f32.xlu2 %v459_v9  ;;  %454 = vadd.xlane.f32.xlu1 %v453_v11  ;;  %v498_v53 = vsel %vm443_vm0, %v7903_v50, 0.0  ;;  %v525_v56 = vsel %vm443_vm0, %v7912_v54, 0.0  ;;  %v531_v57 = vsel %vm443_vm0, %v7915_v55, 0.0  ;;  %v7922_v58 = vld [vmem:[%s7762_s1 + $0x98] sm:$0xff]  ;;  %v7927_v60 = vld [vmem:[%s7762_s1 + $0xf0] sm:$0xff]  ;;  %v541_v2 = vmul.f32 32.0, %v6734_v63 }
  0x48   : > { %448 = vadd.xlane.f32.xlu0 %v447_v10  ;;  %v501_v59 = vsel %vm443_vm0, %v7922_v58, 0.0  ;;  %v534_v61 = vsel %vm443_vm0, %v7927_v60, 0.0  ;;  %s7569_s17 = smov 64   ;;  %s7570_s23 = smov 88  }
  0x49   : > { %v542_v3 = vsub.f32 1.0, %v541_v2  ;;  %s7571_s25 = smov 120   ;;  %s7572_s12 = smov 56  }
  0x4a   : > { %s7573_s21 = smov 80   ;;  %s7574_s14 = smov 112  }
  0x4b   : > { %v543_v5 = vmul.f32 %v6734_v63, %v542_v3  ;;  %s7575_s5 = smov 48   ;;  %s7576_s24 = smov 72  }
  0x4c   : > { %s7578_s3 = smov 40   ;;  %s7579_s6 = smov 8  }
  0x4d   : > { %v544_v9 = vadd.f32 %v6734_v63, %v543_v5  ;;  %s7580_s13 = smov 24   ;;  %s7581_s15 = smov 16  }
  0x4f   : > { %463 = vadd.xlane.f32.xlu2 %v462_v15  ;;  %481 = vadd.xlane.f32.xlu1 %v480_v17  ;;  %v7931_v10 = vsel %vm545_vm1, %v6734_v63, %v544_v9 }
  0x50   : > { %466 = vadd.xlane.f32.xlu0 %v465_v16 }
  0x57   : > { %484 = vadd.xlane.f32.xlu2 %v483_v21  ;;  %487 = vadd.xlane.f32.xlu1 %v486_v23 }
  0x58   : > { %472 = vadd.xlane.f32.xlu0 %v471_v22 }
  0x5f   : > { %469 = vadd.xlane.f32.xlu2 %v468_v27  ;;  %505 = vadd.xlane.f32.xlu1 %v504_v29 }
  0x60   : > { %478 = vadd.xlane.f32.xlu0 %v477_v28 }
  0x67   : > { %490 = vadd.xlane.f32.xlu2 %v489_v33  ;;  %520 = vadd.xlane.f32.xlu1 %v519_v35 }
  0x68   : > { %517 = vadd.xlane.f32.xlu0 %v516_v34 }
  0x6f   : > { %475 = vadd.xlane.f32.xlu2 %v474_v39  ;;  %514 = vadd.xlane.f32.xlu1 %v513_v41 }
  0x70   : > { %511 = vadd.xlane.f32.xlu0 %v510_v40 }
  0x77   : > { %508 = vadd.xlane.f32.xlu2 %v507_v45  ;;  %523 = vadd.xlane.f32.xlu1 %v522_v47 }
  0x78   : > { %496 = vadd.xlane.f32.xlu0 %v495_v46 }
  0x7f   : > { %493 = vadd.xlane.f32.xlu2 %v492_v51  ;;  %499 = vadd.xlane.f32.xlu1 %v498_v53 }
  0x80   : > { %529 = vadd.xlane.f32.xlu0 %v528_v52 }
  0x87   : > { %526 = vadd.xlane.f32.xlu2 %v525_v56  ;;  %532 = vadd.xlane.f32.xlu1 %v531_v57 }
  0x8f   : > { %502 = vadd.xlane.f32.xlu2 %v501_v59 }
  0x97   : > { %535 = vadd.xlane.f32.xlu2 %v534_v61 }
  0xb2   : > { %v458_v11 = vpop.xlane.xlu2 %457  ;;  %v452_v17 = vpop.xlane.xlu1 %451 }
  0xb3   : > { %v446_v15 = vpop.xlane.xlu0 %445  ;;  %v549_v21 = vmul.f32 %v7931_v10, %v452_v17  ;;  %v551_v40 = vmul.f32 %v7931_v10, %v458_v11 }
  0xb4   : > { %v547_v16 = vmul.f32 %v7931_v10, %v446_v15 }
  0xb5   : > { %v7939_v23 = vsub.f32 %v7787_v4, %v549_v21  ;;  %v7959_v47 = vsub.f32 %v7777_v0, %v551_v40 }
  0xb6   : > { %v7936_v22 = vsub.f32 %v7780_v1, %v547_v16 }
  0xb7   : > { %v613_v39 = vmul.f32 %v7939_v23, %v7939_v23  ;;  %v615_v0 = vmul.f32 %v7959_v47, %v7959_v47 }
  0xb8   : > { %v611_v27 = vmul.f32 %v7936_v22, %v7936_v22 }
  0xb9   : > { %v649_v41 = vsel %vm443_vm0, %v613_v39, 0.0  ;;  %v655_v5 = vsel %vm443_vm0, %v615_v0, 0.0 }
  0xba   : > { %v643_v28 = vsel %vm443_vm0, %v611_v27, 0.0  ;;  %v461_v29 = vpop.xlane.xlu2 %460  ;;  %v455_v35 = vpop.xlane.xlu1 %454 }
  0xbb   : > { %644 = vadd.xlane.f32.xlu0 %v643_v28  ;;  %v449_v33 = vpop.xlane.xlu0 %448  ;;  %v550_v1 = vmul.f32 %v7931_v10, %v455_v35  ;;  %v552_v61 = vmul.f32 %v7931_v10, %v461_v29 }
  0xbc   : > { %v548_v34 = vmul.f32 %v7931_v10, %v449_v33 }
  0xbd   : > { %v7956_v46 = vsub.f32 %v7798_v8, %v550_v1 }
  0xbe   : > { %v7950_v4 = vsub.f32 %v7795_v7, %v548_v34 }
  0xbf   : > { %v614_v59 = vmul.f32 %v7956_v46, %v7956_v46 }
  0xc0   : > { %v612_v45 = vmul.f32 %v7950_v4, %v7950_v4 }
  0xc1   : > { %v652_v2 = vsel %vm443_vm0, %v614_v59, 0.0 }
  0xc2   : > { %v646_v51 = vsel %vm443_vm0, %v612_v45, 0.0  ;;  %v464_v52 = vpop.xlane.xlu2 %463  ;;  %v482_v56 = vpop.xlane.xlu1 %481 }
  0xc3   : > { %650 = vadd.xlane.f32.xlu0 %v649_v41  ;;  %647 = vadd.xlane.f32.xlu1 %v646_v51  ;;  %v467_v53 = vpop.xlane.xlu0 %466  ;;  %v553_v7 = vmul.f32 %v7931_v10, %v464_v52  ;;  %v559_v17 = vmul.f32 %v7931_v10, %v482_v56 }
  0xc4   : > { %v554_v57 = vmul.f32 %v7931_v10, %v467_v53 }
  0xc5   : > { %v7967_v8 = vsub.f32 %v7807_v12, %v553_v7  ;;  %v7981_v12 = vsub.f32 %v7792_v6, %v552_v61  ;;  %v8000_v34 = vsub.f32 %v7813_v14, %v559_v17 }
  0xc6   : > { %v7975_v63 = vsub.f32 %v7810_v13, %v554_v57 }
  0xc7   : > { %v617_v62 = vmul.f32 %v7967_v8, %v7967_v8  ;;  %v616_v6 = vmul.f32 %v7981_v12, %v7981_v12  ;;  %v623_v45 = vmul.f32 %v8000_v34, %v8000_v34 }
  0xc8   : > { %v618_v13 = vmul.f32 %v7975_v63, %v7975_v63 }
  0xc9   : > { %v661_v3 = vsel %vm443_vm0, %v617_v62, 0.0  ;;  %v679_v7 = vsel %vm443_vm0, %v623_v45, 0.0 }
  0xca   : > { %662 = vadd.xlane.f32.xlu2 %v661_v3  ;;  %v485_v9 = vpop.xlane.xlu2 %484  ;;  %v488_v16 = vpop.xlane.xlu1 %487  ;;  %v664_v33 = vsel %vm443_vm0, %v618_v13, 0.0 }
  0xcb   : > { %656 = vadd.xlane.f32.xlu0 %v655_v5  ;;  %v473_v11 = vpop.xlane.xlu0 %472  ;;  %v560_v15 = vmul.f32 %v7931_v10, %v485_v9  ;;  %653 = vadd.xlane.f32.xlu1 %v652_v2  ;;  %v561_v21 = vmul.f32 %v7931_v10, %v488_v16 }
  0xcc   : > { %v556_v14 = vmul.f32 %v7931_v10, %v473_v11 }
  0xcd   : > { %v7989_v27 = vsub.f32 %v7822_v18, %v560_v15  ;;  %v7996_v29 = vsub.f32 %v7828_v20, %v561_v21  ;;  %v658_v18 = vsel %vm443_vm0, %v616_v6, 0.0 }
  0xce   : > { %v8018_v56 = vsub.f32 %v7825_v19, %v556_v14 }
  0xcf   : > { %v624_v28 = vmul.f32 %v7989_v27, %v7989_v27  ;;  %v625_v40 = vmul.f32 %v7996_v29, %v7996_v29 }
  0xd0   : > { %12179 = vst [vmem:[#allocation19_spill] sm:$0xff] %v8018_v56  ;;  %v620_v2 = vmul.f32 %v8018_v56, %v8018_v56 }
  0xd1   : > { %v682_v35 = vsel %vm443_vm0, %v624_v28, 0.0  ;;  %v685_v52 = vsel %vm443_vm0, %v625_v40, 0.0 }
  0xd2   : > { %683 = vadd.xlane.f32.xlu2 %v682_v35  ;;  %v470_v39 = vpop.xlane.xlu2 %469  ;;  %v506_v20 = vpop.xlane.xlu1 %505  ;;  %v670_v15 = vsel %vm443_vm0, %v620_v2, 0.0 }
  0xd3   : > { %665 = vadd.xlane.f32.xlu0 %v664_v33  ;;  %v555_v1 = vmul.f32 %v7931_v10, %v470_v39  ;;  %659 = vadd.xlane.f32.xlu1 %v658_v18  ;;  %v479_v41 = vpop.xlane.xlu0 %478  ;;  %v567_v62 = vmul.f32 %v7931_v10, %v506_v20 }
  0xd5   : > { %v8011_v51 = vsub.f32 %v7837_v24, %v555_v1  ;;  %v558_v24 = vmul.f32 %v7931_v10, %v479_v41  ;;  %v8035_v11 = vsub.f32 %v7843_v26, %v567_v62 }
  0xd7   : > { %12178 = vst [vmem:[#allocation18_spill] sm:$0xff] %v8011_v51  ;;  %v619_v53 = vmul.f32 %v8011_v51, %v8011_v51  ;;  %v8032_v9 = vsub.f32 %v7840_v25, %v558_v24  ;;  %v631_v26 = vmul.f32 %v8035_v11, %v8035_v11 }
  0xd9   : > { %v667_v57 = vsel %vm443_vm0, %v619_v53, 0.0  ;;  %12180 = vst [vmem:[#allocation20_spill] sm:$0xff] %v8032_v9  ;;  %v703_v40 = vsel %vm443_vm0, %v631_v26, 0.0 }
  0xda   : > { %v491_v59 = vpop.xlane.xlu2 %490  ;;  %686 = vadd.xlane.f32.xlu2 %v685_v52  ;;  %v521_v61 = vpop.xlane.xlu1 %520 }
  0xdb   : > { %668 = vadd.xlane.f32.xlu0 %v667_v57  ;;  %v562_v0 = vmul.f32 %v7931_v10, %v491_v59  ;;  %680 = vadd.xlane.f32.xlu1 %v679_v7  ;;  %v518_v19 = vpop.xlane.xlu0 %517  ;;  %v572_v25 = vmul.f32 %v7931_v10, %v521_v61 }
  0xdc   : > { %v571_v21 = vmul.f32 %v7931_v10, %v518_v19 }
  0xdd   : > { %v8027_v3 = vsub.f32 %v7852_v30, %v562_v0  ;;  %v622_v30 = vmul.f32 %v8032_v9, %v8032_v9  ;;  %v8056_v1 = vsub.f32 %v7858_v32, %v572_v25 }
  0xde   : > { %v8053_v39 = vsub.f32 %v7855_v31, %v571_v21 }
  0xdf   : > { %v626_v5 = vmul.f32 %v8027_v3, %v8027_v3  ;;  %v676_v35 = vsel %vm443_vm0, %v622_v30, 0.0  ;;  %v636_v14 = vmul.f32 %v8056_v1, %v8056_v1 }
  0xe0   : > { %v635_v31 = vmul.f32 %v8053_v39, %v8053_v39 }
  0xe1   : > { %v688_v16 = vsel %vm443_vm0, %v626_v5, 0.0  ;;  %v718_v0 = vsel %vm443_vm0, %v636_v14, 0.0  ;;  %v8086_v5 = vld [vmem:[%s7762_s1 + $0xf8] sm:$0xff]  ;;  %s7577_s1 = smov 104  }
  0xe2   : > { %v476_v13 = vpop.xlane.xlu2 %475  ;;  %v515_v6 = vpop.xlane.xlu1 %514  ;;  %v715_v59 = vsel %vm443_vm0, %v635_v31, 0.0  ;;  %v537_v30 = vsel %vm443_vm0, %v8086_v5, 0.0 }
  0xe3   : > { %689 = vadd.xlane.f32.xlu0 %v688_v16  ;;  %v557_v17 = vmul.f32 %v7931_v10, %v476_v13  ;;  %671 = vadd.xlane.f32.xlu1 %v670_v15  ;;  %v512_v18 = vpop.xlane.xlu0 %511  ;;  %v570_v45 = vmul.f32 %v7931_v10, %v515_v6 }
  0xe4   : > { %v569_v32 = vmul.f32 %v7931_v10, %v512_v18 }
  0xe5   : > { %v8047_v28 = vsub.f32 %v7867_v36, %v557_v17  ;;  %v8073_v57 = vsub.f32 %v7873_v38, %v570_v45 }
  0xe6   : > { %v8078_v24 = vsub.f32 %v7870_v37, %v569_v32 }
  0xe7   : > { %12181 = vst [vmem:[#allocation21_spill] sm:$0xff] %v8047_v28  ;;  %v621_v33 = vmul.f32 %v8047_v28, %v8047_v28  ;;  %v634_v38 = vmul.f32 %v8073_v57, %v8073_v57 }
  0xe8   : > { %12182 = vst [vmem:[#allocation22_spill] sm:$0xff] %v8073_v57  ;;  %v633_v37 = vmul.f32 %v8078_v24, %v8078_v24 }
  0xe9   : > { %v673_v20 = vsel %vm443_vm0, %v621_v33, 0.0  ;;  %12183 = vst [vmem:[#allocation23_spill] sm:$0xff] %v8078_v24  ;;  %v712_v13 = vsel %vm443_vm0, %v634_v38, 0.0 }
  0xea   : > { %v509_v41 = vpop.xlane.xlu2 %508  ;;  %674 = vadd.xlane.f32.xlu2 %v673_v20  ;;  %v524_v53 = vpop.xlane.xlu1 %523  ;;  %v709_v6 = vsel %vm443_vm0, %v633_v37, 0.0 }
  0xeb   : > { %677 = vadd.xlane.f32.xlu0 %v676_v35  ;;  %v568_v36 = vmul.f32 %v7931_v10, %v509_v41  ;;  %704 = vadd.xlane.f32.xlu1 %v703_v40  ;;  %v497_v62 = vpop.xlane.xlu0 %496  ;;  %v573_v19 = vmul.f32 %v7931_v10, %v524_v53 }
  0xec   : > { %v564_v15 = vmul.f32 %v7931_v10, %v497_v62 }
  0xed   : > { %v8068_v52 = vsub.f32 %v7882_v42, %v568_v36  ;;  %v8096_v17 = vsub.f32 %v7888_v44, %v573_v19 }
  0xee   : > { %v8102_v25 = vsub.f32 %v7885_v43, %v564_v15 }
  0xef   : > { %v632_v7 = vmul.f32 %v8068_v52, %v8068_v52  ;;  %12185 = vst [vmem:[#allocation25_spill] sm:$0xff] %v8096_v17  ;;  %v637_v33 = vmul.f32 %v8096_v17, %v8096_v17 }
  0xf0   : > { %12186 = vst [vmem:[#allocation26_spill] sm:$0xff] %v8102_v25  ;;  %v628_v18 = vmul.f32 %v8102_v25, %v8102_v25 }
  0xf1   : > { %v706_v61 = vsel %vm443_vm0, %v632_v7, 0.0  ;;  %v721_v40 = vsel %vm443_vm0, %v637_v33, 0.0 }
  0xf2   : > { %v494_v42 = vpop.xlane.xlu2 %493  ;;  %707 = vadd.xlane.f32.xlu2 %v706_v61  ;;  %v500_v21 = vpop.xlane.xlu1 %499  ;;  %v694_v36 = vsel %vm443_vm0, %v628_v18, 0.0 }
  0xf3   : > { %716 = vadd.xlane.f32.xlu0 %v715_v59  ;;  %v563_v2 = vmul.f32 %v7931_v10, %v494_v42  ;;  %719 = vadd.xlane.f32.xlu1 %v718_v0  ;;  %v565_v35 = vmul.f32 %v7931_v10, %v500_v21  ;;  %v530_v45 = vpop.xlane.xlu0 %529 }
  0xf4   : > { %v575_v53 = vmul.f32 %v7931_v10, %v530_v45 }
  0xf5   : > { %v8092_v16 = vsub.f32 %v7897_v48, %v563_v2  ;;  %v8118_v41 = vsub.f32 %v7903_v50, %v565_v35 }
  0xf6   : > { %v8135_v62 = vsub.f32 %v7900_v49, %v575_v53 }
  0xf7   : > { %12184 = vst [vmem:[#allocation24_spill] sm:$0xff] %v8092_v16  ;;  %v627_v44 = vmul.f32 %v8092_v16, %v8092_v16  ;;  %v629_v50 = vmul.f32 %v8118_v41, %v8118_v41 }
  0xf8   : > { %12188 = vst [vmem:[#allocation28_spill] sm:$0xff] %v8118_v41  ;;  %v639_v37 = vmul.f32 %v8135_v62, %v8135_v62 }
  0xf9   : > { %v691_v20 = vsel %vm443_vm0, %v627_v44, 0.0  ;;  %12190 = vst [vmem:[#allocation30_spill] sm:$0xff] %v8135_v62  ;;  %v697_v2 = vsel %vm443_vm0, %v629_v50, 0.0 }
  0xfa   : > { %v527_v26 = vpop.xlane.xlu2 %526  ;;  %713 = vadd.xlane.f32.xlu2 %v712_v13  ;;  %v533_v31 = vpop.xlane.xlu1 %532  ;;  %v727_v13 = vsel %vm443_vm0, %v639_v37, 0.0 }
  0xfb   : > { %538 = vadd.xlane.f32.xlu0 %v537_v30  ;;  %v574_v48 = vmul.f32 %v7931_v10, %v527_v26  ;;  %710 = vadd.xlane.f32.xlu1 %v709_v6  ;;  %v576_v7 = vmul.f32 %v7931_v10, %v533_v31 }
  0xfd   : > { %v8113_v43 = vsub.f32 %v7912_v54, %v574_v48  ;;  %v8138_v42 = vsub.f32 %v7915_v55, %v576_v7  ;;  %v6351_v48 = vld [vmem:[#allocation7 + $0x8] sm:$0xff] }
  0xfe   : > { %1317 = vmatpush.bf16.msra.mxu0 %v6351_v48  ;;  %6354 = vmatpush.bf16.msra.mxu1 %v6351_v48 }
  0xff   : > { %12187 = vst [vmem:[#allocation27_spill] sm:$0xff] %v8113_v43  ;;  %v638_v54 = vmul.f32 %v8113_v43, %v8113_v43  ;;  %v640_v49 = vmul.f32 %v8138_v42, %v8138_v42  ;;  %6355 = vmatpush.bf16.msra.mxu2 %v6351_v48  ;;  %6356 = vmatpush.bf16.msra.mxu3 %v6351_v48 }
 0x100   : > { %12191 = vst [vmem:[#allocation31_spill] sm:$0xff] %v8138_v42 }
 0x101   : > { %v724_v61 = vsel %vm443_vm0, %v638_v54, 0.0  ;;  %v730_v30 = vsel %vm443_vm0, %v640_v49, 0.0 }
 0x102   : > { %v503_v14 = vpop.xlane.xlu2 %502  ;;  %722 = vadd.xlane.f32.xlu2 %v721_v40 }
 0x103   : > { %692 = vadd.xlane.f32.xlu0 %v691_v20  ;;  %v566_v32 = vmul.f32 %v7931_v10, %v503_v14  ;;  %695 = vadd.xlane.f32.xlu1 %v694_v36 }
 0x105   : > { %v8129_v59 = vsub.f32 %v7922_v58, %v566_v32 }
 0x107   : > { %12189 = vst [vmem:[#allocation29_spill] sm:$0xff] %v8129_v59  ;;  %v630_v0 = vmul.f32 %v8129_v59, %v8129_v59 }
 0x109   : > { %v700_v38 = vsel %vm443_vm0, %v630_v0, 0.0 }
 0x10a   : > { %v536_v19 = vpop.xlane.xlu2 %535  ;;  %701 = vadd.xlane.f32.xlu2 %v700_v38 }
 0x10b   : > { %725 = vadd.xlane.f32.xlu0 %v724_v61  ;;  %v577_v58 = vmul.f32 %v7931_v10, %v536_v19  ;;  %698 = vadd.xlane.f32.xlu1 %v697_v2 }
 0x10d   : > { %v8148_v15 = vsub.f32 %v7927_v60, %v577_v58  ;;  %v6350_v60 = vld [vmem:[#allocation7] sm:$0xff] }
 0x10e   : > { %1318 = vmatpush.bf16.msra.mxu0 %v6350_v60  ;;  %6357 = vmatpush.bf16.msra.mxu1 %v6350_v60 }
 0x10f   : > { %12192 = vst [vmem:[#allocation32_spill] sm:$0xff] %v8148_v15  ;;  %v641_v55 = vmul.f32 %v8148_v15, %v8148_v15  ;;  %6358 = vmatpush.bf16.msra.mxu2 %v6350_v60  ;;  %6359 = vmatpush.bf16.msra.mxu3 %v6350_v60 }
 0x111   : > { %v733_v21 = vsel %vm443_vm0, %v641_v55, 0.0 }
 0x112   : > { %734 = vadd.xlane.f32.xlu2 %v733_v21 }
 0x113   : > { %728 = vadd.xlane.f32.xlu0 %v727_v13  ;;  %731 = vadd.xlane.f32.xlu1 %v730_v30 }
 0x12e   : > { %v645_v6 = vpop.xlane.xlu0 %644 }
 0x12f   : > { %v739_v26 = vmul.f32 %v645_v6, %v7931_v10 }
 0x131   : > { %v771_v33 = vadd.f32 1e-05, %v739_v26 }
 0x133   : > { %6735 = vrsqrt.f32 %v771_v33  ;;  %vm809_vm3 = vweird.f32 %v771_v33 }
 0x136   : > { %v648_v44 = vpop.xlane.xlu1 %647  ;;  %v651_v35 = vpop.xlane.xlu0 %650 }
 0x137   : > { %v740_v18 = vmul.f32 %v648_v44, %v7931_v10  ;;  %v741_v40 = vmul.f32 %v651_v35, %v7931_v10 }
 0x139   : > { %v8158_v20 = vpop.eup %6735  ;;  %v772_v36 = vadd.f32 1e-05, %v740_v18  ;;  %v8160_v45 = vadd.f32 1e-05, %v741_v40 }
 0x13a   : > { %v804_v31 = vmul.f32 %v8158_v20, %v771_v33  ;;  %vm810_vm2 = vweird.f32 %v8158_v20 }
 0x13b   : > { %6737 = vrsqrt.f32 %v772_v36  ;;  %vm8206_vm4 = vmor %vm809_vm3, %vm810_vm2  ;;  %vm819_vm6 = vweird.f32 %v772_v36  ;;  %vm829_vm9 = vweird.f32 %v8160_v45 }
 0x13c   : > { %v805_v14 = vmul.f32 %v8158_v20, %v804_v31  ;;  %6739 = vrsqrt.f32 %v8160_v45 }
 0x13d   : > { %v663_v32 = vpop.xlane.xlu2 %662 }
 0x13e   : > { %v657_v54 = vpop.xlane.xlu0 %656  ;;  %v745_v53 = vmul.f32 %v663_v32, %v7931_v10  ;;  %v654_v7 = vpop.xlane.xlu1 %653  ;;  %v806_v2 = vmul.f32 0.5, %v805_v14 }
 0x13f   : > { %v743_v50 = vmul.f32 %v657_v54, %v7931_v10  ;;  %v742_v0 = vmul.f32 %v654_v7, %v7931_v10 }
 0x140   : > { %v8170_v38 = vadd.f32 1e-05, %v745_v53  ;;  %v807_v13 = vsub.f32 1.5, %v806_v2 }
 0x141   : > { %v8168_v61 = vpop.eup %6737  ;;  %v8173_v58 = vadd.f32 1e-05, %v742_v0  ;;  %v8175_v37 = vadd.f32 1e-05, %v743_v50 }
 0x142   : > { %v814_v19 = vmul.f32 %v8168_v61, %v772_v36  ;;  %v8177_v49 = vpop.eup %6739  ;;  %6741 = vrsqrt.f32 %v8170_v38  ;;  %v808_v40 = vmul.f32 %v8158_v20, %v807_v13  ;;  %vm820_vm5 = vweird.f32 %v8168_v61 }
 0x143   : > { %6743 = vrsqrt.f32 %v8173_v58  ;;  %v824_v21 = vmul.f32 %v8177_v49, %v8160_v45  ;;  %vm8218_vm7 = vmor %vm819_vm6, %vm820_vm5  ;;  %vm830_vm8 = vweird.f32 %v8177_v49  ;;  %vm839_vm10 = vweird.f32 %v8173_v58 }
 0x144   : > { %v815_v55 = vmul.f32 %v8168_v61, %v814_v19  ;;  %6745 = vrsqrt.f32 %v8175_v37  ;;  %v812_v19 = vsel %vm8206_vm4, %v8158_v20, %v808_v40  ;;  %vm8274_vm11 = vmor %vm829_vm9, %vm830_vm8  ;;  %vm869_vm14 = vweird.f32 %v8170_v38 }
 0x145   : > { %v684_v6 = vpop.xlane.xlu2 %683  ;;  %v825_v54 = vmul.f32 %v8177_v49, %v824_v21  ;;  %v1123_v40 = vmul.f32 %v812_v19, %v7936_v22  ;;  %vm849_vm5 = vweird.f32 %v8175_v37 }
 0x146   : > { %v816_v30 = vmul.f32 0.5, %v815_v55  ;;  %v666_v26 = vpop.xlane.xlu0 %665  ;;  %v752_v48 = vmul.f32 %v684_v6, %v7931_v10  ;;  %v660_v60 = vpop.xlane.xlu1 %659 }
 0x147   : > { %v744_v35 = vmul.f32 %v660_v60, %v7931_v10  ;;  %v746_v14 = vmul.f32 %v666_v26, %v7931_v10 }
 0x148   : > { %v817_v44 = vsub.f32 1.5, %v816_v30  ;;  %v8187_v18 = vpop.eup %6741  ;;  %v8191_v31 = vadd.f32 1e-05, %v752_v48  ;;  %v826_v30 = vmul.f32 0.5, %v825_v54 }
 0x149   : > { %v8194_v32 = vpop.eup %6743  ;;  %v864_v53 = vmul.f32 %v8187_v18, %v8170_v38  ;;  %v8202_v50 = vadd.f32 1e-05, %v744_v35  ;;  %v8216_v13 = vadd.f32 1e-05, %v746_v14  ;;  %v8232_v14 = vld [vmem:[#allocation5] ss:$0 sm:$0xff]  ;;  %vm870_vm13 = vweird.f32 %v8187_v18 }
 0x14a   : > { %v834_v7 = vmul.f32 %v8194_v32, %v8173_v58  ;;  %6747 = vrsqrt.f32 %v8191_v31  ;;  %v8204_v0 = vpop.eup %6745  ;;  %v818_v33 = vmul.f32 %v8168_v61, %v817_v44  ;;  %vm840_vm12 = vweird.f32 %v8194_v32  ;;  %vm8316_vm2 = vmor %vm869_vm14, %vm870_vm13 }
 0x14b   : > { %v865_v48 = vmul.f32 %v8187_v18, %v864_v53  ;;  %v844_v60 = vmul.f32 %v8204_v0, %v8175_v37  ;;  %6749 = vrsqrt.f32 %v8202_v50  ;;  %vm8299_vm15 = vmor %vm839_vm10, %vm840_vm12  ;;  %vm939_vm1 = vweird.f32 %v8191_v31 }
 0x14c   : > { %v835_v55 = vmul.f32 %v8194_v32, %v834_v7  ;;  %v822_v36 = vsel %vm8218_vm7, %v8168_v61, %v818_v33  ;;  %6751 = vrsqrt.f32 %v8216_v13  ;;  %vm850_vm4 = vweird.f32 %v8204_v0 }
 0x14d   : > { %v687_v21 = vpop.xlane.xlu2 %686  ;;  %v866_v61 = vmul.f32 0.5, %v865_v48  ;;  %v845_v33 = vmul.f32 %v8204_v0, %v844_v60  ;;  %v1124_v19 = vmul.f32 %v822_v36, %v7950_v4  ;;  %vm859_vm8 = vweird.f32 %v8202_v50 }
 0x14e   : > { %v669_v6 = vpop.xlane.xlu0 %668  ;;  %v753_v20 = vmul.f32 %v687_v21, %v7931_v10  ;;  %v681_v44 = vpop.xlane.xlu1 %680  ;;  %v836_v53 = vmul.f32 0.5, %v835_v55  ;;  %v827_v21 = vsub.f32 1.5, %v826_v30  ;;  %v1159_v55 = vmul.f32 %v8232_v14, %v1123_v40 }
 0x14f   : > { %v751_v35 = vmul.f32 %v681_v44, %v7931_v10  ;;  %v747_v2 = vmul.f32 %v669_v6, %v7931_v10  ;;  %v846_v40 = vmul.f32 0.5, %v845_v33  ;;  %vm879_vm13 = vweird.f32 %v8216_v13 }
 0x150   : > { %v8234_v54 = vpop.eup %6747  ;;  %v8237_v7 = vadd.f32 1e-05, %v753_v20  ;;  %v8251_v20 = vld [vmem:[%s12084_s2] ss:$0 sm:$0xff]  ;;  %v837_v6 = vsub.f32 1.5, %v836_v53  ;;  %v828_v48 = vmul.f32 %v8177_v49, %v827_v21  ;;  %v1160_v21 = vmul.f32 %v8232_v14, %v1124_v19 }
 0x151   : > { %v934_v26 = vmul.f32 %v8234_v54, %v8191_v31  ;;  %v8244_v22 = vadd.f32 1e-05, %v751_v35  ;;  %v8253_v30 = vpop.eup %6749  ;;  %v8255_v44 = vadd.f32 1e-05, %v747_v2  ;;  %v867_v35 = vsub.f32 1.5, %v866_v61 }
 0x152   : > { %6753 = vrsqrt.f32 %v8237_v7  ;;  %v8261_v36 = vpop.eup %6751  ;;  %v854_v2 = vmul.f32 %v8253_v30, %v8202_v50  ;;  %v1195_v15 = vadd.f32 %v8251_v20, %v1159_v55  ;;  %v838_v61 = vmul.f32 %v8194_v32, %v837_v6 }
 0x153   : > { %v935_v60 = vmul.f32 %v8234_v54, %v934_v26  ;;  %6755 = vrsqrt.f32 %v8244_v22  ;;  %v832_v19 = vsel %vm8274_vm11, %v8177_v49, %v828_v48  ;;  %v8289_v62 = vmul.f32 %v8187_v18, %v867_v35 }
 0x154   : > { %6757 = vrsqrt.f32 %v8255_v44  ;;  %v847_v6 = vsub.f32 1.5, %v846_v40  ;;  %v1196_v59 = vadd.f32 %v8251_v20, %v1160_v21  ;;  %v855_v48 = vmul.f32 %v8253_v30, %v854_v2 }
 0x155   : > { %v936_v55 = vmul.f32 0.5, %v935_v60  ;;  %v842_v35 = vsel %vm8299_vm15, %v8194_v32, %v838_v61  ;;  %vm940_vm3 = vweird.f32 %v8234_v54  ;;  %v1125_v32 = vmul.f32 %v832_v19, %v7939_v23  ;;  %vm8407_vm15 = vmor %vm849_vm5, %vm850_vm4 }
 0x156   : > { %v690_v4 = vpop.xlane.xlu0 %689  ;;  %v672_v53 = vpop.xlane.xlu1 %671  ;;  %v1227_v58 = vpack.c.bf16 %v1196_v59, %v1195_v15  ;;  %v8330_v15 = vmul.f32 %v8204_v0, %v847_v6  ;;  %v856_v23 = vmul.f32 0.5, %v855_v48  ;;  %vm860_vm6 = vweird.f32 %v8253_v30  ;;  %vm8363_vm10 = vmor %vm939_vm1, %vm940_vm3 }
 0x157   : > { %v748_v26 = vmul.f32 %v672_v53, %v7931_v10  ;;  %v754_v33 = vmul.f32 %v690_v4, %v7931_v10  ;;  %v874_v53 = vmul.f32 %v8261_v36, %v8216_v13  ;;  %v937_v2 = vsub.f32 1.5, %v936_v55  ;;  %vm8442_vm3 = vmor %vm859_vm8, %vm860_vm6 }
 0x158   : > { %v8270_v42 = vpop.eup %6753  ;;  %6178 = vmatmul.msk.bf16.vlgmr.msra.gmra.mxu0 %vm443_vm0, %v1227_v58  ;;  %vm880_vm9 = vweird.f32 %v8261_v36  ;;  %vm949_vm11 = vweird.f32 %v8237_v7  ;;  %vm929_vm12 = vweird.f32 %v8244_v22  ;;  %vm889_vm4 = vweird.f32 %v8255_v44 }
 0x159   : > { %v8292_v41 = vadd.f32 1e-05, %v748_v26  ;;  %v8294_v9 = vpop.eup %6755  ;;  %v944_v60 = vmul.f32 %v8270_v42, %v8237_v7  ;;  %v8306_v4 = vadd.f32 1e-05, %v754_v33  ;;  %v875_v21 = vmul.f32 %v8261_v36, %v874_v53  ;;  %vm8459_vm5 = vmor %vm879_vm13, %vm880_vm9 }
 0x15a   : > { %v924_v38 = vmul.f32 %v8294_v9, %v8244_v22  ;;  %v8323_v61 = vpop.eup %6757  ;;  %v1126_v53 = vmul.f32 %v842_v35, %v7956_v46  ;;  %v938_v58 = vmul.f32 %v8234_v54, %v937_v2  ;;  %vm930_vm7 = vweird.f32 %v8294_v9 }
 0x15b   : > { %6759 = vrsqrt.f32 %v8292_v41  ;;  %v945_v19 = vmul.f32 %v8270_v42, %v944_v60  ;;  %v876_v48 = vmul.f32 0.5, %v875_v21  ;;  %v884_v60 = vmul.f32 %v8323_v61, %v8255_v44  ;;  %vm8377_vm14 = vmor %vm929_vm12, %vm930_vm7 }
 0x15c   : > { %v925_v33 = vmul.f32 %v8294_v9, %v924_v38  ;;  %6761 = vrsqrt.f32 %v8306_v4  ;;  %v1162_v21 = vmul.f32 %v8232_v14, %v1126_v53  ;;  %vm950_vm1 = vweird.f32 %v8270_v42 }
 0x15d   : > { %v675_v26 = vpop.xlane.xlu2 %674  ;;  %v877_v53 = vsub.f32 1.5, %v876_v48  ;;  %vm890_vm6 = vweird.f32 %v8323_v61  ;;  %vm8478_vm7 = vmor %vm949_vm11, %vm950_vm1  ;;  %vm899_vm8 = vweird.f32 %v8292_v41  ;;  %vm959_vm9 = vweird.f32 %v8306_v4 }
 0x15e   : > { %v678_v45 = vpop.xlane.xlu0 %677  ;;  %v705_v55 = vpop.xlane.xlu1 %704  ;;  %v926_v6 = vmul.f32 0.5, %v925_v33  ;;  %v749_v49 = vmul.f32 %v675_v26, %v7931_v10  ;;  %v857_v26 = vsub.f32 1.5, %v856_v23  ;;  %v1161_v23 = vmul.f32 %v8232_v14, %v1125_v32  ;;  %vm8521_vm12 = vmor %vm889_vm4, %vm890_vm6 }
 0x15f   : > { %v759_v59 = vmul.f32 %v705_v55, %v7931_v10  ;;  %v750_v38 = vmul.f32 %v678_v45, %v7931_v10  ;;  %v946_v45 = vmul.f32 0.5, %v945_v19  ;;  %v1198_v57 = vadd.f32 %v8251_v20, %v1162_v21 }
 0x160   : > { %v927_v28 = vsub.f32 1.5, %v926_v6  ;;  %v8348_v46 = vadd.f32 1e-05, %v749_v49  ;;  %v885_v6 = vmul.f32 %v8323_v61, %v884_v60  ;;  %v942_v49 = vsel %vm8363_vm10, %v8234_v54, %v938_v58 }
 0x161   : > { %v8350_v35 = vadd.f32 1e-05, %v759_v59  ;;  %v8354_v2 = vadd.f32 1e-05, %v750_v38  ;;  %v8357_v33 = vpop.eup %6759  ;;  %v8395_v43 = vmul.f32 %v8253_v30, %v857_v26  ;;  %v947_v17 = vsub.f32 1.5, %v946_v45 }
 0x162   : > { %v928_v59 = vmul.f32 %v8294_v9, %v927_v28  ;;  %6763 = vrsqrt.f32 %v8348_v46  ;;  %v8372_v19 = vpop.eup %6761  ;;  %v894_v28 = vmul.f32 %v8357_v33, %v8292_v41  ;;  %v886_v45 = vmul.f32 0.5, %v885_v6 }
 0x163   : > { %12203 = vst [vmem:[#allocation33_spill] sm:$0xff] %v8354_v2  ;;  %6765 = vrsqrt.f32 %v8350_v35  ;;  %v954_v48 = vmul.f32 %v8372_v19, %v8306_v4  ;;  %v1136_v31 = vmul.f32 %v942_v49, %v7989_v27  ;;  %v1197_v37 = vadd.f32 %v8251_v20, %v1161_v23 }
 0x164   : > { %v932_v38 = vsel %vm8377_vm14, %v8294_v9, %v928_v59  ;;  %6767 = vrsqrt.f32 %v8354_v2  ;;  %v895_v54 = vmul.f32 %v8357_v33, %v894_v28  ;;  %v8431_v27 = vmul.f32 %v8270_v42, %v947_v17 }
 0x165   : > { %v708_v22 = vpop.xlane.xlu2 %707  ;;  %v1135_v55 = vmul.f32 %v932_v38, %v8000_v34  ;;  %v955_v21 = vmul.f32 %v8372_v19, %v954_v48  ;;  %v852_v34 = vsel %vm8407_vm15, %v8204_v0, %v8330_v15  ;;  %v1228_v23 = vpack.c.bf16 %v1198_v57, %v1197_v37 }
 0x166   : > { %v717_v32 = vpop.xlane.xlu0 %716  ;;  %v720_v60 = vpop.xlane.xlu1 %719  ;;  %v760_v24 = vmul.f32 %v708_v22, %v7931_v10  ;;  %v896_v15 = vmul.f32 0.5, %v895_v54  ;;  %v887_v48 = vsub.f32 1.5, %v886_v45  ;;  %vm900_vm10 = vweird.f32 %v8357_v33 }
 0x167   : > { %v764_v58 = vmul.f32 %v720_v60, %v7931_v10  ;;  %v763_v9 = vmul.f32 %v717_v32, %v7931_v10  ;;  %v956_v50 = vmul.f32 0.5, %v955_v21  ;;  %v1172_v60 = vmul.f32 %v8232_v14, %v1136_v31  ;;  %vm8544_vm14 = vmor %vm899_vm8, %vm900_vm10 }
 0x168   : > { %v8412_v59 = vadd.f32 1e-05, %v760_v24  ;;  %v8415_v28 = vpop.eup %6763  ;;  %v8428_v24 = vmul.f32 %v8261_v36, %v877_v53  ;;  %v1171_v53 = vmul.f32 %v8232_v14, %v1135_v55  ;;  %6179 = vmatmul.msk.bf16.gmra.mxu0 %vm443_vm0, %v1228_v23  ;;  %v897_v31 = vsub.f32 1.5, %v896_v15 }
 0x169   : > { %v8423_v22 = vadd.f32 1e-05, %v764_v58  ;;  %v8425_v6 = vpop.eup %6765  ;;  %v8434_v32 = vadd.f32 1e-05, %v763_v9  ;;  %v904_v57 = vmul.f32 %v8415_v28, %v8348_v46  ;;  %v8494_v13 = vmul.f32 %v8323_v61, %v887_v48 }
 0x16a   : > { %6769 = vrsqrt.f32 %v8412_v59  ;;  %v8436_v49 = vpop.eup %6767  ;;  %v1004_v17 = vmul.f32 %v8425_v6, %v8350_v35  ;;  %v1207_v7 = vadd.f32 %v8251_v20, %v1171_v53  ;;  %v957_v38 = vsub.f32 1.5, %v956_v50 }
 0x16b   : > { %v914_v9 = vmul.f32 %v8436_v49, %v8354_v2  ;;  %6771 = vrsqrt.f32 %v8423_v22  ;;  %v905_v16 = vmul.f32 %v8415_v28, %v904_v57  ;;  %vm960_vm11 = vweird.f32 %v8372_v19 }
 0x16c   : > { %v1005_v45 = vmul.f32 %v8425_v6, %v1004_v17  ;;  %6773 = vrsqrt.f32 %v8434_v32  ;;  %v1208_v17 = vadd.f32 %v8251_v20, %v1172_v60  ;;  %v8509_v60 = vmul.f32 %v8357_v33, %v897_v31  ;;  %vm8559_vm1 = vmor %vm959_vm9, %vm960_vm11 }
 0x16d   : > { %v714_v58 = vpop.xlane.xlu2 %713  ;;  %v915_v21 = vmul.f32 %v8436_v49, %v914_v9  ;;  %vm1009_vm13 = vweird.f32 %v8350_v35  ;;  %vm1010_vm15 = vweird.f32 %v8425_v6  ;;  %vm1019_vm4 = vweird.f32 %v8412_v59 }
 0x16e   : > { %v711_v55 = vpop.xlane.xlu1 %710  ;;  %v539_v37 = vpop.xlane.xlu0 %538  ;;  %v762_v25 = vmul.f32 %v714_v58, %v7931_v10  ;;  %v1006_v56 = vmul.f32 0.5, %v1005_v45  ;;  %v1233_v51 = vpack.c.bf16 %v1208_v17, %v1207_v7  ;;  %12216 = vst [vmem:[#allocation34_spill] sm:$0xff] %v8509_v60  ;;  %v1127_v7 = vmul.f32 %v852_v34, %v7959_v47  ;;  %vm8613_vm9 = vmor %vm1009_vm13, %vm1010_vm15 }
 0x16f   : > { %v761_v53 = vmul.f32 %v711_v55, %v7931_v10  ;;  %v8526_v55 = vmul.f32 %v8372_v19, %v957_v38  ;;  %v578_v31 = vmul.f32 %v7931_v10, %v539_v37  ;;  %v916_v38 = vmul.f32 0.5, %v915_v21 }
 0x170   : > { %v8491_v23 = vpop.eup %6769  ;;  %v8504_v48 = vadd.f32 1e-05, %v762_v25  ;;  %6184 = vmatmul.msk.bf16.vlgmr.msra.gmra.mxu1 %vm443_vm0, %v1233_v51  ;;  %v1007_v51 = vsub.f32 1.5, %v1006_v56  ;;  %v12223_v4 = vsel %vm8442_vm3, %v8253_v30, %v8395_v43  ;;  %vm1059_vm3 = vweird.f32 %v8423_v22 }
 0x171   : > { %v1014_v15 = vmul.f32 %v8491_v23, %v8412_v59  ;;  %v8506_v50 = vpop.eup %6771  ;;  %v8513_v57 = vadd.f32 1e-05, %v761_v53  ;;  %v962_v37 = vsel %vm8559_vm1, %v8372_v19, %v8526_v55  ;;  %v917_v44 = vsub.f32 1.5, %v916_v38 }
 0x172   : > { %v8515_v9 = vpop.eup %6773  ;;  %v1054_v45 = vmul.f32 %v8506_v50, %v8423_v22  ;;  %6775 = vrsqrt.f32 %v8504_v48  ;;  %v8583_v41 = vmul.f32 %v8425_v6, %v1007_v51  ;;  %vm1020_vm6 = vweird.f32 %v8491_v23 }
 0x173   : > { %v1015_v58 = vmul.f32 %v8491_v23, %v1014_v15  ;;  %v906_v15 = vmul.f32 0.5, %v905_v16  ;;  %v1044_v53 = vmul.f32 %v8515_v9, %v8434_v32  ;;  %6777 = vrsqrt.f32 %v8513_v57 }
 0x174   : > { %v1055_v16 = vmul.f32 %v8506_v50, %v1054_v45  ;;  %v8571_v45 = vsub.f32 %v8086_v5, %v578_v31  ;;  %vm1049_vm8 = vweird.f32 %v8434_v32  ;;  %vm1060_vm10 = vweird.f32 %v8506_v50 }
 0x175   : > { %v723_v17 = vpop.xlane.xlu2 %722  ;;  %v1016_v56 = vmul.f32 0.5, %v1015_v58  ;;  %v1045_v21 = vmul.f32 %v8515_v9, %v1044_v53  ;;  %v1128_v58 = vmul.f32 %v12223_v4, %v7981_v12  ;;  %v1163_v53 = vmul.f32 %v8232_v14, %v1127_v7  ;;  %vm8682_vm15 = vmor %vm1059_vm3, %vm1060_vm10 }
 0x176   : > { %v696_v2 = vpop.xlane.xlu1 %695  ;;  %v907_v34 = vsub.f32 1.5, %v906_v15  ;;  %v765_v60 = vmul.f32 %v723_v17, %v7931_v10  ;;  %v693_v55 = vpop.xlane.xlu0 %692  ;;  %v1056_v5 = vmul.f32 0.5, %v1055_v16  ;;  %v642_v0 = vmul.f32 %v8571_v45, %v8571_v45 }
 0x177   : > { %v756_v19 = vmul.f32 %v696_v2, %v7931_v10  ;;  %v1164_v31 = vmul.f32 %v8232_v14, %v1128_v58  ;;  %v1017_v43 = vsub.f32 1.5, %v1016_v56  ;;  %v1046_v12 = vmul.f32 0.5, %v1045_v21 }
 0x178   : > { %v8588_v30 = vadd.f32 1e-05, %v765_v60  ;;  %v8592_v15 = vpop.eup %6775  ;;  %v1199_v2 = vadd.f32 %v8251_v20, %v1163_v53  ;;  %v736_v38 = vsel %vm443_vm0, %v642_v0, 0.0  ;;  %v755_v51 = vmul.f32 %v693_v55, %v7931_v10 }
 0x179   : > { %v8590_v7 = vadd.f32 1e-05, %v756_v19  ;;  %v1200_v17 = vadd.f32 %v8251_v20, %v1164_v31  ;;  %v8599_v16 = vpop.eup %6777  ;;  %v8602_v56 = vmul.f32 %v8415_v28, %v907_v34  ;;  %v1034_v60 = vmul.f32 %v8592_v15, %v8504_v48  ;;  %737 = vadd.xlane.f32.xlu0 %v736_v38 }
 0x17a   : > { %6779 = vrsqrt.f32 %v8588_v30  ;;  %v8618_v34 = vmul.f32 %v8436_v49, %v917_v44  ;;  %v1057_v4 = vsub.f32 1.5, %v1056_v5  ;;  %v1024_v58 = vmul.f32 %v8599_v16, %v8513_v57 }
 0x17b   : > { %v1229_v53 = vpack.c.bf16 %v1200_v17, %v1199_v2  ;;  %v1012_v31 = vsel %vm8613_vm9, %v8425_v6, %v8583_v41  ;;  %v1047_v35 = vsub.f32 1.5, %v1046_v12  ;;  %6781 = vrsqrt.f32 %v8590_v7 }
 0x17c   : > { %v8629_v44 = vmul.f32 %v8491_v23, %v1017_v43  ;;  %v1035_v5 = vmul.f32 %v8592_v15, %v1034_v60  ;;  %v8633_v0 = vadd.f32 1e-05, %v755_v51  ;;  %v12226_v6 = vsel %vm8478_vm7, %v8270_v42, %v8431_v27  ;;  %vm8657_vm7 = vmor %vm1019_vm4, %vm1020_vm6 }
 0x17d   : > { %v702_v19 = vpop.xlane.xlu2 %701  ;;  %6180 = vmatmul.msk.bf16.gmra.mxu0 %vm443_vm0, %v1229_v53  ;;  %v1137_v41 = vmul.f32 %v12226_v6, %v7996_v29  ;;  %vm1050_vm11 = vweird.f32 %v8515_v9  ;;  %v1138_v12 = vmul.f32 %v962_v37, %v8027_v3  ;;  %v8646_v17 = vmul.f32 %v8506_v50, %v1057_v4 }
 0x17e   : > { %v699_v55 = vpop.xlane.xlu1 %698  ;;  %v758_v43 = vmul.f32 %v702_v19, %v7931_v10  ;;  %v1025_v38 = vmul.f32 %v8599_v16, %v1024_v58  ;;  %6783 = vrsqrt.f32 %v8633_v0  ;;  %v8662_v3 = vmul.f32 %v8515_v9, %v1047_v35  ;;  %v726_v19 = vpop.xlane.xlu0 %725  ;;  %vm8698_vm4 = vmor %vm1049_vm8, %vm1050_vm11 }
 0x17f   : > { %v757_v2 = vmul.f32 %v699_v55, %v7931_v10  ;;  %v1173_v26 = vmul.f32 %v8232_v14, %v1137_v41  ;;  %v1174_v42 = vmul.f32 %v8232_v14, %v1138_v12  ;;  %v1022_v60 = vsel %vm8657_vm7, %v8491_v23, %v8629_v44 }
 0x180   : > { %v8651_v51 = vpop.eup %6779  ;;  %v8665_v27 = vadd.f32 1e-05, %v758_v43  ;;  %v1036_v21 = vmul.f32 0.5, %v1035_v5  ;;  %vm1039_vm13 = vweird.f32 %v8504_v48  ;;  %vm1040_vm1 = vweird.f32 %v8592_v15 }
 0x181   : > { %v8667_v37 = vadd.f32 1e-05, %v757_v2  ;;  %v1064_v59 = vmul.f32 %v8651_v51, %v8588_v30  ;;  %v8676_v4 = vpop.eup %6781  ;;  %v1209_v23 = vadd.f32 %v8251_v20, %v1173_v26  ;;  %v1210_v53 = vadd.f32 %v8251_v20, %v1174_v42 }
 0x182   : > { %6785 = vrsqrt.f32 %v8665_v27  ;;  %v1062_v55 = vsel %vm8682_vm15, %v8506_v50, %v8646_v17  ;;  %v1026_v35 = vmul.f32 0.5, %v1025_v38  ;;  %vm1029_vm3 = vweird.f32 %v8513_v57  ;;  %v12243_v17 = vld [vmem:[#allocation33_spill] sm:$0xff] }
 0x183   : > { %v1065_v44 = vmul.f32 %v8651_v51, %v1064_v59  ;;  %v974_v5 = vmul.f32 %v8676_v4, %v8590_v7  ;;  %v1052_v6 = vsel %vm8698_vm4, %v8515_v9, %v8662_v3  ;;  %vm1030_vm6 = vweird.f32 %v8599_v16 }
 0x184   : > { %v1234_v32 = vpack.c.bf16 %v1210_v53, %v1209_v23  ;;  %6787 = vrsqrt.f32 %v8667_v37  ;;  %v8712_v41 = vpop.eup %6783  ;;  %v1037_v12 = vsub.f32 1.5, %v1036_v21  ;;  %vm1069_vm8 = vweird.f32 %v8588_v30 }
 0x185   : > { %v975_v43 = vmul.f32 %v8676_v4, %v974_v5  ;;  %v766_v2 = vmul.f32 %v726_v19, %v7931_v10  ;;  %v1066_v38 = vmul.f32 0.5, %v1065_v44  ;;  %v964_v26 = vmul.f32 %v8712_v41, %v8633_v0 }
 0x186   : > { %6185 = vmatmul.msk.bf16.gmra.mxu1 %vm443_vm0, %v1234_v32  ;;  %v12233_v9 = vsel %vm8316_vm2, %v8187_v18, %v8289_v62  ;;  %v12234_v3 = vsel %vm8459_vm5, %v8261_v36, %v8428_v24  ;;  %v1027_v21 = vsub.f32 1.5, %v1026_v35  ;;  %vm979_vm9 = vweird.f32 %v8590_v7  ;;  %vm8754_vm5 = vmor %vm1039_vm13, %vm1040_vm1 }
 0x187   : > { %v1129_v29 = vmul.f32 %v12233_v9, %v7967_v8  ;;  %v1130_v42 = vmul.f32 %v12234_v3, %v7975_v63  ;;  %v976_v59 = vmul.f32 0.5, %v975_v43  ;;  %v8733_v23 = vadd.f32 1e-05, %v766_v2  ;;  %vm8782_vm1 = vmor %vm1029_vm3, %vm1030_vm6 }
 0x188   : > { %v8735_v53 = vpop.eup %6785  ;;  %v965_v40 = vmul.f32 %v8712_v41, %v964_v26  ;;  %v1143_v18 = vmul.f32 %v1012_v31, %v8035_v11  ;;  %v8742_v54 = vmul.f32 %v8592_v15, %v1037_v12  ;;  %vm969_vm2 = vweird.f32 %v8633_v0 }
 0x189   : > { %v1165_v62 = vmul.f32 %v8232_v14, %v1129_v29  ;;  %v1166_v8 = vmul.f32 %v8232_v14, %v1130_v42  ;;  %v994_v63 = vmul.f32 %v8735_v53, %v8665_v27  ;;  %v1144_v36 = vmul.f32 %v1022_v60, %v8068_v52 }
 0x18a   : > { %v8748_v24 = vpop.eup %6787  ;;  %v1067_v11 = vsub.f32 1.5, %v1066_v38  ;;  %vm1070_vm10 = vweird.f32 %v8651_v51  ;;  %v966_v31 = vmul.f32 0.5, %v965_v40  ;;  %6789 = vrsqrt.f32 %v8733_v23  ;;  %v732_v38 = vpop.xlane.xlu1 %731 }
 0x18b   : > { %v8761_v22 = vmul.f32 %v8599_v16, %v1027_v21  ;;  %v977_v52 = vsub.f32 1.5, %v976_v59  ;;  %v995_v60 = vmul.f32 %v8735_v53, %v994_v63  ;;  %v984_v35 = vmul.f32 %v8748_v24, %v8667_v37  ;;  %vm8796_vm13 = vmor %vm1069_vm8, %vm1070_vm10 }
 0x18c   : > { %v967_v48 = vsub.f32 1.5, %v966_v31  ;;  %v1201_v44 = vadd.f32 %v8251_v20, %v1165_v62  ;;  %v1202_v5 = vadd.f32 %v8251_v20, %v1166_v8  ;;  %v1179_v32 = vmul.f32 %v8232_v14, %v1143_v18  ;;  %v729_v18 = vpop.xlane.xlu0 %728 }
 0x18d   : > { %v1042_v12 = vsel %vm8754_vm5, %v8592_v15, %v8742_v54  ;;  %vm980_vm11 = vweird.f32 %v8676_v4  ;;  %v985_v43 = vmul.f32 %v8748_v24, %v984_v35  ;;  %v1180_v2 = vmul.f32 %v8232_v14, %v1144_v36 }
 0x18e   : > { %v8787_v9 = vmul.f32 %v8651_v51, %v1067_v11  ;;  %vm970_vm4 = vweird.f32 %v8712_v41  ;;  %v1230_v29 = vpack.c.bf16 %v1202_v5, %v1201_v44  ;;  %v1147_v3 = vmul.f32 %v1052_v6, %v8053_v39  ;;  %vm8814_vm3 = vmor %vm979_vm9, %vm980_vm11 }
 0x18f   : > { %vm920_vm7 = vweird.f32 %v8436_v49  ;;  %v978_v42 = vmul.f32 %v8676_v4, %v977_v52  ;;  %v996_v21 = vmul.f32 0.5, %v995_v60  ;;  %v1216_v59 = vadd.f32 %v8251_v20, %v1180_v2  ;;  %vm8833_vm8 = vmor %vm969_vm2, %vm970_vm4  ;;  %v12248_v2 = vld [vmem:[#allocation19_spill] sm:$0xff] }
 0x190   : > { %v1148_v39 = vmul.f32 %v1062_v55, %v8056_v1  ;;  %v8808_v6 = vpop.eup %6789  ;;  %v968_v40 = vmul.f32 %v8712_v41, %v967_v48  ;;  %vm999_vm6 = vweird.f32 %v8665_v27  ;;  %6181 = vmatmul.msk.bf16.gmra.mxu0 %vm443_vm0, %v1230_v29  ;;  %v1215_v58 = vadd.f32 %v8251_v20, %v1179_v32  ;;  %v12246_v32 = vld [vmem:[#allocation18_spill] sm:$0xff]  ;;  %v12263_v55 = vld [vmem:[#allocation25_spill] sm:$0xff] }
 0x191   : > { %v1183_v1 = vmul.f32 %v8232_v14, %v1147_v3  ;;  %v768_v50 = vmul.f32 %v732_v38, %v7931_v10  ;;  %vm919_vm15 = vweird.f32 %v12243_v17  ;;  %v1032_v7 = vsel %vm8782_vm1, %v8599_v16, %v8761_v22  ;;  %v12249_v38 = vld [vmem:[#allocation34_spill] sm:$0xff]  ;;  %v12251_v3 = vld [vmem:[#allocation24_spill] sm:$0xff] }
 0x192   : > { %vm1000_vm9 = vweird.f32 %v8735_v53  ;;  %v986_v62 = vmul.f32 0.5, %v985_v43  ;;  %vm989_vm10 = vweird.f32 %v8667_v37  ;;  %v1074_v8 = vmul.f32 %v8808_v6, %v8733_v23 }
 0x193   : > { %vm1079_vm11 = vweird.f32 %v8733_v23  ;;  %v1237_v16 = vpack.c.bf16 %v1216_v59, %v1215_v58  ;;  %v1184_v63 = vmul.f32 %v8232_v14, %v1148_v39  ;;  %v1219_v0 = vadd.f32 %v8251_v20, %v1183_v1  ;;  %v12253_v59 = vld [vmem:[#allocation23_spill] sm:$0xff]  ;;  %vm8923_vm5 = vmor %vm999_vm6, %vm1000_vm9 }
 0x194   : > { %v1072_v36 = vsel %vm8796_vm13, %v8651_v51, %v8787_v9  ;;  %v982_v11 = vsel %vm8814_vm3, %v8676_v4, %v978_v42  ;;  %v1075_v31 = vmul.f32 %v8808_v6, %v1074_v8  ;;  %v8852_v22 = vadd.f32 1e-05, %v768_v50  ;;  %v12252_v42 = vld [vmem:[#allocation26_spill] sm:$0xff]  ;;  %vm8911_vm3 = vmor %vm919_vm15, %vm920_vm7 }
 0x195   : > { %v972_v52 = vsel %vm8833_vm8, %v8712_v41, %v968_v40  ;;  %v997_v60 = vsub.f32 1.5, %v996_v21  ;;  %6188 = vmatmul.msk.bf16.vlgmr.msra.gmra.mxu2 %vm443_vm0, %v1237_v16  ;;  %v1220_v35 = vadd.f32 %v8251_v20, %v1184_v63  ;;  %v767_v48 = vmul.f32 %v729_v18, %v7931_v10  ;;  %v12260_v40 = vld [vmem:[#allocation22_spill] sm:$0xff] }
 0x196   : > { %v987_v51 = vsub.f32 1.5, %v986_v62  ;;  %v1076_v44 = vmul.f32 0.5, %v1075_v31  ;;  %vm1080_vm2 = vweird.f32 %v8808_v6  ;;  %6791 = vrsqrt.f32 %v8852_v22 }
 0x197   : > { %v1239_v4 = vpack.c.bf16 %v1220_v35, %v1219_v0  ;;  %v8862_v5 = vadd.f32 1e-05, %v767_v48  ;;  %v12247_v41 = vsel %vm8521_vm12, %v8323_v61, %v8494_v13  ;;  %v12250_v26 = vsel %vm8544_vm14, %v8357_v33, %v12249_v38  ;;  %vm8882_vm12 = vmor %vm1079_vm11, %vm1080_vm2 }
 0x198   : > { %v1131_v43 = vmul.f32 %v12247_v41, %v12246_v32  ;;  %v1132_v9 = vmul.f32 %v12250_v26, %v12248_v2  ;;  %v1077_v29 = vsub.f32 1.5, %v1076_v44  ;;  %v1139_v57 = vmul.f32 %v972_v52, %v12251_v3  ;;  %v12269_v32 = vld [vmem:[#allocation21_spill] sm:$0xff] }
 0x199   : > { %v1140_v21 = vmul.f32 %v982_v11, %v12252_v42  ;;  %v1145_v39 = vmul.f32 %v1032_v7, %v12253_v59  ;;  %vm990_vm13 = vweird.f32 %v8748_v24  ;;  %6190 = vmatmul.msk.bf16.vlgmr.msra.gmra.mxu3 %vm443_vm0, %v1239_v4  ;;  %6793 = vrsqrt.f32 %v8862_v5 }
 0x19a   : > { %v1167_v33 = vmul.f32 %v8232_v14, %v1131_v43  ;;  %v1168_v13 = vmul.f32 %v8232_v14, %v1132_v9  ;;  %vm12256_vm14 = vweird.f32 %v8415_v28  ;;  %vm12257_vm1 = vweird.f32 %v8348_v46  ;;  %vm8941_vm7 = vmor %vm989_vm10, %vm990_vm13  ;;  %v12271_v9 = vld [vmem:[#allocation28_spill] sm:$0xff] }
 0x19b   : > { %vm8894_vm4 = vmor %vm12257_vm1, %vm12256_vm14  ;;  %v1078_v47 = vmul.f32 %v8808_v6, %v1077_v29  ;;  %v1175_v23 = vmul.f32 %v8232_v14, %v1139_v57  ;;  %v1176_v30 = vmul.f32 %v8232_v14, %v1140_v21  ;;  %v1146_v58 = vmul.f32 %v1042_v12, %v12260_v40  ;;  %v12272_v57 = vld [vmem:[#allocation29_spill] sm:$0xff] }
 0x19c   : > { %v998_v1 = vmul.f32 %v8735_v53, %v997_v60  ;;  %v1204_v50 = vadd.f32 %v8251_v20, %v1168_v13  ;;  %v1181_v7 = vmul.f32 %v8232_v14, %v1145_v39  ;;  %v1149_v19 = vmul.f32 %v1072_v36, %v12263_v55  ;;  %v6792_v62 = vpop.eup %6791 }
 0x19d   : > { %v988_v54 = vmul.f32 %v8748_v24, %v987_v51  ;;  %v1082_v12 = vsel %vm8882_vm12, %v8808_v6, %v1078_v47  ;;  %v1203_v17 = vadd.f32 %v8251_v20, %v1167_v33  ;;  %v1211_v8 = vadd.f32 %v8251_v20, %v1175_v23 }
 0x19e   : > { %v912_v18 = vsel %vm8894_vm4, %v8415_v28, %v8602_v56  ;;  %v1094_v16 = vmul.f32 %v6792_v62, %v8852_v22  ;;  %v1212_v6 = vadd.f32 %v8251_v20, %v1176_v30  ;;  %v922_v63 = vsel %vm8911_vm3, %v8436_v49, %v8618_v34  ;;  %v12268_v56 = vld [vmem:[#allocation27_spill] sm:$0xff] }
 0x19f   : > { %v1231_v0 = vpack.c.bf16 %v1204_v50, %v1203_v17  ;;  %v1182_v28 = vmul.f32 %v8232_v14, %v1146_v58  ;;  %v1150_v36 = vmul.f32 %v1082_v12, %v12268_v56  ;;  %v6794_v11 = vpop.eup %6793  ;;  %v1217_v52 = vadd.f32 %v8251_v20, %v1181_v7  ;;  %v12276_v7 = vld [vmem:[#allocation31_spill] sm:$0xff] }
 0x1a0   : > { %v1095_v37 = vmul.f32 %v6792_v62, %v1094_v16  ;;  %v1235_v31 = vpack.c.bf16 %v1212_v6, %v1211_v8  ;;  %v1185_v60 = vmul.f32 %v8232_v14, %v1149_v19  ;;  %v1002_v35 = vsel %vm8923_vm5, %v8735_v53, %v998_v1  ;;  %v12275_v1 = vld [vmem:[#allocation30_spill] sm:$0xff]  ;;  %v9006_v6 = vld [vmem:[%s12086_s4] ss:$0 sm:$0xff] }
 0x1a1   : > { %v992_v49 = vsel %vm8941_vm7, %v8748_v24, %v988_v54  ;;  %v1084_v34 = vmul.f32 %v6794_v11, %v8862_v5  ;;  %v1218_v48 = vadd.f32 %v8251_v20, %v1182_v28  ;;  %vm1099_vm6 = vweird.f32 %v8852_v22  ;;  %6182 = vmatmul.msk.bf16.gmra.mxu0 %vm443_vm0, %v1231_v0  ;;  %v12270_v24 = vld [vmem:[#allocation20_spill] sm:$0xff] }
 0x1a2   : > { %v1096_v51 = vmul.f32 0.5, %v1095_v37  ;;  %vm1100_vm15 = vweird.f32 %v6792_v62  ;;  %6186 = vmatmul.msk.bf16.gmra.mxu1 %vm443_vm0, %v1235_v31  ;;  %v1186_v44 = vmul.f32 %v8232_v14, %v1150_v36  ;;  %v1221_v53 = vadd.f32 %v8251_v20, %v1185_v60 }
 0x1a3   : > { %v1085_v4 = vmul.f32 %v6794_v11, %v1084_v34  ;;  %v1133_v41 = vmul.f32 %v912_v18, %v12269_v32  ;;  %v1134_v43 = vmul.f32 %v922_v63, %v12270_v24  ;;  %v1238_v38 = vpack.c.bf16 %v1218_v48, %v1217_v52  ;;  %vm8977_vm10 = vmor %vm1099_vm6, %vm1100_vm15  ;;  %v735_v18 = vpop.xlane.xlu2 %734 }
 0x1a4   : > { %v1097_v2 = vsub.f32 1.5, %v1096_v51  ;;  %v1222_v26 = vadd.f32 %v8251_v20, %v1186_v44  ;;  %v1141_v29 = vmul.f32 %v992_v49, %v12271_v9  ;;  %vm1089_vm8 = vweird.f32 %v8862_v5 }
 0x1a5   : > { %v1086_v3 = vmul.f32 0.5, %v1085_v4  ;;  %vm1090_vm9 = vweird.f32 %v6794_v11  ;;  %v1142_v42 = vmul.f32 %v1002_v35, %v12272_v57  ;;  %6189 = vmatmul.msk.bf16.gmra.mxu2 %vm443_vm0, %v1238_v38  ;;  %v1169_v33 = vmul.f32 %v8232_v14, %v1133_v41 }
 0x1a6   : > { %v1098_v21 = vmul.f32 %v6792_v62, %v1097_v2  ;;  %v1240_v39 = vpack.c.bf16 %v1222_v26, %v1221_v53  ;;  %v1170_v13 = vmul.f32 %v8232_v14, %v1134_v43  ;;  %vm1091_vm11 = vmor %vm1089_vm8, %vm1090_vm9  ;;  %v1177_v5 = vmul.f32 %v8232_v14, %v1141_v29 }
 0x1a7   : > { %v1087_v61 = vsub.f32 1.5, %v1086_v3  ;;  %v1178_v25 = vmul.f32 %v8232_v14, %v1142_v42  ;;  %v1205_v30 = vadd.f32 %v8251_v20, %v1169_v33  ;;  %v769_v16 = vmul.f32 %v735_v18, %v7931_v10 }
 0x1a8   : > { %v1102_v22 = vsel %vm8977_vm10, %v6792_v62, %v1098_v21  ;;  %v1206_v40 = vadd.f32 %v8251_v20, %v1170_v13  ;;  %v1213_v58 = vadd.f32 %v8251_v20, %v1177_v5  ;;  %v12279_v21 = vld [vmem:[#allocation32_spill] sm:$0xff]  ;;  %v7311_v13 = vld [vmem:[#allocation5] ss:$0 sm:$0xff]  ;;  %vm1468_vm3 = vcmask 64512  }
 0x1a9   : > { %v1088_v47 = vmul.f32 %v6794_v11, %v1087_v61  ;;  %6191 = vmatmul.msk.bf16.gmra.mxu3 %vm443_vm0, %v1240_v39  ;;  %v1214_v46 = vadd.f32 %v8251_v20, %v1178_v25  ;;  %v1152_v55 = vmul.f32 %v1102_v22, %v12276_v7  ;;  %v7312_v22 = vld [vmem:[%s12084_s2] ss:$0 sm:$0xff]  ;;  %vm1765_vm5 = vcmask 523264  }
 0x1aa   : > { %v1232_v19 = vpack.c.bf16 %v1206_v40, %v1205_v30  ;;  %vm5741_vm7 = vcmask 130048   ;;  %vm5774_vm6 = vcmask 195584  }
 0x1ab   : > { %v1092_v23 = vsel %vm1091_vm11, %v6794_v11, %v1088_v47  ;;  %v1236_v15 = vpack.c.bf16 %v1214_v46, %v1213_v58  ;;  %v1188_v54 = vmul.f32 %v8232_v14, %v1152_v55 }
 0x1ac   : > { %v1151_v50 = vmul.f32 %v1092_v23, %v12275_v1 }
 0x1ad   : > { %v1224_v17 = vadd.f32 %v8251_v20, %v1188_v54 }
 0x1ae   : > { %v1187_v62 = vmul.f32 %v8232_v14, %v1151_v50  ;;  %v801_v14 = vadd.f32 1e-05, %v769_v16 }
 0x1b0   : > { %v1223_v12 = vadd.f32 %v8251_v20, %v1187_v62  ;;  %6795 = vrsqrt.f32 %v801_v14  ;;  %vm1109_vm2 = vweird.f32 %v801_v14 }
 0x1b1   : > { %6183 = vmatmul.msk.bf16.gmra.mxu0 %vm443_vm0, %v1232_v19 }
 0x1b2   : > { %6187 = vmatmul.msk.bf16.gmra.mxu1 %vm443_vm0, %v1236_v15  ;;  %v1241_v8 = vpack.c.bf16 %v1224_v17, %v1223_v12 }
 0x1b6   : > { %v6796_v37 = vpop.eup %6795 }
 0x1b7   : > { %v1104_v52 = vmul.f32 %v6796_v37, %v801_v14  ;;  %vm1110_vm13 = vweird.f32 %v6796_v37 }
 0x1b8   : > { %vm1111_vm12 = vmor %vm1109_vm2, %vm1110_vm13 }
 0x1b9   : > { %6192 = vmatmul.msk.bf16.gmra.mxu3 %vm443_vm0, %v1241_v8  ;;  %v1105_v60 = vmul.f32 %v6796_v37, %v1104_v52 }
 0x1bb   : > { %v1106_v51 = vmul.f32 0.5, %v1105_v60 }
 0x1bd   : > { %v1107_v4 = vsub.f32 1.5, %v1106_v51 }
 0x1bf   : > { %v1108_v43 = vmul.f32 %v6796_v37, %v1107_v4 }
 0x1c1   : > { %v1112_v29 = vsel %vm1111_vm12, %v6796_v37, %v1108_v43 }
 0x1c2   : > { %v1153_v59 = vmul.f32 %v1112_v29, %v12279_v21 }
 0x1c4   : > { %v1189_v5 = vmul.f32 %v7311_v13, %v1153_v59 }
 0x1c6   : > { %v1225_v47 = vadd.f32 %v7312_v22, %v1189_v5 }
 0x1d5   : > { %v1320_v27 = vpop.f32.mrf.mxu0 }
 0x1d6   : > { %v1321_v63 = vadd.f32 %v9006_v6, %v1320_v27 }
 0x1d8   : > { %v1400_v28 = vpack.c.bf16 %v1321_v63, %v1321_v63 }
 0x1da   : > { %v1448_v36 = vunpack.c.l.b16 %v1400_v28 }
 0x1dd   : > { %v1322_v0 = vpop.f32.mrf.mxu0 }
 0x1de   : > { %v1323_v20 = vadd.f32 %v9006_v6, %v1322_v0 }
 0x1e0   : > { %v1401_v56 = vpack.c.bf16 %v1323_v20, %v1323_v20 }
 0x1e2   : > { %v1449_v11 = vunpack.c.l.b16 %v1401_v56 }
 0x1e4   : > { %v9010_v31 = vpack.c.b16 %v1449_v11, %v1448_v36 }
 0x1e5   : > { %v1325_v8 = vpop.f32.mrf.mxu0 }
 0x1e6   : > { %12277 = vst [vmem:[#allocation33_spill] sm:$0xff] %v9010_v31  ;;  %1460 = vrot.lane.b32.xlu0 %v9010_v31, %s7568_s20 }
 0x1ec   : > { %v738_v35 = vpop.xlane.xlu0 %737 }
 0x1ed   : > { %v770_v49 = vmul.f32 %v738_v35, %v7931_v10  ;;  %v1350_v34 = vpop.f32.mrf.mxu1  ;;  %v1327_v11 = vpop.f32.mrf.mxu0  ;;  %v1326_v35 = vadd.f32 %v9006_v6, %v1325_v8 }
 0x1ee   : > { %v1351_v44 = vadd.f32 %v9006_v6, %v1350_v34  ;;  %v1328_v52 = vadd.f32 %v9006_v6, %v1327_v11 }
 0x1ef   : > { %v802_v48 = vadd.f32 1e-05, %v770_v49  ;;  %v1402_v4 = vpack.c.bf16 %v1326_v35, %v1326_v35 }
 0x1f0   : > { %v1412_v32 = vpack.c.bf16 %v1351_v44, %v1351_v44 }
 0x1f1   : > { %6797 = vrsqrt.f32 %v802_v48  ;;  %vm1119_vm14 = vweird.f32 %v802_v48 }
 0x1f2   : > { %v1534_v10 = vunpack.c.l.b16 %v1412_v32 }
 0x1f5   : > { %v1352_v53 = vpop.f32.mrf.mxu1 }
 0x1f6   : > { %v1353_v41 = vadd.f32 %v9006_v6, %v1352_v53 }
 0x1f7   : > { %v6798_v24 = vpop.eup %6797 }
 0x1f8   : > { %v1114_v2 = vmul.f32 %v6798_v24, %v802_v48  ;;  %v1413_v38 = vpack.c.bf16 %v1353_v41, %v1353_v41  ;;  %vm1120_vm1 = vweird.f32 %v6798_v24  ;;  %v1403_v48 = vpack.c.bf16 %v1328_v52, %v1328_v52 }
 0x1f9   : > { %vm1121_vm4 = vmor %vm1119_vm14, %vm1120_vm1  ;;  %v1450_v41 = vunpack.c.l.b16 %v1402_v4 }
 0x1fa   : > { %v1115_v26 = vmul.f32 %v6798_v24, %v1114_v2  ;;  %v1535_v9 = vunpack.c.l.b16 %v1413_v38  ;;  %v1451_v53 = vunpack.c.l.b16 %v1403_v48  ;;  %v1330_v43 = vpop.f32.mrf.mxu0 }
 0x1fc   : > { %v1116_v3 = vmul.f32 0.5, %v1115_v26  ;;  %v9017_v57 = vpack.c.b16 %v1535_v9, %v1534_v10  ;;  %v9073_v2 = vpack.c.b16 %v1451_v53, %v1450_v41 }
 0x1fe   : > { %12278 = vst [vmem:[#allocation18_spill] sm:$0xff] %v9017_v57  ;;  %v1117_v42 = vsub.f32 1.5, %v1116_v3  ;;  %1546 = vrot.lane.b32.xlu2 %v9017_v57, %s7568_s20  ;;  %2247 = vrot.lane.b32.xlu1 %v9017_v57, %s7569_s17 }
 0x1ff   : > { %12282 = vst [vmem:[#allocation24_spill] sm:$0xff] %v9073_v2 }
 0x200   : > { %v1118_v39 = vmul.f32 %v6798_v24, %v1117_v42 }
 0x202   : > { %v1122_v61 = vsel %vm1121_vm4, %v6798_v24, %v1118_v39 }
 0x203   : > { %v1154_v33 = vmul.f32 %v1122_v61, %v8571_v45  ;;  %v1355_v46 = vpop.f32.mrf.mxu1  ;;  %v1332_v61 = vpop.f32.mrf.mxu0 }
 0x204   : > { %v1356_v20 = vadd.f32 %v9006_v6, %v1355_v46 }
 0x205   : > { %v1190_v25 = vmul.f32 %v7311_v13, %v1154_v33 }
 0x206   : > { %2459 = vrot.lane.b32.xlu1 %v9010_v31, %s7570_s23  ;;  %2170 = vrot.lane.b32.xlu2 %v9010_v31, %s7569_s17  ;;  %v1414_v37 = vpack.c.bf16 %v1356_v20, %v1356_v20 }
 0x207   : > { %v1226_v23 = vadd.f32 %v7312_v22, %v1190_v25 }
 0x208   : > { %v1536_v49 = vunpack.c.l.b16 %v1414_v37 }
 0x209   : > { %v1242_v30 = vpack.c.bf16 %v1226_v23, %v1225_v47 }
 0x20b   : > { %6193 = vmatmul.msk.bf16.gmra.mxu3 %vm443_vm0, %v1242_v30  ;;  %v1357_v16 = vpop.f32.mrf.mxu1  ;;  %v1333_v30 = vadd.f32 %v9006_v6, %v1332_v61 }
 0x20c   : > { %v1358_v0 = vadd.f32 %v9006_v6, %v1357_v16 }
 0x20d   : > { %v1335_v23 = vpop.f32.mrf.mxu0 }
 0x20e   : > { %2524 = vrot.lane.b32.xlu1 %v9017_v57, %s7571_s25  ;;  %2451 = vrot.lane.b32.xlu2 %v9010_v31, %s7571_s25  ;;  %v1415_v36 = vpack.c.bf16 %v1358_v0, %v1358_v0  ;;  %v1336_v53 = vadd.f32 %v9006_v6, %v1335_v23 }
 0x210   : > { %v1537_v60 = vunpack.c.l.b16 %v1415_v36 }
 0x212   : > { %v9063_v51 = vpack.c.b16 %v1537_v60, %v1536_v49 }
 0x214   : > { %12281 = vst [vmem:[#allocation34_spill] sm:$0xff] %v9063_v51 }
 0x216   : > { %2532 = vrot.lane.b32.xlu2 %v9017_v57, %s7570_s23 }
 0x218   : > { %v1370_v45 = vpop.f32.mrf.mxu2 }
 0x219   : > { %v1371_v58 = vadd.f32 %v9006_v6, %v1370_v45  ;;  %v1331_v45 = vadd.f32 %v9006_v6, %v1330_v43 }
 0x21b   : > { %v1420_v50 = vpack.c.bf16 %v1371_v58, %v1371_v58  ;;  %v1405_v58 = vpack.c.bf16 %v1333_v30, %v1333_v30 }
 0x21c   : > { %v1380_v40 = vpop.f32.mrf.mxu3 }
 0x21d   : > { %v1381_v7 = vadd.f32 %v9006_v6, %v1380_v40  ;;  %v1615_v62 = vunpack.c.l.b16 %v1420_v50  ;;  %v1453_v50 = vunpack.c.l.b16 %v1405_v58 }
 0x21f   : > { %v1424_v54 = vpack.c.bf16 %v1381_v7, %v1381_v7  ;;  %v1360_v9 = vpop.f32.mrf.mxu1 }
 0x220   : > { %v1372_v1 = vpop.f32.mrf.mxu2 }
 0x221   : > { %v1373_v55 = vadd.f32 %v9006_v6, %v1372_v1  ;;  %v1692_v14 = vunpack.c.l.b16 %v1424_v54  ;;  %v1404_v1 = vpack.c.bf16 %v1331_v45, %v1331_v45  ;;  %v1361_v54 = vadd.f32 %v9006_v6, %v1360_v9 }
 0x223   : > { %v1421_v19 = vpack.c.bf16 %v1373_v55, %v1373_v55 }
 0x224   : > { %v1382_v15 = vpop.f32.mrf.mxu3 }
 0x225   : > { %v1616_v12 = vunpack.c.l.b16 %v1421_v19  ;;  %v1383_v17 = vadd.f32 %v9006_v6, %v1382_v15  ;;  %v1337_v15 = vpop.f32.mrf.mxu0 }
 0x227   : > { %v9043_v18 = vpack.c.b16 %v1616_v12, %v1615_v62  ;;  %v1425_v27 = vpack.c.bf16 %v1383_v17, %v1383_v17  ;;  %v1362_v5 = vpop.f32.mrf.mxu1  ;;  %v1452_v62 = vunpack.c.l.b16 %v1404_v1 }
 0x228   : > { %v1375_v56 = vpop.f32.mrf.mxu2  ;;  %v1363_v7 = vadd.f32 %v9006_v6, %v1362_v5 }
 0x229   : > { %v1693_v63 = vunpack.c.l.b16 %v1425_v27  ;;  %2320 = vrot.lane.b32.xlu1 %v9043_v18, %s7569_s17  ;;  %1627 = vrot.lane.b32.xlu2 %v9043_v18, %s7568_s20  ;;  %v1376_v24 = vadd.f32 %v9006_v6, %v1375_v56  ;;  %v9113_v17 = vpack.c.b16 %v1453_v50, %v1452_v62 }
 0x22a   : > { %v1417_v8 = vpack.c.bf16 %v1363_v7, %v1363_v7 }
 0x22b   : > { %v9050_v28 = vpack.c.b16 %v1693_v63, %v1692_v14  ;;  %v1422_v10 = vpack.c.bf16 %v1376_v24, %v1376_v24  ;;  %12284 = vst [vmem:[#allocation23_spill] sm:$0xff] %v9113_v17  ;;  %v1416_v14 = vpack.c.bf16 %v1361_v54, %v1361_v54 }
 0x22c   : > { %v1385_v34 = vpop.f32.mrf.mxu3  ;;  %v1612_v0 = vunpack.c.l.b16 %v1417_v8 }
 0x22d   : > { %12280 = vst [vmem:[#allocation19_spill] sm:$0xff] %v9050_v28  ;;  %2389 = vrot.lane.b32.xlu0 %v9050_v28, %s7569_s17  ;;  %v1617_v42 = vunpack.c.l.b16 %v1422_v10  ;;  %v1386_v21 = vadd.f32 %v9006_v6, %v1385_v34  ;;  %v1611_v36 = vunpack.c.l.b16 %v1416_v14  ;;  %v1340_v60 = vpop.f32.mrf.mxu0 }
 0x22f   : > { %v1426_v33 = vpack.c.bf16 %v1386_v21, %v1386_v21  ;;  %v1365_v40 = vpop.f32.mrf.mxu1  ;;  %v9125_v35 = vpack.c.b16 %v1612_v0, %v1611_v36 }
 0x230   : > { %v1377_v44 = vpop.f32.mrf.mxu2  ;;  %v1366_v11 = vadd.f32 %v9006_v6, %v1365_v40 }
 0x231   : > { %2658 = vrot.lane.b32.xlu1 %v9050_v28, %s7571_s25  ;;  %1704 = vrot.lane.b32.xlu2 %v9050_v28, %s7568_s20  ;;  %v1378_v32 = vadd.f32 %v9006_v6, %v1377_v44  ;;  %v1694_v25 = vunpack.c.l.b16 %v1426_v33  ;;  %12285 = vst [vmem:[#allocation22_spill] sm:$0xff] %v9125_v35  ;;  %v1338_v44 = vadd.f32 %v9006_v6, %v1337_v15 }
 0x232   : > { %v1418_v48 = vpack.c.bf16 %v1366_v11, %v1366_v11 }
 0x233   : > { %v1423_v38 = vpack.c.bf16 %v1378_v32, %v1378_v32  ;;  %v1407_v41 = vpack.c.bf16 %v1338_v44, %v1338_v44 }
 0x234   : > { %v1387_v26 = vpop.f32.mrf.mxu3  ;;  %v1613_v32 = vunpack.c.l.b16 %v1418_v48 }
 0x235   : > { %2593 = vrot.lane.b32.xlu0 %v9043_v18, %s7571_s25  ;;  %v1618_v29 = vunpack.c.l.b16 %v1423_v38  ;;  %v1388_v3 = vadd.f32 %v9006_v6, %v1387_v26  ;;  %v1342_v38 = vpop.f32.mrf.mxu0  ;;  %v1406_v26 = vpack.c.bf16 %v1336_v53, %v1336_v53  ;;  %v1455_v10 = vunpack.c.l.b16 %v1407_v41 }
 0x236   : > { %v1343_v9 = vadd.f32 %v9006_v6, %v1342_v38 }
 0x237   : > { %v9083_v59 = vpack.c.b16 %v1618_v29, %v1617_v42  ;;  %v1427_v39 = vpack.c.bf16 %v1388_v3, %v1388_v3  ;;  %v1367_v16 = vpop.f32.mrf.mxu1  ;;  %v1454_v29 = vunpack.c.l.b16 %v1406_v26  ;;  %v1341_v3 = vadd.f32 %v9006_v6, %v1340_v60 }
 0x238   : > { %v1368_v20 = vadd.f32 %v9006_v6, %v1367_v16  ;;  %v1409_v21 = vpack.c.bf16 %v1343_v9, %v1343_v9 }
 0x239   : > { %1548 = vrot.lane.b32.xlu1 %v9063_v51, %s7568_s20  ;;  %2601 = vrot.lane.b32.xlu2 %v9043_v18, %s7570_s23  ;;  %v1695_v13 = vunpack.c.l.b16 %v1427_v39  ;;  %v9149_v42 = vpack.c.b16 %v1455_v10, %v1454_v29  ;;  %v1408_v39 = vpack.c.bf16 %v1341_v3, %v1341_v3 }
 0x23a   : > { %v1419_v49 = vpack.c.bf16 %v1368_v20, %v1368_v20  ;;  %v1531_v33 = vunpack.c.l.b16 %v1409_v21 }
 0x23b   : > { %v9091_v47 = vpack.c.b16 %v1695_v13, %v1694_v25  ;;  %v1530_v13 = vunpack.c.l.b16 %v1408_v39 }
 0x23c   : > { %v1390_v22 = vpop.f32.mrf.mxu3  ;;  %v1614_v4 = vunpack.c.l.b16 %v1419_v49 }
 0x23d   : > { %2666 = vrot.lane.b32.xlu0 %v9050_v28, %s7570_s23  ;;  %12283 = vst [vmem:[#allocation26_spill] sm:$0xff] %v9091_v47  ;;  %v1391_v12 = vadd.f32 %v9006_v6, %v1390_v22  ;;  %v9159_v5 = vpack.c.b16 %v1531_v33, %v1530_v13  ;;  %v1345_v1 = vpop.f32.mrf.mxu0 }
 0x23e   : > { %v9137_v24 = vpack.c.b16 %v1614_v4, %v1613_v32  ;;  %v1346_v36 = vadd.f32 %v9006_v6, %v1345_v1 }
 0x23f   : > { %v1428_v63 = vpack.c.bf16 %v1391_v12, %v1391_v12  ;;  %12288 = vst [vmem:[#allocation21_spill] sm:$0xff] %v9159_v5 }
 0x240   : > { %v1410_v60 = vpack.c.bf16 %v1346_v36, %v1346_v36 }
 0x241   : > { %2534 = vrot.lane.b32.xlu1 %v9063_v51, %s7570_s23  ;;  %1462 = vrot.lane.b32.xlu2 %v9073_v2, %s7568_s20  ;;  %v1696_v37 = vunpack.c.l.b16 %v1428_v63 }
 0x242   : > { %v1532_v4 = vunpack.c.l.b16 %v1410_v60 }
 0x244   : > { %v1392_v46 = vpop.f32.mrf.mxu3 }
 0x245   : > { %2172 = vrot.lane.b32.xlu0 %v9073_v2, %s7569_s17  ;;  %v1393_v55 = vadd.f32 %v9006_v6, %v1392_v46  ;;  %v1347_v63 = vpop.f32.mrf.mxu0 }
 0x246   : > { %v1348_v0 = vadd.f32 %v9006_v6, %v1347_v63 }
 0x247   : > { %v1429_v27 = vpack.c.bf16 %v1393_v55, %v1393_v55 }
 0x248   : > { %v1411_v11 = vpack.c.bf16 %v1348_v0, %v1348_v0 }
 0x249   : > { %1629 = vrot.lane.b32.xlu1 %v9083_v59, %s7568_s20  ;;  %2249 = vrot.lane.b32.xlu2 %v9063_v51, %s7569_s17  ;;  %v1697_v56 = vunpack.c.l.b16 %v1429_v27 }
 0x24a   : > { %v1533_v49 = vunpack.c.l.b16 %v1411_v11 }
 0x24b   : > { %v9127_v34 = vpack.c.b16 %v1697_v56, %v1696_v37 }
 0x24c   : > { %v9232_v53 = vpack.c.b16 %v1533_v49, %v1532_v4 }
 0x24d   : > { %2453 = vrot.lane.b32.xlu0 %v9073_v2, %s7571_s25  ;;  %12286 = vst [vmem:[#allocation25_spill] sm:$0xff] %v9127_v34 }
 0x251   : > { %2391 = vrot.lane.b32.xlu1 %v9091_v47, %s7569_s17  ;;  %2461 = vrot.lane.b32.xlu2 %v9073_v2, %s7570_s23 }
 0x255   : > { %2526 = vrot.lane.b32.xlu0 %v9063_v51, %s7571_s25 }
 0x258   : > { %v9107_v19 = vpop.permute.xlu2 %1546  ;;  %v9192_v50 = vpop.permute.xlu0 %1460 }
 0x259   : > { %2595 = vrot.lane.b32.xlu1 %v9083_v59, %s7571_s25  ;;  %2668 = vrot.lane.b32.xlu2 %v9091_v47, %s7570_s23  ;;  %v1569_v26 = vsel %vm1468_vm3, %v9107_v19, 0 }
 0x25d   : > { %1706 = vrot.lane.b32.xlu0 %v9091_v47, %s7568_s20 }
 0x260   : > { %v9123_v52 = vpop.permute.xlu2 %2170 }
 0x261   : > { %2174 = vrot.lane.b32.xlu1 %v9113_v17, %s7569_s17  ;;  %2660 = vrot.lane.b32.xlu2 %v9091_v47, %s7571_s25 }
 0x265   : > { %2322 = vrot.lane.b32.xlu0 %v9083_v59, %s7569_s17 }
 0x268   : > { %v9139_v43 = vpop.permute.xlu2 %2451 }
 0x269   : > { %1708 = vrot.lane.b32.xlu1 %v9127_v34, %s7568_s20  ;;  %2316 = vrot.lane.b32.xlu2 %v9125_v35, %s7569_s17  ;;  %12287 = vst [vmem:[#allocation27_spill] sm:$0xff] %v9139_v43 }
 0x26d   : > { %2603 = vrot.lane.b32.xlu0 %v9083_v59, %s7570_s23 }
 0x270   : > { %v9155_v61 = vpop.permute.xlu2 %2532  ;;  %v9161_v25 = vpop.permute.xlu1 %2247 }
 0x271   : > { %1625 = vrot.lane.b32.xlu1 %v9137_v24, %s7568_s20  ;;  %2455 = vrot.lane.b32.xlu2 %v9113_v17, %s7571_s25 }
 0x275   : > { %1464 = vrot.lane.b32.xlu0 %v9113_v17, %s7568_s20 }
 0x278   : > { %v9171_v23 = vpop.permute.xlu1 %2459 }
 0x279   : > { %2465 = vrot.lane.b32.xlu1 %v9149_v42, %s7570_s23  ;;  %2589 = vrot.lane.b32.xlu2 %v9125_v35, %s7571_s25 }
 0x27d   : > { %1623 = vrot.lane.b32.xlu0 %v9125_v35, %s7568_s20 }
 0x280   : > { %v9185_v40 = vpop.permute.xlu1 %2524 }
 0x281   : > { %1542 = vrot.lane.b32.xlu1 %v9159_v5, %s7568_s20  ;;  %1466 = vrot.lane.b32.xlu2 %v9149_v42, %s7568_s20  ;;  %12289 = vst [vmem:[#allocation20_spill] sm:$0xff] %v9185_v40 }
 0x283   : > { %v9167_v22 = vpop.permute.xlu2 %1627 }
 0x284   : > { %v1650_v33 = vsel %vm1468_vm3, %v9167_v22, 0 }
 0x285   : > { %2463 = vrot.lane.b32.xlu0 %v9113_v17, %s7570_s23 }
 0x289   : > { %3133 = vrot.lane.b32.xlu1 %v9073_v2, %s7572_s12  ;;  %2176 = vrot.lane.b32.xlu2 %v9149_v42, %s7569_s17 }
 0x28b   : > { %v9177_v30 = vpop.permute.xlu2 %1704 }
 0x28d   : > { %2597 = vrot.lane.b32.xlu0 %v9125_v35, %s7570_s23 }
 0x28e   : > { %v1395_v45 = vpop.f32.mrf.mxu3 }
 0x28f   : > { %v1396_v46 = vadd.f32 %v9006_v6, %v1395_v45 }
 0x291   : > { %2528 = vrot.lane.b32.xlu1 %v9159_v5, %s7570_s23  ;;  %2599 = vrot.lane.b32.xlu2 %v9137_v24, %s7570_s23  ;;  %v1430_v55 = vpack.c.bf16 %v1396_v46, %v1396_v46 }
 0x293   : > { %v9187_v58 = vpop.permute.xlu2 %2601  ;;  %v1698_v8 = vunpack.c.l.b16 %v1430_v55 }
 0x295   : > { %2393 = vrot.lane.b32.xlu0 %v9127_v34, %s7569_s17 }
 0x296   : > { %v1397_v7 = vpop.f32.mrf.mxu3 }
 0x297   : > { %v1398_v15 = vadd.f32 %v9006_v6, %v1397_v7 }
 0x299   : > { %2520 = vrot.lane.b32.xlu1 %v9159_v5, %s7571_s25  ;;  %2591 = vrot.lane.b32.xlu2 %v9137_v24, %s7571_s25  ;;  %v1431_v12 = vpack.c.bf16 %v1398_v15, %v1398_v15 }
 0x29b   : > { %v9199_v62 = vpop.permute.xlu1 %2320  ;;  %v9201_v54 = vpop.permute.xlu2 %1462  ;;  %v1699_v27 = vunpack.c.l.b16 %v1431_v12 }
 0x29c   : > { %v1485_v4 = vsel %vm1468_vm3, %v9201_v54, 0 }
 0x29d   : > { %2670 = vrot.lane.b32.xlu0 %v9127_v34, %s7570_s23  ;;  %v9207_v14 = vpack.c.b16 %v1699_v27, %v1698_v8 }
 0x29f   : > { %v9205_v16 = vpop.permute.xlu0 %2389  ;;  %12290 = vst [vmem:[#allocation28_spill] sm:$0xff] %v9207_v14 }
 0x2a1   : > { %3424 = vrot.lane.b32.xlu1 %v9113_v17, %s7573_s21  ;;  %1710 = vrot.lane.b32.xlu2 %v9207_v14, %s7568_s20 }
 0x2a3   : > { %v9214_v20 = vpop.permute.xlu1 %2658  ;;  %v9216_v56 = vpop.permute.xlu2 %2249 }
 0x2a4   : > { %12291 = vst [vmem:[#allocation29_spill] sm:$0xff] %v9214_v20 }
 0x2a5   : > { %2662 = vrot.lane.b32.xlu0 %v9127_v34, %s7571_s25 }
 0x2a7   : > { %v9221_v37 = vpop.permute.xlu0 %2593 }
 0x2a8   : > { %12292 = vst [vmem:[#allocation30_spill] sm:$0xff] %v9221_v37 }
 0x2a9   : > { %3210 = vrot.lane.b32.xlu1 %v9063_v51, %s7572_s12  ;;  %2672 = vrot.lane.b32.xlu2 %v9207_v14, %s7570_s23 }
 0x2ab   : > { %v1549_v48 = vpop.permute.xlu1 %1548  ;;  %v9227_v44 = vpop.permute.xlu2 %2461 }
 0x2ac   : > { %v1572_v6 = vsel %vm1468_vm3, %v1549_v48, 0 }
 0x2ad   : > { %2318 = vrot.lane.b32.xlu0 %v9137_v24, %s7569_s17  ;;  %1578 = vmatpush.bf16.xpose.msrb.mxu2 %v1572_v6 }
 0x2af   : > { %v9234_v32 = vpop.permute.xlu0 %2666 }
 0x2b0   : > { %12293 = vst [vmem:[#allocation31_spill] sm:$0xff] %v9234_v32 }
 0x2b1   : > { %3206 = vrot.lane.b32.xlu1 %v9232_v53, %s7572_s12  ;;  %2243 = vrot.lane.b32.xlu2 %v9159_v5, %s7569_s17 }
 0x2b3   : > { %v9240_v41 = vpop.permute.xlu1 %2534  ;;  %v9242_v38 = vpop.permute.xlu2 %2668 }
 0x2b4   : > { %12294 = vst [vmem:[#allocation32_spill] sm:$0xff] %v9242_v38 }
 0x2b5   : > { %2457 = vrot.lane.b32.xlu0 %v9149_v42, %s7571_s25  ;;  %1579 = vmatpush.bf16.xpose.msrb.mxu2 %v1569_v26 }
 0x2b7   : > { %v9248_v10 = vpop.permute.xlu0 %2172 }
 0x2b9   : > { %3204 = vrot.lane.b32.xlu1 %v9159_v5, %s7572_s12  ;;  %3137 = vrot.lane.b32.xlu2 %v9149_v42, %s7572_s12 }
 0x2bb   : > { %v1630_v9 = vpop.permute.xlu1 %1629  ;;  %v9254_v29 = vpop.permute.xlu2 %2660 }
 0x2bc   : > { %12295 = vst [vmem:[#allocation35_spill] sm:$0xff] %v9254_v29  ;;  %v1653_v3 = vsel %vm1468_vm3, %v1630_v9, 0 }
 0x2bd   : > { %2395 = vrot.lane.b32.xlu0 %v9207_v14, %s7569_s17  ;;  %1659 = vmatpush.bf16.xpose.msrb.mxu3 %v1653_v3  ;;  %v1482_v3 = vsel %vm1468_vm3, %v9192_v50, 0 }
 0x2bf   : > { %v9259_v19 = vpop.permute.xlu0 %2453 }
 0x2c0   : > { %12296 = vst [vmem:[#allocation36_spill] sm:$0xff] %v9259_v19 }
 0x2c1   : > { %3495 = vrot.lane.b32.xlu1 %v9063_v51, %s7573_s21  ;;  %3426 = vrot.lane.b32.xlu2 %v9149_v42, %s7573_s21 }
 0x2c3   : > { %v9265_v21 = vpop.permute.xlu1 %2391  ;;  %v9267_v39 = vpop.permute.xlu2 %2316 }
 0x2c5   : > { %2664 = vrot.lane.b32.xlu0 %v9207_v14, %s7571_s25  ;;  %1660 = vmatpush.bf16.xpose.msrb.mxu3 %v1650_v33 }
 0x2c7   : > { %v9273_v13 = vpop.permute.xlu0 %2526 }
 0x2c8   : > { %12297 = vst [vmem:[#allocation37_spill] sm:$0xff] %v9273_v13 }
 0x2c9   : > { %3208 = vrot.lane.b32.xlu2 %v9017_v57, %s7572_s12 }
 0x2cb   : > { %v9277_v45 = vpop.permute.xlu1 %2595  ;;  %v9279_v46 = vpop.permute.xlu2 %2455 }
 0x2cc   : > { %12298 = vst [vmem:[#allocation38_spill] sm:$0xff] %v9277_v45 }
 0x2cd   : > { %12299 = vst [vmem:[#allocation39_spill] sm:$0xff] %v9279_v46  ;;  %3135 = vrot.lane.b32.xlu0 %v9113_v17, %s7572_s12 }
 0x2cf   : > { %v1707_v1 = vpop.permute.xlu0 %1706 }
 0x2d1   : > { %3412 = vrot.lane.b32.xlu2 %v9010_v31, %s7574_s14 }
 0x2d3   : > { %v9285_v22 = vpop.permute.xlu1 %2174  ;;  %v9287_v7 = vpop.permute.xlu2 %2589 }
 0x2d4   : > { %12300 = vst [vmem:[#allocation40_spill] sm:$0xff] %v9287_v7 }
 0x2d5   : > { %1544 = vrot.lane.b32.xlu0 %v9232_v53, %s7568_s20 }
 0x2d7   : > { %v2323_v55 = vpop.permute.xlu0 %2322 }
 0x2d9   : > { %3414 = vrot.lane.b32.xlu2 %v9073_v2, %s7574_s14 }
 0x2db   : > { %v1709_v15 = vpop.permute.xlu1 %1708  ;;  %v1467_v12 = vpop.permute.xlu2 %1466 }
 0x2dc   : > { %v1491_v8 = vsel %vm1468_vm3, %v1467_v12, 0  ;;  %v1731_v12 = vsel %vm1468_vm3, %v1709_v15, 0 }
 0x2dd   : > { %2245 = vrot.lane.b32.xlu0 %v9232_v53, %s7569_s17  ;;  %1497 = vmatpush.bf16.xpose.msrb.mxu1 %v1491_v8 }
 0x2df   : > { %v9296_v27 = vpop.permute.xlu0 %2603 }
 0x2e3   : > { %v1626_v63 = vpop.permute.xlu1 %1625  ;;  %v9298_v0 = vpop.permute.xlu2 %2176 }
 0x2e4   : > { %v1647_v36 = vsel %vm1468_vm3, %v1626_v63, 0  ;;  %v1728_v63 = vsel %vm1468_vm3, %v1707_v1, 0 }
 0x2e5   : > { %2530 = vrot.lane.b32.xlu0 %v9232_v53, %s7570_s23  ;;  %1661 = vmatpush.bf16.xpose.msrb.mxu3 %v1647_v36  ;;  %s11846_s23 = scalar_lea.vmem [#allocation11], %s6164_s18  ;;  %s6347_s18 = sshll.u32 %s7548_s30, 3 }
 0x2e6   : > { %s6013_s30 = scalar_lea.sflag [#allocation4], %s7756_s11 }
 0x2e7   : > { %v1465_v11 = vpop.permute.xlu0 %1464 }
 0x2e8   : > { %v1488_v60 = vsel %vm1468_vm3, %v1465_v11, 0  ;;  %v1725_v11 = vsel %vm1468_vm3, %v9177_v30, 0 }
 0x2e9   : > { %1498 = vmatpush.bf16.xpose.msrb.mxu1 %v1488_v60 }
 0x2eb   : > { %v9304_v49 = vpop.permute.xlu2 %2599 }
 0x2ed   : > { %2522 = vrot.lane.b32.xlu0 %v9232_v53, %s7571_s25  ;;  %s6026_s25 = scalar_lea.hbm %s12090_s8, %s6347_s18 }
 0x2ef   : > { %v1624_v48 = vpop.permute.xlu0 %1623 }
 0x2f0   : > { %v1644_v6 = vsel %vm1468_vm3, %v1624_v48, 0 }
 0x2f1   : > { %1662 = vmatpush.bf16.xpose.msrb.mxu3 %v1644_v6  ;;  %1499 = vmatpush.bf16.xpose.msrb.mxu1 %v1485_v4 }
 0x2f3   : > { %v9312_v26 = vpop.permute.xlu2 %2591 }
 0x2f4   : > { %12301 = vst [vmem:[#allocation41_spill] sm:$0xff] %v9312_v26 }
 0x2f5   : > { %3131 = vrot.lane.b32.xlu0 %v9010_v31, %s7572_s12 }
 0x2f7   : > { %v9317_v9 = vpop.permute.xlu0 %2463 }
 0x2f8   : > { %6202 = vmatmul.msk.bf16.vlgmr.msrb.gmra.mxu3 %vm1468_vm3, %v9125_v35 }
 0x2f9   : > { %2271 = vmatpush.bf16.msra.mxu3 %v9216_v56  ;;  %1500 = vmatpush.bf16.xpose.msrb.mxu1 %v1482_v3  ;;  %v2558_v3 = vsel %vm1468_vm3, %v9240_v41, 0 }
 0x2fb   : > { %v1711_v54 = vpop.permute.xlu2 %1710 }
 0x2fc   : > { %v1734_v33 = vsel %vm1468_vm3, %v1711_v54, 0 }
 0x2fd   : > { %2272 = vmatpush.bf16.msra.mxu3 %v9161_v25  ;;  %3422 = vrot.lane.b32.xlu0 %v9073_v2, %s7573_s21 }
 0x2ff   : > { %v9326_v56 = vpop.permute.xlu0 %2597 }
 0x300   : > { %6194 = vmatmul.msk.bf16.vlgmr.msrb.gmra.mxu1 %vm1468_vm3, %v9010_v31 }
 0x301   : > { %1740 = vmatpush.bf16.xpose.msra.mxu1 %v1734_v33 }
 0x303   : > { %v9330_v25 = vpop.permute.xlu2 %2672 }
 0x305   : > { %3420 = vrot.lane.b32.xlu0 %v9010_v31, %s7573_s21 }
 0x307   : > { %v9335_v50 = vpop.permute.xlu0 %2393 }
 0x308   : > { %6203 = vmatmul.msk.bf16.gmra.mxu3 %vm1468_vm3, %v9137_v24 }
 0x309   : > { %1741 = vmatpush.bf16.xpose.msra.mxu1 %v1731_v12  ;;  %v2555_v12 = vsel %vm1468_vm3, %v9155_v61, 0 }
 0x30b   : > { %v2244_v8 = vpop.permute.xlu2 %2243 }
 0x30d   : > { %3283 = vrot.lane.b32.xlu0 %v9083_v59, %s7572_s12 }
 0x30f   : > { %v9342_v36 = vpop.permute.xlu0 %2670 }
 0x310   : > { %6195 = vmatmul.msk.bf16.gmra.mxu1 %vm1468_vm3, %v9073_v2 }
 0x311   : > { %1742 = vmatpush.bf16.xpose.msra.mxu1 %v1728_v63 }
 0x313   : > { %v9346_v15 = vpop.permute.xlu2 %3137 }
 0x314   : > { %12302 = vst [vmem:[#allocation42_spill] sm:$0xff] %v9346_v15  ;;  %3159 = vmatpush.bf16.msrb.mxu0 %v9346_v15 }
 0x315   : > { %3416 = vrot.lane.b32.xlu0 %v9113_v17, %s7574_s14 }
 0x317   : > { %v9353_v1 = vpop.permute.xlu0 %2662 }
 0x318   : > { %12303 = vst [vmem:[#allocation43_spill] sm:$0xff] %v9353_v1  ;;  %6204 = vmatmul.msk.bf16.gmra.mxu3 %vm1468_vm3, %v9043_v18 }
 0x319   : > { %1743 = vmatpush.bf16.xpose.msra.mxu1 %v1725_v11 }
 0x31d   : > { %3281 = vrot.lane.b32.xlu0 %v9043_v18, %s7572_s12 }
 0x31f   : > { %v2319_v60 = vpop.permute.xlu0 %2318 }
 0x320   : > { %6196 = vmatmul.msk.bf16.gmra.mxu1 %vm1468_vm3, %v9113_v17 }
 0x321   : > { %2344 = vmatpush.bf16.msrb.mxu1 %v2323_v55  ;;  %v2466_v55 = vpop.permute.xlu1 %2465 }
 0x322   : > { %v2489_v11 = vsel %vm1468_vm3, %v2466_v55, 0 }
 0x325   : > { %2345 = vmatpush.bf16.msrb.mxu1 %v9199_v62 }
 0x327   : > { %v9363_v30 = vpop.permute.xlu0 %2457 }
 0x328   : > { %12304 = vst [vmem:[#allocation44_spill] sm:$0xff] %v9363_v30  ;;  %6205 = vmatmul.msk.bf16.gmra.mxu3 %vm1468_vm3, %v9083_v59 }
 0x329   : > { %2346 = vmatpush.bf16.msrb.mxu1 %v2319_v60  ;;  %v1543_v6 = vpop.permute.xlu1 %1542 }
 0x32a   : > { %v1563_v41 = vsel %vm1468_vm3, %v1543_v6, 0  ;;  %v2486_v6 = vsel %vm1468_vm3, %v9317_v9, 0  ;;  %v3427_v9 = vpop.permute.xlu2 %3426 }
 0x32b   : > { %v3450_v55 = vsel %vm1468_vm3, %v3427_v9, 0 }
 0x32d   : > { %2347 = vmatpush.bf16.msrb.mxu1 %v9267_v39 }
 0x32f   : > { %v2396_v48 = vpop.permute.xlu0 %2395 }
 0x330   : > { %6197 = vmatmul.msk.bf16.gmra.mxu1 %vm1468_vm3, %v9149_v42 }
 0x331   : > { %v9378_v39 = vpop.permute.xlu1 %3133 }
 0x332   : > { %12307 = vst [vmem:[#allocation47_spill] sm:$0xff] %v9378_v39  ;;  %v9534_v46 = vpop.permute.xlu2 %3208 }
 0x337   : > { %v9369_v62 = vpop.permute.xlu0 %2664 }
 0x338   : > { %12305 = vst [vmem:[#allocation45_spill] sm:$0xff] %v9369_v62  ;;  %v9498_v62 = vld [vmem:[#allocation8 + $0x28] sm:$0xff] }
 0x33f   : > { %v9371_v4 = vpop.permute.xlu0 %3135 }
 0x340   : > { %12306 = vst [vmem:[#allocation46_spill] sm:$0xff] %v9371_v4  ;;  %3160 = vmatpush.bf16.msrb.mxu0 %v9371_v4  ;;  %6206 = vmatmul.msk.bf16.vlgmr.msra.gmra.mxu1 %vm1468_vm3, %v9050_v28 }
 0x341   : > { %2564 = vmatpush.bf16.xpose.msra.mxu1 %v2558_v3  ;;  %v2529_v3 = vpop.permute.xlu1 %2528 }
 0x344   : > { %3161 = vmatpush.bf16.msrb.mxu0 %v9378_v39 }
 0x347   : > { %v1545_v54 = vpop.permute.xlu0 %1544 }
 0x348   : > { %v1566_v33 = vsel %vm1468_vm3, %v1545_v54, 0 }
 0x349   : > { %1580 = vmatpush.bf16.xpose.msrb.mxu2 %v1566_v33  ;;  %2565 = vmatpush.bf16.xpose.msra.mxu1 %v2555_v12  ;;  %v9423_v33 = vld [vmem:[#allocation8] sm:$0xff] }
 0x34f   : > { %v2246_v63 = vpop.permute.xlu0 %2245 }
 0x350   : > { %2273 = vmatpush.bf16.msra.mxu3 %v2246_v63  ;;  %6207 = vmatmul.msk.bf16.gmra.mxu1 %vm1468_vm3, %v9091_v47 }
 0x351   : > { %1581 = vmatpush.bf16.xpose.msrb.mxu2 %v1563_v41 }
 0x354   : > { %2274 = vmatpush.bf16.msra.mxu3 %v2244_v8  ;;  %v9402_v8 = vpop.permute.xlu1 %2520 }
 0x355   : > { %12309 = vst [vmem:[#allocation49_spill] sm:$0xff] %v9402_v8 }
 0x357   : > { %v2531_v60 = vpop.permute.xlu0 %2530 }
 0x358   : > { %2495 = vmatpush.bf16.xpose.msrb.mxu3 %v2489_v11  ;;  %6198 = vmatmul.msk.bf16.vlgmr.msrb.gmra.mxu2 %vm1468_vm3, %v9159_v5  ;;  %v2552_v61 = vsel %vm1468_vm3, %v2531_v60, 0 }
 0x359   : > { %2198 = vmatpush.bf16.msra.mxu2 %v9298_v0  ;;  %2566 = vmatpush.bf16.xpose.msra.mxu1 %v2552_v61 }
 0x35d   : > { %2199 = vmatpush.bf16.msra.mxu2 %v9285_v22  ;;  %v2549_v22 = vsel %vm1468_vm3, %v2529_v3, 0  ;;  %v9436_v3 = vld [vmem:[#allocation8 + $0x8] sm:$0xff] }
 0x35f   : > { %v9397_v0 = vpop.permute.xlu0 %2522 }
 0x360   : > { %2496 = vmatpush.bf16.xpose.msrb.mxu3 %v2486_v6  ;;  %12308 = vst [vmem:[#allocation48_spill] sm:$0xff] %v9397_v0  ;;  %6208 = vmatmul.msk.bf16.gmra.mxu1 %vm1468_vm3, %v9127_v34 }
 0x361   : > { %2200 = vmatpush.bf16.msra.mxu2 %v9248_v10  ;;  %2567 = vmatpush.bf16.xpose.msra.mxu1 %v2549_v22  ;;  %v2483_v10 = vsel %vm1468_vm3, %v9227_v44, 0  ;;  %v3425_v44 = vpop.permute.xlu1 %3424 }
 0x365   : > { %2201 = vmatpush.bf16.msra.mxu2 %v9123_v52 }
 0x367   : > { %v9408_v52 = vpop.permute.xlu0 %3131 }
 0x368   : > { %2497 = vmatpush.bf16.xpose.msrb.mxu3 %v2483_v10  ;;  %12310 = vst [vmem:[#allocation50_spill] sm:$0xff] %v9408_v52  ;;  %6199 = vmatmul.msk.bf16.gmra.mxu2 %vm1468_vm3, %v9232_v53 }
 0x369   : > { %2417 = vmatpush.bf16.msrb.mxu2 %v2396_v48  ;;  %3162 = vmatpush.bf16.msrb.mxu0 %v9408_v52  ;;  %v3447_v48 = vsel %vm1468_vm3, %v3425_v44, 0  ;;  %v9450_v44 = vld [vmem:[#allocation8 + $0x10] sm:$0xff] }
 0x36d   : > { %2418 = vmatpush.bf16.msrb.mxu2 %v9335_v50  ;;  %3456 = vmatpush.bf16.xpose.msra.mxu0 %v3450_v55  ;;  %v2480_v50 = vsel %vm1468_vm3, %v9171_v23, 0 }
 0x370   : > { %2498 = vmatpush.bf16.xpose.msrb.mxu3 %v2480_v50  ;;  %6209 = vmatmul.msk.bf16.gmra.mxu1 %vm1468_vm3, %v9207_v14 }
 0x371   : > { %2419 = vmatpush.bf16.msrb.mxu2 %v9265_v21  ;;  %v3423_v21 = vpop.permute.xlu0 %3422 }
 0x372   : > { %v3444_v54 = vsel %vm1468_vm3, %v3423_v21, 0 }
 0x375   : > { %2420 = vmatpush.bf16.msrb.mxu2 %v9205_v16  ;;  %3457 = vmatpush.bf16.xpose.msra.mxu0 %v3447_v48 }
 0x378   : > { %6200 = vmatmul.msk.bf16.gmra.mxu2 %vm1468_vm3, %v9017_v57 }
 0x379   : > { %v3421_v12 = vpop.permute.xlu0 %3420 }
 0x37a   : > { %v3441_v60 = vsel %vm1468_vm3, %v3421_v12, 0 }
 0x37b   : > { %v1664_v16 = vpop.f32.mrf.mxu3 }
 0x37c   : > { %v9426_v23 = vadd.f32 %v1664_v16, %v9423_v33 }
 0x37d   : > { %3458 = vmatpush.bf16.xpose.msra.mxu0 %v3444_v54  ;;  %v1502_v63 = vpop.f32.mrf.mxu1 }
 0x37e   : > { %v9429_v41 = vadd.f32 %v1502_v63, %v9423_v33  ;;  %v1814_v11 = vsel %vm1765_vm5, %v9426_v23, -inf }
 0x37f   : > { %1815 = vmax.xlane.f32.xlu0 %v1814_v11  ;;  %v9462_v11 = vld [vmem:[#allocation8 + $0x18] sm:$0xff] }
 0x380   : > { %v1766_v61 = vsel %vm1765_vm5, %v9429_v41, -inf }
 0x381   : > { %1767 = vmax.xlane.f32.xlu1 %v1766_v61  ;;  %v9513_v29 = vpop.permute.xlu0 %3283 }
 0x382   : > { %12311 = vst [vmem:[#allocation51_spill] sm:$0xff] %v9513_v29 }
 0x383   : > { %v1666_v6 = vpop.f32.mrf.mxu3 }
 0x384   : > { %v9439_v22 = vadd.f32 %v1666_v6, %v9436_v3 }
 0x385   : > { %3459 = vmatpush.bf16.xpose.msra.mxu0 %v3441_v60  ;;  %v1504_v10 = vpop.f32.mrf.mxu1 }
 0x386   : > { %v9442_v9 = vadd.f32 %v1504_v10, %v9436_v3  ;;  %v1817_v55 = vsel %vm1765_vm5, %v9439_v22, -inf }
 0x387   : > { %1818 = vmax.xlane.f32.xlu2 %v1817_v55 }
 0x388   : > { %6201 = vmatmul.msk.bf16.gmra.mxu2 %vm1468_vm3, %v9063_v51  ;;  %v1769_v50 = vsel %vm1765_vm5, %v9442_v9, -inf }
 0x389   : > { %1770 = vmax.xlane.f32.xlu0 %v1769_v50 }
 0x38b   : > { %v1669_v48 = vpop.f32.mrf.mxu3 }
 0x38c   : > { %v9453_v21 = vadd.f32 %v1669_v48, %v9450_v44  ;;  %v9474_v48 = vld [vmem:[#allocation8 + $0x20] sm:$0xff] }
 0x38d   : > { %v1507_v54 = vpop.f32.mrf.mxu1 }
 0x38e   : > { %v9456_v16 = vadd.f32 %v1507_v54, %v9450_v44  ;;  %v1820_v12 = vsel %vm1765_vm5, %v9453_v21, -inf }
 0x38f   : > { %1821 = vmax.xlane.f32.xlu1 %v1820_v12 }
 0x390   : > { %v1772_v63 = vsel %vm1765_vm5, %v9456_v16, -inf }
 0x391   : > { %1773 = vmax.xlane.f32.xlu2 %v1772_v63 }
 0x393   : > { %v1671_v60 = vpop.f32.mrf.mxu3 }
 0x394   : > { %v9465_v61 = vadd.f32 %v1671_v60, %v9462_v11 }
 0x395   : > { %v1509_v6 = vpop.f32.mrf.mxu1 }
 0x396   : > { %v9468_v10 = vadd.f32 %v1509_v6, %v9462_v11  ;;  %v1823_v55 = vsel %vm1765_vm5, %v9465_v61, -inf }
 0x397   : > { %1824 = vmax.xlane.f32.xlu0 %v1823_v55 }
 0x398   : > { %v1775_v50 = vsel %vm1765_vm5, %v9468_v10, -inf }
 0x399   : > { %1776 = vmax.xlane.f32.xlu1 %v1775_v50 }
 0x39b   : > { %v1674_v17 = vpop.f32.mrf.mxu3 }
 0x39d   : > { %v1512_v54 = vpop.f32.mrf.mxu1 }
 0x39e   : > { %v9477_v12 = vadd.f32 %v1512_v54, %v9474_v48  ;;  %v9487_v54 = vadd.f32 %v1674_v17, %v9474_v48 }
 0x3a0   : > { %v1778_v63 = vsel %vm1765_vm5, %v9477_v12, -inf }
 0x3a1   : > { %1779 = vmax.xlane.f32.xlu0 %v1778_v63 }
 0x3a3   : > { %v1676_v63 = vpop.f32.mrf.mxu3 }
 0x3a4   : > { %v9501_v17 = vadd.f32 %v1676_v63, %v9498_v62 }
 0x3a5   : > { %v1514_v60 = vpop.f32.mrf.mxu1 }
 0x3a6   : > { %v9506_v45 = vadd.f32 %v1514_v60, %v9498_v62  ;;  %v1829_v63 = vsel %vm1765_vm5, %v9501_v17, -inf }
 0x3a8   : > { %v1781_v60 = vsel %vm1765_vm5, %v9506_v45, -inf }
 0x3ab   : > { %v1679_v26 = vpop.f32.mrf.mxu3 }
 0x3ad   : > { %v1517_v6 = vpop.f32.mrf.mxu1 }
 0x3b3   : > { %v1681_v19 = vpop.f32.mrf.mxu3 }
 0x3b5   : > { %v1519_v2 = vpop.f32.mrf.mxu1 }
 0x3bd   : > { %v1745_v31 = vpop.f32.mrf.mxu1 }
 0x3c5   : > { %v9489_v51 = vpop.f32.mrf.mxu1 }
 0x3cd   : > { %v9511_v37 = vpop.f32.mrf.mxu1 }
 0x3db   : > { %v1583_v55 = vpop.f32.mrf.mxu2 }
 0x3dc   : > { %v9482_v47 = vadd.f32 %v1583_v55, %v9423_v33  ;;  %v1826_v55 = vsel %vm1765_vm5, %v9487_v54, -inf }
 0x3de   : > { %v1790_v50 = vsel %vm1765_vm5, %v9482_v47, -inf }
 0x3df   : > { %1791 = vmax.xlane.f32.xlu2 %v1790_v50  ;;  %v9503_v50 = vpop.permute.xlu1 %3210 }
 0x3e3   : > { %v1585_v14 = vpop.f32.mrf.mxu2 }
 0x3e4   : > { %v9492_v28 = vadd.f32 %v1585_v14, %v9436_v3 }
 0x3e6   : > { %v1793_v34 = vsel %vm1765_vm5, %v9492_v28, -inf }
 0x3e7   : > { %1794 = vmax.xlane.f32.xlu1 %v1793_v34  ;;  %1827 = vmax.xlane.f32.xlu2 %v1826_v55  ;;  %v9519_v55 = vld [vmem:[#allocation8 + $0x30] sm:$0xff]  ;;  %v9532_v30 = vpop.permute.xlu1 %3206 }
 0x3e8   : > { %v9527_v20 = vadd.f32 %v1517_v6, %v9519_v55  ;;  %v9542_v6 = vpop.permute.xlu0 %3416 }
 0x3e9   : > { %12312 = vst [vmem:[#allocation52_spill] sm:$0xff] %v9542_v6 }
 0x3eb   : > { %v1588_v14 = vpop.f32.mrf.mxu2 }
 0x3ec   : > { %v9509_v1 = vadd.f32 %v1588_v14, %v9450_v44  ;;  %v9524_v14 = vadd.f32 %v1679_v26, %v9519_v55 }
 0x3ee   : > { %v1796_v34 = vsel %vm1765_vm5, %v9509_v1, -inf }
 0x3ef   : > { %1797 = vmax.xlane.f32.xlu0 %v1796_v34  ;;  %1830 = vmax.xlane.f32.xlu1 %v1829_v63  ;;  %v1832_v34 = vsel %vm1765_vm5, %v9524_v14, -inf  ;;  %v1784_v63 = vsel %vm1765_vm5, %v9527_v20, -inf  ;;  %v9559_v6 = vpop.permute.xlu1 %3204 }
 0x3f0   : > { %1782 = vmax.xlane.f32.xlu2 %v1781_v60  ;;  %v1752_v60 = vpop.f32.mrf.mxu1  ;;  %v9565_v39 = vpop.permute.xlu0 %3281 }
 0x3f1   : > { %12314 = vst [vmem:[#allocation54_spill] sm:$0xff] %v9565_v39 }
 0x3f3   : > { %v1590_v29 = vpop.f32.mrf.mxu2 }
 0x3f4   : > { %v9530_v7 = vadd.f32 %v1590_v29, %v9462_v11  ;;  %v9544_v29 = vld [vmem:[#allocation8 + $0x38] sm:$0xff] }
 0x3f5   : > { %v9547_v13 = vadd.f32 %v1519_v2, %v9544_v29  ;;  %v9550_v43 = vadd.f32 %v1681_v19, %v9544_v29 }
 0x3f6   : > { %v1799_v26 = vsel %vm1765_vm5, %v9530_v7, -inf }
 0x3f7   : > { %1833 = vmax.xlane.f32.xlu0 %v1832_v34  ;;  %1785 = vmax.xlane.f32.xlu1 %v1784_v63  ;;  %v1787_v34 = vsel %vm1765_vm5, %v9547_v13, -inf  ;;  %v1835_v2 = vsel %vm1765_vm5, %v9550_v43, -inf }
 0x3f8   : > { %1800 = vmax.xlane.f32.xlu2 %v1799_v26  ;;  %v9563_v26 = vpop.permute.xlu2 %3412  ;;  %v1755_v19 = vpop.f32.mrf.mxu1 }
 0x3f9   : > { %12313 = vst [vmem:[#allocation53_spill] sm:$0xff] %v9563_v26  ;;  %v9577_v26 = vpop.permute.xlu1 %3495 }
 0x3fa   : > { %12315 = vst [vmem:[#allocation55_spill] sm:$0xff] %v9577_v26 }
 0x3fb   : > { %v1593_v40 = vpop.f32.mrf.mxu2 }
 0x3fc   : > { %v9553_v52 = vadd.f32 %v1593_v40, %v9474_v48  ;;  %v9568_v40 = vadd.f32 %v1745_v31, %v9423_v33  ;;  %v9583_v31 = vadd.f32 %v9489_v51, %v9436_v3  ;;  %v1816_v33 = vpop.xlane.xlu0 %1815 }
 0x3fd   : > { %v1878_v8 = vsub.f32 %v9426_v23, %v1816_v33 }
 0x3fe   : > { %v1802_v63 = vsel %vm1765_vm5, %v9553_v52, -inf }
 0x3ff   : > { %1788 = vmax.xlane.f32.xlu0 %v1787_v34  ;;  %1803 = vmax.xlane.f32.xlu1 %v1802_v63  ;;  %v1838_v63 = vsel %vm1765_vm5, %v9568_v40, -inf }
 0x400   : > { %1836 = vmax.xlane.f32.xlu2 %v1835_v2  ;;  %v9579_v2 = vpop.permute.xlu2 %3414  ;;  %v1757_v39 = vpop.f32.mrf.mxu1 }
 0x401   : > { %12316 = vst [vmem:[#allocation56_spill] sm:$0xff] %v9579_v2  ;;  %v1926_v2 = vmul.f32 1.442695, %v1878_v8  ;;  %v9594_v51 = vadd.f32 %v1757_v39, %v9498_v62  ;;  %v1768_v3 = vpop.xlane.xlu1 %1767 }
 0x403   : > { %v1595_v0 = vpop.f32.mrf.mxu2  ;;  %6799 = vpow2.f32 %v1926_v2  ;;  %v1853_v8 = vsel %vm1765_vm5, %v9594_v51, -inf }
 0x404   : > { %v9571_v4 = vadd.f32 %v1595_v0, %v9498_v62  ;;  %v1771_v32 = vpop.xlane.xlu0 %1770 }
 0x406   : > { %v1805_v34 = vsel %vm1765_vm5, %v9571_v4, -inf }
 0x407   : > { %1806 = vmax.xlane.f32.xlu0 %v1805_v34  ;;  %1839 = vmax.xlane.f32.xlu1 %v1838_v63  ;;  %v1841_v34 = vsel %vm1765_vm5, %v9583_v31, -inf }
 0x408   : > { %v1819_v26 = vpop.xlane.xlu2 %1818  ;;  %v1760_v38 = vpop.f32.mrf.mxu1 }
 0x409   : > { %v9613_v2 = vpop.eup %6799 }
 0x40b   : > { %v1598_v0 = vpop.f32.mrf.mxu2 }
 0x40c   : > { %v9586_v15 = vadd.f32 %v1598_v0, %v9519_v55  ;;  %v9598_v0 = vadd.f32 %v9511_v37, %v9450_v44  ;;  %v9611_v44 = vadd.f32 %v1755_v19, %v9474_v48  ;;  %v2006_v48 = vsel %vm1765_vm5, %v9613_v2, 0.0 }
 0x40e   : > { %v1808_v63 = vsel %vm1765_vm5, %v9586_v15, -inf  ;;  %v1844_v37 = vsel %vm1765_vm5, %v9598_v0, -inf }
 0x40f   : > { %1842 = vmax.xlane.f32.xlu0 %v1841_v34  ;;  %1809 = vmax.xlane.f32.xlu2 %v1808_v63  ;;  %v1879_v34 = vsub.f32 %v9439_v22, %v1819_v26  ;;  %v1822_v63 = vpop.xlane.xlu1 %1821  ;;  %v9616_v22 = vadd.f32 %v1752_v60, %v9462_v11  ;;  %v1825_v26 = vpop.xlane.xlu0 %1824 }
 0x410   : > { %v1762_v19 = vpop.f32.mrf.mxu1 }
 0x411   : > { %v1928_v39 = vmul.f32 1.442695, %v1879_v34  ;;  %v1850_v34 = vsel %vm1765_vm5, %v9611_v44, -inf  ;;  %v1847_v11 = vsel %vm1765_vm5, %v9616_v22, -inf }
 0x413   : > { %v1600_v23 = vpop.f32.mrf.mxu2  ;;  %6801 = vpow2.f32 %v1928_v39  ;;  %v9633_v39 = vadd.f32 %v1760_v38, %v9519_v55 }
 0x414   : > { %v9601_v33 = vadd.f32 %v1600_v23, %v9544_v29  ;;  %v1862_v23 = vsub.f32 %v9429_v41, %v1768_v3  ;;  %v9628_v3 = vadd.f32 %v1762_v19, %v9544_v29 }
 0x415   : > { %v1856_v38 = vsel %vm1765_vm5, %v9633_v39, -inf }
 0x416   : > { %v1811_v62 = vsel %vm1765_vm5, %v9601_v33, -inf  ;;  %v1894_v60 = vmul.f32 1.442695, %v1862_v23 }
 0x417   : > { %1854 = vmax.xlane.f32.xlu0 %v1853_v8  ;;  %1812 = vmax.xlane.f32.xlu1 %v1811_v62  ;;  %v1880_v8 = vsub.f32 %v9453_v21, %v1822_v63  ;;  %v1881_v62 = vsub.f32 %v9465_v61, %v1825_v26  ;;  %v1777_v61 = vpop.xlane.xlu1 %1776  ;;  %v1780_v63 = vpop.xlane.xlu0 %1779  ;;  %v1863_v26 = vsub.f32 %v9442_v9, %v1771_v32 }
 0x418   : > { %1845 = vmax.xlane.f32.xlu2 %v1844_v37  ;;  %6803 = vpow2.f32 %v1894_v60  ;;  %v1866_v23 = vsub.f32 %v9477_v12, %v1780_v63 }
 0x419   : > { %v1930_v41 = vmul.f32 1.442695, %v1880_v8  ;;  %v1932_v21 = vmul.f32 1.442695, %v1881_v62  ;;  %v9630_v37 = vpop.eup %6801  ;;  %v1859_v8 = vsel %vm1765_vm5, %v9628_v3, -inf }
 0x41a   : > { %v2009_v29 = vsel %vm1765_vm5, %v9630_v37, 0.0  ;;  %v1896_v55 = vmul.f32 1.442695, %v1863_v26  ;;  %v1902_v62 = vmul.f32 1.442695, %v1866_v23 }
 0x41b   : > { %6805 = vpow2.f32 %v1930_v41 }
 0x41c   : > { %6807 = vpow2.f32 %v1932_v21 }
 0x41d   : > { %6809 = vpow2.f32 %v1896_v55 }
 0x41e   : > { %v9644_v9 = vpop.eup %6803 }
 0x41f   : > { %1851 = vmax.xlane.f32.xlu1 %v1850_v34  ;;  %2007 = vadd.xlane.f32.xlu0 %v2006_v48  ;;  %v1865_v34 = vsub.f32 %v9468_v10, %v1777_v61  ;;  %v1774_v10 = vpop.xlane.xlu2 %1773  ;;  %v1958_v60 = vsel %vm1765_vm5, %v9644_v9, 0.0 }
 0x420   : > { %1848 = vmax.xlane.f32.xlu2 %v1847_v11  ;;  %v1864_v19 = vsub.f32 %v9456_v16, %v1774_v10 }
 0x421   : > { %v1900_v32 = vmul.f32 1.442695, %v1865_v34  ;;  %v9646_v48 = vpop.eup %6805 }
 0x422   : > { %v9648_v12 = vpop.eup %6807  ;;  %v2012_v11 = vsel %vm1765_vm5, %v9646_v48, 0.0  ;;  %v1898_v21 = vmul.f32 1.442695, %v1864_v19 }
 0x423   : > { %6811 = vpow2.f32 %v1900_v32  ;;  %v2015_v41 = vsel %vm1765_vm5, %v9648_v12, 0.0  ;;  %v9657_v61 = vpop.eup %6809 }
 0x424   : > { %6813 = vpow2.f32 %v1902_v62  ;;  %v1961_v34 = vsel %vm1765_vm5, %v9657_v61, 0.0 }
 0x425   : > { %6815 = vpow2.f32 %v1898_v21 }
 0x427   : > { %2010 = vadd.xlane.f32.xlu1 %v2009_v29  ;;  %1860 = vmax.xlane.f32.xlu0 %v1859_v8 }
 0x428   : > { %1857 = vmax.xlane.f32.xlu2 %v1856_v38 }
 0x429   : > { %v9659_v63 = vpop.eup %6811 }
 0x42a   : > { %v9661_v16 = vpop.eup %6813  ;;  %v1967_v26 = vsel %vm1765_vm5, %v9659_v63, 0.0 }
 0x42b   : > { %v1970_v23 = vsel %vm1765_vm5, %v9661_v16, 0.0  ;;  %v9669_v29 = vpop.eup %6815 }
 0x42c   : > { %v1964_v8 = vsel %vm1765_vm5, %v9669_v29, 0.0 }
 0x42f   : > { %2013 = vadd.xlane.f32.xlu1 %v2012_v11  ;;  %1959 = vadd.xlane.f32.xlu0 %v1958_v60 }
 0x430   : > { %2016 = vadd.xlane.f32.xlu2 %v2015_v41 }
 0x437   : > { %1968 = vadd.xlane.f32.xlu0 %v1967_v26  ;;  %1962 = vadd.xlane.f32.xlu1 %v1961_v34 }
 0x438   : > { %1971 = vadd.xlane.f32.xlu2 %v1970_v23 }
 0x43f   : > { %1965 = vadd.xlane.f32.xlu1 %v1964_v8 }
 0x452   : > { %v1792_v38 = vpop.xlane.xlu2 %1791 }
 0x453   : > { %v1870_v55 = vsub.f32 %v9482_v47, %v1792_v38 }
 0x455   : > { %v1910_v32 = vmul.f32 1.442695, %v1870_v55 }
 0x457   : > { %6817 = vpow2.f32 %v1910_v32 }
 0x45a   : > { %v1795_v10 = vpop.xlane.xlu1 %1794  ;;  %v1828_v62 = vpop.xlane.xlu2 %1827 }
 0x45b   : > { %v1871_v19 = vsub.f32 %v9492_v28, %v1795_v10  ;;  %v1882_v11 = vsub.f32 %v9487_v54, %v1828_v62 }
 0x45d   : > { %v9676_v60 = vpop.eup %6817  ;;  %v1912_v41 = vmul.f32 1.442695, %v1871_v19  ;;  %v1934_v21 = vmul.f32 1.442695, %v1882_v11 }
 0x45e   : > { %v1982_v26 = vsel %vm1765_vm5, %v9676_v60, 0.0 }
 0x45f   : > { %6819 = vpow2.f32 %v1912_v41  ;;  %1983 = vadd.xlane.f32.xlu1 %v1982_v26 }
 0x460   : > { %6821 = vpow2.f32 %v1934_v21 }
 0x462   : > { %v1831_v34 = vpop.xlane.xlu1 %1830  ;;  %v1798_v47 = vpop.xlane.xlu0 %1797 }
 0x463   : > { %v1883_v23 = vsub.f32 %v9501_v17, %v1831_v34  ;;  %v1783_v8 = vpop.xlane.xlu2 %1782  ;;  %v1872_v38 = vsub.f32 %v9509_v1, %v1798_v47 }
 0x464   : > { %v1867_v10 = vsub.f32 %v9506_v45, %v1783_v8 }
 0x465   : > { %v9682_v28 = vpop.eup %6819  ;;  %v1936_v54 = vmul.f32 1.442695, %v1883_v23  ;;  %v1914_v55 = vmul.f32 1.442695, %v1872_v38 }
 0x466   : > { %v9684_v32 = vpop.eup %6821  ;;  %v1985_v62 = vsel %vm1765_vm5, %v9682_v28, 0.0  ;;  %v1904_v17 = vmul.f32 1.442695, %v1867_v10 }
 0x467   : > { %6823 = vpow2.f32 %v1936_v54  ;;  %1986 = vadd.xlane.f32.xlu0 %v1985_v62  ;;  %v2018_v19 = vsel %vm1765_vm5, %v9684_v32, 0.0 }
 0x468   : > { %2019 = vadd.xlane.f32.xlu1 %v2018_v19  ;;  %6825 = vpow2.f32 %v1914_v55 }
 0x469   : > { %6827 = vpow2.f32 %v1904_v17 }
 0x46a   : > { %v1786_v1 = vpop.xlane.xlu1 %1785  ;;  %v1834_v11 = vpop.xlane.xlu0 %1833 }
 0x46b   : > { %v1868_v41 = vsub.f32 %v9527_v20, %v1786_v1  ;;  %v1801_v21 = vpop.xlane.xlu2 %1800  ;;  %v1884_v26 = vsub.f32 %v9524_v14, %v1834_v11 }
 0x46c   : > { %v1873_v38 = vsub.f32 %v9530_v7, %v1801_v21 }
 0x46d   : > { %v9693_v34 = vpop.eup %6823  ;;  %v1906_v45 = vmul.f32 1.442695, %v1868_v41  ;;  %v1938_v47 = vmul.f32 1.442695, %v1884_v26 }
 0x46e   : > { %v2021_v23 = vsel %vm1765_vm5, %v9693_v34, 0.0  ;;  %v9697_v8 = vpop.eup %6825  ;;  %v1916_v55 = vmul.f32 1.442695, %v1873_v38 }
 0x46f   : > { %6829 = vpow2.f32 %v1906_v45  ;;  %v1988_v20 = vsel %vm1765_vm5, %v9697_v8, 0.0  ;;  %v9703_v19 = vpop.eup %6827 }
 0x470   : > { %2022 = vadd.xlane.f32.xlu1 %v2021_v23  ;;  %6831 = vpow2.f32 %v1938_v47  ;;  %1989 = vadd.xlane.f32.xlu2 %v1988_v20 }
 0x471   : > { %6833 = vpow2.f32 %v1916_v55 }
 0x472   : > { %v1804_v14 = vpop.xlane.xlu1 %1803  ;;  %v1789_v54 = vpop.xlane.xlu0 %1788 }
 0x473   : > { %v1837_v10 = vpop.xlane.xlu2 %1836  ;;  %v1869_v62 = vsub.f32 %v9547_v13, %v1789_v54  ;;  %v1874_v7 = vsub.f32 %v9553_v52, %v1804_v14  ;;  %v1973_v13 = vsel %vm1765_vm5, %v9703_v19, 0.0 }
 0x474   : > { %v1885_v17 = vsub.f32 %v9550_v43, %v1837_v10 }
 0x475   : > { %v9706_v1 = vpop.eup %6829  ;;  %v1908_v11 = vmul.f32 1.442695, %v1869_v62  ;;  %v1918_v45 = vmul.f32 1.442695, %v1874_v7 }
 0x476   : > { %v1940_v41 = vmul.f32 1.442695, %v1885_v17  ;;  %v1976_v21 = vsel %vm1765_vm5, %v9706_v1, 0.0  ;;  %v9711_v26 = vpop.eup %6831 }
 0x477   : > { %v2024_v43 = vsel %vm1765_vm5, %v9711_v26, 0.0  ;;  %v9719_v20 = vpop.eup %6833 }
 0x478   : > { %6835 = vpow2.f32 %v1940_v41  ;;  %1977 = vadd.xlane.f32.xlu1 %v1976_v21  ;;  %1974 = vadd.xlane.f32.xlu2 %v1973_v13  ;;  %v1991_v17 = vsel %vm1765_vm5, %v9719_v20, 0.0 }
 0x479   : > { %6837 = vpow2.f32 %v1908_v11  ;;  %2025 = vadd.xlane.f32.xlu0 %v2024_v43 }
 0x47a   : > { %v1840_v52 = vpop.xlane.xlu1 %1839  ;;  %v1807_v47 = vpop.xlane.xlu0 %1806  ;;  %6839 = vpow2.f32 %v1918_v45 }
 0x47b   : > { %v1886_v23 = vsub.f32 %v9568_v40, %v1840_v52  ;;  %v1875_v38 = vsub.f32 %v9571_v4, %v1807_v47 }
 0x47d   : > { %v1942_v14 = vmul.f32 1.442695, %v1886_v23  ;;  %v1920_v54 = vmul.f32 1.442695, %v1875_v38 }
 0x47e   : > { %v9721_v55 = vpop.eup %6835 }
 0x47f   : > { %v9723_v10 = vpop.eup %6837  ;;  %6841 = vpow2.f32 %v1942_v14  ;;  %v2027_v62 = vsel %vm1765_vm5, %v9721_v55, 0.0 }
 0x480   : > { %6843 = vpow2.f32 %v1920_v54  ;;  %v1979_v4 = vsel %vm1765_vm5, %v9723_v10, 0.0  ;;  %2028 = vadd.xlane.f32.xlu2 %v2027_v62  ;;  %v9733_v21 = vpop.eup %6839 }
 0x481   : > { %1992 = vadd.xlane.f32.xlu0 %v1991_v17  ;;  %1980 = vadd.xlane.f32.xlu1 %v1979_v4 }
 0x482   : > { %v1810_v40 = vpop.xlane.xlu2 %1809  ;;  %v1843_v11 = vpop.xlane.xlu0 %1842 }
 0x483   : > { %v1876_v7 = vsub.f32 %v9586_v15, %v1810_v40  ;;  %v1887_v41 = vsub.f32 %v9583_v31, %v1843_v11  ;;  %v1994_v15 = vsel %vm1765_vm5, %v9733_v21, 0.0 }
 0x485   : > { %v9735_v13 = vpop.eup %6841  ;;  %v1922_v43 = vmul.f32 1.442695, %v1876_v7  ;;  %v1944_v45 = vmul.f32 1.442695, %v1887_v41 }
 0x486   : > { %v9737_v52 = vpop.eup %6843  ;;  %v2030_v47 = vsel %vm1765_vm5, %v9735_v13, 0.0 }
 0x487   : > { %6845 = vpow2.f32 %v1922_v43  ;;  %v1997_v23 = vsel %vm1765_vm5, %v9737_v52, 0.0 }
 0x488   : > { %6847 = vpow2.f32 %v1944_v45  ;;  %1995 = vadd.xlane.f32.xlu2 %v1994_v15 }
 0x489   : > { %2031 = vadd.xlane.f32.xlu0 %v2030_v47  ;;  %1998 = vadd.xlane.f32.xlu1 %v1997_v23 }
 0x48a   : > { %v1813_v31 = vpop.xlane.xlu1 %1812  ;;  %v1855_v38 = vpop.xlane.xlu0 %1854 }
 0x48b   : > { %v1877_v14 = vsub.f32 %v9601_v33, %v1813_v31  ;;  %v1846_v54 = vpop.xlane.xlu2 %1845 }
 0x48c   : > { %v1888_v62 = vsub.f32 %v9598_v0, %v1846_v54 }
 0x48d   : > { %v9747_v17 = vpop.eup %6845  ;;  %v1924_v4 = vmul.f32 1.442695, %v1877_v14  ;;  %v1891_v14 = vsub.f32 %v9594_v51, %v1855_v38 }
 0x48e   : > { %v9749_v40 = vpop.eup %6847  ;;  %v1946_v11 = vmul.f32 1.442695, %v1888_v62  ;;  %v2000_v7 = vsel %vm1765_vm5, %v9747_v17, 0.0 }
 0x48f   : > { %6849 = vpow2.f32 %v1924_v4  ;;  %v2033_v41 = vsel %vm1765_vm5, %v9749_v40, 0.0  ;;  %v1952_v4 = vmul.f32 1.442695, %v1891_v14 }
 0x490   : > { %6851 = vpow2.f32 %v1946_v11  ;;  %2001 = vadd.xlane.f32.xlu2 %v2000_v7 }
 0x491   : > { %2034 = vadd.xlane.f32.xlu1 %v2033_v41 }
 0x492   : > { %v1852_v33 = vpop.xlane.xlu1 %1851  ;;  %v2008_v43 = vpop.xlane.xlu0 %2007 }
 0x493   : > { %v1890_v0 = vsub.f32 %v9611_v44, %v1852_v33  ;;  %v1849_v45 = vpop.xlane.xlu2 %1848  ;;  %6853 = vrcp.f32 %v2008_v43 }
 0x494   : > { %v1889_v47 = vsub.f32 %v9616_v22, %v1849_v45 }
 0x495   : > { %v9757_v23 = vpop.eup %6849  ;;  %v1950_v15 = vmul.f32 1.442695, %v1890_v0 }
 0x496   : > { %v9759_v31 = vpop.eup %6851  ;;  %v1948_v54 = vmul.f32 1.442695, %v1889_v47  ;;  %v2003_v62 = vsel %vm1765_vm5, %v9757_v23, 0.0 }
 0x497   : > { %6855 = vpow2.f32 %v1950_v15  ;;  %2004 = vadd.xlane.f32.xlu0 %v2003_v62  ;;  %v2036_v44 = vsel %vm1765_vm5, %v9759_v31, 0.0 }
 0x498   : > { %6857 = vpow2.f32 %v1948_v54 }
 0x499   : > { %2037 = vadd.xlane.f32.xlu1 %v2036_v44  ;;  %v6854_v7 = vpop.eup %6853 }
 0x49a   : > { %v2011_v22 = vpop.xlane.xlu1 %2010  ;;  %v1861_v11 = vpop.xlane.xlu0 %1860  ;;  %v2102_v0 = vmul.f32 %v6854_v7, %v9613_v2 }
 0x49b   : > { %6859 = vrcp.f32 %v2011_v22  ;;  %v9766_v41 = vpop.xlane.xlu2 %1857  ;;  %v1893_v51 = vsub.f32 %v9628_v3, %v1861_v11 }
 0x49c   : > { %6861 = vpow2.f32 %v1952_v4  ;;  %v2134_v14 = vpack.c.bf16 %v2102_v0, %v2102_v0 }
 0x49d   : > { %v9769_v38 = vpop.eup %6855  ;;  %v1956_v33 = vmul.f32 1.442695, %v1893_v51 }
 0x49e   : > { %v9771_v43 = vpop.eup %6857  ;;  %v2042_v45 = vsel %vm1765_vm5, %v9769_v38, 0.0  ;;  %v2304_v11 = vunpack.c.l.b16 %v2134_v14 }
 0x49f   : > { %6863 = vpow2.f32 %v1956_v33  ;;  %v2039_v47 = vsel %vm1765_vm5, %v9771_v43, 0.0  ;;  %2043 = vadd.xlane.f32.xlu0 %v2042_v45 }
 0x4a0   : > { %2040 = vadd.xlane.f32.xlu2 %v2039_v47 }
 0x4a1   : > { %v6860_v15 = vpop.eup %6859 }
 0x4a2   : > { %v2103_v3 = vmul.f32 %v6860_v15, %v9630_v37  ;;  %v2014_v54 = vpop.xlane.xlu1 %2013  ;;  %v1960_v62 = vpop.xlane.xlu0 %1959 }
 0x4a3   : > { %6865 = vrcp.f32 %v2014_v54  ;;  %v2017_v44 = vpop.xlane.xlu2 %2016  ;;  %v9779_v4 = vpop.eup %6861 }
 0x4a4   : > { %v2135_v2 = vpack.c.bf16 %v2103_v3, %v2103_v3  ;;  %6867 = vrcp.f32 %v2017_v44  ;;  %v2045_v33 = vsel %vm1765_vm5, %v9779_v4, 0.0 }
 0x4a5   : > { %v9781_v22 = vpop.eup %6863  ;;  %6869 = vrcp.f32 %v1960_v62 }
 0x4a6   : > { %v2305_v7 = vunpack.c.l.b16 %v2135_v2  ;;  %v2051_v51 = vsel %vm1765_vm5, %v9781_v22, 0.0 }
 0x4a7   : > { %2052 = vadd.xlane.f32.xlu1 %v2051_v51 }
 0x4a8   : > { %v2312_v37 = vpack.c.b16 %v2305_v7, %v2304_v11  ;;  %2046 = vadd.xlane.f32.xlu2 %v2045_v33 }
 0x4a9   : > { %v6866_v0 = vpop.eup %6865 }
 0x4aa   : > { %v6868_v45 = vpop.eup %6867  ;;  %v1963_v47 = vpop.xlane.xlu1 %1962  ;;  %6218 = vmatmul.msk.bf16.vlgmr.msrb.gmra.mxu1 %vm1765_vm5, %v2312_v37  ;;  %v2104_v14 = vmul.f32 %v6866_v0, %v9646_v48 }
 0x4ab   : > { %v6870_v15 = vpop.eup %6869  ;;  %6871 = vrcp.f32 %v1963_v47  ;;  %3232 = vmatpush.bf16.msrb.mxu1 %v9503_v50  ;;  %v2105_v3 = vmul.f32 %v6868_v45, %v9648_v12  ;;  %v1969_v51 = vpop.xlane.xlu0 %1968 }
 0x4ac   : > { %v2086_v54 = vmul.f32 %v6870_v15, %v9644_v9  ;;  %v2136_v62 = vpack.c.bf16 %v2104_v14, %v2104_v14 }
 0x4ad   : > { %v2137_v44 = vpack.c.bf16 %v2105_v3, %v2105_v3 }
 0x4ae   : > { %v2118_v11 = vpack.c.bf16 %v2086_v54, %v2086_v54  ;;  %v2306_v48 = vunpack.c.l.b16 %v2136_v62  ;;  %v1892_v62 = vsub.f32 %v9633_v39, %v9766_v41 }
 0x4af   : > { %3233 = vmatpush.bf16.msrb.mxu1 %v9534_v46  ;;  %v2307_v12 = vunpack.c.l.b16 %v2137_v44 }
 0x4b0   : > { %v2158_v9 = vunpack.c.l.b16 %v2118_v11 }
 0x4b1   : > { %v6872_v2 = vpop.eup %6871  ;;  %v2313_v0 = vpack.c.b16 %v2307_v12, %v2306_v48 }
 0x4b2   : > { %v2087_v7 = vmul.f32 %v6872_v2, %v9657_v61  ;;  %v1966_v33 = vpop.xlane.xlu1 %1965  ;;  %v2627_v61 = vsel %vm1468_vm3, %v9296_v27, 0  ;;  %v2624_v27 = vsel %vm1468_vm3, %v9187_v58, 0  ;;  %v1954_v58 = vmul.f32 1.442695, %v1892_v62 }
 0x4b3   : > { %6873 = vrcp.f32 %v1966_v33  ;;  %3234 = vmatpush.bf16.msrb.mxu1 %v9532_v30  ;;  %3493 = vrot.lane.b32.xlu0 %v9017_v57, %s7573_s21  ;;  %v2618_v2 = vsel %vm1468_vm3, %v9326_v56, 0 }
 0x4b4   : > { %v2119_v50 = vpack.c.bf16 %v2087_v7, %v2087_v7  ;;  %6875 = vrcp.f32 %v1969_v51  ;;  %v1972_v7 = vpop.xlane.xlu2 %1971 }
 0x4b5   : > { %6877 = vpow2.f32 %v1954_v58 }
 0x4b6   : > { %v2159_v46 = vunpack.c.l.b16 %v2119_v50 }
 0x4b7   : > { %3235 = vmatpush.bf16.msrb.mxu1 %v9559_v6 }
 0x4b8   : > { %v2166_v37 = vpack.c.b16 %v2159_v46, %v2158_v9 }
 0x4b9   : > { %v6874_v45 = vpop.eup %6873 }
 0x4ba   : > { %6210 = vmatmul.msk.bf16.vlgmr.msra.gmra.mxu2 %vm1765_vm5, %v2166_v37  ;;  %6219 = vmatmul.msk.bf16.gmra.mxu1 %vm1765_vm5, %v2313_v0  ;;  %v6876_v30 = vpop.eup %6875  ;;  %v2088_v47 = vmul.f32 %v6874_v45, %v9669_v29  ;;  %v2621_v29 = vsel %vm1468_vm3, %v9304_v49, 0 }
 0x4bb   : > { %2633 = vmatpush.bf16.xpose.msra.mxu2 %v2627_v61  ;;  %v2089_v15 = vmul.f32 %v6876_v30, %v9659_v63  ;;  %v9827_v49 = vpop.eup %6877 }
 0x4bc   : > { %v2120_v6 = vpack.c.bf16 %v2088_v47, %v2088_v47  ;;  %v2048_v51 = vsel %vm1765_vm5, %v9827_v49, 0.0 }
 0x4bd   : > { %v2121_v14 = vpack.c.bf16 %v2089_v15, %v2089_v15 }
 0x4be   : > { %v2160_v3 = vunpack.c.l.b16 %v2120_v6 }
 0x4bf   : > { %v2161_v54 = vunpack.c.l.b16 %v2121_v14 }
 0x4c0   : > { %3279 = vrot.lane.b32.xlu2 %v9137_v24, %s7572_s12  ;;  %3418 = vrot.lane.b32.xlu1 %v9149_v42, %s7574_s14 }
 0x4c1   : > { %v2167_v63 = vpack.c.b16 %v2161_v54, %v2160_v3 }
 0x4c3   : > { %2634 = vmatpush.bf16.xpose.msra.mxu2 %v2624_v27 }
 0x4c8   : > { %3277 = vrot.lane.b32.xlu2 %v9125_v35, %s7572_s12  ;;  %3481 = vrot.lane.b32.xlu1 %v9159_v5, %s7574_s14 }
 0x4ca   : > { %6211 = vmatmul.msk.bf16.gmra.mxu2 %vm1765_vm5, %v2167_v63 }
 0x4cb   : > { %2635 = vmatpush.bf16.xpose.msra.mxu2 %v2621_v29 }
 0x4d0   : > { %3489 = vrot.lane.b32.xlu2 %v9159_v5, %s7573_s21  ;;  %3483 = vrot.lane.b32.xlu1 %v9232_v53, %s7574_s14 }
 0x4d2   : > { %v1984_v44 = vpop.xlane.xlu1 %1983 }
 0x4d3   : > { %2636 = vmatpush.bf16.xpose.msra.mxu2 %v2618_v2  ;;  %6879 = vrcp.f32 %v1984_v44 }
 0x4d8   : > { %3564 = vrot.lane.b32.xlu2 %v9083_v59, %s7573_s21 }
 0x4d9   : > { %v6880_v41 = vpop.eup %6879 }
 0x4da   : > { %v1987_v39 = vpop.xlane.xlu0 %1986  ;;  %v2094_v33 = vmul.f32 %v6880_v41, %v9676_v60  ;;  %v2696_v60 = vsel %vm1468_vm3, %v9330_v25, 0 }
 0x4db   : > { %v2020_v11 = vpop.xlane.xlu1 %2019  ;;  %6881 = vrcp.f32 %v1987_v39 }
 0x4dc   : > { %6883 = vrcp.f32 %v2020_v11  ;;  %v2126_v50 = vpack.c.bf16 %v2094_v33, %v2094_v33 }
 0x4dd   : > { %2049 = vadd.xlane.f32.xlu0 %v2048_v51 }
 0x4de   : > { %v2231_v0 = vunpack.c.l.b16 %v2126_v50 }
 0x4e1   : > { %v6882_v56 = vpop.eup %6881 }
 0x4e2   : > { %v2095_v48 = vmul.f32 %v6882_v56, %v9682_v28  ;;  %v6884_v9 = vpop.eup %6883 }
 0x4e3   : > { %v2023_v12 = vpop.xlane.xlu1 %2022  ;;  %v1990_v37 = vpop.xlane.xlu2 %1989  ;;  %v2106_v61 = vmul.f32 %v6884_v9, %v9684_v32 }
 0x4e4   : > { %v2127_v46 = vpack.c.bf16 %v2095_v48, %v2095_v48  ;;  %6885 = vrcp.f32 %v2023_v12 }
 0x4e5   : > { %6887 = vrcp.f32 %v1972_v7  ;;  %v2138_v15 = vpack.c.bf16 %v2106_v61, %v2106_v61 }
 0x4e6   : > { %v2232_v45 = vunpack.c.l.b16 %v2127_v46 }
 0x4e7   : > { %v2308_v63 = vunpack.c.l.b16 %v2138_v15 }
 0x4e8   : > { %v2239_v30 = vpack.c.b16 %v2232_v45, %v2231_v0 }
 0x4ea   : > { %v6886_v47 = vpop.eup %6885  ;;  %6214 = vmatmul.msk.bf16.vlgmr.msra.gmra.mxu3 %vm1765_vm5, %v2239_v30 }
 0x4eb   : > { %v2107_v28 = vmul.f32 %v6886_v47, %v9693_v34  ;;  %v1978_v6 = vpop.xlane.xlu1 %1977  ;;  %2702 = vmatpush.bf16.xpose.msra.mxu3 %v2696_v60  ;;  %v1975_v27 = vpop.xlane.xlu2 %1974  ;;  %v2693_v34 = vsel %vm1468_vm3, %v9342_v36, 0 }
 0x4ec   : > { %v2026_v14 = vpop.xlane.xlu0 %2025  ;;  %v6888_v3 = vpop.eup %6887  ;;  %6889 = vrcp.f32 %v1975_v27 }
 0x4ed   : > { %v2139_v54 = vpack.c.bf16 %v2107_v28, %v2107_v28  ;;  %6891 = vrcp.f32 %v2026_v14  ;;  %v2090_v29 = vmul.f32 %v6888_v3, %v9661_v16  ;;  %v12318_v14 = vld [vmem:[#allocation31_spill] sm:$0xff] }
 0x4ee   : > { %6893 = vrcp.f32 %v1990_v37 }
 0x4ef   : > { %v2309_v32 = vunpack.c.l.b16 %v2139_v54  ;;  %6895 = vrcp.f32 %v1978_v6  ;;  %v2122_v39 = vpack.c.bf16 %v2090_v29, %v2090_v29 }
 0x4f1   : > { %3491 = vrot.lane.b32.xlu0 %v9232_v53, %s7573_s21  ;;  %v2314_v25 = vpack.c.b16 %v2309_v32, %v2308_v63  ;;  %v2162_v36 = vunpack.c.l.b16 %v2122_v39 }
 0x4f2   : > { %v6890_v62 = vpop.eup %6889 }
 0x4f3   : > { %6220 = vmatmul.msk.bf16.gmra.mxu1 %vm1765_vm5, %v2314_v25  ;;  %2703 = vmatpush.bf16.xpose.msra.mxu3 %v2693_v34  ;;  %v2029_v58 = vpop.xlane.xlu2 %2028  ;;  %v2091_v2 = vmul.f32 %v6890_v62, %v9703_v19  ;;  %v6892_v41 = vpop.eup %6891  ;;  %v12317_v19 = vld [vmem:[#allocation32_spill] sm:$0xff] }
 0x4f4   : > { %v1993_v44 = vpop.xlane.xlu0 %1992  ;;  %6897 = vrcp.f32 %v2029_v58  ;;  %v1981_v16 = vpop.xlane.xlu1 %1980  ;;  %v2108_v51 = vmul.f32 %v6892_v41, %v9711_v26  ;;  %v2690_v12 = vsel %vm1468_vm3, %v12317_v19, 0 }
 0x4f5   : > { %v6894_v11 = vpop.eup %6893  ;;  %6899 = vrcp.f32 %v1981_v16  ;;  %v2123_v7 = vpack.c.bf16 %v2091_v2, %v2091_v2 }
 0x4f6   : > { %6901 = vrcp.f32 %v1993_v44  ;;  %v2096_v56 = vmul.f32 %v6894_v11, %v9697_v8  ;;  %v6896_v50 = vpop.eup %6895  ;;  %v2140_v37 = vpack.c.bf16 %v2108_v51, %v2108_v51 }
 0x4f7   : > { %v2163_v33 = vunpack.c.l.b16 %v2123_v7  ;;  %v2092_v27 = vmul.f32 %v6896_v50, %v9706_v1 }
 0x4f8   : > { %v2128_v30 = vpack.c.bf16 %v2096_v56, %v2096_v56  ;;  %v2310_v28 = vunpack.c.l.b16 %v2140_v37 }
 0x4f9   : > { %3562 = vrot.lane.b32.xlu0 %v9043_v18, %s7573_s21  ;;  %v2168_v48 = vpack.c.b16 %v2163_v33, %v2162_v36 }
 0x4fa   : > { %v6898_v9 = vpop.eup %6897  ;;  %v2233_v3 = vunpack.c.l.b16 %v2128_v30 }
 0x4fb   : > { %2704 = vmatpush.bf16.xpose.msra.mxu3 %v2690_v12  ;;  %v6900_v46 = vpop.eup %6899  ;;  %v2109_v0 = vmul.f32 %v6898_v9, %v9721_v55  ;;  %v1996_v45 = vpop.xlane.xlu2 %1995  ;;  %6212 = vmatmul.msk.bf16.gmra.mxu2 %vm1765_vm5, %v2168_v48  ;;  %v2687_v55 = vsel %vm1468_vm3, %v12318_v14, 0 }
 0x4fc   : > { %v6902_v26 = vpop.eup %6901  ;;  %v1999_v61 = vpop.xlane.xlu1 %1998  ;;  %6903 = vrcp.f32 %v1996_v45  ;;  %v2093_v60 = vmul.f32 %v6900_v46, %v9723_v10 }
 0x4fd   : > { %v2141_v47 = vpack.c.bf16 %v2109_v0, %v2109_v0  ;;  %v2097_v8 = vmul.f32 %v6902_v26, %v9719_v20  ;;  %6905 = vrcp.f32 %v1999_v61  ;;  %v2032_v25 = vpop.xlane.xlu0 %2031  ;;  %v2124_v20 = vpack.c.bf16 %v2092_v27, %v2092_v27  ;;  %v12320_v0 = vld [vmem:[#allocation49_spill] sm:$0xff] }
 0x4fe   : > { %v2125_v32 = vpack.c.bf16 %v2093_v60, %v2093_v60 }
 0x4ff   : > { %v2129_v15 = vpack.c.bf16 %v2097_v8, %v2097_v8  ;;  %v2311_v6 = vunpack.c.l.b16 %v2141_v47  ;;  %v2164_v58 = vunpack.c.l.b16 %v2124_v20 }
 0x500   : > { %v2165_v1 = vunpack.c.l.b16 %v2125_v32 }
 0x501   : > { %v2234_v54 = vunpack.c.l.b16 %v2129_v15  ;;  %v2315_v63 = vpack.c.b16 %v2311_v6, %v2310_v28  ;;  %v12321_v6 = vld [vmem:[#allocation42_spill] sm:$0xff] }
 0x502   : > { %v6904_v29 = vpop.eup %6903  ;;  %v2169_v39 = vpack.c.b16 %v2165_v1, %v2164_v58 }
 0x503   : > { %2705 = vmatpush.bf16.xpose.msra.mxu3 %v2687_v55  ;;  %v2240_v34 = vpack.c.b16 %v2234_v54, %v2233_v3  ;;  %6221 = vmatmul.msk.bf16.gmra.mxu1 %vm1765_vm5, %v2315_v63  ;;  %v6906_v10 = vpop.eup %6905  ;;  %v2098_v44 = vmul.f32 %v6904_v29, %v9733_v21  ;;  %v2002_v41 = vpop.xlane.xlu2 %2001  ;;  %v12322_v54 = vld [vmem:[#allocation46_spill] sm:$0xff]  ;;  %v12323_v29 = vld [vmem:[#allocation48_spill] sm:$0xff] }
 0x504   : > { %v2035_v62 = vpop.xlane.xlu1 %2034  ;;  %v2099_v2 = vmul.f32 %v6906_v10, %v9737_v52  ;;  %v12319_v52 = vld [vmem:[#allocation55_spill] sm:$0xff] }
 0x505   : > { %6907 = vrcp.f32 %v2035_v62  ;;  %6215 = vmatmul.msk.bf16.gmra.mxu3 %vm1765_vm5, %v2240_v34  ;;  %v2130_v7 = vpack.c.bf16 %v2098_v44, %v2098_v44  ;;  %v3519_v12 = vsel %vm1468_vm3, %v12319_v52, 0  ;;  %v12324_v34 = vld [vmem:[#allocation47_spill] sm:$0xff]  ;;  %v12325_v62 = vld [vmem:[#allocation50_spill] sm:$0xff] }
 0x506   : > { %6909 = vrcp.f32 %v2032_v25  ;;  %v2131_v51 = vpack.c.bf16 %v2099_v2, %v2099_v2 }
 0x507   : > { %v2235_v50 = vunpack.c.l.b16 %v2130_v7  ;;  %v12327_v7 = vld [vmem:[#allocation27_spill] sm:$0xff] }
 0x508   : > { %v2236_v48 = vunpack.c.l.b16 %v2131_v51 }
 0x50a   : > { %v2005_v11 = vpop.xlane.xlu0 %2004  ;;  %v2241_v37 = vpack.c.b16 %v2236_v48, %v2235_v50  ;;  %v12329_v50 = vld [vmem:[#allocation36_spill] sm:$0xff] }
 0x50b   : > { %v6908_v16 = vpop.eup %6907  ;;  %6213 = vmatmul.msk.bf16.gmra.mxu2 %vm1765_vm5, %v2169_v39  ;;  %6911 = vrcp.f32 %v2005_v11  ;;  %v12326_v11 = vld [vmem:[#allocation20_spill] sm:$0xff] }
 0x50c   : > { %v6910_v36 = vpop.eup %6909  ;;  %v2111_v33 = vmul.f32 %v6908_v16, %v9749_v40  ;;  %6913 = vrcp.f32 %v2002_v41  ;;  %v2038_v46 = vpop.xlane.xlu1 %2037 }
 0x50d   : > { %v2110_v56 = vmul.f32 %v6910_v36, %v9735_v13 }
 0x50e   : > { %v2143_v21 = vpack.c.bf16 %v2111_v33, %v2111_v33 }
 0x50f   : > { %v2142_v9 = vpack.c.bf16 %v2110_v56, %v2110_v56  ;;  %v12328_v56 = vld [vmem:[#allocation37_spill] sm:$0xff] }
 0x510   : > { %v2378_v40 = vunpack.c.l.b16 %v2143_v21 }
 0x511   : > { %v6912_v45 = vpop.eup %6911  ;;  %v2377_v26 = vunpack.c.l.b16 %v2142_v9  ;;  %v12332_v9 = vld [vmem:[#allocation39_spill] sm:$0xff] }
 0x512   : > { %v6914_v13 = vpop.eup %6913  ;;  %v2101_v61 = vmul.f32 %v6912_v45, %v9757_v23  ;;  %v2044_v28 = vpop.xlane.xlu0 %2043 }
 0x513   : > { %v2041_v19 = vpop.xlane.xlu2 %2040  ;;  %6230 = vmatmul.msk.bf16.vlgmr.msra.gmra.mxu1 %vm1468_vm3, %v12320_v0  ;;  %v2385_v30 = vpack.c.b16 %v2378_v40, %v2377_v26  ;;  %v2100_v47 = vmul.f32 %v6914_v13, %v9747_v17 }
 0x514   : > { %6915 = vrcp.f32 %v2041_v19  ;;  %3525 = vmatpush.bf16.xpose.msra.mxu1 %v3519_v12  ;;  %v2133_v60 = vpack.c.bf16 %v2101_v61, %v2101_v61 }
 0x515   : > { %6216 = vmatmul.msk.bf16.gmra.mxu3 %vm1765_vm5, %v2241_v37  ;;  %6917 = vrcp.f32 %v2038_v46  ;;  %v2132_v27 = vpack.c.bf16 %v2100_v47, %v2100_v47 }
 0x516   : > { %v2238_v55 = vunpack.c.l.b16 %v2133_v60 }
 0x517   : > { %v2237_v63 = vunpack.c.l.b16 %v2132_v27 }
 0x519   : > { %v2242_v17 = vpack.c.b16 %v2238_v55, %v2237_v63  ;;  %v12340_v55 = vld [vmem:[#allocation40_spill] sm:$0xff] }
 0x51a   : > { %v6916_v8 = vpop.eup %6915 }
 0x51b   : > { %6222 = vmatmul.msk.bf16.vlgmr.msrb.gmra.mxu2 %vm1765_vm5, %v2385_v30  ;;  %v6918_v15 = vpop.eup %6917  ;;  %v2113_v14 = vmul.f32 %v6916_v8, %v9771_v43  ;;  %v2047_v23 = vpop.xlane.xlu2 %2046 }
 0x51c   : > { %6360 = vmatpush.bf16.msrb.mxu2 %v12321_v6  ;;  %v2112_v3 = vmul.f32 %v6918_v15, %v9759_v31  ;;  %6919 = vrcp.f32 %v2047_v23  ;;  %v12336_v15 = vld [vmem:[#allocation44_spill] sm:$0xff]  ;;  %v12343_v23 = vld [vmem:[#allocation29_spill] sm:$0xff] }
 0x51d   : > { %v2145_v32 = vpack.c.bf16 %v2113_v14, %v2113_v14  ;;  %6921 = vrcp.f32 %v2044_v28 }
 0x51e   : > { %v2144_v25 = vpack.c.bf16 %v2112_v3, %v2112_v3  ;;  %v12341_v3 = vld [vmem:[#allocation51_spill] sm:$0xff] }
 0x51f   : > { %v2380_v10 = vunpack.c.l.b16 %v2145_v32 }
 0x520   : > { %6361 = vmatpush.bf16.msrb.mxu2 %v12322_v54  ;;  %v2379_v31 = vunpack.c.l.b16 %v2144_v25  ;;  %v12342_v54 = vld [vmem:[#allocation54_spill] sm:$0xff]  ;;  %v12348_v25 = vld [vmem:[#allocation41_spill] sm:$0xff] }
 0x522   : > { %v2386_v1 = vpack.c.b16 %v2380_v10, %v2379_v31  ;;  %v6920_v58 = vpop.eup %6919 }
 0x523   : > { %6231 = vmatmul.msk.bf16.gmra.mxu1 %vm1468_vm3, %v12323_v29  ;;  %v6922_v44 = vpop.eup %6921  ;;  %v2115_v2 = vmul.f32 %v6920_v58, %v9779_v4  ;;  %v3280_v12 = vpop.permute.xlu2 %3279  ;;  %v12355_v58 = vld [vmem:[#allocation30_spill] sm:$0xff] }
 0x524   : > { %6362 = vmatpush.bf16.msrb.mxu2 %v12324_v34  ;;  %v2114_v39 = vmul.f32 %v6922_v44, %v9769_v38  ;;  %v2053_v38 = vpop.xlane.xlu1 %2052 }
 0x525   : > { %v3494_v20 = vpop.permute.xlu0 %3493  ;;  %6217 = vmatmul.msk.bf16.gmra.mxu3 %vm1765_vm5, %v2242_v17  ;;  %v2147_v41 = vpack.c.bf16 %v2115_v2, %v2115_v2  ;;  %6923 = vrcp.f32 %v2053_v38  ;;  %v9974_v38 = vld [vmem:[#allocation8 + $0x50] sm:$0xff] }
 0x526   : > { %v3516_v43 = vsel %vm1468_vm3, %v3494_v20, 0  ;;  %v2146_v16 = vpack.c.bf16 %v2114_v39, %v2114_v39 }
 0x527   : > { %3526 = vmatpush.bf16.xpose.msra.mxu1 %v3516_v43  ;;  %v2382_v51 = vunpack.c.l.b16 %v2147_v41  ;;  %v9895_v4 = vpop.f32.mrf.mxu1  ;;  %v12351_v43 = vld [vmem:[#allocation35_spill] sm:$0xff] }
 0x528   : > { %6363 = vmatpush.bf16.msrb.mxu2 %v12325_v62  ;;  %v2381_v36 = vunpack.c.l.b16 %v2146_v16  ;;  %12330 = vst [vmem:[#allocation32_spill] sm:$0xff] %v9895_v4 }
 0x52a   : > { %v2387_v33 = vpack.c.b16 %v2382_v51, %v2381_v36 }
 0x52b   : > { %6223 = vmatmul.msk.bf16.gmra.mxu2 %vm1765_vm5, %v2386_v1  ;;  %v6924_v21 = vpop.eup %6923  ;;  %v3278_v47 = vpop.permute.xlu2 %3277  ;;  %v9948_v1 = vld [vmem:[#allocation8 + $0x40] sm:$0xff] }
 0x52c   : > { %v2117_v19 = vmul.f32 %v6924_v21, %v9781_v22 }
 0x52e   : > { %v2149_v37 = vpack.c.bf16 %v2117_v19, %v2117_v19 }
 0x52f   : > { %v9898_v52 = vpop.f32.mrf.mxu1 }
 0x530   : > { %12331 = vst [vmem:[#allocation31_spill] sm:$0xff] %v9898_v52  ;;  %v2384_v26 = vunpack.c.l.b16 %v2149_v37  ;;  %v9987_v37 = vld [vmem:[#allocation8 + $0x58] sm:$0xff] }
 0x533   : > { %6232 = vmatmul.msk.bf16.gmra.mxu1 %vm1468_vm3, %v12326_v11  ;;  %v3490_v28 = vpop.permute.xlu2 %3489  ;;  %v12358_v11 = vld [vmem:[#allocation43_spill] sm:$0xff] }
 0x534   : > { %v3510_v6 = vsel %vm1468_vm3, %v3490_v28, 0 }
 0x535   : > { %6226 = vmatmul.msk.bf16.vlgmr.msrb.gmra.mxu3 %vm1468_vm3, %v12327_v7  ;;  %v9963_v7 = vld [vmem:[#allocation8 + $0x48] sm:$0xff] }
 0x537   : > { %v9905_v61 = vpop.f32.mrf.mxu1 }
 0x538   : > { %12334 = vst [vmem:[#allocation49_spill] sm:$0xff] %v9905_v61 }
 0x53b   : > { %6224 = vmatmul.msk.bf16.gmra.mxu2 %vm1765_vm5, %v2387_v33 }
 0x53d   : > { %v9903_v45 = vpop.f32.mrf.mxu2 }
 0x53e   : > { %12333 = vst [vmem:[#allocation55_spill] sm:$0xff] %v9903_v45 }
 0x543   : > { %6233 = vmatmul.msk.bf16.gmra.mxu1 %vm1468_vm3, %v12328_v56 }
 0x545   : > { %6227 = vmatmul.msk.bf16.gmra.mxu3 %vm1468_vm3, %v12329_v50  ;;  %v9908_v8 = vpop.f32.mrf.mxu2 }
 0x546   : > { %12335 = vst [vmem:[#allocation42_spill] sm:$0xff] %v9908_v8 }
 0x54d   : > { %v9916_v27 = vpop.f32.mrf.mxu2 }
 0x54e   : > { %12338 = vst [vmem:[#allocation48_spill] sm:$0xff] %v9916_v27 }
 0x550   : > { %v2050_v48 = vpop.xlane.xlu0 %2049 }
 0x551   : > { %6925 = vrcp.f32 %v2050_v48  ;;  %v12361_v48 = vld [vmem:[#allocation38_spill] sm:$0xff] }
 0x555   : > { %6228 = vmatmul.msk.bf16.gmra.mxu3 %vm1468_vm3, %v12332_v9  ;;  %v9928_v32 = vpop.f32.mrf.mxu2 }
 0x556   : > { %12345 = vst [vmem:[#allocation20_spill] sm:$0xff] %v9928_v32 }
 0x557   : > { %v6926_v46 = vpop.eup %6925 }
 0x558   : > { %v2116_v0 = vmul.f32 %v6926_v46, %v9827_v49  ;;  %v9913_v49 = vpop.f32.mrf.mxu1  ;;  %v12363_v46 = vld [vmem:[#allocation45_spill] sm:$0xff] }
 0x559   : > { %12337 = vst [vmem:[#allocation46_spill] sm:$0xff] %v9913_v49 }
 0x55a   : > { %v2148_v40 = vpack.c.bf16 %v2116_v0, %v2116_v0 }
 0x55c   : > { %v2383_v13 = vunpack.c.l.b16 %v2148_v40 }
 0x55e   : > { %v2388_v30 = vpack.c.b16 %v2384_v26, %v2383_v13 }
 0x560   : > { %6225 = vmatmul.msk.bf16.gmra.mxu2 %vm1765_vm5, %v2388_v30 }
 0x563   : > { %v3492_v22 = vpop.permute.xlu0 %3491 }
 0x564   : > { %v3513_v60 = vsel %vm1468_vm3, %v3492_v22, 0 }
 0x565   : > { %3527 = vmatpush.bf16.xpose.msra.mxu1 %v3513_v60  ;;  %6229 = vmatmul.msk.bf16.gmra.mxu3 %vm1468_vm3, %v12336_v15 }
 0x56d   : > { %3528 = vmatpush.bf16.xpose.msra.mxu1 %v3510_v6  ;;  %v9926_v63 = vpop.f32.mrf.mxu3 }
 0x56e   : > { %12344 = vst [vmem:[#allocation50_spill] sm:$0xff] %v9926_v63 }
 0x570   : > { %v9918_v14 = vpop.f32.mrf.mxu1  ;;  %6234 = vmatmul.msk.bf16.vlgmr.msra.gmra.mxu2 %vm1468_vm3, %v12340_v55  ;;  %v10009_v55 = vld [vmem:[#allocation8 + $0x68] sm:$0xff] }
 0x571   : > { %12339 = vst [vmem:[#allocation47_spill] sm:$0xff] %v9918_v14  ;;  %3305 = vmatpush.bf16.msra.mxu2 %v12341_v3 }
 0x575   : > { %3306 = vmatpush.bf16.msra.mxu2 %v12342_v54  ;;  %6238 = vmatmul.msk.bf16.vlgmr.msra.gmra.mxu3 %vm1468_vm3, %v12343_v23  ;;  %v9936_v34 = vpop.f32.mrf.mxu3 }
 0x576   : > { %12349 = vst [vmem:[#allocation36_spill] sm:$0xff] %v9936_v34 }
 0x578   : > { %v9930_v17 = vpop.f32.mrf.mxu1 }
 0x579   : > { %12346 = vst [vmem:[#allocation27_spill] sm:$0xff] %v9930_v17  ;;  %3307 = vmatpush.bf16.msra.mxu2 %v3280_v12 }
 0x57d   : > { %3308 = vmatpush.bf16.msra.mxu2 %v3278_v47  ;;  %v9998_v47 = vld [vmem:[#allocation8 + $0x60] sm:$0xff] }
 0x57e   : > { %v9932_v29 = vpop.f32.mrf.mxu2 }
 0x57f   : > { %12347 = vst [vmem:[#allocation37_spill] sm:$0xff] %v9932_v29 }
 0x580   : > { %6235 = vmatmul.msk.bf16.gmra.mxu2 %vm1468_vm3, %v12348_v25  ;;  %v9938_v20 = vpop.f32.mrf.mxu1 }
 0x581   : > { %12350 = vst [vmem:[#allocation39_spill] sm:$0xff] %v9938_v20 }
 0x585   : > { %6239 = vmatmul.msk.bf16.gmra.mxu3 %vm1468_vm3, %v12351_v43 }
 0x586   : > { %v9946_v62 = vpop.f32.mrf.mxu2 }
 0x587   : > { %12354 = vst [vmem:[#allocation51_spill] sm:$0xff] %v9946_v62 }
 0x588   : > { %v9942_v10 = vpop.f32.mrf.mxu3  ;;  %v9944_v31 = vpop.f32.mrf.mxu1 }
 0x589   : > { %12352 = vst [vmem:[#allocation44_spill] sm:$0xff] %v9942_v10 }
 0x58a   : > { %12353 = vst [vmem:[#allocation40_spill] sm:$0xff] %v9944_v31 }
 0x58e   : > { %v9957_v41 = vpop.f32.mrf.mxu2 }
 0x58f   : > { %12357 = vst [vmem:[#allocation29_spill] sm:$0xff] %v9957_v41 }
 0x590   : > { %6236 = vmatmul.msk.bf16.gmra.mxu2 %vm1468_vm3, %v12355_v58  ;;  %v9952_v44 = vpop.f32.mrf.mxu3  ;;  %v2569_v2 = vpop.f32.mrf.mxu1 }
 0x591   : > { %12356 = vst [vmem:[#allocation54_spill] sm:$0xff] %v9952_v44  ;;  %v9955_v39 = vadd.f32 %v2569_v2, %v9948_v1 }
 0x593   : > { %v2751_v16 = vsel %vm1765_vm5, %v9955_v39, -inf }
 0x594   : > { %2752 = vmax.xlane.f32.xlu2 %v2751_v16  ;;  %v10023_v16 = vld [vmem:[#allocation8 + $0x70] sm:$0xff] }
 0x595   : > { %6240 = vmatmul.msk.bf16.gmra.mxu3 %vm1468_vm3, %v12358_v11 }
 0x596   : > { %v9972_v50 = vpop.f32.mrf.mxu2 }
 0x597   : > { %12360 = vst [vmem:[#allocation35_spill] sm:$0xff] %v9972_v50 }
 0x598   : > { %v9965_v51 = vpop.f32.mrf.mxu3  ;;  %v2571_v36 = vpop.f32.mrf.mxu1 }
 0x599   : > { %12359 = vst [vmem:[#allocation41_spill] sm:$0xff] %v9965_v51  ;;  %v9968_v33 = vadd.f32 %v2571_v36, %v9963_v7 }
 0x59b   : > { %v2754_v56 = vsel %vm1765_vm5, %v9968_v33, -inf }
 0x59c   : > { %2755 = vmax.xlane.f32.xlu1 %v2754_v56 }
 0x59e   : > { %v9989_v0 = vpop.f32.mrf.mxu2 }
 0x59f   : > { %12364 = vst [vmem:[#allocation43_spill] sm:$0xff] %v9989_v0 }
 0x5a0   : > { %6237 = vmatmul.msk.bf16.gmra.mxu2 %vm1468_vm3, %v12361_v48  ;;  %v9978_v21 = vpop.f32.mrf.mxu3  ;;  %v2574_v19 = vpop.f32.mrf.mxu1 }
 0x5a1   : > { %12362 = vst [vmem:[#allocation30_spill] sm:$0xff] %v9978_v21  ;;  %v9981_v12 = vadd.f32 %v2574_v19, %v9974_v38 }
 0x5a3   : > { %v2757_v9 = vsel %vm1765_vm5, %v9981_v12, -inf }
 0x5a4   : > { %2758 = vmax.xlane.f32.xlu1 %v2757_v9 }
 0x5a5   : > { %6241 = vmatmul.msk.bf16.gmra.mxu3 %vm1468_vm3, %v12363_v46 }
 0x5a6   : > { %v10005_v28 = vpop.f32.mrf.mxu2 }
 0x5a7   : > { %12367 = vst [vmem:[#allocation57_spill] sm:$0xff] %v10005_v28 }
 0x5a8   : > { %v9991_v40 = vpop.f32.mrf.mxu3  ;;  %v2576_v13 = vpop.f32.mrf.mxu1 }
 0x5a9   : > { %12365 = vst [vmem:[#allocation38_spill] sm:$0xff] %v9991_v40  ;;  %v9994_v26 = vadd.f32 %v2576_v13, %v9987_v37 }
 0x5ab   : > { %v2760_v30 = vsel %vm1765_vm5, %v9994_v26, -inf }
 0x5ac   : > { %2761 = vmax.xlane.f32.xlu2 %v2760_v30 }
 0x5ae   : > { %v10021_v2 = vpop.f32.mrf.mxu2 }
 0x5af   : > { %12368 = vst [vmem:[#allocation58_spill] sm:$0xff] %v10021_v2 }
 0x5b0   : > { %v10000_v22 = vpop.f32.mrf.mxu3  ;;  %v2579_v60 = vpop.f32.mrf.mxu1 }
 0x5b1   : > { %12366 = vst [vmem:[#allocation45_spill] sm:$0xff] %v10000_v22  ;;  %v10003_v15 = vadd.f32 %v2579_v60, %v9998_v47 }
 0x5b3   : > { %v2763_v6 = vsel %vm1765_vm5, %v10003_v15, -inf }
 0x5b4   : > { %2764 = vmax.xlane.f32.xlu1 %v2763_v6  ;;  %v10042_v6 = vld [vmem:[#allocation8 + $0x78] sm:$0xff] }
 0x5b6   : > { %v10035_v46 = vpop.f32.mrf.mxu2 }
 0x5b7   : > { %12369 = vst [vmem:[#allocation59_spill] sm:$0xff] %v10035_v46 }
 0x5b8   : > { %v2500_v3 = vpop.f32.mrf.mxu3  ;;  %v2581_v54 = vpop.f32.mrf.mxu1 }
 0x5b9   : > { %v10012_v23 = vadd.f32 %v2500_v3, %v9948_v1  ;;  %v10015_v25 = vadd.f32 %v2581_v54, %v10009_v55 }
 0x5bb   : > { %v2766_v43 = vsel %vm1765_vm5, %v10015_v25, -inf  ;;  %v2727_v58 = vsel %vm1765_vm5, %v10012_v23, -inf }
 0x5bc   : > { %2767 = vmax.xlane.f32.xlu2 %v2766_v43  ;;  %2728 = vmax.xlane.f32.xlu1 %v2727_v58 }
 0x5be   : > { %v10047_v43 = vpop.f32.mrf.mxu2 }
 0x5bf   : > { %12370 = vst [vmem:[#allocation60_spill] sm:$0xff] %v10047_v43 }
 0x5c0   : > { %v2502_v11 = vpop.f32.mrf.mxu3  ;;  %v2584_v36 = vpop.f32.mrf.mxu1 }
 0x5c1   : > { %v10026_v56 = vadd.f32 %v2502_v11, %v9963_v7  ;;  %v10029_v48 = vadd.f32 %v2584_v36, %v10023_v16 }
 0x5c3   : > { %v2730_v19 = vsel %vm1765_vm5, %v10026_v56, -inf  ;;  %v2769_v9 = vsel %vm1765_vm5, %v10029_v48, -inf }
 0x5c4   : > { %2731 = vmax.xlane.f32.xlu2 %v2730_v19  ;;  %2770 = vmax.xlane.f32.xlu1 %v2769_v9 }
 0x5c8   : > { %v2505_v13 = vpop.f32.mrf.mxu3  ;;  %v2586_v3 = vpop.f32.mrf.mxu1 }
 0x5c9   : > { %v10038_v30 = vadd.f32 %v2505_v13, %v9974_v38  ;;  %v10045_v54 = vadd.f32 %v2586_v3, %v10042_v6 }
 0x5cb   : > { %v2733_v60 = vsel %vm1765_vm5, %v10038_v30, -inf  ;;  %v2772_v36 = vsel %vm1765_vm5, %v10045_v54, -inf }
 0x5cc   : > { %2734 = vmax.xlane.f32.xlu0 %v2733_v60  ;;  %v10059_v60 = vpop.f32.mrf.mxu2 }
 0x5cd   : > { %12371 = vst [vmem:[#allocation61_spill] sm:$0xff] %v10059_v60 }
 0x5d0   : > { %v2507_v58 = vpop.f32.mrf.mxu3 }
 0x5d1   : > { %v10050_v11 = vadd.f32 %v2507_v58, %v9987_v37 }
 0x5d3   : > { %v2736_v19 = vsel %vm1765_vm5, %v10050_v11, -inf }
 0x5d4   : > { %2773 = vmax.xlane.f32.xlu0 %v2772_v36  ;;  %2737 = vmax.xlane.f32.xlu1 %v2736_v19 }
 0x5d8   : > { %v2510_v9 = vpop.f32.mrf.mxu3 }
 0x5d9   : > { %v10057_v13 = vadd.f32 %v2510_v9, %v9998_v47 }
 0x5db   : > { %v2739_v3 = vsel %vm1765_vm5, %v10057_v13, -inf }
 0x5dc   : > { %2740 = vmax.xlane.f32.xlu2 %v2739_v3 }
 0x5e0   : > { %v2512_v58 = vpop.f32.mrf.mxu3 }
 0x5e1   : > { %v10064_v43 = vadd.f32 %v2512_v58, %v10009_v55  ;;  %v10077_v58 = vpop.permute.xlu1 %3418 }
 0x5e3   : > { %v10066_v2 = vpop.f32.mrf.mxu2  ;;  %v2742_v36 = vsel %vm1765_vm5, %v10064_v43, -inf }
 0x5e4   : > { %12372 = vst [vmem:[#allocation62_spill] sm:$0xff] %v10066_v2  ;;  %2743 = vmax.xlane.f32.xlu0 %v2742_v36 }
 0x5e8   : > { %v2515_v19 = vpop.f32.mrf.mxu3 }
 0x5e9   : > { %v10071_v9 = vadd.f32 %v2515_v19, %v10023_v16 }
 0x5eb   : > { %v10073_v46 = vpop.f32.mrf.mxu2  ;;  %v2745_v60 = vsel %vm1765_vm5, %v10071_v9, -inf }
 0x5ec   : > { %12373 = vst [vmem:[#allocation63_spill] sm:$0xff] %v10073_v46  ;;  %2746 = vmax.xlane.f32.xlu2 %v2745_v60  ;;  %v10090_v60 = vpop.permute.xlu1 %3481 }
 0x5f0   : > { %v2517_v3 = vpop.f32.mrf.mxu3 }
 0x5f1   : > { %v10085_v19 = vadd.f32 %v2517_v3, %v10042_v6 }
 0x5f3   : > { %v2638_v0 = vpop.f32.mrf.mxu2 }
 0x5f4   : > { %v10080_v2 = vadd.f32 %v2638_v0, %v9948_v1  ;;  %v2748_v0 = vsel %vm1765_vm5, %v10085_v19, -inf  ;;  %v10106_v49 = vpop.permute.xlu1 %3483 }
 0x5f6   : > { %v2775_v36 = vsel %vm1765_vm5, %v10080_v2, -inf }
 0x5f7   : > { %2776 = vmax.xlane.f32.xlu0 %v2775_v36 }
 0x5f8   : > { %v2707_v28 = vpop.f32.mrf.mxu3 }
 0x5fb   : > { %v2640_v46 = vpop.f32.mrf.mxu2 }
 0x5fc   : > { %v10088_v20 = vadd.f32 %v2640_v46, %v9963_v7 }
 0x5fe   : > { %v2778_v31 = vsel %vm1765_vm5, %v10088_v20, -inf }
 0x5ff   : > { %2779 = vmax.xlane.f32.xlu2 %v2778_v31  ;;  %2749 = vmax.xlane.f32.xlu0 %v2748_v0  ;;  %v10108_v31 = vpop.permute.xlu2 %3564  ;;  %v10111_v0 = vadd.f32 %v2707_v28, %v9948_v1 }
 0x600   : > { %v2709_v14 = vpop.f32.mrf.mxu3 }
 0x601   : > { %v10097_v36 = vadd.f32 %v2709_v14, %v9963_v7 }
 0x603   : > { %v2643_v3 = vpop.f32.mrf.mxu2  ;;  %v2802_v17 = vsel %vm1765_vm5, %v10097_v36, -inf }
 0x604   : > { %v10102_v46 = vadd.f32 %v2643_v3, %v9974_v38  ;;  %2803 = vmax.xlane.f32.xlu1 %v2802_v17  ;;  %v2799_v17 = vsel %vm1765_vm5, %v10111_v0, -inf }
 0x606   : > { %v2781_v61 = vsel %vm1765_vm5, %v10102_v46, -inf }
 0x607   : > { %2782 = vmax.xlane.f32.xlu0 %v2781_v61  ;;  %v2753_v52 = vpop.xlane.xlu2 %2752 }
 0x608   : > { %v2712_v4 = vpop.f32.mrf.mxu3 }
 0x609   : > { %v10122_v1 = vadd.f32 %v2712_v4, %v9974_v38 }
 0x60b   : > { %v2645_v14 = vpop.f32.mrf.mxu2 }
 0x60c   : > { %v10114_v7 = vadd.f32 %v2645_v14, %v9987_v37  ;;  %v2831_v14 = vsub.f32 %v9955_v39, %v2753_v52 }
 0x60e   : > { %v2784_v3 = vsel %vm1765_vm5, %v10114_v7, -inf }
 0x60f   : > { %2785 = vmax.xlane.f32.xlu2 %v2784_v3  ;;  %2800 = vmax.xlane.f32.xlu0 %v2799_v17  ;;  %v2756_v61 = vpop.xlane.xlu1 %2755  ;;  %v2805_v3 = vsel %vm1765_vm5, %v10122_v1, -inf }
 0x610   : > { %v2832_v40 = vsub.f32 %v9968_v33, %v2756_v61  ;;  %v2714_v17 = vpop.f32.mrf.mxu3  ;;  %v2871_v33 = vmul.f32 1.442695, %v2831_v14 }
 0x612   : > { %v2873_v28 = vmul.f32 1.442695, %v2832_v40  ;;  %v10134_v40 = vadd.f32 %v2714_v17, %v9987_v37 }
 0x613   : > { %v2648_v22 = vpop.f32.mrf.mxu2 }
 0x614   : > { %v10126_v51 = vadd.f32 %v2648_v22, %v9998_v47  ;;  %6927 = vpow2.f32 %v2873_v28 }
 0x615   : > { %6929 = vpow2.f32 %v2871_v33 }
 0x616   : > { %v2787_v21 = vsel %vm1765_vm5, %v10126_v51, -inf }
 0x617   : > { %2788 = vmax.xlane.f32.xlu1 %v2787_v21  ;;  %2806 = vmax.xlane.f32.xlu0 %v2805_v3  ;;  %v2759_v4 = vpop.xlane.xlu1 %2758  ;;  %v2808_v21 = vsel %vm1765_vm5, %v10134_v40, -inf }
 0x618   : > { %v2833_v38 = vsub.f32 %v9981_v12, %v2759_v4 }
 0x61a   : > { %v10136_v52 = vpop.eup %6927  ;;  %v2875_v39 = vmul.f32 1.442695, %v2833_v38 }
 0x61b   : > { %v2650_v22 = vpop.f32.mrf.mxu2  ;;  %v2946_v28 = vsel %vm1765_vm5, %v10136_v52, 0.0  ;;  %v10147_v37 = vpop.eup %6929 }
 0x61c   : > { %v10139_v61 = vadd.f32 %v2650_v22, %v10009_v55  ;;  %6931 = vpow2.f32 %v2875_v39  ;;  %2947 = vadd.xlane.f32.xlu2 %v2946_v28  ;;  %v2943_v38 = vsel %vm1765_vm5, %v10147_v37, 0.0  ;;  %v2717_v39 = vpop.f32.mrf.mxu3 }
 0x61e   : > { %v2790_v12 = vsel %vm1765_vm5, %v10139_v61, -inf }
 0x61f   : > { %2809 = vmax.xlane.f32.xlu1 %v2808_v21  ;;  %2791 = vmax.xlane.f32.xlu0 %v2790_v12  ;;  %v2762_v22 = vpop.xlane.xlu2 %2761  ;;  %v10162_v12 = vadd.f32 %v2717_v39, %v9998_v47  ;;  %v10176_v39 = vpop.permute.xlu0 %3562 }
 0x622   : > { %v10149_v14 = vpop.eup %6931 }
 0x623   : > { %v2653_v3 = vpop.f32.mrf.mxu2  ;;  %v2949_v33 = vsel %vm1765_vm5, %v10149_v14, 0.0 }
 0x624   : > { %v10152_v17 = vadd.f32 %v2653_v3, %v10023_v16  ;;  %2950 = vadd.xlane.f32.xlu2 %v2949_v33  ;;  %v2811_v33 = vsel %vm1765_vm5, %v10162_v12, -inf }
 0x626   : > { %v2793_v4 = vsel %vm1765_vm5, %v10152_v17, -inf }
 0x627   : > { %2794 = vmax.xlane.f32.xlu1 %v2793_v4  ;;  %2944 = vadd.xlane.f32.xlu0 %v2943_v38  ;;  %v2765_v28 = vpop.xlane.xlu1 %2764  ;;  %v2834_v38 = vsub.f32 %v9994_v26, %v2762_v22 }
 0x628   : > { %v2835_v21 = vsub.f32 %v10003_v15, %v2765_v28  ;;  %v2719_v28 = vpop.f32.mrf.mxu3 }
 0x629   : > { %v10180_v41 = vadd.f32 %v2719_v28, %v10009_v55 }
 0x62a   : > { %v2879_v3 = vmul.f32 1.442695, %v2835_v21  ;;  %v2877_v21 = vmul.f32 1.442695, %v2834_v38 }
 0x62b   : > { %v2655_v10 = vpop.f32.mrf.mxu2  ;;  %v2814_v50 = vsel %vm1765_vm5, %v10180_v41, -inf }
 0x62c   : > { %6933 = vpow2.f32 %v2879_v3  ;;  %v10167_v34 = vadd.f32 %v2655_v10, %v10042_v6 }
 0x62d   : > { %6935 = vpow2.f32 %v2877_v21 }
 0x62e   : > { %v2796_v15 = vsel %vm1765_vm5, %v10167_v34, -inf }
 0x62f   : > { %2812 = vmax.xlane.f32.xlu0 %v2811_v33  ;;  %v2768_v44 = vpop.xlane.xlu2 %2767  ;;  %v2729_v63 = vpop.xlane.xlu1 %2728 }
 0x632   : > { %v10169_v4 = vpop.eup %6933 }
 0x633   : > { %v2955_v47 = vsel %vm1765_vm5, %v10169_v4, 0.0 }
 0x634   : > { %2956 = vadd.xlane.f32.xlu1 %v2955_v47  ;;  %v2823_v47 = vsub.f32 %v10012_v23, %v2729_v63  ;;  %v2836_v23 = vsub.f32 %v10015_v25, %v2768_v44 }
 0x636   : > { %v2855_v38 = vmul.f32 1.442695, %v2823_v47  ;;  %v2881_v21 = vmul.f32 1.442695, %v2836_v23 }
 0x637   : > { %2797 = vmax.xlane.f32.xlu0 %v2796_v15  ;;  %v2732_v3 = vpop.xlane.xlu2 %2731  ;;  %v2771_v33 = vpop.xlane.xlu1 %2770 }
 0x638   : > { %v2824_v10 = vsub.f32 %v10026_v56, %v2732_v3  ;;  %v2837_v22 = vsub.f32 %v10029_v48, %v2771_v33  ;;  %v10187_v56 = vpop.eup %6935 }
 0x63a   : > { %v2857_v26 = vmul.f32 1.442695, %v2824_v10  ;;  %v2883_v29 = vmul.f32 1.442695, %v2837_v22 }
 0x63c   : > { %6937 = vpow2.f32 %v2857_v26 }
 0x63d   : > { %6939 = vpow2.f32 %v2883_v29 }
 0x63e   : > { %6941 = vpow2.f32 %v2855_v38 }
 0x63f   : > { %2815 = vmax.xlane.f32.xlu0 %v2814_v50  ;;  %v2735_v15 = vpop.xlane.xlu0 %2734  ;;  %v2952_v50 = vsel %vm1765_vm5, %v10187_v56, 0.0 }
 0x640   : > { %v2825_v62 = vsub.f32 %v10038_v30, %v2735_v15 }
 0x642   : > { %v10189_v55 = vpop.eup %6937  ;;  %v2859_v28 = vmul.f32 1.442695, %v2825_v62 }
 0x643   : > { %v2922_v63 = vsel %vm1765_vm5, %v10189_v55, 0.0  ;;  %v10196_v30 = vpop.eup %6939 }
 0x644   : > { %6943 = vpow2.f32 %v2859_v28  ;;  %2923 = vadd.xlane.f32.xlu1 %v2922_v63  ;;  %v10199_v62 = vpop.eup %6941  ;;  %v2961_v26 = vsel %vm1765_vm5, %v10196_v30, 0.0 }
 0x645   : > { %6945 = vpow2.f32 %v2881_v21 }
 0x647   : > { %2953 = vadd.xlane.f32.xlu0 %v2952_v50  ;;  %v2774_v48 = vpop.xlane.xlu0 %2773  ;;  %v2738_v3 = vpop.xlane.xlu1 %2737 }
 0x648   : > { %v2838_v29 = vsub.f32 %v10045_v54, %v2774_v48  ;;  %v2826_v44 = vsub.f32 %v10050_v11, %v2738_v3  ;;  %v2919_v54 = vsel %vm1765_vm5, %v10199_v62, 0.0 }
 0x64a   : > { %v10201_v33 = vpop.eup %6943  ;;  %v2885_v10 = vmul.f32 1.442695, %v2838_v29  ;;  %v2861_v22 = vmul.f32 1.442695, %v2826_v44 }
 0x64b   : > { %v2925_v25 = vsel %vm1765_vm5, %v10201_v33, 0.0  ;;  %v10210_v38 = vpop.eup %6945 }
 0x64c   : > { %2926 = vadd.xlane.f32.xlu2 %v2925_v25  ;;  %2962 = vadd.xlane.f32.xlu1 %v2961_v26  ;;  %6947 = vpow2.f32 %v2885_v10  ;;  %v2958_v63 = vsel %vm1765_vm5, %v10210_v38, 0.0 }
 0x64d   : > { %6949 = vpow2.f32 %v2861_v22 }
 0x64f   : > { %2920 = vadd.xlane.f32.xlu0 %v2919_v54  ;;  %v2741_v47 = vpop.xlane.xlu2 %2740 }
 0x650   : > { %v2827_v11 = vsub.f32 %v10057_v13, %v2741_v47 }
 0x652   : > { %v10212_v15 = vpop.eup %6947  ;;  %v2863_v23 = vmul.f32 1.442695, %v2827_v11 }
 0x653   : > { %v2964_v28 = vsel %vm1765_vm5, %v10212_v15, 0.0  ;;  %v10220_v21 = vpop.eup %6949 }
 0x654   : > { %2965 = vadd.xlane.f32.xlu1 %v2964_v28  ;;  %6951 = vpow2.f32 %v2863_v23  ;;  %v2928_v13 = vsel %vm1765_vm5, %v10220_v21, 0.0 }
 0x657   : > { %2959 = vadd.xlane.f32.xlu0 %v2958_v63  ;;  %v2744_v50 = vpop.xlane.xlu0 %2743 }
 0x658   : > { %v2828_v48 = vsub.f32 %v10064_v43, %v2744_v50 }
 0x65a   : > { %v2865_v3 = vmul.f32 1.442695, %v2828_v48  ;;  %v10225_v44 = vpop.eup %6951 }
 0x65b   : > { %v2931_v54 = vsel %vm1765_vm5, %v10225_v44, 0.0 }
 0x65c   : > { %6953 = vpow2.f32 %v2865_v3  ;;  %2929 = vadd.xlane.f32.xlu1 %v2928_v13 }
 0x65f   : > { %v2747_v29 = vpop.xlane.xlu2 %2746 }
 0x660   : > { %v2829_v10 = vsub.f32 %v10071_v9, %v2747_v29  ;;  %v2722_v9 = vpop.f32.mrf.mxu3 }
 0x662   : > { %v10227_v25 = vpop.eup %6953  ;;  %v2867_v26 = vmul.f32 1.442695, %v2829_v10 }
 0x663   : > { %v2934_v43 = vsel %vm1765_vm5, %v10227_v25, 0.0 }
 0x664   : > { %6955 = vpow2.f32 %v2867_v26  ;;  %2935 = vadd.xlane.f32.xlu0 %v2934_v43  ;;  %2932 = vadd.xlane.f32.xlu1 %v2931_v54 }
 0x668   : > { %v2724_v26 = vpop.f32.mrf.mxu3 }
 0x669   : > { %v10245_v43 = vadd.f32 %v2724_v26, %v10042_v6 }
 0x66a   : > { %v2777_v22 = vpop.xlane.xlu0 %2776  ;;  %v10233_v47 = vpop.eup %6955 }
 0x66b   : > { %v2839_v11 = vsub.f32 %v10080_v2, %v2777_v22  ;;  %v2937_v63 = vsel %vm1765_vm5, %v10233_v47, 0.0 }
 0x66c   : > { %2938 = vadd.xlane.f32.xlu1 %v2937_v63 }
 0x66d   : > { %v2887_v28 = vmul.f32 1.442695, %v2839_v11 }
 0x66f   : > { %6957 = vpow2.f32 %v2887_v28 }
 0x672   : > { %v2780_v23 = vpop.xlane.xlu2 %2779  ;;  %v2750_v50 = vpop.xlane.xlu0 %2749 }
 0x673   : > { %v2840_v48 = vsub.f32 %v10088_v20, %v2780_v23  ;;  %v2830_v3 = vsub.f32 %v10085_v19, %v2750_v50  ;;  %v2820_v50 = vsel %vm1765_vm5, %v10245_v43, -inf }
 0x675   : > { %v10240_v13 = vpop.eup %6957  ;;  %v2889_v29 = vmul.f32 1.442695, %v2840_v48  ;;  %v2869_v10 = vmul.f32 1.442695, %v2830_v3  ;;  %v10260_v48 = vadd.f32 %v2722_v9, %v10023_v16 }
 0x676   : > { %v2967_v2 = vsel %vm1765_vm5, %v10240_v13, 0.0 }
 0x677   : > { %6959 = vpow2.f32 %v2889_v29  ;;  %2968 = vadd.xlane.f32.xlu2 %v2967_v2  ;;  %v2804_v54 = vpop.xlane.xlu1 %2803 }
 0x678   : > { %6961 = vpow2.f32 %v2869_v10  ;;  %v2848_v19 = vsub.f32 %v10097_v36, %v2804_v54  ;;  %v2817_v54 = vsel %vm1765_vm5, %v10260_v48, -inf }
 0x67a   : > { %v2783_v22 = vpop.xlane.xlu0 %2782 }
 0x67b   : > { %v2841_v20 = vsub.f32 %v10102_v46, %v2783_v22  ;;  %v2905_v46 = vmul.f32 1.442695, %v2848_v19 }
 0x67d   : > { %v10248_v11 = vpop.eup %6959  ;;  %v2891_v28 = vmul.f32 1.442695, %v2841_v20 }
 0x67e   : > { %v10251_v63 = vpop.eup %6961  ;;  %v2970_v23 = vsel %vm1765_vm5, %v10248_v11, 0.0 }
 0x67f   : > { %6963 = vpow2.f32 %v2891_v28  ;;  %2971 = vadd.xlane.f32.xlu1 %v2970_v23  ;;  %2821 = vmax.xlane.f32.xlu2 %v2820_v50  ;;  %v2940_v6 = vsel %vm1765_vm5, %v10251_v63, 0.0 }
 0x680   : > { %2941 = vadd.xlane.f32.xlu0 %v2940_v6  ;;  %6965 = vpow2.f32 %v2905_v46 }
 0x682   : > { %v2801_v36 = vpop.xlane.xlu0 %2800  ;;  %v2786_v3 = vpop.xlane.xlu2 %2785 }
 0x683   : > { %v2847_v29 = vsub.f32 %v10111_v0, %v2801_v36  ;;  %v2842_v26 = vsub.f32 %v10114_v7, %v2786_v3 }
 0x685   : > { %v10263_v10 = vpop.eup %6963  ;;  %v2903_v2 = vmul.f32 1.442695, %v2847_v29  ;;  %v2893_v16 = vmul.f32 1.442695, %v2842_v26 }
 0x686   : > { %v2973_v22 = vsel %vm1765_vm5, %v10263_v10, 0.0  ;;  %v10272_v0 = vpop.eup %6965 }
 0x687   : > { %2818 = vmax.xlane.f32.xlu1 %v2817_v54  ;;  %2974 = vadd.xlane.f32.xlu2 %v2973_v22  ;;  %6967 = vpow2.f32 %v2903_v2  ;;  %v2994_v7 = vsel %vm1765_vm5, %v10272_v0, 0.0 }
 0x688   : > { %6969 = vpow2.f32 %v2893_v16 }
 0x68a   : > { %v2789_v9 = vpop.xlane.xlu1 %2788  ;;  %v10270_v20 = vpop.xlane.xlu0 %2806 }
 0x68b   : > { %v2843_v19 = vsub.f32 %v10126_v51, %v2789_v9 }
 0x68d   : > { %v2895_v28 = vmul.f32 1.442695, %v2843_v19  ;;  %v10275_v23 = vpop.eup %6967 }
 0x68e   : > { %v2991_v50 = vsel %vm1765_vm5, %v10275_v23, 0.0  ;;  %v10284_v51 = vpop.eup %6969 }
 0x68f   : > { %6971 = vpow2.f32 %v2895_v28  ;;  %2995 = vadd.xlane.f32.xlu1 %v2994_v7  ;;  %2992 = vadd.xlane.f32.xlu0 %v2991_v50  ;;  %v2948_v6 = vpop.xlane.xlu2 %2947  ;;  %v2976_v54 = vsel %vm1765_vm5, %v10284_v51, 0.0 }
 0x690   : > { %6973 = vrcp.f32 %v2948_v6 }
 0x692   : > { %v10281_v46 = vpop.xlane.xlu1 %2809  ;;  %v2792_v36 = vpop.xlane.xlu0 %2791 }
 0x693   : > { %v2844_v3 = vsub.f32 %v10139_v61, %v2792_v36 }
 0x695   : > { %v10286_v29 = vpop.eup %6971  ;;  %v2897_v2 = vmul.f32 1.442695, %v2844_v3 }
 0x696   : > { %v2979_v26 = vsel %vm1765_vm5, %v10286_v29, 0.0  ;;  %v6974_v9 = vpop.eup %6973 }
 0x697   : > { %2980 = vadd.xlane.f32.xlu2 %v2979_v26  ;;  %6975 = vpow2.f32 %v2897_v2  ;;  %2977 = vadd.xlane.f32.xlu0 %v2976_v54  ;;  %v3056_v7 = vmul.f32 %v6974_v9, %v10136_v52 }
 0x699   : > { %v3088_v36 = vpack.c.bf16 %v3056_v7, %v3056_v7 }
 0x69a   : > { %v2795_v22 = vpop.xlane.xlu1 %2794  ;;  %v2945_v16 = vpop.xlane.xlu0 %2944 }
 0x69b   : > { %v2845_v61 = vsub.f32 %v10152_v17, %v2795_v22  ;;  %6977 = vrcp.f32 %v2945_v16  ;;  %v3193_v17 = vunpack.c.l.b16 %v3088_v36 }
 0x69d   : > { %v2899_v19 = vmul.f32 1.442695, %v2845_v61  ;;  %v10293_v28 = vpop.eup %6975 }
 0x69e   : > { %v2982_v50 = vsel %vm1765_vm5, %v10293_v28, 0.0 }
 0x69f   : > { %6979 = vpow2.f32 %v2899_v19  ;;  %2983 = vadd.xlane.f32.xlu0 %v2982_v50  ;;  %v2951_v19 = vpop.xlane.xlu2 %2950 }
 0x6a0   : > { %6981 = vrcp.f32 %v2951_v19 }
 0x6a1   : > { %v6978_v6 = vpop.eup %6977 }
 0x6a2   : > { %v3055_v3 = vmul.f32 %v6978_v6, %v10147_v37  ;;  %v10299_v2 = vpop.xlane.xlu0 %2812  ;;  %v12374_v37 = vld [vmem:[#allocation25_spill] sm:$0xff]  ;;  %v12375_v6 = vld [vmem:[#allocation19_spill] sm:$0xff] }
 0x6a4   : > { %v3087_v26 = vpack.c.bf16 %v3055_v3, %v3055_v3 }
 0x6a5   : > { %v10301_v54 = vpop.eup %6979 }
 0x6a6   : > { %v3192_v22 = vunpack.c.l.b16 %v3087_v26  ;;  %v2985_v16 = vsel %vm1765_vm5, %v10301_v54, 0.0  ;;  %v6982_v3 = vpop.eup %6981 }
 0x6a7   : > { %2986 = vadd.xlane.f32.xlu2 %v2985_v16  ;;  %v2957_v61 = vpop.xlane.xlu1 %2956  ;;  %v3057_v26 = vmul.f32 %v6982_v3, %v10149_v14  ;;  %v12377_v3 = vld [vmem:[#allocation34_spill] sm:$0xff] }
 0x6a8   : > { %v3200_v52 = vpack.c.b16 %v3193_v17, %v3192_v22  ;;  %3560 = vrot.lane.b32.xlu1 %v9137_v24, %s7573_s21  ;;  %v12376_v17 = vld [vmem:[#allocation28_spill] sm:$0xff] }
 0x6aa   : > { %6246 = vmatmul.msk.bf16.vlgmr.msrb.gmra.mxu1 %vm1765_vm5, %v3200_v52  ;;  %v2798_v9 = vpop.xlane.xlu0 %2797  ;;  %v3089_v52 = vpack.c.bf16 %v3057_v26, %v3057_v26 }
 0x6b0   : > { %3354 = vrot.lane.b32.xlu1 %v12374_v37, %s7572_s12 }
 0x6b2   : > { %v10310_v7 = vpop.xlane.xlu0 %2815 }
 0x6b3   : > { %3485 = vrot.lane.b32.xlu0 %v9017_v57, %s7574_s14 }
 0x6b7   : > { %v2924_v50 = vpop.xlane.xlu1 %2923 }
 0x6b8   : > { %3350 = vrot.lane.b32.xlu1 %v12375_v6, %s7572_s12 }
 0x6ba   : > { %v2954_v36 = vpop.xlane.xlu0 %2953 }
 0x6bb   : > { %6983 = vrcp.f32 %v2954_v36  ;;  %v3194_v36 = vunpack.c.l.b16 %v3089_v52 }
 0x6bc   : > { %6985 = vrcp.f32 %v2924_v50 }
 0x6bf   : > { %3356 = vrot.lane.b32.xlu2 %v12376_v17, %s7572_s12  ;;  %v2963_v22 = vpop.xlane.xlu1 %2962 }
 0x6c0   : > { %3550 = vrot.lane.b32.xlu1 %v9125_v35, %s7574_s14 }
 0x6c1   : > { %v6984_v16 = vpop.eup %6983 }
 0x6c2   : > { %v3058_v19 = vmul.f32 %v6984_v16, %v10187_v56  ;;  %v2921_v27 = vpop.xlane.xlu0 %2920  ;;  %v6986_v32 = vpop.eup %6985 }
 0x6c3   : > { %6987 = vrcp.f32 %v2921_v27  ;;  %v3048_v50 = vmul.f32 %v6986_v32, %v10189_v55  ;;  %v2927_v56 = vpop.xlane.xlu2 %2926 }
 0x6c4   : > { %v3090_v45 = vpack.c.bf16 %v3058_v19, %v3058_v19  ;;  %6989 = vrcp.f32 %v2957_v61 }
 0x6c5   : > { %v3080_v57 = vpack.c.bf16 %v3048_v50, %v3048_v50 }
 0x6c6   : > { %v3195_v14 = vunpack.c.l.b16 %v3090_v45  ;;  %v2846_v45 = vsub.f32 %v10167_v34, %v2798_v9 }
 0x6c7   : > { %3558 = vrot.lane.b32.xlu2 %v9125_v35, %s7573_s21  ;;  %v2966_v26 = vpop.xlane.xlu1 %2965  ;;  %v3120_v19 = vunpack.c.l.b16 %v3080_v57 }
 0x6c8   : > { %3487 = vrot.lane.b32.xlu1 %v12377_v3, %s7574_s14  ;;  %v3201_v8 = vpack.c.b16 %v3195_v14, %v3194_v36  ;;  %v2901_v36 = vmul.f32 1.442695, %v2846_v45 }
 0x6c9   : > { %v6988_v5 = vpop.eup %6987 }
 0x6ca   : > { %v3047_v16 = vmul.f32 %v6988_v5, %v10199_v62  ;;  %6247 = vmatmul.msk.bf16.gmra.mxu1 %vm1765_vm5, %v3201_v8  ;;  %v2960_v27 = vpop.xlane.xlu0 %2959  ;;  %v6990_v61 = vpop.eup %6989 }
 0x6cb   : > { %6991 = vrcp.f32 %v2960_v27  ;;  %v3059_v55 = vmul.f32 %v6990_v61, %v10169_v4 }
 0x6cc   : > { %v3079_v32 = vpack.c.bf16 %v3047_v16, %v3047_v16  ;;  %6993 = vrcp.f32 %v2927_v56 }
 0x6cd   : > { %v3091_v3 = vpack.c.bf16 %v3059_v55, %v3059_v55  ;;  %v2849_v55 = vsub.f32 %v10122_v1, %v10270_v20 }
 0x6ce   : > { %v3119_v52 = vunpack.c.l.b16 %v3079_v32 }
 0x6cf   : > { %v2930_v50 = vpop.xlane.xlu1 %2929  ;;  %v3196_v62 = vunpack.c.l.b16 %v3091_v3 }
 0x6d0   : > { %v3127_v14 = vpack.c.b16 %v3120_v19, %v3119_v52  ;;  %6995 = vrcp.f32 %v2930_v50 }
 0x6d1   : > { %v6992_v35 = vpop.eup %6991  ;;  %6997 = vrcp.f32 %v2966_v26 }
 0x6d2   : > { %v3060_v5 = vmul.f32 %v6992_v35, %v10210_v38  ;;  %6242 = vmatmul.msk.bf16.vlgmr.msrb.gmra.mxu0 %vm1765_vm5, %v3127_v14  ;;  %v6994_v8 = vpop.eup %6993  ;;  %6999 = vpow2.f32 %v2901_v36 }
 0x6d3   : > { %7001 = vrcp.f32 %v2963_v22  ;;  %v3049_v4 = vmul.f32 %v6994_v8, %v10201_v33 }
 0x6d4   : > { %v3092_v34 = vpack.c.bf16 %v3060_v5, %v3060_v5 }
 0x6d5   : > { %v3081_v26 = vpack.c.bf16 %v3049_v4, %v3049_v4  ;;  %v2852_v4 = vsub.f32 %v10180_v41, %v10310_v7 }
 0x6d6   : > { %v3197_v9 = vunpack.c.l.b16 %v3092_v34  ;;  %v6996_v57 = vpop.eup %6995  ;;  %v2907_v34 = vmul.f32 1.442695, %v2849_v55 }
 0x6d7   : > { %v2936_v56 = vpop.xlane.xlu0 %2935  ;;  %v6998_v27 = vpop.eup %6997  ;;  %v3050_v35 = vmul.f32 %v6996_v57, %v10220_v21  ;;  %v3121_v21 = vunpack.c.l.b16 %v3081_v26  ;;  %v12378_v26 = vld [vmem:[#allocation26_spill] sm:$0xff] }
 0x6d8   : > { %v3202_v16 = vpack.c.b16 %v3197_v9, %v3196_v62  ;;  %7003 = vrcp.f32 %v2936_v56  ;;  %v2933_v61 = vpop.xlane.xlu1 %2932  ;;  %v10335_v38 = vpop.eup %6999  ;;  %v3062_v3 = vmul.f32 %v6998_v27, %v10212_v15  ;;  %v2851_v15 = vsub.f32 %v10162_v12, %v10299_v2 }
 0x6d9   : > { %7005 = vrcp.f32 %v2933_v61  ;;  %v7002_v45 = vpop.eup %7001  ;;  %v3082_v22 = vpack.c.bf16 %v3050_v35, %v3050_v35  ;;  %v2988_v33 = vsel %vm1765_vm5, %v10335_v38, 0.0  ;;  %v3588_v12 = vsel %vm1468_vm3, %v10108_v31, 0 }
 0x6da   : > { %6248 = vmatmul.msk.bf16.gmra.mxu1 %vm1765_vm5, %v3202_v16  ;;  %v3061_v52 = vmul.f32 %v7002_v45, %v10196_v30  ;;  %v3094_v14 = vpack.c.bf16 %v3062_v3, %v3062_v3  ;;  %v2911_v20 = vmul.f32 1.442695, %v2851_v15  ;;  %7007 = vpow2.f32 %v2907_v34 }
 0x6db   : > { %v3122_v32 = vunpack.c.l.b16 %v3082_v22  ;;  %v3585_v31 = vsel %vm1468_vm3, %v10176_v39, 0 }
 0x6dc   : > { %v3093_v62 = vpack.c.bf16 %v3061_v52, %v3061_v52  ;;  %v3199_v30 = vunpack.c.l.b16 %v3094_v14  ;;  %7009 = vpow2.f32 %v2911_v20 }
 0x6dd   : > { %2989 = vadd.xlane.f32.xlu0 %v2988_v33  ;;  %v3128_v5 = vpack.c.b16 %v3122_v32, %v3121_v21  ;;  %v12379_v33 = vld [vmem:[#allocation53_spill] sm:$0xff] }
 0x6de   : > { %v7004_v19 = vpop.eup %7003 }
 0x6df   : > { %v7006_v36 = vpop.eup %7005  ;;  %v3052_v50 = vmul.f32 %v7004_v19, %v10227_v25  ;;  %v3198_v25 = vunpack.c.l.b16 %v3093_v62 }
 0x6e0   : > { %v3051_v8 = vmul.f32 %v7006_v36, %v10225_v44  ;;  %v2913_v44 = vmul.f32 1.442695, %v2852_v4  ;;  %v2939_v2 = vpop.xlane.xlu1 %2938  ;;  %v10355_v61 = vpop.eup %7007 }
 0x6e1   : > { %v3084_v9 = vpack.c.bf16 %v3052_v50, %v3052_v50  ;;  %v3203_v27 = vpack.c.b16 %v3199_v30, %v3198_v25  ;;  %v2997_v7 = vsel %vm1765_vm5, %v10355_v61, 0.0  ;;  %v2850_v25 = vsub.f32 %v10134_v40, %v10281_v46 }
 0x6e2   : > { %6243 = vmatmul.msk.bf16.gmra.mxu0 %vm1765_vm5, %v3128_v5  ;;  %v3083_v1 = vpack.c.bf16 %v3051_v8, %v3051_v8  ;;  %7011 = vpow2.f32 %v2913_v44  ;;  %v10357_v41 = vpop.eup %7009 }
 0x6e3   : > { %v3124_v57 = vunpack.c.l.b16 %v3084_v9  ;;  %7013 = vrcp.f32 %v2939_v2  ;;  %v3003_v22 = vsel %vm1765_vm5, %v10357_v41, 0.0  ;;  %v2909_v2 = vmul.f32 1.442695, %v2850_v25 }
 0x6e4   : > { %v3123_v56 = vunpack.c.l.b16 %v3083_v1 }
 0x6e6   : > { %v3129_v16 = vpack.c.b16 %v3124_v57, %v3123_v56 }
 0x6e8   : > { %6244 = vmatmul.msk.bf16.vlgmr.msrb.gmra.mxu2 %vm1765_vm5, %v3129_v16  ;;  %v10367_v3 = vpop.eup %7011 }
 0x6e9   : > { %3594 = vmatpush.bf16.xpose.msrb.mxu2 %v3588_v12  ;;  %v7014_v55 = vpop.eup %7013  ;;  %v3006_v39 = vsel %vm1765_vm5, %v10367_v3, 0.0 }
 0x6ea   : > { %6249 = vmatmul.msk.bf16.gmra.mxu1 %vm1765_vm5, %v3203_v27  ;;  %v2969_v35 = vpop.xlane.xlu2 %2968  ;;  %v3053_v52 = vmul.f32 %v7014_v55, %v10233_v47 }
 0x6ec   : > { %v3085_v14 = vpack.c.bf16 %v3053_v52, %v3053_v52 }
 0x6ee   : > { %v3125_v34 = vunpack.c.l.b16 %v3085_v14 }
 0x6f0   : > { %2998 = vadd.xlane.f32.xlu2 %v2997_v7 }
 0x6f1   : > { %3595 = vmatpush.bf16.xpose.msrb.mxu2 %v3585_v31  ;;  %3352 = vrot.lane.b32.xlu0 %v12378_v26, %s7572_s12  ;;  %v12381_v31 = vld [vmem:[#allocation52_spill] sm:$0xff]  ;;  %s6027_s12 = sshll.u32 %s11846_s23, 4  ;;  %s6028_s12 = int_to_ptr.vmem [resolvable:$true] %s6027_s12 }
 0x6f2   : > { %v2972_v45 = vpop.xlane.xlu1 %2971  ;;  %3004 = vadd.xlane.f32.xlu1 %v3003_v22  ;;  %6258 = vmatmul.msk.bf16.vlgmr.msra.gmra.mxu0 %vm1468_vm3, %v12379_v33  ;;  %v2822_v19 = vpop.xlane.xlu2 %2821 }
 0x6f3   : > { %v2942_v32 = vpop.xlane.xlu0 %2941  ;;  %v2854_v15 = vsub.f32 %v10245_v43, %v2822_v19 }
 0x6f4   : > { %7015 = vrcp.f32 %v2942_v32 }
 0x6f5   : > { %7017 = vrcp.f32 %v2972_v45  ;;  %v2917_v9 = vmul.f32 1.442695, %v2854_v15 }
 0x6f6   : > { %7019 = vrcp.f32 %v2969_v35 }
 0x6f8   : > { %3007 = vadd.xlane.f32.xlu2 %v3006_v39 }
 0x6fa   : > { %v7016_v21 = vpop.eup %7015  ;;  %v2819_v36 = vpop.xlane.xlu1 %2818  ;;  %6262 = vmatmul.msk.bf16.vlgmr.msra.gmra.mxu1 %vm1468_vm3, %v10090_v60  ;;  %v12380_v60 = vld [vmem:[#allocation56_spill] sm:$0xff] }
 0x6fb   : > { %v3054_v50 = vmul.f32 %v7016_v21, %v10251_v63  ;;  %v2853_v5 = vsub.f32 %v10260_v48, %v2819_v36  ;;  %v7018_v30 = vpop.eup %7017  ;;  %v2975_v16 = vpop.xlane.xlu2 %2974 }
 0x6fc   : > { %v7020_v48 = vpop.eup %7019  ;;  %v3064_v43 = vmul.f32 %v7018_v30, %v10248_v11 }
 0x6fd   : > { %v3086_v8 = vpack.c.bf16 %v3054_v50, %v3054_v50  ;;  %v2915_v47 = vmul.f32 1.442695, %v2853_v5  ;;  %v3063_v57 = vmul.f32 %v7020_v48, %v10240_v13 }
 0x6fe   : > { %v3096_v56 = vpack.c.bf16 %v3064_v43, %v3064_v43 }
 0x6ff   : > { %7021 = vpow2.f32 %v2915_v47  ;;  %v3126_v62 = vunpack.c.l.b16 %v3086_v8  ;;  %v3095_v12 = vpack.c.bf16 %v3063_v57, %v3063_v57 }
 0x700   : > { %7023 = vpow2.f32 %v2917_v9  ;;  %v3266_v11 = vunpack.c.l.b16 %v3096_v56 }
 0x701   : > { %v3130_v1 = vpack.c.b16 %v3126_v62, %v3125_v34  ;;  %v3265_v7 = vunpack.c.l.b16 %v3095_v12  ;;  %v12382_v34 = vld [vmem:[#allocation23_spill] sm:$0xff] }
 0x702   : > { %6259 = vmatmul.msk.bf16.gmra.mxu0 %vm1468_vm3, %v12380_v60  ;;  %v10382_v63 = vpop.xlane.xlu0 %2992 }
 0x703   : > { %6245 = vmatmul.msk.bf16.gmra.mxu2 %vm1765_vm5, %v3130_v1  ;;  %v3273_v40 = vpack.c.b16 %v3266_v11, %v3265_v7 }
 0x705   : > { %v10384_v20 = vpop.eup %7021 }
 0x706   : > { %v3009_v4 = vsel %vm1765_vm5, %v10384_v20, 0.0  ;;  %v10394_v27 = vpop.eup %7023 }
 0x707   : > { %3010 = vadd.xlane.f32.xlu2 %v3009_v4  ;;  %v3012_v13 = vsel %vm1765_vm5, %v10394_v27, 0.0  ;;  %v12383_v4 = vld [vmem:[#allocation33_spill] sm:$0xff] }
 0x70a   : > { %6263 = vmatmul.msk.bf16.gmra.mxu1 %vm1468_vm3, %v10106_v49  ;;  %v2978_v44 = vpop.xlane.xlu0 %2977  ;;  %v10400_v49 = vpop.xlane.xlu1 %2995 }
 0x70b   : > { %7025 = vrcp.f32 %v2978_v44  ;;  %3554 = vrot.lane.b32.xlu1 %v9043_v18, %s7574_s14  ;;  %v2981_v35 = vpop.xlane.xlu2 %2980  ;;  %v12386_v44 = vld [vmem:[#allocation24_spill] sm:$0xff] }
 0x70c   : > { %7027 = vrcp.f32 %v2975_v16 }
 0x70d   : > { %7029 = vpow2.f32 %v2909_v2 }
 0x70f   : > { %3013 = vadd.xlane.f32.xlu2 %v3012_v13 }
 0x711   : > { %v7026_v46 = vpop.eup %7025 }
 0x712   : > { %6260 = vmatmul.msk.bf16.gmra.mxu0 %vm1468_vm3, %v12381_v31  ;;  %v7028_v45 = vpop.eup %7027  ;;  %v3066_v22 = vmul.f32 %v7026_v46, %v10284_v51  ;;  %v2984_v52 = vpop.xlane.xlu0 %2983 }
 0x713   : > { %6250 = vmatmul.msk.bf16.vlgmr.msra.gmra.mxu2 %vm1765_vm5, %v3273_v40  ;;  %3619 = vrot.lane.b32.xlu1 %v12375_v6, %s7574_s14  ;;  %v3065_v33 = vmul.f32 %v7028_v45, %v10263_v10  ;;  %v10409_v32 = vpop.eup %7029  ;;  %7031 = vrcp.f32 %v2984_v52 }
 0x714   : > { %v3098_v55 = vpack.c.bf16 %v3066_v22, %v3066_v22  ;;  %v3000_v36 = vsel %vm1765_vm5, %v10409_v32, 0.0  ;;  %7033 = vrcp.f32 %v2981_v35 }
 0x715   : > { %v3097_v19 = vpack.c.bf16 %v3065_v33, %v3065_v33 }
 0x716   : > { %v3268_v51 = vunpack.c.l.b16 %v3098_v55 }
 0x717   : > { %v3267_v10 = vunpack.c.l.b16 %v3097_v19 }
 0x719   : > { %v3274_v50 = vpack.c.b16 %v3268_v51, %v3267_v10  ;;  %v7032_v5 = vpop.eup %7031 }
 0x71a   : > { %v3561_v39 = vpop.permute.xlu1 %3560  ;;  %v2987_v21 = vpop.xlane.xlu2 %2986  ;;  %v3068_v62 = vmul.f32 %v7032_v5, %v10293_v28 }
 0x71b   : > { %v3582_v14 = vsel %vm1468_vm3, %v3561_v39, 0  ;;  %3621 = vrot.lane.b32.xlu1 %v12378_v26, %s7574_s14  ;;  %3001 = vadd.xlane.f32.xlu0 %v3000_v36  ;;  %v7034_v47 = vpop.eup %7033  ;;  %7035 = vrcp.f32 %v2987_v21 }
 0x71c   : > { %3596 = vmatpush.bf16.xpose.msrb.mxu2 %v3582_v14  ;;  %v3067_v1 = vmul.f32 %v7034_v47, %v10286_v29  ;;  %v3100_v30 = vpack.c.bf16 %v3068_v62, %v3068_v62  ;;  %v10479_v47 = vld [vmem:[#allocation8 + $0x80] sm:$0xff] }
 0x71e   : > { %v3099_v48 = vpack.c.bf16 %v3067_v1, %v3067_v1  ;;  %v3270_v28 = vunpack.c.l.b16 %v3100_v30 }
 0x720   : > { %v3269_v29 = vunpack.c.l.b16 %v3099_v48 }
 0x721   : > { %v7036_v40 = vpop.eup %7035 }
 0x722   : > { %v3355_v15 = vpop.permute.xlu1 %3354  ;;  %v3357_v8 = vpop.permute.xlu2 %3356  ;;  %6261 = vmatmul.msk.bf16.gmra.mxu0 %vm1468_vm3, %v10077_v58  ;;  %v3275_v57 = vpack.c.b16 %v3270_v28, %v3269_v29  ;;  %v3069_v46 = vmul.f32 %v7036_v40, %v10301_v54 }
 0x723   : > { %6251 = vmatmul.msk.bf16.gmra.mxu2 %vm1765_vm5, %v3274_v50  ;;  %3378 = vmatpush.bf16.msrb.mxu3 %v3357_v8 }
 0x724   : > { %4096 = vrot.lane.b32.xlu1 %v12382_v34, %s7575_s5  ;;  %v3101_v22 = vpack.c.bf16 %v3069_v46, %v3069_v46 }
 0x725   : > { %v3486_v9 = vpop.permute.xlu0 %3485 }
 0x726   : > { %6264 = vmatmul.msk.bf16.gmra.mxu1 %vm1468_vm3, %v3486_v9  ;;  %v3271_v21 = vunpack.c.l.b16 %v3101_v22 }
 0x727   : > { %3631 = vrot.lane.b32.xlu2 %v12374_v37, %s7573_s21  ;;  %3379 = vmatpush.bf16.msrb.mxu3 %v3355_v15  ;;  %v10434_v25 = vpop.f32.mrf.mxu1 }
 0x728   : > { %12384 = vst [vmem:[#allocation25_spill] sm:$0xff] %v10434_v25 }
 0x72a   : > { %v3351_v60 = vpop.permute.xlu1 %3350  ;;  %v3559_v58 = vpop.permute.xlu2 %3558 }
 0x72b   : > { %v3579_v43 = vsel %vm1468_vm3, %v3559_v58, 0 }
 0x72c   : > { %4092 = vrot.lane.b32.xlu1 %v12383_v4, %s7575_s5  ;;  %3597 = vmatpush.bf16.xpose.msrb.mxu2 %v3579_v43 }
 0x72f   : > { %3625 = vrot.lane.b32.xlu2 %v12376_v17, %s7574_s14  ;;  %3552 = vrot.lane.b32.xlu0 %v9137_v24, %s7574_s14  ;;  %v10441_v12 = vpop.f32.mrf.mxu1 }
 0x730   : > { %12385 = vst [vmem:[#allocation19_spill] sm:$0xff] %v10441_v12 }
 0x732   : > { %v3551_v56 = vpop.permute.xlu1 %3550 }
 0x733   : > { %6252 = vmatmul.msk.bf16.gmra.mxu2 %vm1765_vm5, %v3275_v57 }
 0x737   : > { %4098 = vrot.lane.b32.xlu2 %v9149_v42, %s7575_s5  ;;  %3633 = vrot.lane.b32.xlu0 %v12376_v17, %s7573_s21 }
 0x73a   : > { %v3488_v16 = vpop.permute.xlu1 %3487 }
 0x73b   : > { %6265 = vmatmul.msk.bf16.gmra.mxu1 %vm1468_vm3, %v3488_v16 }
 0x73f   : > { %4094 = vrot.lane.b32.xlu2 %v12386_v44, %s7575_s5  ;;  %3556 = vrot.lane.b32.xlu0 %v9083_v59, %s7574_s14 }
 0x747   : > { %v10447_v11 = vpop.f32.mrf.mxu1  ;;  %3629 = vrot.lane.b32.xlu0 %v12378_v26, %s7573_s21 }
 0x748   : > { %12387 = vst [vmem:[#allocation28_spill] sm:$0xff] %v10447_v11 }
 0x74f   : > { %v10451_v2 = vpop.f32.mrf.mxu0  ;;  %v10453_v13 = vpop.f32.mrf.mxu1  ;;  %3627 = vrot.lane.b32.xlu0 %v12375_v6, %s7573_s21  ;;  %s6029_s21 = sshll.u32 %s6026_s25, 4  ;;  %s6030_s21 = int_to_ptr.hbm [resolvable:$true] %s6029_s21 }
 0x750   : > { %12388 = vst [vmem:[#allocation26_spill] sm:$0xff] %v10451_v2  ;;  %v2990_v7 = vpop.xlane.xlu0 %2989 }
 0x751   : > { %12389 = vst [vmem:[#allocation53_spill] sm:$0xff] %v10453_v13  ;;  %7037 = vrcp.f32 %v2990_v7  ;;  %v10500_v7 = vld [vmem:[#allocation8 + $0x88] sm:$0xff] }
 0x752   : > { %7039 = vrcp.f32 %v10400_v49 }
 0x753   : > { %7041 = vrcp.f32 %v10382_v63 }
 0x757   : > { %v10460_v35 = vpop.f32.mrf.mxu0  ;;  %v10462_v31 = vpop.f32.mrf.mxu1  ;;  %3623 = vrot.lane.b32.xlu0 %v12374_v37, %s7574_s14  ;;  %s7480_s14 = sshra.s32 %s6030_s21, 4  ;;  %s7481_s14 = int_to_ptr.hbm [resolvable:$true] %s7480_s14 }
 0x758   : > { %12390 = vst [vmem:[#allocation56_spill] sm:$0xff] %v10460_v35  ;;  %v7038_v45 = vpop.eup %7037  ;;  %p7487_p11 = scmp.lt.s32.totalorder %s7481_s14, %s12090_s8 }
 0x759   : > { %12391 = vst [vmem:[#allocation52_spill] sm:$0xff] %v10462_v31  ;;  %v3070_v33 = vmul.f32 %v7038_v45, %v10335_v38  ;;  %v7040_v55 = vpop.eup %7039 }
 0x75a   : > { %v7042_v52 = vpop.eup %7041  ;;  %v3072_v63 = vmul.f32 %v7040_v55, %v10272_v0 }
 0x75b   : > { %v3102_v39 = vpack.c.bf16 %v3070_v33, %v3070_v33  ;;  %v3071_v54 = vmul.f32 %v7042_v52, %v10275_v23 }
 0x75c   : > { %v3104_v51 = vpack.c.bf16 %v3072_v63, %v3072_v63 }
 0x75d   : > { %v3272_v49 = vunpack.c.l.b16 %v3102_v39  ;;  %v3103_v10 = vpack.c.bf16 %v3071_v54, %v3071_v54 }
 0x75e   : > { %v3339_v38 = vunpack.c.l.b16 %v3104_v51 }
 0x75f   : > { %v10469_v19 = vpop.f32.mrf.mxu0  ;;  %v10471_v36 = vpop.f32.mrf.mxu1  ;;  %v3276_v14 = vpack.c.b16 %v3272_v49, %v3271_v21  ;;  %v3338_v5 = vunpack.c.l.b16 %v3103_v10  ;;  %v10519_v49 = vld [vmem:[#allocation8 + $0x98] sm:$0xff] }
 0x760   : > { %12392 = vst [vmem:[#allocation33_spill] sm:$0xff] %v10469_v19 }
 0x761   : > { %12393 = vst [vmem:[#allocation24_spill] sm:$0xff] %v10471_v36  ;;  %6253 = vmatmul.msk.bf16.gmra.mxu2 %vm1765_vm5, %v3276_v14  ;;  %v3346_v23 = vpack.c.b16 %v3339_v38, %v3338_v5 }
 0x763   : > { %v3353_v50 = vpop.permute.xlu0 %3352  ;;  %v2999_v0 = vpop.xlane.xlu2 %2998 }
 0x764   : > { %3380 = vmatpush.bf16.msrb.mxu3 %v3353_v50  ;;  %7043 = vrcp.f32 %v2999_v0 }
 0x765   : > { %v3005_v48 = vpop.xlane.xlu1 %3004 }
 0x767   : > { %v10474_v15 = vpop.f32.mrf.mxu0  ;;  %v10476_v8 = vpop.f32.mrf.mxu1 }
 0x768   : > { %12394 = vst [vmem:[#allocation64_spill] sm:$0xff] %v10474_v15  ;;  %3381 = vmatpush.bf16.msrb.mxu3 %v3351_v60 }
 0x769   : > { %12395 = vst [vmem:[#allocation65_spill] sm:$0xff] %v10476_v8 }
 0x76b   : > { %6254 = vmatmul.msk.bf16.vlgmr.msrb.gmra.mxu3 %vm1765_vm5, %v3346_v23  ;;  %v3008_v30 = vpop.xlane.xlu2 %3007  ;;  %v10514_v39 = vpop.f32.mrf.mxu2 }
 0x76c   : > { %12397 = vst [vmem:[#allocation67_spill] sm:$0xff] %v10514_v39 }
 0x76f   : > { %v10481_v62 = vpop.f32.mrf.mxu1  ;;  %v3461_v9 = vpop.f32.mrf.mxu0 }
 0x770   : > { %12396 = vst [vmem:[#allocation66_spill] sm:$0xff] %v10481_v62  ;;  %v10484_v1 = vadd.f32 %v3461_v9, %v10479_v47  ;;  %v10537_v9 = vld [vmem:[#allocation8 + $0xa0] sm:$0xff] }
 0x771   : > { %6266 = vmatmul.msk.bf16.vlgmr.msrb.gmra.mxu2 %vm1468_vm3, %v3551_v56  ;;  %v10498_v56 = vld [vmem:[#allocation8 + $0x90] sm:$0xff] }
 0x772   : > { %v3688_v58 = vsel %vm1765_vm5, %v10484_v1, -inf }
 0x773   : > { %3689 = vmax.xlane.f32.xlu2 %v3688_v58  ;;  %v10532_v5 = vpop.f32.mrf.mxu2 }
 0x774   : > { %12398 = vst [vmem:[#allocation68_spill] sm:$0xff] %v10532_v5 }
 0x777   : > { %v3530_v60 = vpop.f32.mrf.mxu1  ;;  %v3463_v43 = vpop.f32.mrf.mxu0 }
 0x778   : > { %v10490_v28 = vadd.f32 %v3530_v60, %v10479_v47  ;;  %v10517_v21 = vadd.f32 %v3463_v43, %v10500_v7  ;;  %v7044_v60 = vpop.eup %7043 }
 0x77a   : > { %v10492_v29 = vpop.xlane.xlu2 %3010  ;;  %v3712_v57 = vsel %vm1765_vm5, %v10490_v28, -inf  ;;  %v3691_v50 = vsel %vm1765_vm5, %v10517_v21, -inf }
 0x77b   : > { %3713 = vmax.xlane.f32.xlu2 %v3712_v57 }
 0x77d   : > { %v10496_v16 = vpop.permute.xlu1 %3554 }
 0x77f   : > { %v3532_v40 = vpop.f32.mrf.mxu1  ;;  %v3466_v46 = vpop.f32.mrf.mxu0 }
 0x780   : > { %v10503_v45 = vadd.f32 %v3532_v40, %v10500_v7  ;;  %v10506_v22 = vadd.f32 %v3466_v46, %v10498_v56 }
 0x782   : > { %v10508_v33 = vpop.xlane.xlu2 %3013  ;;  %v3715_v55 = vsel %vm1765_vm5, %v10503_v45, -inf  ;;  %v3694_v52 = vsel %vm1765_vm5, %v10506_v22, -inf }
 0x783   : > { %3716 = vmax.xlane.f32.xlu0 %v3715_v55  ;;  %3695 = vmax.xlane.f32.xlu1 %v3694_v52  ;;  %v3073_v55 = vmul.f32 %v7044_v60, %v10355_v61 }
 0x785   : > { %v10521_v63 = vpop.permute.xlu1 %3619 }
 0x787   : > { %v3468_v54 = vpop.f32.mrf.mxu0  ;;  %v3535_v51 = vpop.f32.mrf.mxu1 }
 0x788   : > { %v10524_v14 = vadd.f32 %v3468_v54, %v10519_v49  ;;  %v10535_v23 = vadd.f32 %v3535_v51, %v10498_v56 }
 0x78a   : > { %v10526_v10 = vpop.permute.xlu2 %3631  ;;  %v3697_v38 = vsel %vm1765_vm5, %v10524_v14, -inf  ;;  %v3718_v46 = vsel %vm1765_vm5, %v10535_v23, -inf }
 0x78b   : > { %3692 = vmax.xlane.f32.xlu0 %v3691_v50  ;;  %3698 = vmax.xlane.f32.xlu2 %v3697_v38  ;;  %v10551_v50 = vpop.f32.mrf.mxu2 }
 0x78c   : > { %12399 = vst [vmem:[#allocation69_spill] sm:$0xff] %v10551_v50 }
 0x78d   : > { %v10542_v57 = vpop.permute.xlu1 %3621 }
 0x78e   : > { %v3002_v58 = vpop.xlane.xlu0 %3001 }
 0x78f   : > { %7045 = vrcp.f32 %v3002_v58  ;;  %v3471_v0 = vpop.f32.mrf.mxu0  ;;  %v3537_v52 = vpop.f32.mrf.mxu1  ;;  %v3105_v58 = vpack.c.bf16 %v3073_v55, %v3073_v55 }
 0x790   : > { %v10540_v43 = vadd.f32 %v3471_v0, %v10537_v9  ;;  %v10554_v38 = vadd.f32 %v3537_v52, %v10519_v49  ;;  %7047 = vrcp.f32 %v3008_v30 }
 0x791   : > { %7049 = vrcp.f32 %v3005_v48  ;;  %v3340_v60 = vunpack.c.l.b16 %v3105_v58 }
 0x792   : > { %v10544_v40 = vpop.permute.xlu2 %3625  ;;  %v3700_v54 = vsel %vm1765_vm5, %v10540_v43, -inf  ;;  %v3721_v61 = vsel %vm1765_vm5, %v10554_v38, -inf  ;;  %7051 = vrcp.f32 %v10508_v33 }
 0x793   : > { %3719 = vmax.xlane.f32.xlu0 %v3718_v46  ;;  %3701 = vmax.xlane.f32.xlu2 %v3700_v54  ;;  %v10562_v30 = vpop.f32.mrf.mxu2  ;;  %7053 = vrcp.f32 %v10492_v29 }
 0x794   : > { %12400 = vst [vmem:[#allocation70_spill] sm:$0xff] %v10562_v30 }
 0x795   : > { %v7046_v51 = vpop.eup %7045 }
 0x796   : > { %v3074_v0 = vmul.f32 %v7046_v51, %v10409_v32  ;;  %v4097_v54 = vpop.permute.xlu1 %4096  ;;  %v7048_v55 = vpop.eup %7047 }
 0x797   : > { %v7050_v32 = vpop.eup %7049  ;;  %v3076_v48 = vmul.f32 %v7048_v55, %v10367_v3 }
 0x798   : > { %v3106_v62 = vpack.c.bf16 %v3074_v0, %v3074_v0  ;;  %v3075_v58 = vmul.f32 %v7050_v32, %v10357_v41 }
 0x799   : > { %v3108_v0 = vpack.c.bf16 %v3076_v48, %v3076_v48  ;;  %v10577_v48 = vld [vmem:[#allocation8 + $0xa8] sm:$0xff] }
 0x79a   : > { %v4099_v8 = vpop.permute.xlu2 %4098  ;;  %v3341_v46 = vunpack.c.l.b16 %v3106_v62 }
 0x79b   : > { %4120 = vmatpush.bf16.msrb.mxu0 %v4099_v8  ;;  %3722 = vmax.xlane.f32.xlu0 %v3721_v61  ;;  %v3343_v3 = vunpack.c.l.b16 %v3108_v0  ;;  %v10574_v41 = vpop.f32.mrf.mxu2  ;;  %v3473_v0 = vpop.f32.mrf.mxu0 }
 0x79c   : > { %4385 = vrot.lane.b32.xlu1 %v12382_v34, %s7576_s24  ;;  %v3347_v52 = vpack.c.b16 %v3341_v46, %v3340_v60  ;;  %v3107_v46 = vpack.c.bf16 %v3075_v58, %v3075_v58  ;;  %12401 = vst [vmem:[#allocation71_spill] sm:$0xff] %v10574_v41 }
 0x79e   : > { %6255 = vmatmul.msk.bf16.gmra.mxu3 %vm1765_vm5, %v3347_v52  ;;  %v4093_v60 = vpop.permute.xlu1 %4092  ;;  %v3342_v32 = vunpack.c.l.b16 %v3107_v46 }
 0x79f   : > { %4121 = vmatpush.bf16.msrb.mxu0 %v4097_v54 }
 0x7a0   : > { %v3348_v58 = vpack.c.b16 %v3343_v3, %v3342_v32  ;;  %v3654_v3 = vsel %vm1468_vm3, %v10526_v10, 0 }
 0x7a1   : > { %v3553_v51 = vpop.permute.xlu0 %3552 }
 0x7a2   : > { %v4095_v8 = vpop.permute.xlu2 %4094  ;;  %6267 = vmatmul.msk.bf16.gmra.mxu2 %vm1468_vm3, %v3553_v51 }
 0x7a3   : > { %4122 = vmatpush.bf16.msrb.mxu0 %v4095_v8  ;;  %v3540_v62 = vpop.f32.mrf.mxu1 }
 0x7a4   : > { %v10568_v61 = vadd.f32 %v3540_v62, %v10537_v9  ;;  %v7052_v62 = vpop.eup %7051 }
 0x7a5   : > { %v7054_v33 = vpop.eup %7053 }
 0x7a6   : > { %v3724_v54 = vsel %vm1765_vm5, %v10568_v61, -inf }
 0x7a7   : > { %4123 = vmatpush.bf16.msrb.mxu0 %v4093_v60  ;;  %3725 = vmax.xlane.f32.xlu2 %v3724_v54  ;;  %v3078_v60 = vmul.f32 %v7052_v62, %v10394_v27  ;;  %v3077_v54 = vmul.f32 %v7054_v33, %v10384_v20  ;;  %v3476_v62 = vpop.f32.mrf.mxu0 }
 0x7a9   : > { %v3634_v52 = vpop.permute.xlu0 %3633  ;;  %v3109_v32 = vpack.c.bf16 %v3077_v54, %v3077_v54  ;;  %v10604_v54 = vld [vmem:[#allocation8 + $0xb8] sm:$0xff] }
 0x7aa   : > { %v3657_v55 = vsel %vm1468_vm3, %v3634_v52, 0  ;;  %v10591_v52 = vpop.f32.mrf.mxu2 }
 0x7ab   : > { %v3542_v51 = vpop.f32.mrf.mxu1  ;;  %3663 = vmatpush.bf16.xpose.msra.mxu3 %v3657_v55  ;;  %12402 = vst [vmem:[#allocation72_spill] sm:$0xff] %v10591_v52  ;;  %v3110_v55 = vpack.c.bf16 %v3078_v60, %v3078_v60  ;;  %v3344_v10 = vunpack.c.l.b16 %v3109_v32 }
 0x7ac   : > { %v10580_v8 = vadd.f32 %v3542_v51, %v10577_v48  ;;  %v10593_v51 = vld [vmem:[#allocation8 + $0xb0] sm:$0xff] }
 0x7ad   : > { %v3345_v27 = vunpack.c.l.b16 %v3110_v55 }
 0x7ae   : > { %6256 = vmatmul.msk.bf16.gmra.mxu3 %vm1765_vm5, %v3348_v58  ;;  %v3727_v29 = vsel %vm1765_vm5, %v10580_v8, -inf }
 0x7af   : > { %3728 = vmax.xlane.f32.xlu0 %v3727_v29 }
 0x7b1   : > { %v3557_v46 = vpop.permute.xlu0 %3556 }
 0x7b2   : > { %6268 = vmatmul.msk.bf16.gmra.mxu2 %vm1468_vm3, %v10496_v16  ;;  %v10601_v60 = vpop.f32.mrf.mxu2 }
 0x7b3   : > { %3664 = vmatpush.bf16.xpose.msra.mxu3 %v3654_v3  ;;  %v3349_v3 = vpack.c.b16 %v3345_v27, %v3344_v10  ;;  %12403 = vst [vmem:[#allocation73_spill] sm:$0xff] %v10601_v60 }
 0x7b8   : > { %v3545_v58 = vpop.f32.mrf.mxu1 }
 0x7b9   : > { %v10596_v29 = vadd.f32 %v3545_v58, %v10593_v51  ;;  %v3630_v20 = vpop.permute.xlu0 %3629 }
 0x7ba   : > { %v3651_v33 = vsel %vm1468_vm3, %v3630_v20, 0  ;;  %v10612_v20 = vadd.f32 %v3473_v0, %v10577_v48  ;;  %v10623_v0 = vpop.f32.mrf.mxu2 }
 0x7bb   : > { %v3730_v16 = vsel %vm1765_vm5, %v10596_v29, -inf  ;;  %3665 = vmatpush.bf16.xpose.msra.mxu3 %v3651_v33  ;;  %12404 = vst [vmem:[#allocation74_spill] sm:$0xff] %v10623_v0 }
 0x7bc   : > { %3731 = vmax.xlane.f32.xlu0 %v3730_v16  ;;  %v3478_v16 = vpop.f32.mrf.mxu0  ;;  %v3703_v10 = vsel %vm1765_vm5, %v10612_v20, -inf }
 0x7be   : > { %6257 = vmatmul.msk.bf16.gmra.mxu3 %vm1765_vm5, %v3349_v3  ;;  %v10621_v3 = vadd.f32 %v3478_v16, %v10604_v54  ;;  %v12408_v16 = vld [vmem:[#allocation34_spill] sm:$0xff] }
 0x7bf   : > { %4387 = vrot.lane.b32.xlu2 %v9149_v42, %s7576_s24 }
 0x7c0   : > { %v3547_v55 = vpop.f32.mrf.mxu1 }
 0x7c1   : > { %v10609_v58 = vadd.f32 %v3547_v55, %v10604_v54  ;;  %v3628_v32 = vpop.permute.xlu0 %3627  ;;  %v10626_v55 = vadd.f32 %v3476_v62, %v10593_v51 }
 0x7c2   : > { %6269 = vmatmul.msk.bf16.gmra.mxu2 %vm1468_vm3, %v3557_v46  ;;  %v3648_v27 = vsel %vm1468_vm3, %v3628_v32, 0  ;;  %v3709_v46 = vsel %vm1765_vm5, %v10621_v3, -inf }
 0x7c3   : > { %v3733_v33 = vsel %vm1765_vm5, %v10609_v58, -inf  ;;  %3666 = vmatpush.bf16.xpose.msra.mxu3 %v3648_v27  ;;  %v3706_v32 = vsel %vm1765_vm5, %v10626_v55, -inf  ;;  %v10634_v27 = vpop.f32.mrf.mxu2 }
 0x7c4   : > { %3734 = vmax.xlane.f32.xlu0 %v3733_v33  ;;  %12405 = vst [vmem:[#allocation75_spill] sm:$0xff] %v10634_v27 }
 0x7c6   : > { %3704 = vmax.xlane.f32.xlu1 %v3703_v10 }
 0x7cb   : > { %v10636_v33 = vpop.f32.mrf.mxu2 }
 0x7cc   : > { %3710 = vmax.xlane.f32.xlu0 %v3709_v46  ;;  %12406 = vst [vmem:[#allocation76_spill] sm:$0xff] %v10636_v33  ;;  %v12410_v46 = vld [vmem:[#allocation18_spill] sm:$0xff] }
 0x7ce   : > { %3707 = vmax.xlane.f32.xlu1 %v3706_v32  ;;  %6270 = vmatmul.msk.bf16.vlgmr.msra.gmra.mxu3 %vm1468_vm3, %v10521_v63  ;;  %v3624_v63 = vpop.permute.xlu0 %3623 }
 0x7de   : > { %6271 = vmatmul.msk.bf16.gmra.mxu3 %vm1468_vm3, %v10542_v57 }
 0x7e0   : > { %4383 = vrot.lane.b32.xlu0 %v12386_v44, %s7576_s24 }
 0x7e4   : > { %v10642_v62 = vpop.f32.mrf.mxu2 }
 0x7e5   : > { %12407 = vst [vmem:[#allocation77_spill] sm:$0xff] %v10642_v62 }
 0x7e6   : > { %v3690_v57 = vpop.xlane.xlu2 %3689 }
 0x7e7   : > { %4167 = vrot.lane.b32.xlu1 %v9232_v53, %s7575_s5  ;;  %v3784_v0 = vsub.f32 %v10484_v1, %v3690_v57 }
 0x7e8   : > { %4171 = vrot.lane.b32.xlu0 %v12408_v16, %s7575_s5 }
 0x7e9   : > { %v3816_v52 = vmul.f32 1.442695, %v3784_v0 }
 0x7ec   : > { %v10648_v10 = vpop.f32.mrf.mxu2 }
 0x7ed   : > { %12409 = vst [vmem:[#allocation34_spill] sm:$0xff] %v10648_v10 }
 0x7ee   : > { %6272 = vmatmul.msk.bf16.gmra.mxu3 %vm1468_vm3, %v3624_v63  ;;  %v3714_v27 = vpop.xlane.xlu2 %3713 }
 0x7ef   : > { %v3792_v10 = vsub.f32 %v10490_v28, %v3714_v27 }
 0x7f0   : > { %4169 = vrot.lane.b32.xlu0 %v12410_v46, %s7575_s5 }
 0x7f1   : > { %v3832_v11 = vmul.f32 1.442695, %v3792_v10 }
 0x7f3   : > { %7055 = vpow2.f32 %v3832_v11 }
 0x7f4   : > { %v3599_v32 = vpop.f32.mrf.mxu2  ;;  %7057 = vpow2.f32 %v3816_v52 }
 0x7f5   : > { %v10670_v27 = vadd.f32 %v3599_v32, %v10479_v47 }
 0x7f6   : > { %v10661_v63 = vpop.xlane.xlu0 %3716 }
 0x7fc   : > { %v3601_v33 = vpop.f32.mrf.mxu2 }
 0x7fd   : > { %v10654_v62 = vadd.f32 %v3601_v33, %v10500_v7  ;;  %v10664_v33 = vpop.eup %7055 }
 0x7fe   : > { %6273 = vmatmul.msk.bf16.gmra.mxu3 %vm1468_vm3, %v10544_v40  ;;  %v3699_v60 = vpop.xlane.xlu2 %3698  ;;  %v3693_v41 = vpop.xlane.xlu0 %3692  ;;  %v3904_v12 = vsel %vm1765_vm5, %v10664_v33, 0.0 }
 0x7ff   : > { %v3739_v13 = vsel %vm1765_vm5, %v10654_v62, -inf  ;;  %v3785_v40 = vsub.f32 %v10517_v21, %v3693_v41  ;;  %v10672_v10 = vpop.eup %7057  ;;  %v3787_v11 = vsub.f32 %v10524_v14, %v3699_v60  ;;  %v3736_v21 = vsel %vm1765_vm5, %v10670_v27, -inf  ;;  %v3696_v60 = vpop.xlane.xlu1 %3695 }
 0x800   : > { %3740 = vmax.xlane.f32.xlu2 %v3739_v13  ;;  %v3880_v1 = vsel %vm1765_vm5, %v10672_v10, 0.0 }
 0x801   : > { %v3818_v13 = vmul.f32 1.442695, %v3785_v40  ;;  %v3822_v41 = vmul.f32 1.442695, %v3787_v11 }
 0x803   : > { %7059 = vpow2.f32 %v3818_v13 }
 0x804   : > { %7061 = vpow2.f32 %v3822_v41 }
 0x806   : > { %v3702_v28 = vpop.xlane.xlu2 %3701  ;;  %v3720_v52 = vpop.xlane.xlu0 %3719 }
 0x807   : > { %v3794_v14 = vsub.f32 %v10535_v23, %v3720_v52  ;;  %v3788_v25 = vsub.f32 %v10540_v43, %v3702_v28 }
 0x809   : > { %v10683_v0 = vpop.eup %7059  ;;  %v3836_v40 = vmul.f32 1.442695, %v3794_v14  ;;  %v3824_v36 = vmul.f32 1.442695, %v3788_v25 }
 0x80a   : > { %v3883_v57 = vsel %vm1765_vm5, %v10683_v0, 0.0 }
 0x80b   : > { %7063 = vpow2.f32 %v3836_v40 }
 0x80c   : > { %7065 = vpow2.f32 %v3824_v36 }
 0x80e   : > { %v4386_v41 = vpop.permute.xlu1 %4385 }
 0x80f   : > { %v4408_v52 = vsel %vm1468_vm3, %v4386_v41, 0 }
 0x811   : > { %3905 = vadd.xlane.f32.xlu1 %v3904_v12 }
 0x818   : > { %4381 = vrot.lane.b32.xlu2 %v12383_v4, %s7576_s24 }
 0x819   : > { %3881 = vadd.xlane.f32.xlu1 %v3880_v1  ;;  %v10689_v1 = vpop.eup %7061 }
 0x81a   : > { %3737 = vmax.xlane.f32.xlu0 %v3736_v21  ;;  %v10681_v12 = vpop.xlane.xlu2 %3725  ;;  %v10691_v21 = vpop.xlane.xlu0 %3722  ;;  %v3889_v23 = vsel %vm1765_vm5, %v10689_v1, 0.0 }
 0x821   : > { %3884 = vadd.xlane.f32.xlu1 %v3883_v57  ;;  %v10698_v57 = vpop.eup %7063 }
 0x822   : > { %v4388_v32 = vpop.permute.xlu2 %4387  ;;  %v3729_v14 = vpop.xlane.xlu0 %3728  ;;  %v3910_v40 = vsel %vm1765_vm5, %v10698_v57, 0.0 }
 0x823   : > { %v4411_v13 = vsel %vm1468_vm3, %v4388_v32, 0  ;;  %v3797_v41 = vsub.f32 %v10580_v8, %v3729_v14  ;;  %v10708_v50 = vpop.eup %7065 }
 0x824   : > { %4417 = vmatpush.bf16.xpose.msra.mxu0 %v4411_v13  ;;  %v12411_v13 = vld [vmem:[#allocation21_spill] sm:$0xff]  ;;  %v3892_v28 = vsel %vm1765_vm5, %v10708_v50, 0.0 }
 0x825   : > { %v10693_v11 = vpop.f32.mrf.mxu2 }
 0x829   : > { %3890 = vadd.xlane.f32.xlu1 %v3889_v23 }
 0x82c   : > { %4418 = vmatpush.bf16.xpose.msra.mxu0 %v4408_v52  ;;  %v3842_v52 = vmul.f32 1.442695, %v3797_v41 }
 0x82d   : > { %v3606_v32 = vpop.f32.mrf.mxu2 }
 0x82e   : > { %4165 = vrot.lane.b32.xlu0 %v12411_v13, %s7575_s5  ;;  %7067 = vpow2.f32 %v3842_v52 }
 0x82f   : > { %v3732_v31 = vpop.xlane.xlu0 %3731 }
 0x830   : > { %v3798_v52 = vsub.f32 %v10596_v29, %v3732_v31 }
 0x831   : > { %3911 = vadd.xlane.f32.xlu1 %v3910_v40 }
 0x834   : > { %v10718_v40 = vpop.eup %7067 }
 0x835   : > { %v3609_v30 = vpop.f32.mrf.mxu2 }
 0x837   : > { %v3735_v43 = vpop.xlane.xlu0 %3734 }
 0x838   : > { %v3799_v31 = vsub.f32 %v10609_v58, %v3735_v43 }
 0x839   : > { %v10706_v23 = vpop.xlane.xlu1 %3704 }
 0x83d   : > { %v3611_v15 = vpop.f32.mrf.mxu2 }
 0x83e   : > { %v10711_v19 = vadd.f32 %v3611_v15, %v10577_v48  ;;  %v3793_v15 = vsub.f32 %v10503_v45, %v10661_v63 }
 0x83f   : > { %v10727_v39 = vpop.xlane.xlu0 %3710 }
 0x840   : > { %v3751_v25 = vsel %vm1765_vm5, %v10711_v19, -inf  ;;  %v3834_v5 = vmul.f32 1.442695, %v3793_v15  ;;  %v10741_v15 = vadd.f32 %v3606_v32, %v10519_v49 }
 0x841   : > { %3893 = vadd.xlane.f32.xlu2 %v3892_v28  ;;  %v3708_v36 = vpop.xlane.xlu1 %3707  ;;  %3752 = vmax.xlane.f32.xlu1 %v3751_v25  ;;  %v3919_v28 = vsel %vm1765_vm5, %v10718_v40, 0.0  ;;  %v3844_v25 = vmul.f32 1.442695, %v3798_v52  ;;  %v3846_v52 = vmul.f32 1.442695, %v3799_v31  ;;  %v3789_v31 = vsub.f32 %v10612_v20, %v10706_v23 }
 0x842   : > { %v3790_v8 = vsub.f32 %v10626_v55, %v3708_v36  ;;  %v3786_v36 = vsub.f32 %v10506_v22, %v3696_v60  ;;  %v3745_v58 = vsel %vm1765_vm5, %v10741_v15, -inf  ;;  %v10777_v20 = vadd.f32 %v10693_v11, %v10498_v56 }
 0x844   : > { %v3828_v14 = vmul.f32 1.442695, %v3790_v8 }
 0x845   : > { %v10722_v41 = vpop.f32.mrf.mxu2 }
 0x846   : > { %7069 = vpow2.f32 %v3828_v14  ;;  %v3820_v14 = vmul.f32 1.442695, %v3786_v36 }
 0x847   : > { %7071 = vpow2.f32 %v3834_v5 }
 0x848   : > { %7073 = vpow2.f32 %v3844_v25 }
 0x849   : > { %3920 = vadd.xlane.f32.xlu1 %v3919_v28  ;;  %v3796_v28 = vsub.f32 %v10568_v61, %v10681_v12  ;;  %7075 = vpow2.f32 %v3820_v14 }
 0x84a   : > { %7077 = vpow2.f32 %v3846_v52 }
 0x84b   : > { %v3840_v43 = vmul.f32 1.442695, %v3796_v28  ;;  %v3795_v28 = vsub.f32 %v10554_v38, %v10691_v21  ;;  %v3791_v38 = vsub.f32 %v10621_v3, %v10727_v39 }
 0x84c   : > { %v10729_v55 = vpop.eup %7069 }
 0x84d   : > { %v3616_v8 = vpop.f32.mrf.mxu2  ;;  %v3898_v45 = vsel %vm1765_vm5, %v10729_v55, 0.0  ;;  %v10744_v60 = vpop.eup %7071  ;;  %7079 = vpow2.f32 %v3840_v43  ;;  %v3742_v43 = vsel %vm1765_vm5, %v10777_v20, -inf  ;;  %v3830_v11 = vmul.f32 1.442695, %v3791_v38 }
 0x84e   : > { %v10735_v63 = vadd.f32 %v3616_v8, %v10604_v54  ;;  %3899 = vadd.xlane.f32.xlu2 %v3898_v45  ;;  %v10748_v25 = vpop.eup %7073  ;;  %v3907_v32 = vsel %vm1765_vm5, %v10744_v60, 0.0  ;;  %v10757_v8 = vadd.f32 %v3609_v30, %v10537_v9 }
 0x84f   : > { %v3922_v36 = vsel %vm1765_vm5, %v10748_v25, 0.0  ;;  %v10759_v12 = vpop.eup %7075 }
 0x850   : > { %v3757_v29 = vsel %vm1765_vm5, %v10735_v63, -inf  ;;  %v10761_v45 = vpop.eup %7077  ;;  %v3886_v14 = vsel %vm1765_vm5, %v10759_v12, 0.0 }
 0x851   : > { %3758 = vmax.xlane.f32.xlu1 %v3757_v29  ;;  %v3748_v29 = vsel %vm1765_vm5, %v10757_v8, -inf  ;;  %v3925_v30 = vsel %vm1765_vm5, %v10761_v45, 0.0 }
 0x852   : > { %v4384_v22 = vpop.permute.xlu0 %4383 }
 0x853   : > { %v4405_v5 = vsel %vm1468_vm3, %v4384_v22, 0  ;;  %v10771_v22 = vpop.f32.mrf.mxu3  ;;  %v10773_v52 = vpop.eup %7079 }
 0x854   : > { %4419 = vmatpush.bf16.xpose.msra.mxu0 %v4405_v5  ;;  %12412 = vst [vmem:[#allocation18_spill] sm:$0xff] %v10771_v22  ;;  %v3826_v5 = vmul.f32 1.442695, %v3789_v31 }
 0x856   : > { %3746 = vmax.xlane.f32.xlu2 %v3745_v58  ;;  %7081 = vpow2.f32 %v3826_v5  ;;  %v3916_v58 = vsel %vm1765_vm5, %v10773_v52, 0.0 }
 0x858   : > { %3908 = vadd.xlane.f32.xlu0 %v3907_v32 }
 0x859   : > { %3923 = vadd.xlane.f32.xlu1 %v3922_v36  ;;  %v4168_v32 = vpop.permute.xlu1 %4167  ;;  %v3838_v36 = vmul.f32 1.442695, %v3795_v28 }
 0x85a   : > { %v4172_v61 = vpop.permute.xlu0 %4171 }
 0x85b   : > { %4193 = vmatpush.bf16.msrb.mxu1 %v4172_v61  ;;  %v10787_v56 = vpop.f32.mrf.mxu3  ;;  %7083 = vpow2.f32 %v3838_v36 }
 0x85c   : > { %v10785_v61 = vpop.eup %7081  ;;  %12413 = vst [vmem:[#allocation21_spill] sm:$0xff] %v10787_v56  ;;  %7085 = vpow2.f32 %v3830_v11 }
 0x85d   : > { %v3895_v21 = vsel %vm1765_vm5, %v10785_v61, 0.0 }
 0x85e   : > { %3749 = vmax.xlane.f32.xlu2 %v3748_v29 }
 0x860   : > { %3887 = vadd.xlane.f32.xlu0 %v3886_v14 }
 0x861   : > { %3926 = vadd.xlane.f32.xlu1 %v3925_v30  ;;  %v10793_v29 = vpop.eup %7083 }
 0x862   : > { %v4170_v23 = vpop.permute.xlu0 %4169  ;;  %v3913_v30 = vsel %vm1765_vm5, %v10793_v29, 0.0  ;;  %v10801_v39 = vpop.eup %7085 }
 0x863   : > { %4194 = vmatpush.bf16.msrb.mxu1 %v4170_v23  ;;  %v10795_v14 = vpop.f32.mrf.mxu3  ;;  %v3901_v28 = vsel %vm1765_vm5, %v10801_v39, 0.0 }
 0x864   : > { %12414 = vst [vmem:[#allocation78_spill] sm:$0xff] %v10795_v14 }
 0x866   : > { %3917 = vadd.xlane.f32.xlu2 %v3916_v58 }
 0x867   : > { %4195 = vmatpush.bf16.msrb.mxu1 %v4168_v32 }
 0x868   : > { %3743 = vmax.xlane.f32.xlu0 %v3742_v43 }
 0x86b   : > { %v10804_v23 = vpop.f32.mrf.mxu3 }
 0x86c   : > { %12415 = vst [vmem:[#allocation79_spill] sm:$0xff] %v10804_v23 }
 0x870   : > { %3896 = vadd.xlane.f32.xlu0 %v3895_v21 }
 0x873   : > { %v3741_v31 = vpop.xlane.xlu2 %3740  ;;  %v10814_v32 = vpop.f32.mrf.mxu3 }
 0x874   : > { %12416 = vst [vmem:[#allocation80_spill] sm:$0xff] %v10814_v32 }
 0x878   : > { %3914 = vadd.xlane.f32.xlu0 %v3913_v30 }
 0x87a   : > { %4456 = vrot.lane.b32.xlu1 %v12408_v16, %s7576_s24 }
 0x87b   : > { %v4382_v5 = vpop.permute.xlu2 %4381  ;;  %v10818_v36 = vpop.f32.mrf.mxu3 }
 0x87c   : > { %v4402_v3 = vsel %vm1468_vm3, %v4382_v5, 0  ;;  %12417 = vst [vmem:[#allocation81_spill] sm:$0xff] %v10818_v36 }
 0x87d   : > { %4420 = vmatpush.bf16.xpose.msra.mxu0 %v4402_v3 }
 0x87e   : > { %4375 = vrot.lane.b32.xlu2 %v12386_v44, %s7577_s1 }
 0x880   : > { %3902 = vadd.xlane.f32.xlu0 %v3901_v28 }
 0x882   : > { %4454 = vrot.lane.b32.xlu1 %v12410_v46, %s7576_s24 }
 0x883   : > { %v10827_v3 = vpop.f32.mrf.mxu3 }
 0x884   : > { %v3906_v58 = vpop.xlane.xlu1 %3905  ;;  %12418 = vst [vmem:[#allocation82_spill] sm:$0xff] %v10827_v3 }
 0x886   : > { %4377 = vrot.lane.b32.xlu2 %v12382_v34, %s7577_s1 }
 0x88a   : > { %4242 = vrot.lane.b32.xlu1 %v9043_v18, %s7575_s5 }
 0x88c   : > { %v3882_v43 = vpop.xlane.xlu1 %3881 }
 0x88d   : > { %7087 = vrcp.f32 %v3882_v43  ;;  %v3738_v11 = vpop.xlane.xlu0 %3737 }
 0x88e   : > { %v3800_v36 = vsub.f32 %v10670_v27, %v3738_v11 }
 0x892   : > { %4240 = vrot.lane.b32.xlu1 %v9137_v24, %s7575_s5 }
 0x893   : > { %v7088_v21 = vpop.eup %7087 }
 0x894   : > { %4373 = vrot.lane.b32.xlu0 %v12383_v4, %s7577_s1  ;;  %v3885_v38 = vpop.xlane.xlu1 %3884  ;;  %v4008_v30 = vmul.f32 %v7088_v21, %v10672_v10  ;;  %v12419_v10 = vld [vmem:[#allocation22_spill] sm:$0xff]  ;;  %v10834_v21 = vpop.f32.mrf.mxu3 }
 0x895   : > { %7089 = vrcp.f32 %v3885_v38  ;;  %v3848_v38 = vmul.f32 1.442695, %v3800_v36  ;;  %12420 = vst [vmem:[#allocation22_spill] sm:$0xff] %v10834_v21  ;;  %v10848_v36 = vadd.f32 %v10722_v41, %v10593_v51 }
 0x896   : > { %v4040_v28 = vpack.c.bf16 %v4008_v30, %v4008_v30 }
 0x897   : > { %7091 = vpow2.f32 %v3848_v38 }
 0x898   : > { %v4080_v14 = vunpack.c.l.b16 %v4040_v28 }
 0x89a   : > { %4379 = vrot.lane.b32.xlu1 %v9149_v42, %s7577_s1 }
 0x89b   : > { %v7090_v5 = vpop.eup %7089 }
 0x89c   : > { %v4009_v43 = vmul.f32 %v7090_v5, %v10683_v0  ;;  %v3891_v30 = vpop.xlane.xlu1 %3890  ;;  %v3668_v0 = vpop.f32.mrf.mxu3  ;;  %v3754_v5 = vsel %vm1765_vm5, %v10848_v36, -inf }
 0x89d   : > { %v10836_v3 = vpop.eup %7091 }
 0x89e   : > { %v4041_v32 = vpack.c.bf16 %v4009_v43, %v4009_v43  ;;  %v3928_v27 = vsel %vm1765_vm5, %v10836_v3, 0.0 }
 0x8a0   : > { %v4166_v23 = vpop.permute.xlu0 %4165  ;;  %v4081_v56 = vunpack.c.l.b16 %v4041_v32 }
 0x8a1   : > { %4196 = vmatpush.bf16.msrb.mxu1 %v4166_v23  ;;  %v10841_v23 = vadd.f32 %v3668_v0, %v10479_v47 }
 0x8a2   : > { %v4088_v22 = vpack.c.b16 %v4081_v56, %v4080_v14  ;;  %4238 = vrot.lane.b32.xlu1 %v12419_v10, %s7575_s5  ;;  %v3801_v56 = vsub.f32 %v10654_v62, %v3741_v31 }
 0x8a4   : > { %6274 = vmatmul.msk.bf16.vlgmr.msrb.gmra.mxu0 %vm1765_vm5, %v4088_v22  ;;  %v3912_v14 = vpop.xlane.xlu1 %3911  ;;  %v3760_v22 = vsel %vm1765_vm5, %v10841_v23, -inf  ;;  %v3850_v32 = vmul.f32 1.442695, %v3801_v56 }
 0x8a6   : > { %7093 = vpow2.f32 %v3850_v32 }
 0x8a7   : > { %7095 = vrcp.f32 %v3906_v58 }
 0x8ac   : > { %v10854_v47 = vpop.eup %7093 }
 0x8ad   : > { %v3931_v62 = vsel %vm1765_vm5, %v10854_v47, 0.0  ;;  %v7096_v41 = vpop.eup %7095 }
 0x8ae   : > { %v4016_v38 = vmul.f32 %v7096_v41, %v10664_v33 }
 0x8af   : > { %3929 = vadd.xlane.f32.xlu2 %v3928_v27 }
 0x8b0   : > { %v4048_v58 = vpack.c.bf16 %v4016_v38, %v4016_v38 }
 0x8b4   : > { %v10850_v11 = vpop.xlane.xlu1 %3752  ;;  %v3894_v28 = vpop.xlane.xlu2 %3893 }
 0x8b7   : > { %3761 = vmax.xlane.f32.xlu2 %v3760_v22  ;;  %v10865_v22 = vpop.f32.mrf.mxu3 }
 0x8bc   : > { %v10858_v31 = vpop.xlane.xlu1 %3920 }
 0x8be   : > { %3755 = vmax.xlane.f32.xlu0 %v3754_v5 }
 0x8c1   : > { %v3900_v56 = vpop.xlane.xlu2 %3899 }
 0x8c4   : > { %v10863_v27 = vpop.xlane.xlu1 %3758 }
 0x8c6   : > { %3932 = vadd.xlane.f32.xlu0 %v3931_v62 }
 0x8cb   : > { %v3909_v43 = vpop.xlane.xlu0 %3908 }
 0x8cc   : > { %7097 = vrcp.f32 %v3909_v43  ;;  %v4153_v43 = vunpack.c.l.b16 %v4048_v58  ;;  %v10871_v34 = vpop.xlane.xlu1 %3923  ;;  %v10876_v58 = vpop.f32.mrf.mxu3 }
 0x8cd   : > { %7099 = vrcp.f32 %v3891_v30 }
 0x8cf   : > { %4452 = vrot.lane.b32.xlu2 %v9232_v53, %s7576_s24 }
 0x8d2   : > { %v7098_v0 = vpop.eup %7097 }
 0x8d3   : > { %v4017_v32 = vmul.f32 %v7098_v0, %v10744_v60  ;;  %v3888_v5 = vpop.xlane.xlu0 %3887  ;;  %v7100_v62 = vpop.eup %7099 }
 0x8d4   : > { %7101 = vrcp.f32 %v3888_v5  ;;  %v4011_v30 = vmul.f32 %v7100_v62, %v10689_v1  ;;  %v3747_v0 = vpop.xlane.xlu2 %3746 }
 0x8d5   : > { %v4049_v21 = vpack.c.bf16 %v4017_v32, %v4017_v32  ;;  %7103 = vrcp.f32 %v3894_v28  ;;  %v3803_v28 = vsub.f32 %v10741_v15, %v3747_v0 }
 0x8d6   : > { %v4043_v2 = vpack.c.bf16 %v4011_v30, %v4011_v30 }
 0x8d7   : > { %v4154_v33 = vunpack.c.l.b16 %v4049_v21 }
 0x8d8   : > { %v4083_v62 = vunpack.c.l.b16 %v4043_v2 }
 0x8d9   : > { %v4161_v41 = vpack.c.b16 %v4154_v33, %v4153_v43 }
 0x8da   : > { %v7102_v35 = vpop.eup %7101  ;;  %4244 = vrot.lane.b32.xlu0 %v9083_v59, %s7575_s5 }
 0x8db   : > { %v4010_v38 = vmul.f32 %v7102_v35, %v10759_v12  ;;  %6278 = vmatmul.msk.bf16.vlgmr.msrb.gmra.mxu1 %vm1765_vm5, %v4161_v41  ;;  %v3744_v60 = vpop.xlane.xlu0 %3743  ;;  %v7104_v33 = vpop.eup %7103 }
 0x8dc   : > { %v3802_v32 = vsub.f32 %v10777_v20, %v3744_v60  ;;  %v10879_v35 = vpop.xlane.xlu1 %3926  ;;  %v3750_v20 = vpop.xlane.xlu2 %3749 }
 0x8dd   : > { %v4042_v1 = vpack.c.bf16 %v4010_v38, %v4010_v38  ;;  %v3675_v41 = vpop.f32.mrf.mxu3  ;;  %v4012_v38 = vmul.f32 %v7104_v33, %v10708_v50 }
 0x8de   : > { %v3852_v21 = vmul.f32 1.442695, %v3802_v32  ;;  %v10888_v32 = vadd.f32 %v3675_v41, %v10519_v49  ;;  %v3804_v49 = vsub.f32 %v10757_v8, %v3750_v20 }
 0x8df   : > { %v4082_v5 = vunpack.c.l.b16 %v4042_v1 }
 0x8e0   : > { %7105 = vpow2.f32 %v3852_v21  ;;  %v3854_v21 = vmul.f32 1.442695, %v3803_v28  ;;  %v3769_v0 = vsel %vm1765_vm5, %v10888_v32, -inf }
 0x8e1   : > { %v4089_v43 = vpack.c.b16 %v4083_v62, %v4082_v5 }
 0x8e3   : > { %6275 = vmatmul.msk.bf16.gmra.mxu0 %vm1765_vm5, %v4089_v43  ;;  %v3897_v30 = vpop.xlane.xlu0 %3896 }
 0x8e4   : > { %7107 = vrcp.f32 %v3897_v30 }
 0x8e5   : > { %7109 = vrcp.f32 %v3912_v14  ;;  %v4044_v14 = vpack.c.bf16 %v4012_v38, %v4012_v38  ;;  %v3918_v38 = vpop.xlane.xlu2 %3917 }
 0x8e6   : > { %v10881_v12 = vpop.eup %7105 }
 0x8e7   : > { %v3934_v2 = vsel %vm1765_vm5, %v10881_v12, 0.0  ;;  %v4084_v33 = vunpack.c.l.b16 %v4044_v14 }
 0x8e8   : > { %3935 = vadd.xlane.f32.xlu1 %v3934_v2 }
 0x8ea   : > { %v7108_v60 = vpop.eup %7107 }
 0x8eb   : > { %v7110_v1 = vpop.eup %7109  ;;  %v4013_v5 = vmul.f32 %v7108_v60, %v10785_v61  ;;  %v3915_v62 = vpop.xlane.xlu0 %3914  ;;  %v3856_v60 = vmul.f32 1.442695, %v3804_v49 }
 0x8ec   : > { %7111 = vrcp.f32 %v3915_v62  ;;  %v4457_v30 = vpop.permute.xlu1 %4456  ;;  %v4018_v50 = vmul.f32 %v7110_v1, %v10698_v57  ;;  %v3805_v62 = vsub.f32 %v10711_v19, %v10850_v11 }
 0x8ed   : > { %v4045_v43 = vpack.c.bf16 %v4013_v5, %v4013_v5  ;;  %7113 = vrcp.f32 %v3900_v56  ;;  %v4480_v15 = vsel %vm1468_vm3, %v4457_v30, 0 }
 0x8ee   : > { %7115 = vpow2.f32 %v3854_v21  ;;  %4486 = vmatpush.bf16.xpose.msra.mxu1 %v4480_v15  ;;  %v4050_v2 = vpack.c.bf16 %v4018_v50, %v4018_v50  ;;  %v3858_v49 = vmul.f32 1.442695, %v3805_v62 }
 0x8ef   : > { %v4085_v41 = vunpack.c.l.b16 %v4045_v43  ;;  %7117 = vrcp.f32 %v3918_v38  ;;  %v10914_v38 = vadd.f32 %v10865_v22, %v10500_v7 }
 0x8f0   : > { %3770 = vmax.xlane.f32.xlu1 %v3769_v0  ;;  %v4155_v5 = vunpack.c.l.b16 %v4050_v2 }
 0x8f1   : > { %v4090_v61 = vpack.c.b16 %v4085_v41, %v4084_v33 }
 0x8f2   : > { %v7112_v28 = vpop.eup %7111 }
 0x8f3   : > { %v4019_v57 = vmul.f32 %v7112_v28, %v10793_v29  ;;  %6276 = vmatmul.msk.bf16.gmra.mxu0 %vm1765_vm5, %v4090_v61  ;;  %v3903_v56 = vpop.xlane.xlu0 %3902  ;;  %v7114_v1 = vpop.eup %7113 }
 0x8f4   : > { %7119 = vrcp.f32 %v3903_v56  ;;  %v10898_v21 = vpop.eup %7115  ;;  %v4455_v20 = vpop.permute.xlu1 %4454  ;;  %v4014_v43 = vmul.f32 %v7114_v1, %v10729_v55 }
 0x8f5   : > { %v4051_v8 = vpack.c.bf16 %v4019_v57, %v4019_v57  ;;  %7121 = vrcp.f32 %v10858_v31  ;;  %v4477_v14 = vsel %vm1468_vm3, %v4455_v20, 0  ;;  %v3937_v30 = vsel %vm1765_vm5, %v10898_v21, 0.0  ;;  %v7118_v50 = vpop.eup %7117 }
 0x8f6   : > { %7123 = vpow2.f32 %v3856_v60  ;;  %4487 = vmatpush.bf16.xpose.msra.mxu1 %v4477_v14  ;;  %v4046_v31 = vpack.c.bf16 %v4014_v43, %v4014_v43  ;;  %v4020_v55 = vmul.f32 %v7118_v50, %v10773_v52  ;;  %v3763_v52 = vsel %vm1765_vm5, %v10914_v38, -inf }
 0x8f7   : > { %v4156_v29 = vunpack.c.l.b16 %v4051_v8  ;;  %7125 = vpow2.f32 %v3858_v49  ;;  %v3678_v8 = vpop.f32.mrf.mxu3 }
 0x8f8   : > { %3938 = vadd.xlane.f32.xlu2 %v3937_v30  ;;  %v4086_v28 = vunpack.c.l.b16 %v4046_v31  ;;  %v4052_v60 = vpack.c.bf16 %v4020_v55, %v4020_v55  ;;  %7127 = vrcp.f32 %v10879_v35  ;;  %v4376_v30 = vpop.permute.xlu2 %4375 }
 0x8f9   : > { %v4162_v15 = vpack.c.b16 %v4156_v29, %v4155_v5  ;;  %7129 = vrcp.f32 %v10871_v34  ;;  %v10932_v5 = vadd.f32 %v3678_v8, %v10537_v9 }
 0x8fa   : > { %v7120_v0 = vpop.eup %7119 }
 0x8fb   : > { %v4015_v33 = vmul.f32 %v7120_v0, %v10801_v39  ;;  %6279 = vmatmul.msk.bf16.gmra.mxu1 %vm1765_vm5, %v4162_v15  ;;  %v7122_v41 = vpop.eup %7121  ;;  %v3772_v43 = vsel %vm1765_vm5, %v10932_v5, -inf }
 0x8fc   : > { %v10909_v19 = vpop.eup %7123  ;;  %v4021_v61 = vmul.f32 %v7122_v41, %v10718_v40  ;;  %v4157_v40 = vunpack.c.l.b16 %v4052_v60 }
 0x8fd   : > { %v4047_v11 = vpack.c.bf16 %v4015_v33, %v4015_v33  ;;  %v3940_v39 = vsel %vm1765_vm5, %v10909_v19, 0.0  ;;  %v10923_v7 = vpop.eup %7125 }
 0x8fe   : > { %v4053_v56 = vpack.c.bf16 %v4021_v61, %v4021_v61  ;;  %v3943_v1 = vsel %vm1765_vm5, %v10923_v7, 0.0  ;;  %v7128_v14 = vpop.eup %7127 }
 0x8ff   : > { %v4087_v2 = vunpack.c.l.b16 %v4047_v11  ;;  %v7130_v35 = vpop.eup %7129  ;;  %v4023_v62 = vmul.f32 %v7128_v14, %v10761_v45  ;;  %v4243_v11 = vpop.permute.xlu1 %4242  ;;  %v3807_v14 = vsub.f32 %v10735_v63, %v10863_v27 }
 0x900   : > { %3941 = vadd.xlane.f32.xlu2 %v3940_v39  ;;  %v4158_v22 = vunpack.c.l.b16 %v4053_v56  ;;  %v4022_v34 = vmul.f32 %v7130_v35, %v10748_v25  ;;  %v4378_v31 = vpop.permute.xlu2 %4377  ;;  %v3680_v25 = vpop.f32.mrf.mxu3 }
 0x901   : > { %v4091_v57 = vpack.c.b16 %v4087_v2, %v4086_v28  ;;  %v4055_v29 = vpack.c.bf16 %v4023_v62, %v4023_v62  ;;  %v10946_v55 = vadd.f32 %v3680_v25, %v10577_v48 }
 0x902   : > { %v4163_v20 = vpack.c.b16 %v4158_v22, %v4157_v40  ;;  %v4054_v15 = vpack.c.bf16 %v4022_v34, %v4022_v34 }
 0x903   : > { %6277 = vmatmul.msk.bf16.gmra.mxu0 %vm1765_vm5, %v4091_v57  ;;  %v4160_v0 = vunpack.c.l.b16 %v4055_v29  ;;  %v3775_v28 = vsel %vm1765_vm5, %v10946_v55, -inf }
 0x904   : > { %3764 = vmax.xlane.f32.xlu0 %v3763_v52  ;;  %v4159_v49 = vunpack.c.l.b16 %v4054_v15 }
 0x906   : > { %v4374_v50 = vpop.permute.xlu0 %4373  ;;  %v4164_v9 = vpack.c.b16 %v4160_v0, %v4159_v49 }
 0x908   : > { %3944 = vadd.xlane.f32.xlu2 %v3943_v1  ;;  %v3683_v33 = vpop.f32.mrf.mxu3  ;;  %v7313_v1 = vld [vmem:[#allocation8 + $0x90] sm:$0xff] }
 0x909   : > { %4442 = vrot.lane.b32.xlu1 %v12411_v13, %s7577_s1  ;;  %v10962_v8 = vadd.f32 %v7313_v1, %v10876_v58  ;;  %v3862_v58 = vmul.f32 1.442695, %v3807_v14 }
 0x90b   : > { %6280 = vmatmul.msk.bf16.gmra.mxu1 %vm1765_vm5, %v4163_v20 }
 0x910   : > { %3773 = vmax.xlane.f32.xlu2 %v3772_v43  ;;  %v3685_v2 = vpop.f32.mrf.mxu3 }
 0x911   : > { %v10956_v48 = vadd.f32 %v3685_v2, %v10604_v54  ;;  %v3766_v54 = vsel %vm1765_vm5, %v10962_v8, -inf }
 0x913   : > { %6290 = vmatmul.msk.bf16.vlgmr.msra.gmra.mxu0 %vm1468_vm3, %v4374_v50  ;;  %v3781_v40 = vsel %vm1765_vm5, %v10956_v48, -inf }
 0x918   : > { %4450 = vrot.lane.b32.xlu0 %v12411_v13, %s7576_s24 }
 0x91b   : > { %6281 = vmatmul.msk.bf16.gmra.mxu1 %vm1765_vm5, %v4164_v9 }
 0x922   : > { %v3930_v45 = vpop.xlane.xlu2 %3929 }
 0x923   : > { %6291 = vmatmul.msk.bf16.gmra.mxu0 %vm1468_vm3, %v4376_v30 }
 0x928   : > { %4444 = vrot.lane.b32.xlu2 %v9232_v53, %s7577_s1 }
 0x92a   : > { %v3762_v41 = vpop.xlane.xlu2 %3761 }
 0x92b   : > { %v3808_v61 = vsub.f32 %v10841_v23, %v3762_v41  ;;  %v4241_v23 = vpop.permute.xlu1 %4240 }
 0x92d   : > { %v3864_v57 = vmul.f32 1.442695, %v3808_v61 }
 0x92f   : > { %7131 = vpow2.f32 %v3864_v57 }
 0x930   : > { %4523 = vrot.lane.b32.xlu2 %v9043_v18, %s7576_s24 }
 0x931   : > { %v3756_v56 = vpop.xlane.xlu0 %3755 }
 0x932   : > { %v4453_v39 = vpop.permute.xlu2 %4452  ;;  %v3806_v52 = vsub.f32 %v10848_v36, %v3756_v56 }
 0x933   : > { %3776 = vmax.xlane.f32.xlu1 %v3775_v28  ;;  %6292 = vmatmul.msk.bf16.gmra.mxu0 %vm1468_vm3, %v4378_v31  ;;  %v4474_v60 = vsel %vm1468_vm3, %v4453_v39, 0  ;;  %v4380_v36 = vpop.permute.xlu1 %4379  ;;  %v10984_v31 = vadd.f32 %v3683_v33, %v10593_v51 }
 0x934   : > { %4488 = vmatpush.bf16.xpose.msra.mxu1 %v4474_v60  ;;  %v3860_v22 = vmul.f32 1.442695, %v3806_v52 }
 0x935   : > { %v10964_v20 = vpop.eup %7131 }
 0x936   : > { %7133 = vpow2.f32 %v3860_v22  ;;  %v3952_v62 = vsel %vm1765_vm5, %v10964_v20, 0.0 }
 0x939   : > { %v3933_v35 = vpop.xlane.xlu0 %3932 }
 0x93a   : > { %7135 = vrcp.f32 %v3933_v35 }
 0x93b   : > { %3782 = vmax.xlane.f32.xlu1 %v3781_v40  ;;  %7137 = vrcp.f32 %v3930_v45  ;;  %v4239_v45 = vpop.permute.xlu1 %4238 }
 0x93c   : > { %v10973_v34 = vpop.eup %7133  ;;  %7139 = vpow2.f32 %v3862_v58 }
 0x93d   : > { %v3946_v63 = vsel %vm1765_vm5, %v10973_v34, 0.0 }
 0x940   : > { %v7136_v27 = vpop.eup %7135 }
 0x941   : > { %v7138_v29 = vpop.eup %7137  ;;  %v4025_v50 = vmul.f32 %v7136_v27, %v10854_v47  ;;  %v3778_v47 = vsel %vm1765_vm5, %v10984_v31, -inf }
 0x942   : > { %3767 = vmax.xlane.f32.xlu0 %v3766_v54  ;;  %v10977_v30 = vpop.eup %7139  ;;  %v4024_v15 = vmul.f32 %v7138_v29, %v10836_v3 }
 0x943   : > { %3953 = vadd.xlane.f32.xlu1 %v3952_v62  ;;  %6293 = vmatmul.msk.bf16.gmra.mxu0 %vm1468_vm3, %v4380_v36  ;;  %v3949_v0 = vsel %vm1765_vm5, %v10977_v30, 0.0  ;;  %v4057_v49 = vpack.c.bf16 %v4025_v50, %v4025_v50 }
 0x944   : > { %v4056_v9 = vpack.c.bf16 %v4024_v15, %v4024_v15 }
 0x945   : > { %v4227_v25 = vunpack.c.l.b16 %v4057_v49 }
 0x946   : > { %v4226_v41 = vunpack.c.l.b16 %v4056_v9 }
 0x948   : > { %v4234_v3 = vpack.c.b16 %v4227_v25, %v4226_v41 }
 0x94a   : > { %3947 = vadd.xlane.f32.xlu0 %v3946_v63 }
 0x94c   : > { %v4245_v43 = vpop.permute.xlu0 %4244 }
 0x94d   : > { %4266 = vmatpush.bf16.msra.mxu2 %v4245_v43 }
 0x951   : > { %4267 = vmatpush.bf16.msra.mxu2 %v4243_v11 }
 0x952   : > { %3950 = vadd.xlane.f32.xlu0 %v3949_v0 }
 0x955   : > { %4268 = vmatpush.bf16.msra.mxu2 %v4241_v23 }
 0x958   : > { %v10986_v61 = vpop.f32.mrf.mxu1 }
 0x959   : > { %4269 = vmatpush.bf16.msra.mxu2 %v4239_v45  ;;  %3779 = vmax.xlane.f32.xlu2 %v3778_v47 }
 0x95b   : > { %v3936_v33 = vpop.xlane.xlu1 %3935 }
 0x95c   : > { %4521 = vrot.lane.b32.xlu1 %v9137_v24, %s7576_s24  ;;  %6282 = vmatmul.msk.bf16.vlgmr.msra.gmra.mxu2 %vm1765_vm5, %v4234_v3  ;;  %7141 = vrcp.f32 %v3936_v33 }
 0x960   : > { %v10993_v11 = vpop.f32.mrf.mxu1 }
 0x962   : > { %v7142_v2 = vpop.eup %7141 }
 0x963   : > { %v4026_v39 = vmul.f32 %v7142_v2, %v10881_v12 }
 0x964   : > { %4315 = vrot.lane.b32.xlu1 %v12374_v37, %s7575_s5 }
 0x965   : > { %v4058_v57 = vpack.c.bf16 %v4026_v39, %v4026_v39 }
 0x966   : > { %4525 = vrot.lane.b32.xlu0 %v9083_v59, %s7576_s24 }
 0x967   : > { %v4228_v22 = vunpack.c.l.b16 %v4058_v57 }
 0x96b   : > { %v3939_v28 = vpop.xlane.xlu2 %3938 }
 0x96c   : > { %4519 = vrot.lane.b32.xlu1 %v12419_v10, %s7576_s24  ;;  %7143 = vrcp.f32 %v3939_v28 }
 0x96e   : > { %4446 = vrot.lane.b32.xlu0 %v12410_v46, %s7577_s1 }
 0x971   : > { %4317 = vrot.lane.b32.xlu2 %v12376_v17, %s7575_s5 }
 0x972   : > { %v7144_v60 = vpop.eup %7143 }
 0x973   : > { %v4027_v56 = vmul.f32 %v7144_v60, %v10898_v21  ;;  %v3942_v23 = vpop.xlane.xlu2 %3941  ;;  %v11016_v21 = vpop.f32.mrf.mxu0 }
 0x974   : > { %4311 = vrot.lane.b32.xlu1 %v12375_v6, %s7575_s5  ;;  %7145 = vrcp.f32 %v3942_v23 }
 0x975   : > { %v4059_v52 = vpack.c.bf16 %v4027_v56, %v4027_v56 }
 0x977   : > { %v4229_v1 = vunpack.c.l.b16 %v4059_v52  ;;  %v3765_v58 = vpop.xlane.xlu0 %3764 }
 0x978   : > { %v11011_v40 = vpop.f32.mrf.mxu1  ;;  %v3809_v29 = vsub.f32 %v10914_v38, %v3765_v58 }
 0x979   : > { %12421 = vst [vmem:[#allocation83_spill] sm:$0xff] %v11011_v40  ;;  %4448 = vrot.lane.b32.xlu2 %v12408_v16, %s7577_s1  ;;  %v4235_v12 = vpack.c.b16 %v4229_v1, %v4228_v22 }
 0x97a   : > { %v7146_v54 = vpop.eup %7145  ;;  %v3866_v25 = vmul.f32 1.442695, %v3809_v29 }
 0x97b   : > { %v3945_v14 = vpop.xlane.xlu2 %3944  ;;  %6283 = vmatmul.msk.bf16.gmra.mxu2 %vm1765_vm5, %v4235_v12  ;;  %v4028_v36 = vmul.f32 %v7146_v54, %v10909_v19  ;;  %v11027_v9 = vpop.f32.mrf.mxu0 }
 0x97c   : > { %7147 = vrcp.f32 %v3945_v14  ;;  %v3771_v19 = vpop.xlane.xlu1 %3770 }
 0x97d   : > { %v4060_v27 = vpack.c.bf16 %v4028_v36, %v4028_v36  ;;  %v3811_v3 = vsub.f32 %v10888_v32, %v3771_v19  ;;  %7149 = vpow2.f32 %v3866_v25 }
 0x97f   : > { %v4230_v0 = vunpack.c.l.b16 %v4060_v27  ;;  %v3870_v38 = vmul.f32 1.442695, %v3811_v3 }
 0x980   : > { %v11019_v35 = vpop.f32.mrf.mxu1 }
 0x981   : > { %12422 = vst [vmem:[#allocation84_spill] sm:$0xff] %v11019_v35  ;;  %7151 = vpow2.f32 %v3870_v38 }
 0x982   : > { %v7148_v63 = vpop.eup %7147 }
 0x983   : > { %v4029_v43 = vmul.f32 %v7148_v63, %v10923_v7  ;;  %v11034_v33 = vpop.f32.mrf.mxu0  ;;  %v11039_v39 = vpop.eup %7149 }
 0x984   : > { %v4443_v2 = vpop.permute.xlu1 %4442  ;;  %v3955_v32 = vsel %vm1765_vm5, %v11039_v39, 0.0  ;;  %v3774_v60 = vpop.xlane.xlu2 %3773 }
 0x985   : > { %v4061_v50 = vpack.c.bf16 %v4029_v43, %v4029_v43  ;;  %v3812_v38 = vsub.f32 %v10932_v5, %v3774_v60 }
 0x987   : > { %v4231_v49 = vunpack.c.l.b16 %v4061_v50  ;;  %v11043_v57 = vpop.eup %7151 }
 0x988   : > { %v11025_v15 = vpop.f32.mrf.mxu1  ;;  %v3961_v23 = vsel %vm1765_vm5, %v11043_v57, 0.0 }
 0x989   : > { %12423 = vst [vmem:[#allocation85_spill] sm:$0xff] %v11025_v15  ;;  %v4236_v41 = vpack.c.b16 %v4231_v49, %v4230_v0 }
 0x98a   : > { %v4451_v45 = vpop.permute.xlu0 %4450 }
 0x98b   : > { %v4471_v47 = vsel %vm1468_vm3, %v4451_v45, 0  ;;  %6284 = vmatmul.msk.bf16.gmra.mxu2 %vm1765_vm5, %v4236_v41  ;;  %v11045_v56 = vpop.f32.mrf.mxu0 }
 0x98c   : > { %4489 = vmatpush.bf16.xpose.msra.mxu1 %v4471_v47  ;;  %v4445_v52 = vpop.permute.xlu2 %4444 }
 0x990   : > { %v11032_v7 = vpop.f32.mrf.mxu1 }
 0x991   : > { %12424 = vst [vmem:[#allocation86_spill] sm:$0xff] %v11032_v7 }
 0x993   : > { %6294 = vmatmul.msk.bf16.vlgmr.msra.gmra.mxu1 %vm1468_vm3, %v4443_v2  ;;  %v11050_v22 = vpop.f32.mrf.mxu0 }
 0x994   : > { %v4524_v49 = vpop.permute.xlu2 %4523 }
 0x998   : > { %3956 = vadd.xlane.f32.xlu0 %v3955_v32 }
 0x99b   : > { %v11054_v1 = vpop.f32.mrf.mxu0 }
 0x99e   : > { %3962 = vadd.xlane.f32.xlu1 %v3961_v23 }
 0x9a3   : > { %6295 = vmatmul.msk.bf16.gmra.mxu1 %vm1468_vm3, %v4445_v52  ;;  %v11062_v63 = vpop.f32.mrf.mxu0 }
 0x9a4   : > { %12425 = vst [vmem:[#allocation87_spill] sm:$0xff] %v11062_v63 }
 0x9a6   : > { %v3777_v12 = vpop.xlane.xlu1 %3776 }
 0x9a7   : > { %v3813_v36 = vsub.f32 %v10946_v55, %v3777_v12 }
 0x9a9   : > { %v3874_v27 = vmul.f32 1.442695, %v3813_v36 }
 0x9ac   : > { %4313 = vrot.lane.b32.xlu0 %v12378_v26, %s7575_s5  ;;  %s7482_s5 = scalar_lea.hbm %s7481_s14, 256 }
 0x9ad   : > { %p7483_p1 = scmp.ne.s32.totalorder %s7481_s14, %s7482_s5 }
 0x9ae   : > { %v3783_v43 = vpop.xlane.xlu1 %3782 }
 0x9af   : > { %v3815_v36 = vsub.f32 %v10956_v48, %v3783_v43  ;;  %p7484_p4 = pnand %p7483_p1, %p7733_p7 }
 0x9b1   : > { %v3878_v60 = vmul.f32 1.442695, %v3815_v36  ;;  %p7485_p8 = pneg %p7484_p4 }
 0x9b4   : > { %4511 = vrot.lane.b32.xlu0 %v12419_v10, %s7577_s1 }
 0x9b5   : > { %v3768_v14 = vpop.xlane.xlu0 %3767 }
 0x9b6   : > { %v3810_v54 = vsub.f32 %v10962_v8, %v3768_v14  ;;  %v11070_v8 = vpop.f32.mrf.mxu0  ;;  %v11074_v45 = vpop.xlane.xlu1 %3953 }
 0x9b7   : > { %4513 = vrot.lane.b32.xlu1 %v9137_v24, %s7577_s1  ;;  %12426 = vst [vmem:[#allocation88_spill] sm:$0xff] %v11070_v8 }
 0x9b8   : > { %v3868_v58 = vmul.f32 1.442695, %v3810_v54 }
 0x9ba   : > { %7153 = vpow2.f32 %v3868_v58 }
 0x9bb   : > { %7155 = vpow2.f32 %v3874_v27 }
 0x9bd   : > { %v3948_v29 = vpop.xlane.xlu0 %3947 }
 0x9be   : > { %7157 = vrcp.f32 %v3948_v29  ;;  %v11082_v2 = vpop.f32.mrf.mxu0 }
 0x9bf   : > { %4592 = vrot.lane.b32.xlu1 %v12374_v37, %s7576_s24 }
 0x9c0   : > { %v11066_v50 = vpop.eup %7153 }
 0x9c1   : > { %v3958_v55 = vsel %vm1765_vm5, %v11066_v50, 0.0  ;;  %v11072_v0 = vpop.eup %7155 }
 0x9c2   : > { %3959 = vadd.xlane.f32.xlu2 %v3958_v55  ;;  %v3967_v47 = vsel %vm1765_vm5, %v11072_v0, 0.0 }
 0x9c4   : > { %v7158_v25 = vpop.eup %7157 }
 0x9c5   : > { %v3951_v19 = vpop.xlane.xlu0 %3950  ;;  %v4030_v41 = vmul.f32 %v7158_v25, %v10973_v34  ;;  %v3872_v34 = vmul.f32 1.442695, %v3812_v38 }
 0x9c6   : > { %7159 = vrcp.f32 %v3951_v19 }
 0x9c7   : > { %4517 = vrot.lane.b32.xlu1 %v9083_v59, %s7577_s1  ;;  %v4062_v32 = vpack.c.bf16 %v4030_v41, %v4030_v41 }
 0x9c9   : > { %v4232_v29 = vunpack.c.l.b16 %v4062_v32 }
 0x9ca   : > { %3968 = vadd.xlane.f32.xlu2 %v3967_v47 }
 0x9cc   : > { %v7160_v3 = vpop.eup %7159  ;;  %v3780_v52 = vpop.xlane.xlu2 %3779 }
 0x9cd   : > { %v4031_v23 = vmul.f32 %v7160_v3, %v10977_v30  ;;  %v3814_v12 = vsub.f32 %v10984_v31, %v3780_v52  ;;  %v11090_v30 = vpop.f32.mrf.mxu0 }
 0x9ce   : > { %v4522_v54 = vpop.permute.xlu1 %4521 }
 0x9cf   : > { %v4063_v14 = vpack.c.bf16 %v4031_v23, %v4031_v23  ;;  %4588 = vrot.lane.b32.xlu1 %v12375_v6, %s7576_s24  ;;  %v3876_v58 = vmul.f32 1.442695, %v3814_v12  ;;  %v4546_v12 = vsel %vm1468_vm3, %v4524_v49, 0  ;;  %v4543_v36 = vsel %vm1468_vm3, %v4522_v54, 0 }
 0x9d1   : > { %v4233_v27 = vunpack.c.l.b16 %v4063_v14  ;;  %7161 = vpow2.f32 %v3876_v58 }
 0x9d2   : > { %7163 = vpow2.f32 %v3872_v34 }
 0x9d3   : > { %v4237_v5 = vpack.c.b16 %v4233_v27, %v4232_v29  ;;  %7165 = vpow2.f32 %v3878_v60  ;;  %v11120_v60 = vld [vmem:[#allocation8 + $0xd0] sm:$0xff] }
 0x9d4   : > { %v4318_v55 = vpop.permute.xlu2 %4317 }
 0x9d5   : > { %6285 = vmatmul.msk.bf16.gmra.mxu2 %vm1765_vm5, %v4237_v5  ;;  %4339 = vmatpush.bf16.msrb.mxu3 %v4318_v55  ;;  %v4427_v23 = vpop.f32.mrf.mxu0 }
 0x9d6   : > { %v4316_v43 = vpop.permute.xlu1 %4315  ;;  %v11127_v54 = vadd.f32 %v4427_v23, %v11120_v60 }
 0x9d7   : > { %4580 = vrot.lane.b32.xlu1 %v12375_v6, %s7577_s1  ;;  %v11094_v31 = vpop.eup %7161 }
 0x9d8   : > { %v4526_v48 = vpop.permute.xlu0 %4525  ;;  %v3970_v25 = vsel %vm1765_vm5, %v11094_v31, 0.0  ;;  %v11099_v41 = vpop.eup %7163 }
 0x9d9   : > { %v4549_v19 = vsel %vm1468_vm3, %v4526_v48, 0  ;;  %4340 = vmatpush.bf16.msrb.mxu3 %v4316_v43  ;;  %3971 = vadd.xlane.f32.xlu2 %v3970_v25  ;;  %v3964_v47 = vsel %vm1765_vm5, %v11099_v41, 0.0  ;;  %v11103_v3 = vpop.eup %7165  ;;  %v4655_v43 = vsel %vm1765_vm5, %v11127_v54, -inf }
 0x9da   : > { %4555 = vmatpush.bf16.xpose.msrb.mxu2 %v4549_v19  ;;  %v3973_v52 = vsel %vm1765_vm5, %v11103_v3, 0.0  ;;  %v11133_v19 = vld [vmem:[#allocation8 + $0xe8] sm:$0xff] }
 0x9dc   : > { %v4449_v29 = vpop.permute.xlu2 %4448 }
 0x9dd   : > { %v4429_v58 = vpop.f32.mrf.mxu0 }
 0x9de   : > { %3965 = vadd.xlane.f32.xlu0 %v3964_v47  ;;  %v4520_v27 = vpop.permute.xlu1 %4519 }
 0x9df   : > { %v11105_v38 = vpop.f32.mrf.mxu2  ;;  %v4540_v5 = vsel %vm1468_vm3, %v4520_v27, 0 }
 0x9e0   : > { %12427 = vst [vmem:[#allocation89_spill] sm:$0xff] %v11105_v38  ;;  %v4447_v32 = vpop.permute.xlu0 %4446 }
 0x9e1   : > { %6296 = vmatmul.msk.bf16.gmra.mxu1 %vm1468_vm3, %v4447_v32  ;;  %3974 = vadd.xlane.f32.xlu2 %v3973_v52  ;;  %v11144_v52 = vld [vmem:[#allocation8 + $0xf0] sm:$0xff]  ;;  %v11162_v32 = vld [vmem:[#allocation8 + $0xc0] sm:$0xff] }
 0x9e2   : > { %4556 = vmatpush.bf16.xpose.msrb.mxu2 %v4546_v12  ;;  %v11170_v15 = vadd.f32 %v11082_v2, %v11162_v32 }
 0x9e5   : > { %v4432_v49 = vpop.f32.mrf.mxu0 }
 0x9e7   : > { %v11111_v14 = vpop.f32.mrf.mxu2 }
 0x9e8   : > { %12428 = vst [vmem:[#allocation90_spill] sm:$0xff] %v11111_v14 }
 0x9ea   : > { %4557 = vmatpush.bf16.xpose.msrb.mxu2 %v4543_v36 }
 0x9ed   : > { %v4434_v55 = vpop.f32.mrf.mxu0 }
 0x9ee   : > { %v11136_v25 = vadd.f32 %v4434_v55, %v11133_v19 }
 0x9f0   : > { %v4664_v23 = vsel %vm1765_vm5, %v11136_v25, -inf }
 0x9f1   : > { %6297 = vmatmul.msk.bf16.gmra.mxu1 %vm1468_vm3, %v4449_v29 }
 0x9f2   : > { %4515 = vrot.lane.b32.xlu0 %v9043_v18, %s7577_s1  ;;  %4558 = vmatpush.bf16.xpose.msrb.mxu2 %v4540_v5 }
 0x9f5   : > { %v4437_v12 = vpop.f32.mrf.mxu0 }
 0x9f6   : > { %v11147_v36 = vadd.f32 %v4437_v12, %v11144_v52 }
 0x9f8   : > { %v4667_v5 = vsel %vm1765_vm5, %v11147_v36, -inf }
 0x9f9   : > { %4594 = vrot.lane.b32.xlu2 %v12376_v17, %s7576_s24 }
 0x9fa   : > { %4590 = vrot.lane.b32.xlu0 %v12378_v26, %s7576_s24 }
 0x9fe   : > { %v11129_v48 = vpop.f32.mrf.mxu2 }
 0x9ff   : > { %12429 = vst [vmem:[#allocation91_spill] sm:$0xff] %v11129_v48 }
 0xa01   : > { %4656 = vmax.xlane.f32.xlu1 %v4655_v43 }
 0xa06   : > { %v11138_v47 = vpop.f32.mrf.mxu2 }
 0xa07   : > { %12430 = vst [vmem:[#allocation92_spill] sm:$0xff] %v11138_v47 }
 0xa09   : > { %4665 = vmax.xlane.f32.xlu1 %v4664_v23  ;;  %v4312_v23 = vpop.permute.xlu1 %4311 }
 0xa0b   : > { %v3957_v27 = vpop.xlane.xlu0 %3956 }
 0xa0c   : > { %7167 = vrcp.f32 %v3957_v27  ;;  %v11160_v27 = vld [vmem:[#allocation8 + $0xc8] sm:$0xff] }
 0xa0d   : > { %7169 = vrcp.f32 %v11074_v45  ;;  %v11166_v45 = vadd.f32 %v11090_v30, %v11160_v27  ;;  %v11176_v30 = vld [vmem:[#allocation8 + $0xd8] sm:$0xff] }
 0xa0e   : > { %v11149_v29 = vpop.f32.mrf.mxu2 }
 0xa0f   : > { %12431 = vst [vmem:[#allocation93_spill] sm:$0xff] %v11149_v29 }
 0xa11   : > { %4668 = vmax.xlane.f32.xlu1 %v4667_v5 }
 0xa12   : > { %v7168_v55 = vpop.eup %7167 }
 0xa13   : > { %v7170_v43 = vpop.eup %7169  ;;  %v4033_v62 = vmul.f32 %v7168_v55, %v11039_v39 }
 0xa14   : > { %v4032_v12 = vmul.f32 %v7170_v43, %v10964_v20  ;;  %v4652_v20 = vsel %vm1765_vm5, %v11166_v45, -inf }
 0xa15   : > { %v4065_v34 = vpack.c.bf16 %v4033_v62, %v4033_v62  ;;  %v4649_v62 = vsel %vm1765_vm5, %v11170_v15, -inf }
 0xa16   : > { %v11154_v28 = vpop.f32.mrf.mxu2  ;;  %v4064_v5 = vpack.c.bf16 %v4032_v12, %v4032_v12  ;;  %v3963_v12 = vpop.xlane.xlu1 %3962 }
 0xa17   : > { %12432 = vst [vmem:[#allocation94_spill] sm:$0xff] %v11154_v28  ;;  %v4300_v39 = vunpack.c.l.b16 %v4065_v34  ;;  %7171 = vrcp.f32 %v3963_v12 }
 0xa18   : > { %v4299_v55 = vunpack.c.l.b16 %v4064_v5 }
 0xa1a   : > { %v4307_v43 = vpack.c.b16 %v4300_v39, %v4299_v55 }
 0xa1d   : > { %v7172_v55 = vpop.eup %7171 }
 0xa1e   : > { %v4314_v51 = vpop.permute.xlu0 %4313 }
 0xa1f   : > { %4341 = vmatpush.bf16.msrb.mxu3 %v4314_v51  ;;  %v11180_v51 = vadd.f32 %v4429_v58, %v11176_v30 }
 0xa21   : > { %v4658_v34 = vsel %vm1765_vm5, %v11180_v51, -inf }
 0xa22   : > { %4653 = vmax.xlane.f32.xlu2 %v4652_v20 }
 0xa23   : > { %4342 = vmatpush.bf16.msrb.mxu3 %v4312_v23  ;;  %v11187_v23 = vld [vmem:[#allocation8 + $0xe0] sm:$0xff] }
 0xa24   : > { %4650 = vmax.xlane.f32.xlu0 %v4649_v62  ;;  %v11190_v5 = vadd.f32 %v4432_v49, %v11187_v23  ;;  %v4035_v62 = vmul.f32 %v7172_v55, %v11043_v57 }
 0xa26   : > { %6286 = vmatmul.msk.bf16.vlgmr.msrb.gmra.mxu3 %vm1765_vm5, %v4307_v43  ;;  %v4512_v2 = vpop.permute.xlu0 %4511  ;;  %v4661_v58 = vsel %vm1765_vm5, %v11190_v5, -inf }
 0xa27   : > { %6298 = vmatmul.msk.bf16.vlgmr.msrb.gmra.mxu2 %vm1468_vm3, %v4512_v2  ;;  %v4067_v2 = vpack.c.bf16 %v4035_v62, %v4035_v62 }
 0xa29   : > { %v4514_v20 = vpop.permute.xlu1 %4513  ;;  %v4302_v7 = vunpack.c.l.b16 %v4067_v2  ;;  %v11204_v2 = vld [vmem:[#allocation8 + $0xf8] sm:$0xff] }
 0xa2a   : > { %4586 = vrot.lane.b32.xlu1 %v12376_v17, %s7577_s1 }
 0xa2c   : > { %4659 = vmax.xlane.f32.xlu0 %v4658_v34 }
 0xa34   : > { %4662 = vmax.xlane.f32.xlu0 %v4661_v58 }
 0xa35   : > { %v3960_v39 = vpop.xlane.xlu2 %3959 }
 0xa36   : > { %7173 = vrcp.f32 %v3960_v39 }
 0xa37   : > { %6299 = vmatmul.msk.bf16.gmra.mxu2 %vm1468_vm3, %v4514_v20 }
 0xa3a   : > { %4582 = vrot.lane.b32.xlu2 %v12378_v26, %s7577_s1 }
 0xa3c   : > { %v7174_v43 = vpop.eup %7173 }
 0xa3d   : > { %v4034_v49 = vmul.f32 %v7174_v43, %v11066_v50  ;;  %v3969_v58 = vpop.xlane.xlu2 %3968 }
 0xa3e   : > { %7175 = vrcp.f32 %v3969_v58 }
 0xa3f   : > { %v4066_v34 = vpack.c.bf16 %v4034_v49, %v4034_v49 }
 0xa41   : > { %v4301_v12 = vunpack.c.l.b16 %v4066_v34 }
 0xa43   : > { %v4308_v40 = vpack.c.b16 %v4302_v7, %v4301_v12 }
 0xa44   : > { %v7176_v55 = vpop.eup %7175 }
 0xa45   : > { %6287 = vmatmul.msk.bf16.gmra.mxu3 %vm1765_vm5, %v4308_v40  ;;  %v4037_v20 = vmul.f32 %v7176_v55, %v11072_v0  ;;  %v4439_v40 = vpop.f32.mrf.mxu0  ;;  %v4593_v0 = vpop.permute.xlu1 %4592 }
 0xa47   : > { %v4069_v50 = vpack.c.bf16 %v4037_v20, %v4037_v20 }
 0xa48   : > { %4584 = vrot.lane.b32.xlu0 %v12374_v37, %s7577_s1 }
 0xa49   : > { %v4304_v49 = vunpack.c.l.b16 %v4069_v50 }
 0xa4c   : > { %v3972_v39 = vpop.xlane.xlu2 %3971 }
 0xa51   : > { %v3966_v57 = vpop.xlane.xlu0 %3965 }
 0xa52   : > { %7177 = vrcp.f32 %v3966_v57  ;;  %v11208_v57 = vadd.f32 %v4439_v40, %v11204_v2 }
 0xa54   : > { %v3975_v62 = vpop.xlane.xlu2 %3974 }
 0xa55   : > { %7179 = vrcp.f32 %v3975_v62 }
 0xa56   : > { %7181 = vrcp.f32 %v3972_v39  ;;  %v4670_v39 = vsel %vm1765_vm5, %v11208_v57, -inf }
 0xa58   : > { %v7178_v35 = vpop.eup %7177 }
 0xa59   : > { %v4036_v43 = vmul.f32 %v7178_v35, %v11099_v41 }
 0xa5b   : > { %v4068_v7 = vpack.c.bf16 %v4036_v43, %v4036_v43  ;;  %v7180_v20 = vpop.eup %7179  ;;  %v4615_v43 = vsel %vm1468_vm3, %v4593_v0, 0 }
 0xa5c   : > { %v4595_v12 = vpop.permute.xlu2 %4594  ;;  %v7182_v35 = vpop.eup %7181  ;;  %v4039_v41 = vmul.f32 %v7180_v20, %v11103_v3 }
 0xa5d   : > { %v4303_v34 = vunpack.c.l.b16 %v4068_v7  ;;  %v4618_v58 = vsel %vm1468_vm3, %v4595_v12, 0  ;;  %v4038_v50 = vmul.f32 %v7182_v35, %v11094_v31  ;;  %v11217_v7 = vpop.f32.mrf.mxu1 }
 0xa5e   : > { %4624 = vmatpush.bf16.xpose.msra.mxu3 %v4618_v58  ;;  %v4071_v40 = vpack.c.bf16 %v4039_v41, %v4039_v41 }
 0xa5f   : > { %v4309_v55 = vpack.c.b16 %v4304_v49, %v4303_v34  ;;  %v4518_v49 = vpop.permute.xlu1 %4517  ;;  %v4070_v34 = vpack.c.bf16 %v4038_v50, %v4038_v50 }
 0xa60   : > { %v4306_v12 = vunpack.c.l.b16 %v4071_v40 }
 0xa61   : > { %6288 = vmatmul.msk.bf16.gmra.mxu3 %vm1765_vm5, %v4309_v55  ;;  %v4305_v3 = vunpack.c.l.b16 %v4070_v34 }
 0xa63   : > { %4671 = vmax.xlane.f32.xlu2 %v4670_v39  ;;  %v4310_v20 = vpack.c.b16 %v4306_v12, %v4305_v3 }
 0xa64   : > { %v4516_v62 = vpop.permute.xlu0 %4515 }
 0xa65   : > { %6300 = vmatmul.msk.bf16.gmra.mxu2 %vm1468_vm3, %v4516_v62  ;;  %v11220_v39 = vpop.f32.mrf.mxu1 }
 0xa66   : > { %4625 = vmatpush.bf16.xpose.msra.mxu3 %v4615_v43 }
 0xa67   : > { %v4589_v31 = vpop.permute.xlu1 %4588 }
 0xa68   : > { %v4609_v0 = vsel %vm1468_vm3, %v4589_v31, 0 }
 0xa6c   : > { %v4591_v58 = vpop.permute.xlu0 %4590 }
 0xa6d   : > { %v4612_v55 = vsel %vm1468_vm3, %v4591_v58, 0  ;;  %v4491_v35 = vpop.f32.mrf.mxu1 }
 0xa6e   : > { %4626 = vmatpush.bf16.xpose.msra.mxu3 %v4612_v55 }
 0xa6f   : > { %v4581_v41 = vpop.permute.xlu1 %4580 }
 0xa71   : > { %6289 = vmatmul.msk.bf16.gmra.mxu3 %vm1765_vm5, %v4310_v20 }
 0xa75   : > { %6301 = vmatmul.msk.bf16.gmra.mxu2 %vm1468_vm3, %v4518_v49  ;;  %v11228_v62 = vpop.f32.mrf.mxu1 }
 0xa76   : > { %4627 = vmatpush.bf16.xpose.msra.mxu3 %v4609_v0 }
 0xa77   : > { %v4657_v43 = vpop.xlane.xlu1 %4656 }
 0xa78   : > { %v4747_v0 = vsub.f32 %v11127_v54, %v4657_v43 }
 0xa7b   : > { %5059 = vrot.lane.b32.xlu2 %v9149_v42, %s7578_s3 }
 0xa7d   : > { %v4496_v50 = vpop.f32.mrf.mxu1 }
 0xa7f   : > { %v4666_v55 = vpop.xlane.xlu1 %4665 }
 0xa81   : > { %6302 = vmatmul.msk.bf16.vlgmr.msra.gmra.mxu3 %vm1468_vm3, %v4581_v41 }
 0xa83   : > { %5055 = vrot.lane.b32.xlu2 %v12386_v44, %s7578_s3 }
 0xa85   : > { %v4498_v49 = vpop.f32.mrf.mxu1 }
 0xa8b   : > { %5053 = vrot.lane.b32.xlu2 %v12383_v4, %s7578_s3 }
 0xa8d   : > { %v11236_v31 = vpop.f32.mrf.mxu1 }
 0xa95   : > { %v4654_v40 = vpop.xlane.xlu2 %4653 }
 0xa96   : > { %v4746_v34 = vsub.f32 %v11166_v45, %v4654_v40 }
 0xa97   : > { %v4651_v12 = vpop.xlane.xlu0 %4650 }
 0xa98   : > { %v4745_v42 = vsub.f32 %v11170_v15, %v4651_v12  ;;  %v4779_v58 = vmul.f32 1.442695, %v4746_v34  ;;  %v4781_v34 = vmul.f32 1.442695, %v4747_v0  ;;  %v11250_v12 = vadd.f32 %v4491_v35, %v11162_v32 }
 0xa9a   : > { %v4777_v3 = vmul.f32 1.442695, %v4745_v42  ;;  %7183 = vpow2.f32 %v4779_v58  ;;  %v4669_v58 = vpop.xlane.xlu1 %4668  ;;  %v4673_v43 = vsel %vm1765_vm5, %v11250_v12, -inf }
 0xa9c   : > { %7185 = vpow2.f32 %v4777_v3  ;;  %v4503_v3 = vpop.f32.mrf.mxu1 }
 0xa9d   : > { %v4583_v20 = vpop.permute.xlu2 %4582  ;;  %7187 = vpow2.f32 %v4781_v34 }
 0xa9e   : > { %6303 = vmatmul.msk.bf16.gmra.mxu3 %vm1468_vm3, %v4583_v20 }
 0xa9f   : > { %v4660_v4 = vpop.xlane.xlu0 %4659 }
 0xaa0   : > { %v11239_v44 = vpop.eup %7183  ;;  %v4748_v45 = vsub.f32 %v11180_v51, %v4660_v4  ;;  %v4751_v51 = vsub.f32 %v11147_v36, %v4669_v58  ;;  %v12435_v58 = vld [vmem:[#allocation23_spill] sm:$0xff] }
 0xaa1   : > { %v4844_v15 = vsel %vm1765_vm5, %v11239_v44, 0.0 }
 0xaa2   : > { %v11242_v41 = vpop.eup %7185  ;;  %4845 = vadd.xlane.f32.xlu1 %v4844_v15  ;;  %v4783_v42 = vmul.f32 1.442695, %v4748_v45  ;;  %v4789_v4 = vmul.f32 1.442695, %v4751_v51 }
 0xaa3   : > { %v4841_v40 = vsel %vm1765_vm5, %v11242_v41, 0.0  ;;  %v11257_v20 = vpop.eup %7187 }
 0xaa4   : > { %4842 = vadd.xlane.f32.xlu0 %v4841_v40  ;;  %7189 = vpow2.f32 %v4783_v42  ;;  %v4847_v40 = vsel %vm1765_vm5, %v11257_v20, 0.0  ;;  %v4506_v34 = vpop.f32.mrf.mxu1  ;;  %v11270_v42 = vadd.f32 %v4496_v50, %v11120_v60 }
 0xaa5   : > { %7191 = vpow2.f32 %v4789_v4 }
 0xaa6   : > { %v4679_v45 = vsel %vm1765_vm5, %v11270_v42, -inf }
 0xaa7   : > { %v4663_v15 = vpop.xlane.xlu0 %4662 }
 0xaa8   : > { %v4749_v51 = vsub.f32 %v11190_v5, %v4663_v15  ;;  %v4750_v5 = vsub.f32 %v11136_v25, %v4666_v55 }
 0xaa9   : > { %v11252_v54 = vpop.f32.mrf.mxu3 }
 0xaaa   : > { %12433 = vst [vmem:[#allocation95_spill] sm:$0xff] %v11252_v54  ;;  %4674 = vmax.xlane.f32.xlu1 %v4673_v43  ;;  %v11259_v0 = vpop.eup %7189  ;;  %v4785_v50 = vmul.f32 1.442695, %v4749_v51 }
 0xaab   : > { %v4850_v36 = vsel %vm1765_vm5, %v11259_v0, 0.0  ;;  %v11274_v43 = vpop.eup %7191 }
 0xaac   : > { %v4859_v4 = vsel %vm1765_vm5, %v11274_v43, 0.0  ;;  %7193 = vpow2.f32 %v4785_v50 }
 0xab1   : > { %v11261_v35 = vpop.f32.mrf.mxu3 }
 0xab2   : > { %12434 = vst [vmem:[#allocation96_spill] sm:$0xff] %v11261_v35  ;;  %4848 = vadd.xlane.f32.xlu1 %v4847_v40  ;;  %v4508_v40 = vpop.f32.mrf.mxu1  ;;  %v11293_v51 = vpop.eup %7193 }
 0xab4   : > { %4851 = vadd.xlane.f32.xlu2 %v4850_v36  ;;  %v11283_v36 = vadd.f32 %v4498_v49, %v11176_v30  ;;  %v4587_v49 = vpop.permute.xlu1 %4586 }
 0xab6   : > { %v4682_v15 = vsel %vm1765_vm5, %v11283_v36, -inf }
 0xab8   : > { %5057 = vrot.lane.b32.xlu0 %v12435_v58, %s7578_s3  ;;  %v11286_v58 = vadd.f32 %v4508_v40, %v11204_v2  ;;  %v4853_v40 = vsel %vm1765_vm5, %v11293_v51, 0.0 }
 0xaba   : > { %v4585_v54 = vpop.permute.xlu0 %4584  ;;  %4680 = vmax.xlane.f32.xlu1 %v4679_v45  ;;  %v4787_v45 = vmul.f32 1.442695, %v4750_v5 }
 0xabb   : > { %6304 = vmatmul.msk.bf16.gmra.mxu3 %vm1468_vm3, %v4585_v54  ;;  %v4694_v54 = vsel %vm1765_vm5, %v11286_v58, -inf }
 0xabc   : > { %4860 = vadd.xlane.f32.xlu2 %v4859_v4  ;;  %7195 = vpow2.f32 %v4787_v45 }
 0xac2   : > { %4683 = vmax.xlane.f32.xlu1 %v4682_v15  ;;  %v11300_v25 = vpop.eup %7195  ;;  %v11309_v15 = vadd.f32 %v4503_v3, %v11133_v19 }
 0xac3   : > { %v4856_v5 = vsel %vm1765_vm5, %v11300_v25, 0.0 }
 0xac4   : > { %4695 = vmax.xlane.f32.xlu2 %v4694_v54  ;;  %v4688_v45 = vsel %vm1765_vm5, %v11309_v15, -inf }
 0xac8   : > { %v11295_v4 = vpop.f32.mrf.mxu3 }
 0xac9   : > { %12436 = vst [vmem:[#allocation23_spill] sm:$0xff] %v11295_v4 }
 0xaca   : > { %4854 = vadd.xlane.f32.xlu1 %v4853_v40  ;;  %v11320_v40 = vadd.f32 %v4506_v34, %v11144_v52 }
 0xacb   : > { %6305 = vmatmul.msk.bf16.gmra.mxu3 %vm1468_vm3, %v4587_v49  ;;  %v11315_v49 = vadd.f32 %v11228_v62, %v11160_v27 }
 0xacd   : > { %v4676_v3 = vsel %vm1765_vm5, %v11315_v49, -inf }
 0xad0   : > { %v11302_v55 = vpop.f32.mrf.mxu3 }
 0xad1   : > { %12437 = vst [vmem:[#allocation97_spill] sm:$0xff] %v11302_v55 }
 0xad2   : > { %4857 = vadd.xlane.f32.xlu1 %v4856_v5 }
 0xad6   : > { %v4672_v54 = vpop.xlane.xlu2 %4671 }
 0xad7   : > { %v4752_v5 = vsub.f32 %v11208_v57, %v4672_v54 }
 0xad9   : > { %v4791_v62 = vmul.f32 1.442695, %v4752_v5 }
 0xada   : > { %4689 = vmax.xlane.f32.xlu1 %v4688_v45  ;;  %v4691_v45 = vsel %vm1765_vm5, %v11320_v40, -inf }
 0xadb   : > { %7197 = vpow2.f32 %v4791_v62  ;;  %v11349_v62 = vpop.f32.mrf.mxu2 }
 0xadc   : > { %5132 = vrot.lane.b32.xlu2 %v12408_v16, %s7578_s3  ;;  %v11331_v16 = vadd.f32 %v11236_v31, %v11187_v23  ;;  %12442 = vst [vmem:[#allocation102_spill] sm:$0xff] %v11349_v62 }
 0xade   : > { %v5060_v50 = vpop.permute.xlu2 %5059  ;;  %v4685_v57 = vsel %vm1765_vm5, %v11331_v16, -inf }
 0xadf   : > { %5081 = vmatpush.bf16.msrb.mxu0 %v5060_v50 }
 0xae1   : > { %v11339_v54 = vpop.eup %7197 }
 0xae2   : > { %4677 = vmax.xlane.f32.xlu0 %v4676_v3  ;;  %4692 = vmax.xlane.f32.xlu1 %v4691_v45  ;;  %v4862_v5 = vsel %vm1765_vm5, %v11339_v54, 0.0 }
 0xae4   : > { %v11327_v4 = vpop.f32.mrf.mxu3 }
 0xae5   : > { %12438 = vst [vmem:[#allocation98_spill] sm:$0xff] %v11327_v4 }
 0xae6   : > { %v5056_v55 = vpop.permute.xlu2 %5055 }
 0xaea   : > { %4686 = vmax.xlane.f32.xlu0 %v4685_v57  ;;  %v11351_v57 = vpop.f32.mrf.mxu2 }
 0xaeb   : > { %12443 = vst [vmem:[#allocation103_spill] sm:$0xff] %v11351_v57 }
 0xaec   : > { %v11335_v34 = vpop.f32.mrf.mxu3 }
 0xaed   : > { %12439 = vst [vmem:[#allocation99_spill] sm:$0xff] %v11335_v34 }
 0xaee   : > { %v5054_v29 = vpop.permute.xlu2 %5053 }
 0xaf2   : > { %4863 = vadd.xlane.f32.xlu0 %v4862_v5  ;;  %v11353_v4 = vpop.f32.mrf.mxu2 }
 0xaf4   : > { %v11343_v3 = vpop.f32.mrf.mxu3 }
 0xaf5   : > { %12440 = vst [vmem:[#allocation100_spill] sm:$0xff] %v11343_v3 }
 0xafa   : > { %v11356_v3 = vpop.f32.mrf.mxu2 }
 0xafc   : > { %v11345_v31 = vpop.f32.mrf.mxu3 }
 0xafd   : > { %12441 = vst [vmem:[#allocation101_spill] sm:$0xff] %v11345_v31 }
 0xb15   : > { %v4846_v35 = vpop.xlane.xlu1 %4845 }
 0xb17   : > { %v4843_v50 = vpop.xlane.xlu0 %4842 }
 0xb18   : > { %7199 = vrcp.f32 %v4843_v50 }
 0xb19   : > { %7201 = vrcp.f32 %v4846_v35 }
 0xb1d   : > { %v4675_v34 = vpop.xlane.xlu1 %4674 }
 0xb1e   : > { %v4753_v5 = vsub.f32 %v11250_v12, %v4675_v34  ;;  %v7200_v48 = vpop.eup %7199 }
 0xb1f   : > { %v7202_v45 = vpop.eup %7201  ;;  %v4969_v31 = vmul.f32 %v7200_v48, %v11242_v41  ;;  %v11365_v41 = vpop.f32.mrf.mxu2 }
 0xb20   : > { %v4793_v28 = vmul.f32 1.442695, %v4753_v5  ;;  %v4970_v38 = vmul.f32 %v7202_v45, %v11239_v44 }
 0xb21   : > { %v5001_v35 = vpack.c.bf16 %v4969_v31, %v4969_v31 }
 0xb22   : > { %7203 = vpow2.f32 %v4793_v28  ;;  %v5002_v28 = vpack.c.bf16 %v4970_v38, %v4970_v38 }
 0xb23   : > { %v5041_v14 = vunpack.c.l.b16 %v5001_v35 }
 0xb24   : > { %v5042_v44 = vunpack.c.l.b16 %v5002_v28 }
 0xb25   : > { %v4849_v47 = vpop.xlane.xlu1 %4848 }
 0xb26   : > { %v5049_v45 = vpack.c.b16 %v5042_v44, %v5041_v14 }
 0xb27   : > { %v4852_v57 = vpop.xlane.xlu2 %4851 }
 0xb28   : > { %v11359_v62 = vpop.eup %7203  ;;  %7205 = vrcp.f32 %v4852_v57 }
 0xb29   : > { %v4865_v50 = vsel %vm1765_vm5, %v11359_v62, 0.0  ;;  %7207 = vrcp.f32 %v4849_v47 }
 0xb2a   : > { %v5058_v12 = vpop.permute.xlu0 %5057  ;;  %4866 = vadd.xlane.f32.xlu0 %v4865_v50 }
 0xb2b   : > { %5082 = vmatpush.bf16.msrb.mxu0 %v5058_v12  ;;  %v4567_v12 = vpop.f32.mrf.mxu2 }
 0xb2c   : > { %v11377_v14 = vadd.f32 %v4567_v12, %v11176_v30 }
 0xb2d   : > { %v4681_v34 = vpop.xlane.xlu1 %4680 }
 0xb2e   : > { %v4755_v5 = vsub.f32 %v11270_v42, %v4681_v34  ;;  %v7206_v63 = vpop.eup %7205 }
 0xb2f   : > { %5083 = vmatpush.bf16.msrb.mxu0 %v5056_v55  ;;  %v4861_v48 = vpop.xlane.xlu2 %4860  ;;  %v7208_v38 = vpop.eup %7207  ;;  %v4972_v31 = vmul.f32 %v7206_v63, %v11259_v0 }
 0xb30   : > { %v4797_v8 = vmul.f32 1.442695, %v4755_v5  ;;  %v4971_v55 = vmul.f32 %v7208_v38, %v11257_v20  ;;  %v4706_v20 = vsel %vm1765_vm5, %v11377_v14, -inf }
 0xb32   : > { %7209 = vpow2.f32 %v4797_v8  ;;  %v5004_v8 = vpack.c.bf16 %v4972_v31, %v4972_v31 }
 0xb33   : > { %5084 = vmatpush.bf16.msrb.mxu0 %v5054_v29  ;;  %v5003_v29 = vpack.c.bf16 %v4971_v55, %v4971_v55 }
 0xb34   : > { %v5044_v63 = vunpack.c.l.b16 %v5004_v8 }
 0xb35   : > { %v4684_v50 = vpop.xlane.xlu1 %4683  ;;  %v5043_v28 = vunpack.c.l.b16 %v5003_v29 }
 0xb36   : > { %6306 = vmatmul.msk.bf16.vlgmr.msrb.gmra.mxu0 %vm1765_vm5, %v5049_v45 }
 0xb37   : > { %v11369_v57 = vpop.xlane.xlu2 %4695  ;;  %v5050_v34 = vpack.c.b16 %v5044_v63, %v5043_v28 }
 0xb38   : > { %v11371_v42 = vpop.eup %7209 }
 0xb39   : > { %v4871_v47 = vsel %vm1765_vm5, %v11371_v42, 0.0 }
 0xb3a   : > { %4872 = vadd.xlane.f32.xlu2 %v4871_v47  ;;  %v4570_v47 = vpop.f32.mrf.mxu2 }
 0xb3d   : > { %v4855_v35 = vpop.xlane.xlu1 %4854 }
 0xb3e   : > { %5130 = vrot.lane.b32.xlu0 %v12410_v46, %s7578_s3  ;;  %7211 = vrcp.f32 %v4855_v35 }
 0xb3f   : > { %v5133_v0 = vpop.permute.xlu2 %5132 }
 0xb40   : > { %5154 = vmatpush.bf16.msrb.mxu1 %v5133_v0 }
 0xb42   : > { %4707 = vmax.xlane.f32.xlu2 %v4706_v20 }
 0xb44   : > { %v7212_v44 = vpop.eup %7211 }
 0xb45   : > { %v4858_v5 = vpop.xlane.xlu1 %4857  ;;  %v4973_v46 = vmul.f32 %v7212_v44, %v11293_v51  ;;  %v4756_v44 = vsub.f32 %v11283_v36, %v4684_v50 }
 0xb46   : > { %6307 = vmatmul.msk.bf16.gmra.mxu0 %vm1765_vm5, %v5050_v34  ;;  %7213 = vrcp.f32 %v4858_v5  ;;  %5128 = vrot.lane.b32.xlu0 %v9232_v53, %s7578_s3  ;;  %v4572_v34 = vpop.f32.mrf.mxu2 }
 0xb47   : > { %v5005_v38 = vpack.c.bf16 %v4973_v46, %v4973_v46  ;;  %v11396_v5 = vadd.f32 %v4572_v34, %v11133_v19 }
 0xb49   : > { %v5045_v35 = vunpack.c.l.b16 %v5005_v38 }
 0xb4c   : > { %v7214_v45 = vpop.eup %7213 }
 0xb4d   : > { %v4974_v31 = vmul.f32 %v7214_v45, %v11300_v25  ;;  %v4690_v55 = vpop.xlane.xlu1 %4689  ;;  %v4712_v45 = vsel %vm1765_vm5, %v11396_v5, -inf }
 0xb4e   : > { %v4758_v12 = vsub.f32 %v11309_v15, %v4690_v55  ;;  %v4575_v38 = vpop.f32.mrf.mxu2  ;;  %v11407_v55 = vadd.f32 %v11353_v4, %v11162_v32 }
 0xb4f   : > { %v5006_v8 = vpack.c.bf16 %v4974_v31, %v4974_v31  ;;  %v4799_v31 = vmul.f32 1.442695, %v4756_v44  ;;  %v11410_v36 = vadd.f32 %v4575_v38, %v11144_v52  ;;  %v11422_v52 = vadd.f32 %v11356_v3, %v11160_v27 }
 0xb50   : > { %v4803_v29 = vmul.f32 1.442695, %v4758_v12 }
 0xb51   : > { %v5046_v63 = vunpack.c.l.b16 %v5006_v8  ;;  %v4697_v8 = vsel %vm1765_vm5, %v11407_v55, -inf  ;;  %v4700_v34 = vsel %vm1765_vm5, %v11422_v52, -inf }
 0xb52   : > { %7215 = vpow2.f32 %v4803_v29  ;;  %v4715_v29 = vsel %vm1765_vm5, %v11410_v36, -inf }
 0xb53   : > { %v5051_v0 = vpack.c.b16 %v5046_v63, %v5045_v35 }
 0xb55   : > { %v4678_v28 = vpop.xlane.xlu0 %4677 }
 0xb56   : > { %v4754_v20 = vsub.f32 %v11315_v49, %v4678_v28  ;;  %6308 = vmatmul.msk.bf16.gmra.mxu0 %vm1765_vm5, %v5051_v0 }
 0xb58   : > { %v4795_v53 = vmul.f32 1.442695, %v4754_v20  ;;  %v11391_v51 = vpop.eup %7215 }
 0xb59   : > { %v4880_v25 = vsel %vm1765_vm5, %v11391_v51, 0.0 }
 0xb5a   : > { %7217 = vpow2.f32 %v4795_v53  ;;  %4881 = vadd.xlane.f32.xlu2 %v4880_v25 }
 0xb5b   : > { %7219 = vrcp.f32 %v4861_v48 }
 0xb5d   : > { %v4687_v15 = vpop.xlane.xlu0 %4686 }
 0xb5e   : > { %v4757_v48 = vsub.f32 %v11331_v16, %v4687_v15  ;;  %v4693_v15 = vpop.xlane.xlu1 %4692 }
 0xb60   : > { %v11399_v46 = vpop.eup %7217  ;;  %v4801_v4 = vmul.f32 1.442695, %v4757_v48 }
 0xb61   : > { %v4868_v49 = vsel %vm1765_vm5, %v11399_v46, 0.0  ;;  %v7220_v12 = vpop.eup %7219 }
 0xb62   : > { %4869 = vadd.xlane.f32.xlu1 %v4868_v49  ;;  %4713 = vmax.xlane.f32.xlu2 %v4712_v45  ;;  %v4975_v50 = vmul.f32 %v7220_v12, %v11274_v43  ;;  %v11436_v45 = vadd.f32 %v4570_v47, %v11187_v23  ;;  %v4577_v12 = vpop.f32.mrf.mxu2 }
 0xb64   : > { %v5007_v0 = vpack.c.bf16 %v4975_v50, %v4975_v50  ;;  %v4709_v38 = vsel %vm1765_vm5, %v11436_v45, -inf  ;;  %v4760_v50 = vsub.f32 %v11286_v58, %v11369_v57 }
 0xb65   : > { %v4864_v19 = vpop.xlane.xlu0 %4863 }
 0xb66   : > { %7221 = vrcp.f32 %v4864_v19  ;;  %v5047_v20 = vunpack.c.l.b16 %v5007_v0 }
 0xb67   : > { %7223 = vpow2.f32 %v4799_v31 }
 0xb68   : > { %7225 = vpow2.f32 %v4801_v4 }
 0xb6a   : > { %4698 = vmax.xlane.f32.xlu1 %v4697_v8  ;;  %4716 = vmax.xlane.f32.xlu2 %v4715_v29  ;;  %v4807_v8 = vmul.f32 1.442695, %v4760_v50  ;;  %v11457_v29 = vadd.f32 %v11365_v41, %v11120_v60 }
 0xb6c   : > { %v7222_v35 = vpop.eup %7221  ;;  %v4703_v4 = vsel %vm1765_vm5, %v11457_v29, -inf }
 0xb6d   : > { %v11418_v63 = vpop.eup %7223  ;;  %v4976_v16 = vmul.f32 %v7222_v35, %v11339_v54  ;;  %v4759_v54 = vsub.f32 %v11320_v40, %v4693_v15  ;;  %v11447_v40 = vadd.f32 %v4577_v12, %v11204_v2 }
 0xb6e   : > { %v4874_v28 = vsel %vm1765_vm5, %v11418_v63, 0.0  ;;  %v11429_v44 = vpop.eup %7225 }
 0xb6f   : > { %v5008_v43 = vpack.c.bf16 %v4976_v16, %v4976_v16  ;;  %v4877_v3 = vsel %vm1765_vm5, %v11429_v44, 0.0  ;;  %v4805_v49 = vmul.f32 1.442695, %v4759_v54  ;;  %v4718_v47 = vsel %vm1765_vm5, %v11447_v40, -inf  ;;  %v4629_v16 = vpop.f32.mrf.mxu3 }
 0xb70   : > { %4875 = vadd.xlane.f32.xlu0 %v4874_v28 }
 0xb71   : > { %v5048_v53 = vunpack.c.l.b16 %v5008_v43  ;;  %7227 = vpow2.f32 %v4805_v49 }
 0xb72   : > { %4701 = vmax.xlane.f32.xlu1 %v4700_v34  ;;  %7229 = vpow2.f32 %v4807_v8 }
 0xb73   : > { %v5052_v25 = vpack.c.b16 %v5048_v53, %v5047_v20  ;;  %v11469_v20 = vadd.f32 %v4629_v16, %v11162_v32 }
 0xb75   : > { %6309 = vmatmul.msk.bf16.gmra.mxu0 %vm1765_vm5, %v5052_v25  ;;  %v4721_v34 = vsel %vm1765_vm5, %v11469_v20, -inf }
 0xb77   : > { %v11440_v31 = vpop.eup %7227  ;;  %v11465_v41 = vpop.f32.mrf.mxu3 }
 0xb78   : > { %4878 = vadd.xlane.f32.xlu0 %v4877_v3  ;;  %v4883_v19 = vsel %vm1765_vm5, %v11440_v31, 0.0  ;;  %v11461_v0 = vpop.eup %7229 }
 0xb79   : > { %v4886_v58 = vsel %vm1765_vm5, %v11461_v0, 0.0 }
 0xb7f   : > { %v11471_v53 = vpop.f32.mrf.mxu3 }
 0xb80   : > { %4710 = vmax.xlane.f32.xlu0 %v4709_v38 }
 0xb87   : > { %v4636_v3 = vpop.f32.mrf.mxu3 }
 0xb88   : > { %4884 = vadd.xlane.f32.xlu0 %v4883_v19 }
 0xb8b   : > { %5126 = vrot.lane.b32.xlu1 %v12411_v13, %s7578_s3 }
 0xb8f   : > { %v4639_v19 = vpop.f32.mrf.mxu3 }
 0xb90   : > { %4719 = vmax.xlane.f32.xlu0 %v4718_v47  ;;  %v11486_v47 = vadd.f32 %v4639_v19, %v11187_v23 }
 0xb9d   : > { %v4867_v48 = vpop.xlane.xlu0 %4866 }
 0xba4   : > { %5205 = vrot.lane.b32.xlu0 %v9083_v59, %s7578_s3 }
 0xbad   : > { %v4873_v35 = vpop.xlane.xlu2 %4872 }
 0xbb0   : > { %v5131_v13 = vpop.permute.xlu0 %5130 }
 0xbb1   : > { %5155 = vmatpush.bf16.msrb.mxu1 %v5131_v13 }
 0xbb5   : > { %4704 = vmax.xlane.f32.xlu1 %v4703_v4  ;;  %v4708_v57 = vpop.xlane.xlu2 %4707 }
 0xbb6   : > { %v4764_v43 = vsub.f32 %v11377_v14, %v4708_v57  ;;  %v11480_v14 = vadd.f32 %v4636_v3, %v11176_v30  ;;  %v4733_v30 = vsel %vm1765_vm5, %v11486_v47, -inf }
 0xbb8   : > { %v5129_v59 = vpop.permute.xlu0 %5128  ;;  %v4815_v28 = vmul.f32 1.442695, %v4764_v43  ;;  %v4730_v38 = vsel %vm1765_vm5, %v11480_v14, -inf }
 0xbb9   : > { %5156 = vmatpush.bf16.msrb.mxu1 %v5129_v59 }
 0xbba   : > { %7231 = vpow2.f32 %v4815_v28 }
 0xbbd   : > { %4887 = vadd.xlane.f32.xlu1 %v4886_v58 }
 0xbc0   : > { %v11475_v25 = vpop.eup %7231 }
 0xbc1   : > { %v4898_v54 = vsel %vm1765_vm5, %v11475_v25, 0.0 }
 0xbce   : > { %4722 = vmax.xlane.f32.xlu0 %v4721_v34 }
 0xbd5   : > { %v4870_v15 = vpop.xlane.xlu1 %4869 }
 0xbd6   : > { %4899 = vadd.xlane.f32.xlu0 %v4898_v54 }
 0xbdd   : > { %v4699_v32 = vpop.xlane.xlu1 %4698 }
 0xbde   : > { %v4761_v49 = vsub.f32 %v11407_v55, %v4699_v32  ;;  %4731 = vmax.xlane.f32.xlu0 %v4730_v38 }
 0xbe0   : > { %v4809_v12 = vmul.f32 1.442695, %v4761_v49 }
 0xbe2   : > { %7233 = vpow2.f32 %v4809_v12 }
 0xbe3   : > { %v4876_v50 = vpop.xlane.xlu0 %4875  ;;  %7235 = vrcp.f32 %v4870_v15 }
 0xbe5   : > { %v4702_v8 = vpop.xlane.xlu1 %4701 }
 0xbe6   : > { %v4762_v13 = vsub.f32 %v11422_v52, %v4702_v8  ;;  %4734 = vmax.xlane.f32.xlu0 %v4733_v30 }
 0xbe8   : > { %v11491_v4 = vpop.eup %7233  ;;  %v4811_v55 = vmul.f32 1.442695, %v4762_v13 }
 0xbe9   : > { %v4889_v59 = vsel %vm1765_vm5, %v11491_v4, 0.0  ;;  %v7236_v16 = vpop.eup %7235 }
 0xbea   : > { %7237 = vpow2.f32 %v4811_v55  ;;  %4890 = vadd.xlane.f32.xlu1 %v4889_v59  ;;  %v4978_v43 = vmul.f32 %v7236_v16, %v11399_v46  ;;  %v4882_v55 = vpop.xlane.xlu2 %4881 }
 0xbeb   : > { %7239 = vrcp.f32 %v4867_v48  ;;  %v4879_v23 = vpop.xlane.xlu0 %4878 }
 0xbec   : > { %v5010_v15 = vpack.c.bf16 %v4978_v43, %v4978_v43  ;;  %7241 = vrcp.f32 %v4876_v50 }
 0xbed   : > { %7243 = vrcp.f32 %v4873_v35 }
 0xbee   : > { %v5115_v3 = vunpack.c.l.b16 %v5010_v15 }
 0xbf0   : > { %v11495_v58 = vpop.eup %7237 }
 0xbf1   : > { %v4892_v52 = vsel %vm1765_vm5, %v11495_v58, 0.0  ;;  %v7240_v57 = vpop.eup %7239 }
 0xbf2   : > { %4893 = vadd.xlane.f32.xlu2 %v4892_v52  ;;  %v4977_v34 = vmul.f32 %v7240_v57, %v11359_v62  ;;  %v7242_v19 = vpop.eup %7241 }
 0xbf3   : > { %v11500_v28 = vpop.xlane.xlu0 %4710  ;;  %v7244_v12 = vpop.eup %7243  ;;  %v4980_v46 = vmul.f32 %v7242_v19, %v11418_v63 }
 0xbf4   : > { %v5009_v54 = vpack.c.bf16 %v4977_v34, %v4977_v34  ;;  %v4979_v8 = vmul.f32 %v7244_v12, %v11371_v42 }
 0xbf5   : > { %v5012_v35 = vpack.c.bf16 %v4980_v46, %v4980_v46  ;;  %v11531_v46 = vadd.f32 %v11471_v53, %v11120_v60 }
 0xbf6   : > { %v5114_v32 = vunpack.c.l.b16 %v5009_v54  ;;  %v5011_v30 = vpack.c.bf16 %v4979_v8, %v4979_v8  ;;  %v4641_v8 = vpop.f32.mrf.mxu3 }
 0xbf7   : > { %v5117_v59 = vunpack.c.l.b16 %v5012_v35 }
 0xbf8   : > { %v5122_v38 = vpack.c.b16 %v5115_v3, %v5114_v32  ;;  %v5116_v63 = vunpack.c.l.b16 %v5011_v30  ;;  %v4714_v32 = vpop.xlane.xlu2 %4713 }
 0xbfb   : > { %v4885_v48 = vpop.xlane.xlu0 %4884 }
 0xbfd   : > { %v5127_v49 = vpop.permute.xlu1 %5126 }
 0xbfe   : > { %5157 = vmatpush.bf16.msrb.mxu1 %v5127_v49  ;;  %v11523_v49 = vadd.f32 %v11465_v41, %v11160_v27 }
 0xc00   : > { %v4724_v19 = vsel %vm1765_vm5, %v11523_v49, -inf }
 0xc01   : > { %6310 = vmatmul.msk.bf16.vlgmr.msrb.gmra.mxu1 %vm1765_vm5, %v5122_v38 }
 0xc03   : > { %5203 = vrot.lane.b32.xlu1 %v9043_v18, %s7578_s3  ;;  %v4720_v62 = vpop.xlane.xlu0 %4719  ;;  %v5123_v18 = vpack.c.b16 %v5117_v59, %v5116_v63 }
 0xc04   : > { %v4768_v50 = vsub.f32 %v11447_v40, %v4720_v62  ;;  %v4717_v62 = vpop.xlane.xlu2 %4716 }
 0xc06   : > { %v4823_v13 = vmul.f32 1.442695, %v4768_v50  ;;  %v4727_v50 = vsel %vm1765_vm5, %v11531_v46, -inf }
 0xc08   : > { %7245 = vpow2.f32 %v4823_v13 }
 0xc09   : > { %7247 = vrcp.f32 %v4879_v23 }
 0xc0a   : > { %5201 = vrot.lane.b32.xlu2 %v9137_v24, %s7578_s3  ;;  %7249 = vrcp.f32 %v4882_v55 }
 0xc0b   : > { %7251 = vrcp.f32 %v4885_v48 }
 0xc0e   : > { %v11511_v16 = vpop.eup %7245 }
 0xc0f   : > { %v7248_v52 = vpop.eup %7247  ;;  %v4910_v42 = vsel %vm1765_vm5, %v11511_v16, 0.0 }
 0xc10   : > { %4911 = vadd.xlane.f32.xlu0 %v4910_v42  ;;  %v7250_v40 = vpop.eup %7249  ;;  %v4981_v23 = vmul.f32 %v7248_v52, %v11429_v44  ;;  %v4766_v44 = vsub.f32 %v11396_v5, %v4714_v32  ;;  %v4767_v5 = vsub.f32 %v11410_v36, %v4717_v62  ;;  %v12445_v62 = vld [vmem:[#allocation56_spill] sm:$0xff] }
 0xc11   : > { %6311 = vmatmul.msk.bf16.gmra.mxu1 %vm1765_vm5, %v5123_v18  ;;  %v4982_v24 = vmul.f32 %v7250_v40, %v11391_v51  ;;  %v7252_v41 = vpop.eup %7251 }
 0xc12   : > { %5199 = vrot.lane.b32.xlu2 %v12419_v10, %s7578_s3  ;;  %v5013_v57 = vpack.c.bf16 %v4981_v23, %v4981_v23  ;;  %v4819_v12 = vmul.f32 1.442695, %v4766_v44  ;;  %v4983_v48 = vmul.f32 %v7252_v41, %v11440_v31  ;;  %v4821_v13 = vmul.f32 1.442695, %v4767_v5  ;;  %v4644_v31 = vpop.f32.mrf.mxu3 }
 0xc13   : > { %v5014_v34 = vpack.c.bf16 %v4982_v24, %v4982_v24 }
 0xc14   : > { %v5118_v15 = vunpack.c.l.b16 %v5013_v57  ;;  %v5015_v30 = vpack.c.bf16 %v4983_v48, %v4983_v48 }
 0xc15   : > { %v5119_v54 = vunpack.c.l.b16 %v5014_v34 }
 0xc16   : > { %v5206_v43 = vpop.permute.xlu0 %5205 }
 0xc17   : > { %5227 = vmatpush.bf16.msra.mxu2 %v5206_v43  ;;  %v5124_v3 = vpack.c.b16 %v5119_v54, %v5118_v15  ;;  %v7314_v15 = vld [vmem:[#allocation8 + $0xe8] sm:$0xff] }
 0xc18   : > { %v11558_v54 = vadd.f32 %v7314_v15, %v4641_v8 }
 0xc1a   : > { %v4646_v43 = vpop.f32.mrf.mxu3  ;;  %v4736_v32 = vsel %vm1765_vm5, %v11558_v54, -inf }
 0xc21   : > { %6312 = vmatmul.msk.bf16.gmra.mxu1 %vm1765_vm5, %v5124_v3  ;;  %v11561_v3 = vadd.f32 %v4646_v43, %v11204_v2 }
 0xc28   : > { %v4705_v38 = vpop.xlane.xlu1 %4704 }
 0xc29   : > { %v4763_v10 = vsub.f32 %v11457_v29, %v4705_v38  ;;  %v4765_v29 = vsub.f32 %v11436_v45, %v11500_v28  ;;  %v5120_v28 = vunpack.c.l.b16 %v5015_v30 }
 0xc2b   : > { %v4813_v51 = vmul.f32 1.442695, %v4763_v10  ;;  %v4817_v35 = vmul.f32 1.442695, %v4765_v29  ;;  %v7315_v10 = vld [vmem:[#allocation8 + $0xf0] sm:$0xff] }
 0xc2c   : > { %v11569_v44 = vadd.f32 %v7315_v10, %v4644_v31 }
 0xc2d   : > { %4725 = vmax.xlane.f32.xlu1 %v4724_v19  ;;  %7253 = vpow2.f32 %v4813_v51  ;;  %v5086_v19 = vpop.f32.mrf.mxu0 }
 0xc2e   : > { %v4739_v2 = vsel %vm1765_vm5, %v11569_v44, -inf }
 0xc30   : > { %v4888_v27 = vpop.xlane.xlu1 %4887 }
 0xc31   : > { %7255 = vrcp.f32 %v4888_v27 }
 0xc32   : > { %7257 = vpow2.f32 %v4819_v12  ;;  %v12444_v12 = vld [vmem:[#allocation26_spill] sm:$0xff] }
 0xc33   : > { %v11539_v60 = vpop.eup %7253  ;;  %7259 = vpow2.f32 %v4817_v35  ;;  %v6489_v27 = vpack.i.bf16 %v12445_v62, %v12444_v12 }
 0xc34   : > { %v4895_v36 = vsel %vm1765_vm5, %v11539_v60, 0.0  ;;  %7261 = vpow2.f32 %v4821_v13 }
 0xc35   : > { %4728 = vmax.xlane.f32.xlu1 %v4727_v50  ;;  %v5088_v41 = vpop.f32.mrf.mxu0 }
 0xc36   : > { %v6499_v29 = vpack.i.bf16 %v5088_v41, %v5086_v19  ;;  %v12447_v19 = vld [vmem:[#allocation68_spill] sm:$0xff] }
 0xc37   : > { %v7256_v53 = vpop.eup %7255 }
 0xc38   : > { %v4984_v55 = vmul.f32 %v7256_v53, %v11461_v0  ;;  %v11542_v59 = vpop.eup %7257 }
 0xc39   : > { %v4904_v18 = vsel %vm1765_vm5, %v11542_v59, 0.0  ;;  %v11548_v42 = vpop.eup %7259 }
 0xc3a   : > { %v5016_v45 = vpack.c.bf16 %v4984_v55, %v4984_v55  ;;  %v11551_v0 = vpop.eup %7261  ;;  %v4901_v23 = vsel %vm1765_vm5, %v11548_v42, 0.0 }
 0xc3b   : > { %4896 = vadd.xlane.f32.xlu2 %v4895_v36  ;;  %v4907_v57 = vsel %vm1765_vm5, %v11551_v0, 0.0 }
 0xc3c   : > { %v5121_v63 = vunpack.c.l.b16 %v5016_v45 }
 0xc3d   : > { %4905 = vadd.xlane.f32.xlu1 %v4904_v18 }
 0xc3e   : > { %v5125_v52 = vpack.c.b16 %v5121_v63, %v5120_v28 }
 0xc40   : > { %6313 = vmatmul.msk.bf16.gmra.mxu1 %vm1765_vm5, %v5125_v52 }
 0xc41   : > { %v4723_v40 = vpop.xlane.xlu0 %4722 }
 0xc42   : > { %v4769_v24 = vsub.f32 %v11469_v20, %v4723_v40  ;;  %v4742_v20 = vsel %vm1765_vm5, %v11561_v3, -inf }
 0xc43   : > { %4902 = vadd.xlane.f32.xlu2 %v4901_v23 }
 0xc44   : > { %v4825_v34 = vmul.f32 1.442695, %v4769_v24 }
 0xc45   : > { %4908 = vadd.xlane.f32.xlu1 %v4907_v57 }
 0xc46   : > { %7263 = vpow2.f32 %v4825_v34 }
 0xc49   : > { %v4900_v28 = vpop.xlane.xlu0 %4899 }
 0xc4b   : > { %4737 = vmax.xlane.f32.xlu2 %v4736_v32 }
 0xc4c   : > { %v11567_v38 = vpop.eup %7263 }
 0xc4d   : > { %4743 = vmax.xlane.f32.xlu1 %v4742_v20  ;;  %v4913_v51 = vsel %vm1765_vm5, %v11567_v38, 0.0 }
 0xc4e   : > { %4914 = vadd.xlane.f32.xlu0 %v4913_v51 }
 0xc53   : > { %4740 = vmax.xlane.f32.xlu2 %v4739_v2  ;;  %v12446_v2 = vld [vmem:[#allocation67_spill] sm:$0xff] }
 0xc5d   : > { %v4891_v5 = vpop.xlane.xlu1 %4890 }
 0xc62   : > { %6490 = vrot.lane.b32.xlu0 %v6489_v27, %s7579_s6 }
 0xc65   : > { %v4894_v8 = vpop.xlane.xlu2 %4893 }
 0xc66   : > { %5278 = vrot.lane.b32.xlu1 %v12376_v17, %s7578_s3  ;;  %7265 = vrcp.f32 %v4894_v8 }
 0xc67   : > { %7267 = vrcp.f32 %v4891_v5 }
 0xc6a   : > { %6500 = vrot.lane.b32.xlu0 %v6499_v29, %s7580_s13 }
 0xc6c   : > { %v7266_v48 = vpop.eup %7265 }
 0xc6d   : > { %v7268_v50 = vpop.eup %7267  ;;  %v4986_v35 = vmul.f32 %v7266_v48, %v11495_v58  ;;  %v5202_v53 = vpop.permute.xlu2 %5201 }
 0xc6e   : > { %5276 = vrot.lane.b32.xlu1 %v12374_v37, %s7578_s3  ;;  %v4985_v17 = vmul.f32 %v7268_v50, %v11491_v4  ;;  %v4732_v58 = vpop.xlane.xlu0 %4731 }
 0xc6f   : > { %v5018_v30 = vpack.c.bf16 %v4986_v35, %v4986_v35  ;;  %v4772_v63 = vsub.f32 %v11480_v14, %v4732_v58 }
 0xc70   : > { %v5017_v55 = vpack.c.bf16 %v4985_v17, %v4985_v17 }
 0xc71   : > { %v5188_v45 = vunpack.c.l.b16 %v5018_v30  ;;  %v4831_v18 = vmul.f32 1.442695, %v4772_v63 }
 0xc72   : > { %5274 = vrot.lane.b32.xlu0 %v12378_v26, %s7578_s3  ;;  %v5187_v36 = vunpack.c.l.b16 %v5017_v55  ;;  %v11589_v26 = vpop.f32.mrf.mxu0 }
 0xc73   : > { %7269 = vpow2.f32 %v4831_v18 }
 0xc74   : > { %v5195_v37 = vpack.c.b16 %v5188_v45, %v5187_v36 }
 0xc75   : > { %v5204_v13 = vpop.permute.xlu1 %5203  ;;  %v5200_v31 = vpop.permute.xlu2 %5199 }
 0xc76   : > { %5228 = vmatpush.bf16.msra.mxu2 %v5204_v13  ;;  %v11613_v30 = vpop.xlane.xlu0 %4734 }
 0xc79   : > { %v11591_v4 = vpop.eup %7269 }
 0xc7a   : > { %5229 = vmatpush.bf16.msra.mxu2 %v5202_v53  ;;  %v4922_v52 = vsel %vm1765_vm5, %v11591_v4, 0.0  ;;  %v11595_v40 = vpop.f32.mrf.mxu0 }
 0xc7e   : > { %5230 = vmatpush.bf16.msra.mxu2 %v5200_v31 }
 0xc81   : > { %6314 = vmatmul.msk.bf16.vlgmr.msra.gmra.mxu2 %vm1765_vm5, %v5195_v37  ;;  %v6494_v37 = vpack.i.bf16 %v11027_v9, %v11016_v21 }
 0xc82   : > { %v5096_v34 = vpop.f32.mrf.mxu0 }
 0xc83   : > { %v4912_v18 = vpop.xlane.xlu0 %4911 }
 0xc8a   : > { %v5098_v62 = vpop.f32.mrf.mxu0 }
 0xc8b   : > { %v6529_v50 = vpack.i.bf16 %v5098_v62, %v5096_v34 }
 0xc9c   : > { %4923 = vadd.xlane.f32.xlu0 %v4922_v52 }
 0xca0   : > { %v4726_v23 = vpop.xlane.xlu1 %4725 }
 0xca1   : > { %v4770_v24 = vsub.f32 %v11523_v49, %v4726_v23  ;;  %v6519_v49 = vpack.i.bf16 %v12447_v19, %v12446_v2 }
 0xca3   : > { %v4827_v57 = vmul.f32 1.442695, %v4770_v24 }
 0xca5   : > { %7271 = vpow2.f32 %v4827_v57 }
 0xca6   : > { %7273 = vrcp.f32 %v4900_v28 }
 0xca8   : > { %v4729_v43 = vpop.xlane.xlu1 %4728 }
 0xca9   : > { %v4771_v14 = vsub.f32 %v11531_v46, %v4729_v43 }
 0xcab   : > { %v11599_v15 = vpop.eup %7271  ;;  %v4829_v32 = vmul.f32 1.442695, %v4771_v14 }
 0xcac   : > { %v4916_v20 = vsel %vm1765_vm5, %v11599_v15, 0.0  ;;  %v7274_v51 = vpop.eup %7273 }
 0xcad   : > { %7275 = vpow2.f32 %v4829_v32  ;;  %4917 = vadd.xlane.f32.xlu2 %v4916_v20  ;;  %v4988_v12 = vmul.f32 %v7274_v51, %v11475_v25  ;;  %v12448_v20 = vld [vmem:[#allocation33_spill] sm:$0xff] }
 0xcae   : > { %v4897_v10 = vpop.xlane.xlu2 %4896 }
 0xcaf   : > { %7277 = vrcp.f32 %v4897_v10  ;;  %v5020_v8 = vpack.c.bf16 %v4988_v12, %v4988_v12  ;;  %v12449_v10 = vld [vmem:[#allocation64_spill] sm:$0xff] }
 0xcb0   : > { %6520 = vrot.lane.b32.xlu0 %v6519_v49, %s7579_s6  ;;  %v4906_v5 = vpop.xlane.xlu1 %4905  ;;  %v6504_v51 = vpack.i.bf16 %v12449_v10, %v12448_v20 }
 0xcb1   : > { %v5190_v25 = vunpack.c.l.b16 %v5020_v8 }
 0xcb3   : > { %v11607_v46 = vpop.eup %7275 }
 0xcb4   : > { %v4919_v27 = vsel %vm1765_vm5, %v11607_v46, 0.0 }
 0xcb5   : > { %v7278_v41 = vpop.eup %7277  ;;  %4920 = vadd.xlane.f32.xlu1 %v4919_v27 }
 0xcb6   : > { %v4987_v29 = vmul.f32 %v7278_v41, %v11539_v60  ;;  %v4903_v48 = vpop.xlane.xlu2 %4902 }
 0xcb7   : > { %7279 = vrcp.f32 %v4903_v48  ;;  %v11654_v48 = vpop.f32.mrf.mxu1 }
 0xcb8   : > { %v5019_v35 = vpack.c.bf16 %v4987_v29, %v4987_v29  ;;  %7281 = vrcp.f32 %v4906_v5  ;;  %6530 = vrot.lane.b32.xlu0 %v6529_v50, %s7580_s13  ;;  %v4909_v63 = vpop.xlane.xlu1 %4908  ;;  %v6524_v29 = vpack.i.bf16 %v11054_v1, %v11050_v22 }
 0xcba   : > { %v5189_v53 = vunpack.c.l.b16 %v5019_v35  ;;  %v12450_v35 = vld [vmem:[#allocation69_spill] sm:$0xff] }
 0xcbc   : > { %v5196_v17 = vpack.c.b16 %v5190_v25, %v5189_v53  ;;  %v12451_v25 = vld [vmem:[#allocation70_spill] sm:$0xff] }
 0xcbd   : > { %v7280_v13 = vpop.eup %7279  ;;  %v6534_v53 = vpack.i.bf16 %v12451_v25, %v12450_v35  ;;  %v12470_v35 = vld [vmem:[#allocation79_spill] sm:$0xff] }
 0xcbe   : > { %v4738_v55 = vpop.xlane.xlu2 %4737  ;;  %6315 = vmatmul.msk.bf16.gmra.mxu2 %vm1765_vm5, %v5196_v17  ;;  %v7282_v45 = vpop.eup %7281  ;;  %v4989_v36 = vmul.f32 %v7280_v13, %v11548_v42 }
 0xcbf   : > { %v4774_v60 = vsub.f32 %v11558_v54, %v4738_v55  ;;  %v4990_v28 = vmul.f32 %v7282_v45, %v11542_v59  ;;  %v11660_v1 = vpop.f32.mrf.mxu1  ;;  %v12454_v45 = vld [vmem:[#allocation25_spill] sm:$0xff] }
 0xcc0   : > { %v5021_v58 = vpack.c.bf16 %v4989_v36, %v4989_v36  ;;  %v4744_v57 = vpop.xlane.xlu1 %4743 }
 0xcc1   : > { %v4835_v31 = vmul.f32 1.442695, %v4774_v60  ;;  %v5022_v52 = vpack.c.bf16 %v4990_v28, %v4990_v28  ;;  %v11626_v9 = vpop.xlane.xlu0 %4914  ;;  %v4776_v34 = vsub.f32 %v11561_v3, %v4744_v57  ;;  %v12455_v60 = vld [vmem:[#allocation19_spill] sm:$0xff]  ;;  %v12461_v57 = vld [vmem:[#allocation28_spill] sm:$0xff] }
 0xcc2   : > { %v5191_v23 = vunpack.c.l.b16 %v5021_v58  ;;  %v6549_v36 = vpack.i.bf16 %v12455_v60, %v12454_v45  ;;  %v12456_v28 = vld [vmem:[#allocation71_spill] sm:$0xff] }
 0xcc3   : > { %7283 = vpow2.f32 %v4835_v31  ;;  %v5192_v42 = vunpack.c.l.b16 %v5022_v52  ;;  %v4839_v19 = vmul.f32 1.442695, %v4776_v34  ;;  %v4773_v31 = vsub.f32 %v11486_v47, %v11613_v30  ;;  %v12460_v47 = vld [vmem:[#allocation74_spill] sm:$0xff]  ;;  %v12464_v34 = vld [vmem:[#allocation76_spill] sm:$0xff]  ;;  %v12472_v45 = vld [vmem:[#allocation55_spill] sm:$0xff] }
 0xcc4   : > { %7285 = vrcp.f32 %v4909_v63 }
 0xcc5   : > { %6495 = vrot.lane.b32.xlu2 %v6494_v37, %s7581_s15  ;;  %7287 = vrcp.f32 %v4912_v18  ;;  %v5197_v54 = vpack.c.b16 %v5192_v42, %v5191_v23  ;;  %v12457_v37 = vld [vmem:[#allocation72_spill] sm:$0xff]  ;;  %v4833_v63 = vmul.f32 1.442695, %v4773_v31  ;;  %v12458_v42 = vpack.i.bf16 %v10993_v11, %v10986_v61  ;;  %v6353_v11 = vld [vmem:[#allocation10 + $0x8] sm:$0xff] }
 0xcc6   : > { %7289 = vpow2.f32 %v4839_v19  ;;  %v6609_v58 = vpack.i.bf16 %v12457_v37, %v12456_v28  ;;  %v4741_v18 = vpop.xlane.xlu2 %4740  ;;  %5897 = vmatpush.bf16.msra.mxu0 %v6353_v11  ;;  %v12465_v19 = vld [vmem:[#allocation77_spill] sm:$0xff]  ;;  %v12473_v37 = vld [vmem:[#allocation87_spill] sm:$0xff]  ;;  %v6559_v11 = vpack.i.bf16 %v11660_v1, %v11654_v48 }
 0xcc7   : > { %v5164_v55 = vpop.f32.mrf.mxu1  ;;  %7291 = vpow2.f32 %v4833_v63  ;;  %v4775_v23 = vsub.f32 %v11569_v44, %v4741_v18  ;;  %v12463_v44 = vld [vmem:[#allocation75_spill] sm:$0xff] }
 0xcc9   : > { %v11622_v24 = vpop.eup %7283 }
 0xcca   : > { %v4928_v59 = vsel %vm1765_vm5, %v11622_v24, 0.0  ;;  %v7286_v21 = vpop.eup %7285 }
 0xccb   : > { %4929 = vadd.xlane.f32.xlu1 %v4928_v59  ;;  %v7288_v43 = vpop.eup %7287  ;;  %v4991_v14 = vmul.f32 %v7286_v21, %v11551_v0  ;;  %v6509_v0 = vpack.i.bf16 %v11045_v56, %v11034_v33  ;;  %v6514_v33 = vpack.i.bf16 %v11595_v40, %v11589_v26  ;;  %v5101_v56 = vpop.f32.mrf.mxu0  ;;  %v12452_v26 = vld [vmem:[#allocation52_spill] sm:$0xff]  ;;  %v12459_v59 = vld [vmem:[#allocation73_spill] sm:$0xff] }
 0xccc   : > { %v4992_v32 = vmul.f32 %v7288_v43, %v11511_v16  ;;  %v11645_v41 = vpop.eup %7289  ;;  %v12453_v40 = vld [vmem:[#allocation24_spill] sm:$0xff]  ;;  %v6624_v30 = vpack.i.bf16 %v12460_v47, %v12459_v59  ;;  %v12462_v43 = vld [vmem:[#allocation53_spill] sm:$0xff]  ;;  %v12475_v59 = vld [vmem:[#allocation90_spill] sm:$0xff] }
 0xccd   : > { %5272 = vrot.lane.b32.xlu2 %v12375_v6, %s7578_s3  ;;  %v5023_v2 = vpack.c.bf16 %v4991_v14, %v4991_v14  ;;  %v4934_v5 = vsel %vm1765_vm5, %v11645_v41, 0.0  ;;  %v6579_v13 = vpack.i.bf16 %v12453_v40, %v12452_v26  ;;  %v11682_v21 = vpop.eup %7291  ;;  %v6564_v14 = vpack.i.bf16 %v12462_v43, %v12461_v57  ;;  %v12476_v47 = vld [vmem:[#allocation89_spill] sm:$0xff]  ;;  %s7486_s3 = scalar_lea.hbm %s12090_s8, 512 }
 0xcce   : > { %6316 = vmatmul.msk.bf16.gmra.mxu2 %vm1765_vm5, %v5197_v54  ;;  %v5024_v6 = vpack.c.bf16 %v4992_v32, %v4992_v32  ;;  %v4837_v54 = vmul.f32 1.442695, %v4775_v23  ;;  %v6639_v32 = vpack.i.bf16 %v12464_v34, %v12463_v44  ;;  %v4925_v61 = vsel %vm1765_vm5, %v11682_v21, 0.0  ;;  %p7488_p12 = scmp.lt.s32.totalorder %s7486_s3, %s7482_s5 }
 0xccf   : > { %v5193_v12 = vunpack.c.l.b16 %v5023_v2  ;;  %v5166_v52 = vpop.f32.mrf.mxu1  ;;  %v6352_v2 = vld [vmem:[#allocation10] sm:$0xff] }
 0xcd0   : > { %v5194_v27 = vunpack.c.l.b16 %v5024_v6  ;;  %7293 = vpow2.f32 %v4837_v54  ;;  %v12466_v6 = vld [vmem:[#allocation34_spill] sm:$0xff]  ;;  %5898 = vmatpush.bf16.msra.mxu0 %v6352_v2  ;;  %v12479_v54 = vld [vmem:[#allocation81_spill] sm:$0xff]  ;;  %v12481_v2 = vld [vmem:[#allocation91_spill] sm:$0xff]  ;;  %p7489_p13 = por %p7488_p12, %p7487_p11 }
 0xcd1   : > { %7295 = vrcp.f32 %v11626_v9 }
 0xcd2   : > { %v5198_v3 = vpack.c.b16 %v5194_v27, %v5193_v12  ;;  %v6654_v12 = vpack.i.bf16 %v12466_v6, %v12465_v19  ;;  %p7490_p0 = pnand %p7489_p13, %p7485_p8 }
 0xcd3   : > { %v5103_v22 = vpop.f32.mrf.mxu0 }
 0xcd4   : > { %v11636_v49 = vpop.permute.xlu0 %6490  ;;  %v6544_v17 = vpack.i.bf16 %v5103_v22, %v5101_v56 }
 0xcd5   : > { %6505 = vrot.lane.b32.xlu2 %v6504_v51, %s7579_s6  ;;  %v6574_v51 = vpack.i.bf16 %v5166_v52, %v5164_v55  ;;  %v6492_v22 = vunpack.i.l.bf16 %v11636_v49 }
 0xcd6   : > { %v11692_v10 = vpop.eup %7293 }
 0xcd7   : > { %v5169_v20 = vpop.f32.mrf.mxu1  ;;  %v7296_v56 = vpop.eup %7295  ;;  %v5709_v60 = vsel %vm1468_vm3, %v12472_v45, %v6492_v22  ;;  %v12493_v45 = vld [vmem:[#allocation86_spill] sm:$0xff] }
 0xcd8   : > { %v5279_v62 = vpop.permute.xlu1 %5278  ;;  %v4993_v9 = vmul.f32 %v7296_v56, %v11567_v38 }
 0xcd9   : > { %5300 = vmatpush.bf16.msrb.mxu3 %v5279_v62  ;;  %v4931_v62 = vsel %vm1765_vm5, %v11692_v10, 0.0 }
 0xcda   : > { %v5025_v18 = vpack.c.bf16 %v4993_v9, %v4993_v9  ;;  %v12491_v9 = vld [vmem:[#allocation102_spill] sm:$0xff] }
 0xcdc   : > { %v11641_v16 = vpop.permute.xlu0 %6500  ;;  %v5260_v34 = vunpack.c.l.b16 %v5025_v18 }
 0xcdd   : > { %6510 = vrot.lane.b32.xlu2 %v6509_v0, %s7581_s15 }
 0xcde   : > { %6317 = vmatmul.msk.bf16.gmra.mxu2 %vm1765_vm5, %v5198_v3  ;;  %v12467_v3 = vld [vmem:[#allocation18_spill] sm:$0xff] }
 0xcdf   : > { %v5171_v27 = vpop.f32.mrf.mxu1 }
 0xce0   : > { %v5277_v8 = vpop.permute.xlu1 %5276  ;;  %v6589_v0 = vpack.i.bf16 %v5171_v27, %v5169_v20 }
 0xce1   : > { %5301 = vmatpush.bf16.msrb.mxu3 %v5277_v8  ;;  %v12468_v8 = vld [vmem:[#allocation21_spill] sm:$0xff] }
 0xce2   : > { %4935 = vadd.xlane.f32.xlu0 %v4934_v5 }
 0xce4   : > { %6525 = vrot.lane.b32.xlu1 %v6524_v29, %s7581_s15  ;;  %v5275_v50 = vpop.permute.xlu0 %5274  ;;  %v6669_v29 = vpack.i.bf16 %v12468_v8, %v12467_v3 }
 0xce5   : > { %6515 = vrot.lane.b32.xlu2 %v6514_v33, %s7580_s13  ;;  %5302 = vmatpush.bf16.msrb.mxu3 %v5275_v50  ;;  %v6599_v33 = vpack.i.bf16 %v11220_v39, %v11217_v7  ;;  %v12469_v50 = vld [vmem:[#allocation78_spill] sm:$0xff] }
 0xce6   : > { %v6684_v25 = vpack.i.bf16 %v12470_v35, %v12469_v50  ;;  %v12471_v7 = vld [vmem:[#allocation42_spill] sm:$0xff]  ;;  %v12488_v35 = vld [vmem:[#allocation84_spill] sm:$0xff] }
 0xcec   : > { %6535 = vrot.lane.b32.xlu1 %v6534_v53, %s7579_s6  ;;  %v6493_v53 = vunpack.i.h.bf16 %v11636_v49  ;;  %v6503_v49 = vunpack.i.h.bf16 %v11641_v16 }
 0xcee   : > { %v5710_v39 = vsel %vm1468_vm3, %v12471_v7, %v6493_v53 }
 0xcf4   : > { %6545 = vrot.lane.b32.xlu1 %v6544_v17, %s7580_s13 }
 0xcf6   : > { %6580 = vrot.lane.b32.xlu0 %v6579_v13, %s7579_s6 }
 0xcfc   : > { %6550 = vrot.lane.b32.xlu1 %v6549_v36, %s7579_s6  ;;  %v6502_v36 = vunpack.i.l.bf16 %v11641_v16  ;;  %v12478_v16 = vld [vmem:[#allocation80_spill] sm:$0xff] }
 0xcfd   : > { %v6699_v57 = vpack.i.bf16 %v12479_v54, %v12478_v16  ;;  %v12499_v16 = vld [vmem:[#allocation66_spill] sm:$0xff] }
 0xcfe   : > { %6610 = vrot.lane.b32.xlu0 %v6609_v58, %s7579_s6  ;;  %v12474_v58 = vld [vmem:[#allocation88_spill] sm:$0xff] }
 0xcff   : > { %v6539_v63 = vpack.i.bf16 %v12474_v58, %v12473_v37 }
 0xd04   : > { %6555 = vrot.lane.b32.xlu1 %v12458_v42, %s7581_s15  ;;  %v11734_v44 = vpop.f32.mrf.mxu2 }
 0xd06   : > { %6625 = vrot.lane.b32.xlu0 %v6624_v30, %s7579_s6  ;;  %v12477_v30 = vpack.i.bf16 %v12475_v59, %v12476_v47 }
 0xd0c   : > { %6565 = vrot.lane.b32.xlu1 %v6564_v14, %s7579_s6  ;;  %v5234_v1 = vpop.f32.mrf.mxu2 }
 0xd0e   : > { %4926 = vadd.xlane.f32.xlu2 %v4925_v61  ;;  %6640 = vrot.lane.b32.xlu0 %v6639_v32, %s7579_s6 }
 0xd0f   : > { %v4924_v52 = vpop.xlane.xlu0 %4923 }
 0xd14   : > { %6575 = vrot.lane.b32.xlu1 %v6574_v51, %s7580_s13  ;;  %v12480_v51 = vld [vmem:[#allocation92_spill] sm:$0xff] }
 0xd15   : > { %v12482_v19 = vpack.i.bf16 %v12480_v51, %v12481_v2 }
 0xd16   : > { %4932 = vadd.xlane.f32.xlu2 %v4931_v62  ;;  %6655 = vrot.lane.b32.xlu0 %v6654_v12, %s7579_s6  ;;  %v12483_v12 = vld [vmem:[#allocation82_spill] sm:$0xff] }
 0xd17   : > { %v12484_v62 = vld [vmem:[#allocation22_spill] sm:$0xff] }
 0xd18   : > { %v6714_v27 = vpack.i.bf16 %v12484_v62, %v12483_v12 }
 0xd1c   : > { %6590 = vrot.lane.b32.xlu1 %v6589_v0, %s7580_s13 }
 0xd1e   : > { %6670 = vrot.lane.b32.xlu0 %v6669_v29, %s7579_s6 }
 0xd20   : > { %v4918_v5 = vpop.xlane.xlu2 %4917 }
 0xd21   : > { %7297 = vrcp.f32 %v4918_v5  ;;  %v12485_v5 = vld [vmem:[#allocation94_spill] sm:$0xff] }
 0xd24   : > { %6600 = vrot.lane.b32.xlu1 %v6599_v33, %s7581_s15  ;;  %v12486_v33 = vld [vmem:[#allocation93_spill] sm:$0xff] }
 0xd25   : > { %v12487_v56 = vpack.i.bf16 %v12485_v5, %v12486_v33 }
 0xd26   : > { %6685 = vrot.lane.b32.xlu0 %v6684_v25, %s7579_s6  ;;  %v12489_v25 = vld [vmem:[#allocation83_spill] sm:$0xff] }
 0xd27   : > { %v7298_v17 = vpop.eup %7297 }
 0xd28   : > { %v4994_v26 = vmul.f32 %v7298_v17, %v11599_v15  ;;  %v6496_v40 = vpop.permute.xlu2 %6495  ;;  %v4921_v28 = vpop.xlane.xlu1 %4920 }
 0xd29   : > { %v6498_v13 = vunpack.i.h.bf16 %v6496_v40  ;;  %v6497_v55 = vunpack.i.l.bf16 %v6496_v40  ;;  %7299 = vrcp.f32 %v4921_v28  ;;  %v12496_v28 = vld [vmem:[#allocation20_spill] sm:$0xff] }
 0xd2a   : > { %v5026_v31 = vpack.c.bf16 %v4994_v26, %v4994_v26  ;;  %7301 = vrcp.f32 %v4924_v52 }
 0xd2b   : > { %v5742_v38 = vsel %vm5741_vm7, %v5709_v60, %v6497_v55  ;;  %v5743_v15 = vsel %vm5741_vm7, %v5710_v39, %v6498_v13  ;;  %v12494_v60 = vld [vmem:[#allocation85_spill] sm:$0xff] }
 0xd2c   : > { %v5775_v23 = vsel %vm5774_vm6, %v5742_v38, %v6502_v36  ;;  %v5776_v42 = vsel %vm5774_vm6, %v5743_v15, %v6503_v49  ;;  %6615 = vrot.lane.b32.xlu1 %v12477_v30, %s7581_s15  ;;  %v5261_v14 = vunpack.c.l.b16 %v5026_v31  ;;  %v12495_v49 = vpack.i.bf16 %v12493_v45, %v12494_v60  ;;  %v5174_v36 = vpop.f32.mrf.mxu1  ;;  %v12497_v15 = vld [vmem:[#allocation48_spill] sm:$0xff]  ;;  %v12498_v30 = vld [vmem:[#allocation65_spill] sm:$0xff] }
 0xd2d   : > { %v5807_v43 = vpack.c.bf16 %v5776_v42, %v5775_v23  ;;  %v6521_v42 = vpop.permute.xlu0 %6520  ;;  %v6594_v54 = vpack.i.bf16 %v12499_v16, %v12498_v30 }
 0xd2e   : > { %6540 = vrot.lane.b32.xlu2 %v6539_v63, %s7581_s15  ;;  %6700 = vrot.lane.b32.xlu0 %v6699_v57, %s7579_s6  ;;  %v5268_v20 = vpack.c.b16 %v5261_v14, %v5260_v34  ;;  %v12501_v14 = vld [vmem:[#allocation95_spill] sm:$0xff]  ;;  %v6523_v51 = vunpack.i.h.bf16 %v6521_v42  ;;  %v6522_v2 = vunpack.i.l.bf16 %v6521_v42 }
 0xd2f   : > { %6330 = vmatmul.msk.bf16.vlgmr.msra.gmra.mxu0 %vm443_vm0, %v5807_v43  ;;  %v7300_v61 = vpop.eup %7299  ;;  %v12500_v43 = vld [vmem:[#allocation96_spill] sm:$0xff] }
 0xd30   : > { %v5273_v32 = vpop.permute.xlu2 %5272  ;;  %v7302_v6 = vpop.eup %7301  ;;  %v4995_v0 = vmul.f32 %v7300_v61, %v11607_v46  ;;  %v12490_v46 = vpack.i.bf16 %v12488_v35, %v12489_v25  ;;  %v12502_v34 = vpack.i.bf16 %v12500_v43, %v12501_v14 }
 0xd31   : > { %5303 = vmatpush.bf16.msrb.mxu3 %v5273_v32  ;;  %v4996_v3 = vmul.f32 %v7302_v6, %v11591_v4  ;;  %v12492_v4 = vld [vmem:[#allocation103_spill] sm:$0xff] }
 0xd32   : > { %v5027_v8 = vpack.c.bf16 %v4995_v0, %v4995_v0  ;;  %v6659_v26 = vpack.i.bf16 %v12492_v4, %v12491_v9  ;;  %v12504_v6 = vld [vmem:[#allocation23_spill] sm:$0xff]  ;;  %v12509_v4 = vld [vmem:[#allocation98_spill] sm:$0xff] }
 0xd33   : > { %v5028_v29 = vpack.c.bf16 %v4996_v3, %v4996_v3  ;;  %v12508_v9 = vld [vmem:[#allocation99_spill] sm:$0xff] }
 0xd34   : > { %6630 = vrot.lane.b32.xlu1 %v12482_v19, %s7581_s15  ;;  %6318 = vmatmul.msk.bf16.vlgmr.msrb.gmra.mxu3 %vm1765_vm5, %v5268_v20  ;;  %v5262_v50 = vunpack.c.l.b16 %v5027_v8  ;;  %v5176_v20 = vpop.f32.mrf.mxu1  ;;  %v12503_v19 = vld [vmem:[#allocation97_spill] sm:$0xff] }
 0xd35   : > { %v5263_v53 = vunpack.c.l.b16 %v5028_v29  ;;  %v12505_v12 = vpack.i.bf16 %v12503_v19, %v12504_v6  ;;  %v6531_v62 = vpop.permute.xlu0 %6530  ;;  %v12507_v29 = vld [vmem:[#allocation37_spill] sm:$0xff] }
 0xd36   : > { %6560 = vrot.lane.b32.xlu2 %v6559_v11, %s7580_s13  ;;  %6715 = vrot.lane.b32.xlu0 %v6714_v27, %s7579_s6  ;;  %v6604_v11 = vpack.i.bf16 %v5176_v20, %v5174_v36  ;;  %v5713_v5 = vsel %vm1468_vm3, %v12507_v29, %v6522_v2  ;;  %v6533_v33 = vunpack.i.h.bf16 %v6531_v62 }
 0xd37   : > { %v5269_v40 = vpack.c.b16 %v5263_v53, %v5262_v50 }
 0xd38   : > { %v6506_v48 = vpop.permute.xlu2 %6505 }
 0xd39   : > { %v6508_v7 = vunpack.i.h.bf16 %v6506_v48  ;;  %v6507_v39 = vunpack.i.l.bf16 %v6506_v48  ;;  %v12506_v48 = vld [vmem:[#allocation51_spill] sm:$0xff] }
 0xd3a   : > { %v5714_v8 = vsel %vm1468_vm3, %v12506_v48, %v6523_v51 }
 0xd3b   : > { %v5712_v38 = vsel %vm1468_vm3, %v12496_v28, %v6508_v7  ;;  %v5711_v37 = vsel %vm1468_vm3, %v12497_v15, %v6507_v39  ;;  %v12511_v39 = vld [vmem:[#allocation101_spill] sm:$0xff] }
 0xd3c   : > { %6645 = vrot.lane.b32.xlu1 %v12487_v56, %s7581_s15  ;;  %v6532_v56 = vunpack.i.l.bf16 %v6531_v62 }
 0xd3e   : > { %6570 = vrot.lane.b32.xlu2 %v12490_v46, %s7581_s15  ;;  %v4930_v32 = vpop.xlane.xlu1 %4929 }
 0xd3f   : > { %7303 = vrcp.f32 %v4930_v32 }
 0xd40   : > { %v6511_v22 = vpop.permute.xlu2 %6510 }
 0xd41   : > { %v5237_v17 = vpop.f32.mrf.mxu2  ;;  %v6513_v13 = vunpack.i.h.bf16 %v6511_v22  ;;  %v6512_v55 = vunpack.i.l.bf16 %v6511_v22  ;;  %v6619_v22 = vpack.i.bf16 %v5234_v1, %v11734_v44 }
 0xd43   : > { %v5744_v52 = vsel %vm5741_vm7, %v5711_v37, %v6512_v55  ;;  %v5745_v23 = vsel %vm5741_vm7, %v5712_v38, %v6513_v13  ;;  %v12512_v13 = vld [vmem:[#allocation100_spill] sm:$0xff] }
 0xd44   : > { %6660 = vrot.lane.b32.xlu1 %v6659_v26, %s7581_s15  ;;  %6319 = vmatmul.msk.bf16.gmra.mxu3 %vm1765_vm5, %v5269_v40  ;;  %v12510_v26 = vpack.i.bf16 %v12508_v9, %v12509_v4  ;;  %v12513_v55 = vpack.i.bf16 %v12511_v39, %v12512_v13 }
 0xd46   : > { %6585 = vrot.lane.b32.xlu2 %v12495_v49, %s7581_s15 }
 0xd48   : > { %v6516_v31 = vpop.permute.xlu2 %6515 }
 0xd49   : > { %v6518_v58 = vunpack.i.h.bf16 %v6516_v31  ;;  %v6517_v63 = vunpack.i.l.bf16 %v6516_v31  ;;  %v5239_v18 = vpop.f32.mrf.mxu2  ;;  %v7304_v31 = vpop.eup %7303 }
 0xd4a   : > { %v6634_v7 = vpack.i.bf16 %v5239_v18, %v5237_v17  ;;  %v4998_v17 = vmul.f32 %v7304_v31, %v11622_v24 }
 0xd4b   : > { %v5777_v59 = vsel %vm5774_vm6, %v5744_v52, %v6517_v63  ;;  %v5778_v47 = vsel %vm5774_vm6, %v5745_v23, %v6518_v58 }
 0xd4c   : > { %v5808_v57 = vpack.c.bf16 %v5778_v47, %v5777_v59  ;;  %6675 = vrot.lane.b32.xlu1 %v12502_v34, %s7581_s15  ;;  %v5030_v15 = vpack.c.bf16 %v4998_v17, %v4998_v17  ;;  %v12515_v34 = vld [vmem:[#allocation29_spill] sm:$0xff]  ;;  %v12518_v17 = vld [vmem:[#allocation54_spill] sm:$0xff] }
 0xd4e   : > { %6595 = vrot.lane.b32.xlu2 %v6594_v54, %s7579_s6  ;;  %6331 = vmatmul.msk.bf16.gmra.mxu0 %vm443_vm0, %v5808_v57  ;;  %v5265_v52 = vunpack.c.l.b16 %v5030_v15  ;;  %v12514_v57 = vld [vmem:[#allocation35_spill] sm:$0xff] }
 0xd51   : > { %v5242_v61 = vpop.f32.mrf.mxu2 }
 0xd54   : > { %6690 = vrot.lane.b32.xlu1 %v12505_v12, %s7581_s15 }
 0xd55   : > { %v4936_v37 = vpop.xlane.xlu0 %4935 }
 0xd56   : > { %v6526_v27 = vpop.permute.xlu1 %6525  ;;  %6605 = vrot.lane.b32.xlu2 %v6604_v11, %s7580_s13 }
 0xd57   : > { %v6528_v0 = vunpack.i.h.bf16 %v6526_v27  ;;  %v6527_v3 = vunpack.i.l.bf16 %v6526_v27 }
 0xd59   : > { %v5746_v50 = vsel %vm5741_vm7, %v5713_v5, %v6527_v3  ;;  %v5747_v35 = vsel %vm5741_vm7, %v5714_v8, %v6528_v0  ;;  %v5244_v40 = vpop.f32.mrf.mxu2 }
 0xd5a   : > { %v5779_v25 = vsel %vm5774_vm6, %v5746_v50, %v6532_v56  ;;  %v5780_v46 = vsel %vm5774_vm6, %v5747_v35, %v6533_v33  ;;  %v6649_v44 = vpack.i.bf16 %v5244_v40, %v5242_v61 }
 0xd5b   : > { %v5809_v53 = vpack.c.bf16 %v5780_v46, %v5779_v25  ;;  %v12516_v25 = vld [vmem:[#allocation36_spill] sm:$0xff] }
 0xd5c   : > { %6705 = vrot.lane.b32.xlu1 %v12510_v26, %s7581_s15 }
 0xd5e   : > { %6620 = vrot.lane.b32.xlu2 %v6619_v22, %s7580_s13  ;;  %6332 = vmatmul.msk.bf16.gmra.mxu0 %vm443_vm0, %v5809_v53  ;;  %v6536_v49 = vpop.permute.xlu1 %6535  ;;  %v12517_v53 = vld [vmem:[#allocation50_spill] sm:$0xff] }
 0xd5f   : > { %v6538_v42 = vunpack.i.h.bf16 %v6536_v49  ;;  %v6537_v59 = vunpack.i.l.bf16 %v6536_v49 }
 0xd61   : > { %v5247_v45 = vpop.f32.mrf.mxu2  ;;  %v5716_v43 = vsel %vm1468_vm3, %v12514_v57, %v6538_v42  ;;  %v5715_v32 = vsel %vm1468_vm3, %v12515_v34, %v6537_v59  ;;  %v12520_v34 = vld [vmem:[#allocation30_spill] sm:$0xff] }
 0xd64   : > { %6720 = vrot.lane.b32.xlu1 %v12513_v55, %s7581_s15  ;;  %v11837_v55 = vld [vmem:[%s12089_s7] ss:$0 sm:$0xff] }
 0xd66   : > { %6635 = vrot.lane.b32.xlu2 %v6634_v7, %s7580_s13  ;;  %v6546_v28 = vpop.permute.xlu1 %6545 }
 0xd67   : > { %v6548_v20 = vunpack.i.h.bf16 %v6546_v28  ;;  %v6547_v61 = vunpack.i.l.bf16 %v6546_v28 }
 0xd69   : > { %v5249_v1 = vpop.f32.mrf.mxu2 }
 0xd6a   : > { %v6664_v60 = vpack.i.bf16 %v5249_v1, %v5247_v45 }
 0xd6e   : > { %6650 = vrot.lane.b32.xlu2 %v6649_v44, %s7580_s13  ;;  %v6551_v16 = vpop.permute.xlu1 %6550 }
 0xd6f   : > { %v6552_v5 = vunpack.i.l.bf16 %v6551_v16 }
 0xd71   : > { %v5717_v22 = vsel %vm1468_vm3, %v12517_v53, %v6552_v5 }
 0xd76   : > { %6665 = vrot.lane.b32.xlu2 %v6664_v60, %s7580_s13  ;;  %v6556_v3 = vpop.permute.xlu1 %6555 }
 0xd77   : > { %v6558_v33 = vunpack.i.h.bf16 %v6556_v3  ;;  %v6557_v56 = vunpack.i.l.bf16 %v6556_v3 }
 0xd79   : > { %v5750_v9 = vsel %vm5741_vm7, %v5717_v22, %v6557_v56 }
 0xd7e   : > { %v6566_v7 = vpop.permute.xlu1 %6565 }
 0xd7f   : > { %v6568_v45 = vunpack.i.h.bf16 %v6566_v7  ;;  %v6567_v44 = vunpack.i.l.bf16 %v6566_v7 }
 0xd81   : > { %v4927_v36 = vpop.xlane.xlu2 %4926  ;;  %v5720_v28 = vsel %vm1468_vm3, %v12518_v17, %v6568_v45 }
 0xd82   : > { %7305 = vrcp.f32 %v4927_v36 }
 0xd86   : > { %v6576_v31 = vpop.permute.xlu1 %6575 }
 0xd88   : > { %v7306_v38 = vpop.eup %7305 }
 0xd89   : > { %v4997_v58 = vmul.f32 %v7306_v38, %v11682_v21  ;;  %v4933_v63 = vpop.xlane.xlu2 %4932  ;;  %v12519_v38 = vld [vmem:[#allocation44_spill] sm:$0xff] }
 0xd8a   : > { %7307 = vrcp.f32 %v4933_v63  ;;  %v5719_v15 = vsel %vm1468_vm3, %v12519_v38, %v6567_v44  ;;  %v6578_v63 = vunpack.i.h.bf16 %v6576_v31 }
 0xd8b   : > { %v5029_v18 = vpack.c.bf16 %v4997_v58, %v4997_v58  ;;  %7309 = vrcp.f32 %v4936_v37 }
 0xd8d   : > { %v5264_v23 = vunpack.c.l.b16 %v5029_v18  ;;  %v6577_v18 = vunpack.i.l.bf16 %v6576_v31 }
 0xd8f   : > { %v5270_v47 = vpack.c.b16 %v5265_v52, %v5264_v23 }
 0xd90   : > { %v7308_v30 = vpop.eup %7307 }
 0xd91   : > { %v6541_v54 = vpop.permute.xlu2 %6540  ;;  %6320 = vmatmul.msk.bf16.gmra.mxu3 %vm1765_vm5, %v5270_v47  ;;  %v7310_v24 = vpop.eup %7309  ;;  %v4999_v11 = vmul.f32 %v7308_v30, %v11692_v10  ;;  %v6553_v10 = vunpack.i.h.bf16 %v6551_v16 }
 0xd92   : > { %v6543_v14 = vunpack.i.h.bf16 %v6541_v54  ;;  %v6542_v21 = vunpack.i.l.bf16 %v6541_v54  ;;  %v5000_v19 = vmul.f32 %v7310_v24, %v11645_v41  ;;  %v6581_v16 = vpop.permute.xlu0 %6580 }
 0xd93   : > { %v5031_v27 = vpack.c.bf16 %v4999_v11, %v4999_v11  ;;  %v5718_v46 = vsel %vm1468_vm3, %v12516_v25, %v6553_v10  ;;  %v6583_v24 = vunpack.i.h.bf16 %v6581_v16  ;;  %v6582_v57 = vunpack.i.l.bf16 %v6581_v16 }
 0xd94   : > { %v5749_v51 = vsel %vm5741_vm7, %v5716_v43, %v6543_v14  ;;  %v5748_v2 = vsel %vm5741_vm7, %v5715_v32, %v6542_v21  ;;  %v5032_v0 = vpack.c.bf16 %v5000_v19, %v5000_v19  ;;  %v5751_v4 = vsel %vm5741_vm7, %v5718_v46, %v6558_v33  ;;  %v6591_v21 = vpop.permute.xlu1 %6590 }
 0xd95   : > { %v5781_v6 = vsel %vm5774_vm6, %v5748_v2, %v6547_v61  ;;  %v5782_v12 = vsel %vm5774_vm6, %v5749_v51, %v6548_v20  ;;  %v5266_v48 = vunpack.c.l.b16 %v5031_v27  ;;  %v5722_v32 = vsel %vm1468_vm3, %v12520_v34, %v6583_v24  ;;  %v12521_v20 = vld [vmem:[#allocation41_spill] sm:$0xff] }
 0xd96   : > { %v5810_v62 = vpack.c.bf16 %v5782_v12, %v5781_v6  ;;  %v5267_v29 = vunpack.c.l.b16 %v5032_v0  ;;  %v5721_v61 = vsel %vm1468_vm3, %v12521_v20, %v6582_v57  ;;  %v6593_v6 = vunpack.i.h.bf16 %v6591_v21 }
 0xd97   : > { %v6592_v12 = vunpack.i.l.bf16 %v6591_v21 }
 0xd98   : > { %6333 = vmatmul.msk.bf16.gmra.mxu0 %vm443_vm0, %v5810_v62  ;;  %v5271_v41 = vpack.c.b16 %v5267_v29, %v5266_v48 }
 0xd99   : > { %v6561_v8 = vpop.permute.xlu2 %6560 }
 0xd9a   : > { %v6563_v50 = vunpack.i.h.bf16 %v6561_v8  ;;  %v6562_v35 = vunpack.i.l.bf16 %v6561_v8 }
 0xd9c   : > { %v5784_v26 = vsel %vm5774_vm6, %v5751_v4, %v6563_v50  ;;  %v5783_v40 = vsel %vm5774_vm6, %v5750_v9, %v6562_v35  ;;  %v6601_v56 = vpop.permute.xlu1 %6600  ;;  %v12522_v50 = vld [vmem:[#allocation45_spill] sm:$0xff] }
 0xd9d   : > { %v5811_v39 = vpack.c.bf16 %v5784_v26, %v5783_v40  ;;  %v6603_v9 = vunpack.i.h.bf16 %v6601_v56  ;;  %v6602_v4 = vunpack.i.l.bf16 %v6601_v56 }
 0xda1   : > { %6321 = vmatmul.msk.bf16.gmra.mxu3 %vm1765_vm5, %v5271_v41  ;;  %v6571_v13 = vpop.permute.xlu2 %6570  ;;  %v12523_v41 = vld [vmem:[#allocation38_spill] sm:$0xff] }
 0xda2   : > { %v6573_v1 = vunpack.i.h.bf16 %v6571_v13  ;;  %v6572_v60 = vunpack.i.l.bf16 %v6571_v13 }
 0xda4   : > { %v5753_v37 = vsel %vm5741_vm7, %v5720_v28, %v6573_v1  ;;  %v5752_v58 = vsel %vm5741_vm7, %v5719_v15, %v6572_v60  ;;  %v6611_v60 = vpop.permute.xlu0 %6610 }
 0xda5   : > { %v5785_v52 = vsel %vm5774_vm6, %v5752_v58, %v6577_v18  ;;  %v5786_v23 = vsel %vm5774_vm6, %v5753_v37, %v6578_v63  ;;  %v6613_v28 = vunpack.i.h.bf16 %v6611_v60  ;;  %v6612_v38 = vunpack.i.l.bf16 %v6611_v60  ;;  %v12524_v18 = vld [vmem:[#allocation31_spill] sm:$0xff] }
 0xda6   : > { %v5812_v47 = vpack.c.bf16 %v5786_v23, %v5785_v52  ;;  %v12525_v23 = vld [vmem:[#allocation32_spill] sm:$0xff] }
 0xda7   : > { %v5726_v52 = vsel %vm1468_vm3, %v12524_v18, %v6613_v28 }
 0xda8   : > { %6334 = vmatmul.msk.bf16.gmra.mxu0 %vm443_vm0, %v5811_v39 }
 0xda9   : > { %v6586_v54 = vpop.permute.xlu2 %6585 }
 0xdaa   : > { %v6588_v43 = vunpack.i.h.bf16 %v6586_v54  ;;  %v6587_v14 = vunpack.i.l.bf16 %v6586_v54 }
 0xdac   : > { %v5900_v49 = vpop.f32.mrf.mxu0  ;;  %v5754_v51 = vsel %vm5741_vm7, %v5721_v61, %v6587_v14  ;;  %v5755_v2 = vsel %vm5741_vm7, %v5722_v32, %v6588_v43  ;;  %v6626_v43 = vpop.permute.xlu0 %6625 }
 0xdad   : > { %v5901_v36 = vadd.f32 %v11837_v55, %v5900_v49  ;;  %v5787_v27 = vsel %vm5774_vm6, %v5754_v51, %v6592_v12  ;;  %v5788_v0 = vsel %vm5774_vm6, %v5755_v2, %v6593_v6  ;;  %v6616_v49 = vpop.permute.xlu1 %6615  ;;  %v6628_v34 = vunpack.i.h.bf16 %v6626_v43  ;;  %v12526_v2 = vld [vmem:[#allocation46_spill] sm:$0xff]  ;;  %v12527_v6 = vld [vmem:[#allocation49_spill] sm:$0xff] }
 0xdae   : > { %v5813_v3 = vpack.c.bf16 %v5788_v0, %v5787_v27  ;;  %v6618_v15 = vunpack.i.h.bf16 %v6616_v49  ;;  %v6617_v37 = vunpack.i.l.bf16 %v6616_v49  ;;  %v6627_v32 = vunpack.i.l.bf16 %v6626_v43 }
 0xdaf   : > { %5980 = vst.msk [vmem:[%s11846_s23] sm:$0xff] %vm443_vm0, %v5901_v36 }
 0xdb0   : > { %v5727_v12 = vsel %vm1468_vm3, %v12527_v6, %v6627_v32 }
 0xdb1   : > { %v6596_v62 = vpop.permute.xlu2 %6595 }
 0xdb2   : > { %v6598_v8 = vunpack.i.h.bf16 %v6596_v62  ;;  %v6597_v29 = vunpack.i.l.bf16 %v6596_v62 }
 0xdb4   : > { %v5902_v42 = vpop.f32.mrf.mxu0  ;;  %v5724_v35 = vsel %vm1468_vm3, %v12522_v50, %v6598_v8  ;;  %v5723_v25 = vsel %vm1468_vm3, %v12523_v41, %v6597_v29  ;;  %v6641_v8 = vpop.permute.xlu0 %6640 }
 0xdb5   : > { %v5903_v59 = vadd.f32 %v11837_v55, %v5902_v42  ;;  %v5756_v40 = vsel %vm5741_vm7, %v5723_v25, %v6602_v4  ;;  %v5757_v7 = vsel %vm5741_vm7, %v5724_v35, %v6603_v9  ;;  %v5725_v42 = vsel %vm1468_vm3, %v12525_v23, %v6612_v38  ;;  %v6631_v14 = vpop.permute.xlu1 %6630  ;;  %v12528_v25 = vld [vmem:[#allocation27_spill] sm:$0xff] }
 0xdb6   : > { %v6633_v20 = vunpack.i.h.bf16 %v6631_v14  ;;  %v6632_v61 = vunpack.i.l.bf16 %v6631_v14  ;;  %v12531_v38 = vld [vmem:[#allocation39_spill] sm:$0xff] }
 0xdb7   : > { %5981 = vst.msk [vmem:[%s11846_s23 + $0x8] sm:$0xff] %vm443_vm0, %v5903_v59  ;;  %v5305_v30 = vpop.f32.mrf.mxu3  ;;  %v5758_v59 = vsel %vm5741_vm7, %v5725_v42, %v6617_v37 }
 0xdb8   : > { %6335 = vmatmul.msk.bf16.gmra.mxu0 %vm443_vm0, %v5812_v47  ;;  %v5759_v47 = vsel %vm5741_vm7, %v5726_v52, %v6618_v15  ;;  %v5760_v62 = vsel %vm5741_vm7, %v5727_v12, %v6632_v61 }
 0xdb9   : > { %v6606_v5 = vpop.permute.xlu2 %6605 }
 0xdba   : > { %v6608_v46 = vunpack.i.h.bf16 %v6606_v5  ;;  %v6607_v53 = vunpack.i.l.bf16 %v6606_v5  ;;  %v6643_v5 = vunpack.i.h.bf16 %v6641_v8 }
 0xdbc   : > { %v5789_v39 = vsel %vm5774_vm6, %v5756_v40, %v6607_v53  ;;  %v5790_v13 = vsel %vm5774_vm6, %v5757_v7, %v6608_v46  ;;  %v5730_v46 = vsel %vm1468_vm3, %v12528_v25, %v6643_v5  ;;  %v12529_v53 = vld [vmem:[#allocation47_spill] sm:$0xff] }
 0xdbd   : > { %v5814_v1 = vpack.c.bf16 %v5790_v13, %v5789_v39  ;;  %v6646_v29 = vpop.permute.xlu1 %6645  ;;  %v6656_v39 = vpop.permute.xlu0 %6655 }
 0xdbe   : > { %v6648_v56 = vunpack.i.h.bf16 %v6646_v29  ;;  %v6647_v50 = vunpack.i.l.bf16 %v6646_v29 }
 0xdbf   : > { %v5307_v11 = vpop.f32.mrf.mxu3 }
 0xdc0   : > { %v6679_v19 = vpack.i.bf16 %v5307_v11, %v5305_v30  ;;  %v5763_v4 = vsel %vm5741_vm7, %v5730_v46, %v6648_v56 }
 0xdc1   : > { %v6621_v31 = vpop.permute.xlu2 %6620 }
 0xdc2   : > { %6680 = vrot.lane.b32.xlu2 %v6679_v19, %s7580_s13  ;;  %v6623_v58 = vunpack.i.h.bf16 %v6621_v31  ;;  %v6622_v63 = vunpack.i.l.bf16 %v6621_v31  ;;  %v5728_v19 = vsel %vm1468_vm3, %v12526_v2, %v6628_v34  ;;  %v12533_v2 = vld [vmem:[#allocation43_spill] sm:$0xff] }
 0xdc3   : > { %v5761_v27 = vsel %vm5741_vm7, %v5728_v19, %v6633_v20 }
 0xdc4   : > { %v5791_v30 = vsel %vm5774_vm6, %v5758_v59, %v6622_v63  ;;  %v5792_v16 = vsel %vm5774_vm6, %v5759_v47, %v6623_v58 }
 0xdc5   : > { %v5815_v57 = vpack.c.bf16 %v5792_v16, %v5791_v30  ;;  %v6661_v13 = vpop.permute.xlu1 %6660  ;;  %v6671_v47 = vpop.permute.xlu0 %6670 }
 0xdc6   : > { %v6663_v60 = vunpack.i.h.bf16 %v6661_v13  ;;  %v6662_v49 = vunpack.i.l.bf16 %v6661_v13 }
 0xdc7   : > { %v5310_v48 = vpop.f32.mrf.mxu3 }
 0xdc8   : > { %6336 = vmatmul.msk.bf16.gmra.mxu0 %vm443_vm0, %v5813_v3 }
 0xdc9   : > { %v6636_v21 = vpop.permute.xlu2 %6635 }
 0xdca   : > { %v6638_v11 = vunpack.i.h.bf16 %v6636_v21  ;;  %v6637_v51 = vunpack.i.l.bf16 %v6636_v21 }
 0xdcb   : > { %v5905_v10 = vpop.f32.mrf.mxu0 }
 0xdcc   : > { %v5906_v33 = vadd.f32 %v11837_v55, %v5905_v10  ;;  %v5793_v0 = vsel %vm5774_vm6, %v5760_v62, %v6637_v51  ;;  %v5794_v3 = vsel %vm5774_vm6, %v5761_v27, %v6638_v11  ;;  %v12532_v11 = vld [vmem:[#allocation57_spill] sm:$0xff] }
 0xdcd   : > { %v6676_v30 = vpop.permute.xlu1 %6675  ;;  %v6686_v29 = vpop.permute.xlu0 %6685 }
 0xdce   : > { %5982 = vst.msk [vmem:[%s11846_s23 + $0x10] sm:$0xff] %vm443_vm0, %v5906_v33  ;;  %v6642_v33 = vunpack.i.l.bf16 %v6641_v8  ;;  %v6678_v21 = vunpack.i.h.bf16 %v6676_v30  ;;  %v6677_v34 = vunpack.i.l.bf16 %v6676_v30  ;;  %v6688_v56 = vunpack.i.h.bf16 %v6686_v29 }
 0xdcf   : > { %v5312_v22 = vpop.f32.mrf.mxu3 }
 0xdd0   : > { %v6694_v26 = vpack.i.bf16 %v5312_v22, %v5310_v48  ;;  %v5816_v48 = vpack.c.bf16 %v5794_v3, %v5793_v0  ;;  %v5729_v22 = vsel %vm1468_vm3, %v12529_v53, %v6642_v33 }
 0xdd1   : > { %v6651_v10 = vpop.permute.xlu2 %6650  ;;  %v5762_v9 = vsel %vm5741_vm7, %v5729_v22, %v6647_v50  ;;  %v6687_v50 = vunpack.i.l.bf16 %v6686_v29 }
 0xdd2   : > { %6695 = vrot.lane.b32.xlu2 %v6694_v26, %s7580_s13  ;;  %v6653_v35 = vunpack.i.h.bf16 %v6651_v10  ;;  %v6652_v41 = vunpack.i.l.bf16 %v6651_v10 }
 0xdd3   : > { %v5907_v45 = vpop.f32.mrf.mxu0 }
 0xdd4   : > { %v5908_v44 = vadd.f32 %v11837_v55, %v5907_v45  ;;  %v5795_v26 = vsel %vm5774_vm6, %v5762_v9, %v6652_v41  ;;  %v5796_v40 = vsel %vm5774_vm6, %v5763_v4, %v6653_v35  ;;  %v12534_v4 = vld [vmem:[#allocation59_spill] sm:$0xff] }
 0xdd5   : > { %v5817_v7 = vpack.c.bf16 %v5796_v40, %v5795_v26  ;;  %v6691_v10 = vpop.permute.xlu1 %6690  ;;  %v5736_v26 = vsel %vm1468_vm3, %v12534_v4, %v6688_v56  ;;  %v12535_v40 = vld [vmem:[#allocation58_spill] sm:$0xff] }
 0xdd6   : > { %5983 = vst.msk [vmem:[%s11846_s23 + $0x18] sm:$0xff] %vm443_vm0, %v5908_v44  ;;  %v6658_v44 = vunpack.i.h.bf16 %v6656_v39  ;;  %v6693_v25 = vunpack.i.h.bf16 %v6691_v10  ;;  %v6692_v46 = vunpack.i.l.bf16 %v6691_v10 }
 0xdd8   : > { %6337 = vmatmul.msk.bf16.gmra.mxu0 %vm443_vm0, %v5814_v1  ;;  %v6657_v1 = vunpack.i.l.bf16 %v6656_v39  ;;  %v5769_v13 = vsel %vm5741_vm7, %v5736_v26, %v6693_v25  ;;  %v12539_v25 = vld [vmem:[#allocation62_spill] sm:$0xff] }
 0xdd9   : > { %v6666_v45 = vpop.permute.xlu2 %6665 }
 0xdda   : > { %v6667_v31 = vunpack.i.l.bf16 %v6666_v45  ;;  %v5731_v15 = vsel %vm1468_vm3, %v12531_v38, %v6657_v1 }
 0xddb   : > { %v5910_v36 = vpop.f32.mrf.mxu0  ;;  %v5764_v37 = vsel %vm5741_vm7, %v5731_v15, %v6662_v49 }
 0xddc   : > { %v5911_v17 = vadd.f32 %v11837_v55, %v5910_v36  ;;  %v6668_v36 = vunpack.i.h.bf16 %v6666_v45  ;;  %v5797_v63 = vsel %vm5774_vm6, %v5764_v37, %v6667_v31 }
 0xddd   : > { %v6706_v30 = vpop.permute.xlu1 %6705 }
 0xdde   : > { %5984 = vst.msk [vmem:[%s11846_s23 + $0x20] sm:$0xff] %vm443_vm0, %v5911_v17  ;;  %v12530_v17 = vld [vmem:[#allocation40_spill] sm:$0xff] }
 0xddf   : > { %v5732_v28 = vsel %vm1468_vm3, %v12530_v17, %v6658_v44 }
 0xde0   : > { %v5765_v58 = vsel %vm5741_vm7, %v5732_v28, %v6663_v60 }
 0xde1   : > { %v5798_v18 = vsel %vm5774_vm6, %v5765_v58, %v6668_v36 }
 0xde2   : > { %v5818_v42 = vpack.c.bf16 %v5798_v18, %v5797_v63 }
 0xde3   : > { %v5912_v54 = vpop.f32.mrf.mxu0 }
 0xde4   : > { %v5913_v24 = vadd.f32 %v11837_v55, %v5912_v54 }
 0xde6   : > { %5985 = vst.msk [vmem:[%s11846_s23 + $0x28] sm:$0xff] %vm443_vm0, %v5913_v24  ;;  %v6673_v24 = vunpack.i.h.bf16 %v6671_v47 }
 0xde8   : > { %6338 = vmatmul.msk.bf16.gmra.mxu0 %vm443_vm0, %v5815_v57  ;;  %v6672_v57 = vunpack.i.l.bf16 %v6671_v47  ;;  %v5734_v51 = vsel %vm1468_vm3, %v12532_v11, %v6673_v24  ;;  %v6701_v47 = vpop.permute.xlu0 %6700 }
 0xde9   : > { %v5767_v12 = vsel %vm5741_vm7, %v5734_v51, %v6678_v21  ;;  %v6702_v24 = vunpack.i.l.bf16 %v6701_v47 }
 0xdea   : > { %v5733_v19 = vsel %vm1468_vm3, %v12533_v2, %v6672_v57 }
 0xdeb   : > { %v5766_v6 = vsel %vm5741_vm7, %v5733_v19, %v6677_v34  ;;  %v12536_v34 = vld [vmem:[#allocation61_spill] sm:$0xff] }
 0xdf8   : > { %6339 = vmatmul.msk.bf16.gmra.mxu0 %vm443_vm0, %v5816_v48 }
 0xe08   : > { %6340 = vmatmul.msk.bf16.gmra.mxu0 %vm443_vm0, %v5817_v7  ;;  %v5735_v7 = vsel %vm1468_vm3, %v12535_v40, %v6687_v50 }
 0xe09   : > { %v5768_v39 = vsel %vm5741_vm7, %v5735_v7, %v6692_v46 }
 0xe14   : > { %v5315_v52 = vpop.f32.mrf.mxu3 }
 0xe15   : > { %v5915_v23 = vpop.f32.mrf.mxu0 }
 0xe16   : > { %v5916_v59 = vadd.f32 %v11837_v55, %v5915_v23 }
 0xe18   : > { %5986 = vst.msk [vmem:[%s11846_s23 + $0x30] sm:$0xff] %vm443_vm0, %v5916_v59  ;;  %6341 = vmatmul.msk.bf16.gmra.mxu0 %vm443_vm0, %v5818_v42 }
 0xe1c   : > { %v6681_v16 = vpop.permute.xlu2 %6680  ;;  %v5317_v54 = vpop.f32.mrf.mxu3 }
 0xe1d   : > { %v6709_v43 = vpack.i.bf16 %v5317_v54, %v5315_v52  ;;  %v5917_v14 = vpop.f32.mrf.mxu0  ;;  %v6683_v20 = vunpack.i.h.bf16 %v6681_v16  ;;  %v6682_v61 = vunpack.i.l.bf16 %v6681_v16  ;;  %v6703_v54 = vunpack.i.h.bf16 %v6701_v47 }
 0xe1e   : > { %v5918_v32 = vadd.f32 %v11837_v55, %v5917_v14  ;;  %v6707_v14 = vunpack.i.l.bf16 %v6706_v30 }
 0xe1f   : > { %6710 = vrot.lane.b32.xlu2 %v6709_v43, %s7580_s13  ;;  %v5799_v62 = vsel %vm5774_vm6, %v5766_v6, %v6682_v61  ;;  %v5800_v27 = vsel %vm5774_vm6, %v5767_v12, %v6683_v20  ;;  %v6708_v43 = vunpack.i.h.bf16 %v6706_v30  ;;  %v12537_v20 = vld [vmem:[#allocation60_spill] sm:$0xff] }
 0xe20   : > { %5987 = vst.msk [vmem:[%s11846_s23 + $0x38] sm:$0xff] %vm443_vm0, %v5918_v32  ;;  %v5819_v48 = vpack.c.bf16 %v5800_v27, %v5799_v62  ;;  %v5738_v32 = vsel %vm1468_vm3, %v12536_v34, %v6703_v54  ;;  %v5737_v61 = vsel %vm1468_vm3, %v12537_v20, %v6702_v24 }
 0xe21   : > { %v5770_v2 = vsel %vm5741_vm7, %v5737_v61, %v6707_v14  ;;  %v5771_v19 = vsel %vm5741_vm7, %v5738_v32, %v6708_v43 }
 0xe24   : > { %v5320_v0 = vpop.f32.mrf.mxu3 }
 0xe25   : > { %v5920_v3 = vpop.f32.mrf.mxu0 }
 0xe26   : > { %v5921_v8 = vadd.f32 %v11837_v55, %v5920_v3  ;;  %v6716_v3 = vpop.permute.xlu0 %6715 }
 0xe27   : > { %v6718_v29 = vunpack.i.h.bf16 %v6716_v3  ;;  %v6717_v10 = vunpack.i.l.bf16 %v6716_v3 }
 0xe28   : > { %5988 = vst.msk [vmem:[%s11846_s23 + $0x40] sm:$0xff] %vm443_vm0, %v5921_v8  ;;  %6342 = vmatmul.msk.bf16.gmra.mxu0 %vm443_vm0, %v5819_v48  ;;  %v6721_v48 = vpop.permute.xlu1 %6720 }
 0xe29   : > { %v6722_v56 = vunpack.i.l.bf16 %v6721_v48  ;;  %v5739_v46 = vsel %vm1468_vm3, %v12539_v25, %v6717_v10 }
 0xe2c   : > { %v6696_v5 = vpop.permute.xlu2 %6695  ;;  %v5322_v33 = vpop.f32.mrf.mxu3 }
 0xe2d   : > { %v6724_v35 = vpack.i.bf16 %v5322_v33, %v5320_v0  ;;  %v5922_v41 = vpop.f32.mrf.mxu0  ;;  %v6698_v22 = vunpack.i.h.bf16 %v6696_v5  ;;  %v6697_v9 = vunpack.i.l.bf16 %v6696_v5  ;;  %v6723_v33 = vunpack.i.h.bf16 %v6721_v48 }
 0xe2e   : > { %v5923_v53 = vadd.f32 %v11837_v55, %v5922_v41 }
 0xe2f   : > { %6725 = vrot.lane.b32.xlu2 %v6724_v35, %s7580_s13  ;;  %v5801_v45 = vsel %vm5774_vm6, %v5768_v39, %v6697_v9  ;;  %v5802_v44 = vsel %vm5774_vm6, %v5769_v13, %v6698_v22  ;;  %v12538_v35 = vld [vmem:[#allocation63_spill] sm:$0xff]  ;;  %v5772_v9 = vsel %vm5741_vm7, %v5739_v46, %v6722_v56 }
 0xe30   : > { %5989 = vst.msk [vmem:[%s11846_s23 + $0x48] sm:$0xff] %vm443_vm0, %v5923_v53  ;;  %v5820_v60 = vpack.c.bf16 %v5802_v44, %v5801_v45  ;;  %v5740_v41 = vsel %vm1468_vm3, %v12538_v35, %v6718_v29 }
 0xe31   : > { %v5773_v4 = vsel %vm5741_vm7, %v5740_v41, %v6723_v33 }
 0xe35   : > { %v5925_v1 = vpop.f32.mrf.mxu0 }
 0xe36   : > { %v5926_v49 = vadd.f32 %v11837_v55, %v5925_v1 }
 0xe38   : > { %5990 = vst.msk [vmem:[%s11846_s23 + $0x50] sm:$0xff] %vm443_vm0, %v5926_v49  ;;  %6343 = vmatmul.msk.bf16.gmra.mxu0 %vm443_vm0, %v5820_v60 }
 0xe3d   : > { %v5927_v36 = vpop.f32.mrf.mxu0 }
 0xe3e   : > { %v5928_v31 = vadd.f32 %v11837_v55, %v5927_v36 }
 0xe40   : > { %5991 = vst.msk [vmem:[%s11846_s23 + $0x58] sm:$0xff] %vm443_vm0, %v5928_v31 }
 0xe45   : > { %v5930_v17 = vpop.f32.mrf.mxu0 }
 0xe46   : > { %v5931_v28 = vadd.f32 %v11837_v55, %v5930_v17 }
 0xe48   : > { %5992 = vst.msk [vmem:[%s11846_s23 + $0x60] sm:$0xff] %vm443_vm0, %v5931_v28 }
 0xe4d   : > { %v5932_v38 = vpop.f32.mrf.mxu0 }
 0xe4e   : > { %v5933_v15 = vadd.f32 %v11837_v55, %v5932_v38 }
 0xe50   : > { %5993 = vst.msk [vmem:[%s11846_s23 + $0x68] sm:$0xff] %vm443_vm0, %v5933_v15 }
 0xe55   : > { %v5935_v37 = vpop.f32.mrf.mxu0 }
 0xe56   : > { %v5936_v58 = vadd.f32 %v11837_v55, %v5935_v37 }
 0xe58   : > { %5994 = vst.msk [vmem:[%s11846_s23 + $0x70] sm:$0xff] %vm443_vm0, %v5936_v58 }
 0xe5d   : > { %v5937_v63 = vpop.f32.mrf.mxu0 }
 0xe5e   : > { %v5938_v18 = vadd.f32 %v11837_v55, %v5937_v63 }
 0xe60   : > { %5995 = vst.msk [vmem:[%s11846_s23 + $0x78] sm:$0xff] %vm443_vm0, %v5938_v18 }
 0xe65   : > { %v5940_v52 = vpop.f32.mrf.mxu0 }
 0xe66   : > { %v5941_v23 = vadd.f32 %v11837_v55, %v5940_v52 }
 0xe68   : > { %5996 = vst.msk [vmem:[%s11846_s23 + $0x80] sm:$0xff] %vm443_vm0, %v5941_v23 }
 0xe6d   : > { %v5942_v42 = vpop.f32.mrf.mxu0 }
 0xe6e   : > { %v5943_v59 = vadd.f32 %v11837_v55, %v5942_v42 }
 0xe70   : > { %5997 = vst.msk [vmem:[%s11846_s23 + $0x88] sm:$0xff] %vm443_vm0, %v5943_v59 }
 0xe75   : > { %v5945_v16 = vpop.f32.mrf.mxu0 }
 0xe76   : > { %v5946_v57 = vadd.f32 %v11837_v55, %v5945_v16 }
 0xe78   : > { %5998 = vst.msk [vmem:[%s11846_s23 + $0x90] sm:$0xff] %vm443_vm0, %v5946_v57 }
 0xe79   : > { %v6711_v21 = vpop.permute.xlu2 %6710 }
 0xe7a   : > { %v6713_v11 = vunpack.i.h.bf16 %v6711_v21  ;;  %v6712_v51 = vunpack.i.l.bf16 %v6711_v21 }
 0xe7c   : > { %v5803_v6 = vsel %vm5774_vm6, %v5770_v2, %v6712_v51  ;;  %v5804_v12 = vsel %vm5774_vm6, %v5771_v19, %v6713_v11 }
 0xe7d   : > { %v5821_v62 = vpack.c.bf16 %v5804_v12, %v5803_v6  ;;  %v5947_v27 = vpop.f32.mrf.mxu0 }
 0xe7e   : > { %v5948_v0 = vadd.f32 %v11837_v55, %v5947_v27 }
 0xe7f   : > { %6344 = vmatmul.msk.bf16.gmra.mxu0 %vm443_vm0, %v5821_v62 }
 0xe80   : > { %5999 = vst.msk [vmem:[%s11846_s23 + $0x98] sm:$0xff] %vm443_vm0, %v5948_v0 }
 0xe85   : > { %v5950_v8 = vpop.f32.mrf.mxu0 }
 0xe86   : > { %v5951_v5 = vadd.f32 %v11837_v55, %v5950_v8 }
 0xe88   : > { %6000 = vst.msk [vmem:[%s11846_s23 + $0xa0] sm:$0xff] %vm443_vm0, %v5951_v5 }
 0xe89   : > { %v6726_v50 = vpop.permute.xlu2 %6725 }
 0xe8a   : > { %v6728_v53 = vunpack.i.h.bf16 %v6726_v50  ;;  %v6727_v22 = vunpack.i.l.bf16 %v6726_v50 }
 0xe8c   : > { %v5805_v26 = vsel %vm5774_vm6, %v5772_v9, %v6727_v22  ;;  %v5806_v40 = vsel %vm5774_vm6, %v5773_v4, %v6728_v53 }
 0xe8d   : > { %v5822_v7 = vpack.c.bf16 %v5806_v40, %v5805_v26  ;;  %v5952_v39 = vpop.f32.mrf.mxu0 }
 0xe8e   : > { %v5953_v13 = vadd.f32 %v11837_v55, %v5952_v39 }
 0xe8f   : > { %6345 = vmatmul.msk.bf16.gmra.mxu0 %vm443_vm0, %v5822_v7 }
 0xe90   : > { %6001 = vst.msk [vmem:[%s11846_s23 + $0xa8] sm:$0xff] %vm443_vm0, %v5953_v13 }
 0xe95   : > { %v5955_v45 = vpop.f32.mrf.mxu0 }
 0xe96   : > { %v5956_v44 = vadd.f32 %v11837_v55, %v5955_v45 }
 0xe98   : > { %6002 = vst.msk [vmem:[%s11846_s23 + $0xb0] sm:$0xff] %vm443_vm0, %v5956_v44 }
 0xe9d   : > { %v5957_v1 = vpop.f32.mrf.mxu0 }
 0xe9e   : > { %v5958_v60 = vadd.f32 %v11837_v55, %v5957_v1 }
 0xea0   : > { %6003 = vst.msk [vmem:[%s11846_s23 + $0xb8] sm:$0xff] %vm443_vm0, %v5958_v60 }
 0xea5   : > { %v5960_v49 = vpop.f32.mrf.mxu0 }
 0xea6   : > { %v5961_v36 = vadd.f32 %v11837_v55, %v5960_v49 }
 0xea8   : > { %6004 = vst.msk [vmem:[%s11846_s23 + $0xc0] sm:$0xff] %vm443_vm0, %v5961_v36 }
 0xead   : > { %v5962_v31 = vpop.f32.mrf.mxu0 }
 0xeae   : > { %v5963_v17 = vadd.f32 %v11837_v55, %v5962_v31 }
 0xeb0   : > { %6005 = vst.msk [vmem:[%s11846_s23 + $0xc8] sm:$0xff] %vm443_vm0, %v5963_v17 }
 0xeb5   : > { %v5965_v28 = vpop.f32.mrf.mxu0 }
 0xeb6   : > { %v5966_v38 = vadd.f32 %v11837_v55, %v5965_v28 }
 0xeb8   : > { %6006 = vst.msk [vmem:[%s11846_s23 + $0xd0] sm:$0xff] %vm443_vm0, %v5966_v38 }
 0xebd   : > { %v5967_v15 = vpop.f32.mrf.mxu0 }
 0xebe   : > { %v5968_v37 = vadd.f32 %v11837_v55, %v5967_v15 }
 0xec0   : > { %6007 = vst.msk [vmem:[%s11846_s23 + $0xd8] sm:$0xff] %vm443_vm0, %v5968_v37 }
 0xefc   : > { %v5970_v58 = vpop.f32.mrf.mxu0 }
 0xefd   : > { %v5971_v63 = vadd.f32 %v11837_v55, %v5970_v58 }
 0xeff   : > { %6008 = vst.msk [vmem:[%s11846_s23 + $0xe0] sm:$0xff] %vm443_vm0, %v5971_v63 }
 0xf04   : > { %v5972_v18 = vpop.f32.mrf.mxu0 }
 0xf05   : > { %v5973_v52 = vadd.f32 %v11837_v55, %v5972_v18 }
 0xf07   : > { %6009 = vst.msk [vmem:[%s11846_s23 + $0xe8] sm:$0xff] %vm443_vm0, %v5973_v52 }
 0xf0c   : > { %v5975_v23 = vpop.f32.mrf.mxu0 }
 0xf0d   : > { %v5976_v42 = vadd.f32 %v11837_v55, %v5975_v23 }
 0xf0f   : > { %6010 = vst.msk [vmem:[%s11846_s23 + $0xf0] sm:$0xff] %vm443_vm0, %v5976_v42 }
 0xf14   : > { %v5977_v59 = vpop.f32.mrf.mxu0 }
 0xf15   : > { %v5978_v47 = vadd.f32 %v11837_v55, %v5977_v59 }
 0xf17   : > { %6011 = vst.msk [vmem:[%s11846_s23 + $0xf8] sm:$0xff] %vm443_vm0, %v5978_v47 }
 0xf18   : > { %7493 = shalt.err (!%p7490_p0)
}
 0xf19   : > { %s7582_s11 = smov 128   ;;  %s7583_s20 = smov 256  }
 0xf1a   : > { %6382 = dma.vmem_to_hbm [thread:$0]  (%p7733_p7), %s6028_s12, 4096, %s6030_s21, %s6013_s30, %s7582_s11, %s7583_s20, %s7579_s6  }
 0xf1b PF: > { %s6044_s23 = sand.u32 1, %s7536_s27   ;;  %p6402_p3 = pnand %p6160_p9, %p7678_p6 }
 0xf1c   : > { %s6045_s18 = scalar_lea.sflag [#allocation4], %s6044_s23 }
 0xf1d   : > { %p6403_p5 = pneg %p6402_p3 }
 0xf1f   : > { %7531 = dma.done.wait (%p6403_p5), %s6045_s18, 4096  }
 0xf20   : > { %7533 = vsyncadd (%p6403_p5), %s6045_s18, 4294963200  ;;  %s26_s10 = sadd.s32 1, %s7556_s10   ;;  %s12541_s26 = sld [smem:[#allocation17_spill]] }
 0xf21   : > { %p23_p10 = scmp.ge.s32.totalorder %s26_s10, 4   ;;  %s12542_s27 = smov %s7540_s28 }
 0xf22   : > { %s12543_s28 = smov %s7544_s29  ;;  %s12544_s29 = smov %s7742_s22 }
 0xf23   : > { %s12545_s30 = smov %s7552_s9  ;;  %25 = sbr.rel (!%p23_p10) target bundleno = 13 (0xd), region = 116 }
 0xf26   : > { %s12546_s9 = smov %s12541_s26 }
 0xf28   :  { %6051 = vsyncpa [#allocation3], 1 }
 0xf29   :  { %6053 = vsyncpa [#allocation3 + $0x1], 1 }
 0xf2a   :  { %6054 = vsyncpa [#allocation6], 1 }
 0xf2b   :  { %6055 = vsyncpa [#allocation9], 1 }
 0xf2c   :  { %6056 = vsyncpa [#allocation4], 1 }
 0xf2d   :  { %6058 = vsyncpa [#allocation4 + $0x1], 1 }

</bundles_post_ra>
